<compile_context>
chip_gen: v7x
topology: tpu7x:2x2x1
jax: 0.10.0
libtpu: 0.0.40
codegen_flags: <defaults>
</compile_context>

<pallas_src>
import functools

import numpy as np
import jax
import jax.numpy as jnp
from jax import lax
from jax.experimental import pallas as pl
from jax.experimental.pallas import tpu as pltpu


def _vmem_cap_bytes():
    """Physical VMEM capacity (generation aware), with a conservative fallback."""
    try:
        info = pltpu.get_tpu_info()
        cap = getattr(info, "vmem_capacity_bytes", None)
        if cap:
            return int(cap)
    except Exception:
        pass
    return 64 * 2 ** 20  # v7x per-TensorCore VMEM (smallest of the targets)


def _stage_kernel(ph_ref, *refs, blocks, eps, slope, compute_dtype):
    """One encoder stage (stack of DWS ConvNormReLU blocks) for a single sample.

    ph_ref : (n_ph, Hph, Wph, Cin0) stride-phase-decomposed zero-padded stage input
    refs   : per block b: w_ref (k*k*Cin_b, Cout_b), fb_ref (1, Cout_b),
             gamma_ref (1, Cout_b), beta_ref (1, Cout_b);
             then out_ref (Ho_last*Wo_last, Cout_last);
             then (nb-1) zero-padded activation VMEM scratch refs for blocks 1..nb-1.
    blocks : static per-block geometry (k, stride, Ho, Wo, cin, cout).
    """
    nb = len(blocks)
    w_refs = [refs[4 * b + 0] for b in range(nb)]
    f_refs = [refs[4 * b + 1] for b in range(nb)]
    g_refs = [refs[4 * b + 2] for b in range(nb)]
    b_refs = [refs[4 * b + 3] for b in range(nb)]
    out_ref = refs[4 * nb]
    pad_refs = list(refs[4 * nb + 1:])

    src = ph_ref  # current (phase-decomposed) padded-input ref
    for b, cfg in enumerate(blocks):
        k, st = cfg["k"], cfg["stride"]
        Ho, Wo = cfg["Ho"], cfg["Wo"]
        Cin, Cout = cfg["cin"], cfg["cout"]
        hw = Ho * Wo

        # ---- im2col slab built once, in VMEM only (never in HBM) ----
        wins = []
        for ki in range(k):
            for kj in range(k):
                if b == 0:
                    # first block may be strided -> read from the stride-phase planes
                    ph = (ki % st) * st + (kj % st)
                    qi, qj = ki // st, kj // st
                    wins.append(src[ph, qi:qi + Ho, qj:qj + Wo, :])
                else:
                    # stage-internal blocks are stride-1 -> contiguous static slices
                    wins.append(src[ki:ki + Ho, kj:kj + Wo, :])
        cols = jnp.concatenate(wins, axis=-1).reshape(hw, k * k * Cin)

        # ---- ONE big-K MXU matmul (depthwise folded into pointwise), f32 accumulate ----
        y = jnp.dot(cols.astype(compute_dtype), w_refs[b][...],
                    preferred_element_type=jnp.float32)
        y = y + f_refs[b][...]

        # ---- InstanceNorm (per-sample, per-channel) + affine, f32 epilogue ----
        inv_hw = 1.0 / hw
        mean = jnp.sum(y, axis=0, keepdims=True) * inv_hw
        var = jnp.sum(y * y, axis=0, keepdims=True) * inv_hw - mean * mean
        var = jnp.maximum(var, 0.0)           # guard against f32 cancellation
        y = (y - mean) * (lax.rsqrt(var + eps) * g_refs[b][...]) + b_refs[b][...]

        # ---- LeakyReLU ----
        y = jnp.where(y >= 0, y, slope * y)

        if b + 1 < nb:
            # Stash the zero-padded activation in VMEM scratch for the next block
            # (activation never leaves VMEM inside a stage).
            nxt = pad_refs[b]
            p_n = (blocks[b + 1]["k"] - 1) // 2
            nxt[...] = jnp.zeros_like(nxt)            # keep halo zero (every grid step:
            nxt[p_n:p_n + Ho, p_n:p_n + Wo, :] = (    #  safe under megacore splitting)
                y.reshape(Ho, Wo, Cout))
            src = nxt
        else:
            out_ref[...] = y                           # 2-D (Ho*Wo, Cout) store


def dws_stage(x_nhwc, stage_params, eps=1e-5, slope=1e-2,
              compute_dtype=jnp.float32):
    """Run one encoder stage (list of (params, stride, k)) as a single Pallas kernel."""
    N, H, W, Cin0 = x_nhwc.shape

    # Static per-block geometry.
    blocks = []
    h, w, cin = H, W, Cin0
    for (params, stride, k) in stage_params:
        p = (k - 1) // 2
        cout = params[2].shape[1]
        ho = (h + 2 * p - k) // stride + 1
        wo = (w + 2 * p - k) // stride + 1
        blocks.append(dict(k=k, stride=stride, Ho=ho, Wo=wo, cin=cin, cout=cout))
        h, w, cin = ho, wo, cout
    nb = len(blocks)

    # ---- glue: zero-pad + stride-phase decomposition for the (possibly strided)
    #      first block (same bytes as the padded image, no k^2 blowup) ----
    k0, s0 = blocks[0]["k"], blocks[0]["stride"]
    p0 = (k0 - 1) // 2
    xpad = jnp.pad(x_nhwc, ((0, 0), (p0, p0), (p0, p0), (0, 0)))
    Hpad, Wpad = H + 2 * p0, W + 2 * p0
    if s0 == 1:
        phases = xpad[:, None]                          # (N, 1, Hpad, Wpad, Cin)
        Hph, Wph = Hpad, Wpad
    else:
        Hph = -(-Hpad // s0)
        Wph = -(-Wpad // s0)
        phs = []
        for ri in range(s0):
            for rj in range(s0):
                ph = xpad[:, ri::s0, rj::s0, :]
                ph = jnp.pad(ph, ((0, 0), (0, Hph - ph.shape[1]),
                                  (0, Wph - ph.shape[2]), (0, 0)))
                phs.append(ph)
        phases = jnp.stack(phs, axis=1)                 # (N, s*s, Hph, Wph, Cin)
    n_ph = s0 * s0

    # ---- glue: fold depthwise into pointwise, big-K weight layout ----
    weight_args, w_specs = [], []
    bytes_w = 0
    for (params, _stride, k), cfg in zip(stage_params, blocks):
        dw_w, dw_b, pw_w, pw_b, gamma, beta = params
        cin, cout = cfg["cin"], cfg["cout"]
        wt = (dw_w.reshape(k * k, cin, 1) * pw_w[None]).reshape(k * k * cin, cout)
        fb = (dw_b @ pw_w + pw_b).reshape(1, cout)
        for arr in (wt.astype(compute_dtype),           # matmul operand (bf16 on v6e/v7x)
                    fb.astype(jnp.float32),             # f32 epilogue params
                    gamma.reshape(1, cout).astype(jnp.float32),
                    beta.reshape(1, cout).astype(jnp.float32)):
            weight_args.append(arr)
            w_specs.append(pl.BlockSpec(arr.shape, lambda n: (0, 0)))
            bytes_w += int(arr.size) * arr.dtype.itemsize

    # ---- VMEM scratch: zero-padded activations for blocks 1..nb-1 ----
    scratch_shapes = []
    bytes_scr = 0
    for b in range(1, nb):
        pb = (blocks[b]["k"] - 1) // 2
        hp = blocks[b - 1]["Ho"] + 2 * pb
        wp = blocks[b - 1]["Wo"] + 2 * pb
        scratch_shapes.append(pltpu.VMEM((hp, wp, blocks[b]["cin"]), jnp.float32))
        bytes_scr += 4 * hp * wp * blocks[b]["cin"]

    Ho_l, Wo_l, Cout_l = blocks[-1]["Ho"], blocks[-1]["Wo"], blocks[-1]["cout"]
    out_shape = jax.ShapeDtypeStruct((N, Ho_l * Wo_l, Cout_l), jnp.float32)
    out_spec = pl.BlockSpec((None, Ho_l * Wo_l, Cout_l), lambda n: (n, 0, 0))

    # ---- generation-aware VMEM budget + cost hint ----
    bytes_in = phases.dtype.itemsize * n_ph * Hph * Wph * Cin0
    bytes_out = 4 * Ho_l * Wo_l * Cout_l
    cap = _vmem_cap_bytes()
    need = 2 * (bytes_in + bytes_out + bytes_w) + bytes_scr + (4 << 20)
    vmem_limit = int(min(cap * 3 // 4, max(need, 16 << 20)))

    flops = 0
    for cfg in blocks:
        hw = cfg["Ho"] * cfg["Wo"]
        flops += 2 * N * hw * cfg["k"] * cfg["k"] * cfg["cin"] * cfg["cout"]
        flops += 10 * N * hw * cfg["cout"]
    cost = pl.CostEstimate(
        flops=int(flops),
        transcendentals=int(N * sum(c["cout"] for c in blocks)),
        bytes_accessed=int(N * (bytes_in + bytes_out) + bytes_w))

    kernel = functools.partial(_stage_kernel, blocks=tuple(blocks), eps=eps,
                               slope=slope, compute_dtype=compute_dtype)

    out = pl.pallas_call(
        kernel,
        out_shape=out_shape,
        grid=(N,),
        in_specs=[pl.BlockSpec((None, n_ph, Hph, Wph, Cin0),
                               lambda n: (n, 0, 0, 0, 0))] + w_specs,
        out_specs=out_spec,
        scratch_shapes=scratch_shapes,
        compiler_params=pltpu.CompilerParams(
            dimension_semantics=("parallel",),          # samples independent (per-sample IN)
            vmem_limit_bytes=vmem_limit),
        cost_estimate=cost,
    )(phases, *weight_args)

    return out.reshape(N, Ho_l, Wo_l, Cout_l)


def init_dws_block_params(key, cin, cout, k):
    k1, k2, k3, k4, k5, k6 = jax.random.split(key, 6)
    dw_w = 0.3 * jax.random.normal(k1, (k, k, cin), jnp.float32)
    dw_b = 0.1 * jax.random.normal(k2, (cin,), jnp.float32)
    pw_w = 0.3 * jax.random.normal(k3, (cin, cout), jnp.float32)
    pw_b = 0.1 * jax.random.normal(k4, (cout,), jnp.float32)
    gamma = 1.0 + 0.1 * jax.random.normal(k5, (cout,), jnp.float32)
    beta = 0.1 * jax.random.normal(k6, (cout,), jnp.float32)
    return (dw_w, dw_b, pw_w, pw_b, gamma, beta)


class DWSConvEncoderPallas:
    """Mirrors DWS_ConvEncoder.forward: sequential stages; each stage is a stack of
    DWS conv blocks (first block of a stage carries the stage stride, pool='conv')."""

    def __init__(self, input_channels, n_stages, features_per_stage,
                 kernel_sizes, strides, n_conv_per_stage,
                 return_skips=False, key=None, compute_dtype=jnp.float32):
        if isinstance(kernel_sizes, int):
            kernel_sizes = [kernel_sizes] * n_stages
        if isinstance(features_per_stage, int):
            features_per_stage = [features_per_stage] * n_stages
        if isinstance(n_conv_per_stage, int):
            n_conv_per_stage = [n_conv_per_stage] * n_stages
        if isinstance(strides, int):
            strides = [strides] * n_stages
        if key is None:
            key = jax.random.PRNGKey(0)

        self.return_skips = return_skips
        self.compute_dtype = compute_dtype
        self.stage_blocks = []          # each stage: list of (params, stride, k)
        cin = input_channels
        for s in range(n_stages):
            blocks = []
            for c in range(n_conv_per_stage[s]):
                key, sub = jax.random.split(key)
                cout = features_per_stage[s]
                stride = strides[s] if c == 0 else 1
                blocks.append((init_dws_block_params(sub, cin, cout, kernel_sizes[s]),
                               stride, kernel_sizes[s]))
                cin = cout
            self.stage_blocks.append(blocks)

        self._jit_forward = jax.jit(self._forward)

    def _forward(self, x_nchw):
        x = jnp.transpose(x_nchw, (0, 2, 3, 1))          # NCHW -> NHWC
        skips = []
        for blocks in self.stage_blocks:
            x = dws_stage(x, blocks, compute_dtype=self.compute_dtype)
            skips.append(x)
        if self.return_skips:
            return [jnp.transpose(o, (0, 3, 1, 2)) for o in skips]
        return jnp.transpose(skips[-1], (0, 3, 1, 2))     # NHWC -> NCHW

    def __call__(self, x_nchw):
        return self._jit_forward(x_nchw)


# ----------------------------- pure-JAX reference -----------------------------
def _ref_dws_block(x, params, stride, k, eps=1e-5, slope=1e-2):
    dw_w, dw_b, pw_w, pw_b, gamma, beta = params
    Cin = x.shape[-1]
    p = (k - 1) // 2
    dw = dw_w[:, :, None, :]                             # HWIO, I=1, groups=Cin
    y = lax.conv_general_dilated(
        x, dw, window_strides=(stride, stride), padding=[(p, p), (p, p)],
        dimension_numbers=('NHWC', 'HWIO', 'NHWC'),
        feature_group_count=Cin, precision=lax.Precision.HIGHEST)
    y = y + dw_b
    y = jnp.einsum('nhwc,cd->nhwd', y, pw_w,
                   precision=lax.Precision.HIGHEST) + pw_b
    mean = jnp.mean(y, axis=(1, 2), keepdims=True)
    var = jnp.mean((y - mean) ** 2, axis=(1, 2), keepdims=True)
    y = (y - mean) * lax.rsqrt(var + eps) * gamma + beta
    return jnp.where(y >= 0, y, slope * y)


if __name__ == "__main__":
    key = jax.random.PRNGKey(0)
    kx, kp = jax.random.split(key)

    # PyTorch-style NCHW input
    x = jax.random.normal(kx, (2, 4, 16, 16), jnp.float32)

    # DWS_ConvEncoder(input_channels=4, n_stages=2, features_per_stage=[8,16],
    #                 conv_op=nn.Conv2d, kernel_sizes=3, strides=[1,2],
    #                 n_conv_per_stage=2, conv_bias=True,
    #                 norm_op=InstanceNorm2d(affine), nonlin=LeakyReLU(0.01),
    #                 return_skips=False, pool='conv')
    enc = DWSConvEncoderPallas(
        input_channels=4, n_stages=2, features_per_stage=[8, 16],
        kernel_sizes=3, strides=[1, 2], n_conv_per_stage=2,
        return_skips=False, key=kp)

    out = jax.block_until_ready(enc(x))
    assert out.shape == (2, 16, 8, 8), out.shape

    # correctness check against a pure-JAX reference (f32 path, tight tolerance)
    xr = jnp.transpose(x, (0, 2, 3, 1))
    for blocks in enc.stage_blocks:
        for params, stride, k in blocks:
            xr = _ref_dws_block(xr, params, stride, k)
    ref = jnp.transpose(xr, (0, 3, 1, 2))
    np.testing.assert_allclose(np.asarray(out), np.asarray(ref),
                               rtol=2e-3, atol=2e-3)

    # bf16 MXU-operand path (recommended production setting on v6e/v7x):
    # f32 accumulation + f32 IN/LeakyReLU epilogue; the 2e-3 f32 check does not
    # apply, so verify shape/finiteness only.
    enc_bf16 = DWSConvEncoderPallas(
        input_channels=4, n_stages=2, features_per_stage=[8, 16],
        kernel_sizes=3, strides=[1, 2], n_conv_per_stage=2,
        return_skips=False, key=kp, compute_dtype=jnp.bfloat16)
    out_bf16 = jax.block_until_ready(enc_bf16(x))
    assert out_bf16.shape == (2, 16, 8, 8)
    assert bool(jnp.isfinite(out_bf16).all())

    print("KERNEL_OK")
</pallas_src>

<mosaic_0001>
module attributes {stable_mosaic.version = 11 : i64} {
  func.func @_stage_kernel(%arg0: i32, %arg1: memref<1x1x18x18x4xf32, #tpu.memory_space<vmem>>, %arg2: memref<36x8xf32, #tpu.memory_space<vmem>>, %arg3: memref<1x8xf32, #tpu.memory_space<vmem>>, %arg4: memref<1x8xf32, #tpu.memory_space<vmem>>, %arg5: memref<1x8xf32, #tpu.memory_space<vmem>>, %arg6: memref<72x8xf32, #tpu.memory_space<vmem>>, %arg7: memref<1x8xf32, #tpu.memory_space<vmem>>, %arg8: memref<1x8xf32, #tpu.memory_space<vmem>>, %arg9: memref<1x8xf32, #tpu.memory_space<vmem>>, %arg10: memref<1x256x8xf32, #tpu.memory_space<vmem>>, %arg11: memref<18x18x8xf32, #tpu.memory_space<vmem>>) attributes {dimension_semantics = [#tpu.dimension_semantics<parallel>], iteration_bounds = array<i64: 2>, scalar_prefetch = 0 : i64, scratch_operands = 1 : i64, tpu.core_type = #tpu.core_type<tc>, window_params = [{transform_indices = @transform_0, window_bounds = array<i64: 1, 1, 18, 18, 4>}, {pipeline_mode = #tpu.pipeline_mode<synchronous>, transform_indices = @transform_1, window_bounds = array<i64: 36, 8>}, {pipeline_mode = #tpu.pipeline_mode<synchronous>, transform_indices = @transform_2, window_bounds = array<i64: 1, 8>}, {pipeline_mode = #tpu.pipeline_mode<synchronous>, transform_indices = @transform_3, window_bounds = array<i64: 1, 8>}, {pipeline_mode = #tpu.pipeline_mode<synchronous>, transform_indices = @transform_4, window_bounds = array<i64: 1, 8>}, {pipeline_mode = #tpu.pipeline_mode<synchronous>, transform_indices = @transform_5, window_bounds = array<i64: 72, 8>}, {pipeline_mode = #tpu.pipeline_mode<synchronous>, transform_indices = @transform_6, window_bounds = array<i64: 1, 8>}, {pipeline_mode = #tpu.pipeline_mode<synchronous>, transform_indices = @transform_7, window_bounds = array<i64: 1, 8>}, {pipeline_mode = #tpu.pipeline_mode<synchronous>, transform_indices = @transform_8, window_bounds = array<i64: 1, 8>}, {transform_indices = @transform_9, window_bounds = array<i64: 1, 256, 8>}]} {
    %c0 = arith.constant 0 : index
    %c0_0 = arith.constant 0 : index
    %c0_1 = arith.constant 0 : index
    %c0_2 = arith.constant 0 : index
    %c0_3 = arith.constant 0 : index
    %0 = vector.load %arg1[%c0, %c0_0, %c0_1, %c0_2, %c0_3] : memref<1x1x18x18x4xf32, #tpu.memory_space<vmem>>, vector<1x1x16x16x4xf32>
    %1 = vector.shape_cast %0 : vector<1x1x16x16x4xf32> to vector<16x16x4xf32>
    %c0_4 = arith.constant 0 : index
    %c0_5 = arith.constant 0 : index
    %c0_6 = arith.constant 0 : index
    %c1 = arith.constant 1 : index
    %c0_7 = arith.constant 0 : index
    %2 = vector.load %arg1[%c0_4, %c0_5, %c0_6, %c1, %c0_7] : memref<1x1x18x18x4xf32, #tpu.memory_space<vmem>>, vector<1x1x16x16x4xf32>
    %3 = vector.shape_cast %2 : vector<1x1x16x16x4xf32> to vector<16x16x4xf32>
    %c0_8 = arith.constant 0 : index
    %c0_9 = arith.constant 0 : index
    %c0_10 = arith.constant 0 : index
    %c2 = arith.constant 2 : index
    %c0_11 = arith.constant 0 : index
    %4 = vector.load %arg1[%c0_8, %c0_9, %c0_10, %c2, %c0_11] : memref<1x1x18x18x4xf32, #tpu.memory_space<vmem>>, vector<1x1x16x16x4xf32>
    %5 = vector.shape_cast %4 : vector<1x1x16x16x4xf32> to vector<16x16x4xf32>
    %c0_12 = arith.constant 0 : index
    %c0_13 = arith.constant 0 : index
    %c1_14 = arith.constant 1 : index
    %c0_15 = arith.constant 0 : index
    %c0_16 = arith.constant 0 : index
    %6 = vector.load %arg1[%c0_12, %c0_13, %c1_14, %c0_15, %c0_16] : memref<1x1x18x18x4xf32, #tpu.memory_space<vmem>>, vector<1x1x16x16x4xf32>
    %7 = vector.shape_cast %6 : vector<1x1x16x16x4xf32> to vector<16x16x4xf32>
    %c0_17 = arith.constant 0 : index
    %c0_18 = arith.constant 0 : index
    %c1_19 = arith.constant 1 : index
    %c1_20 = arith.constant 1 : index
    %c0_21 = arith.constant 0 : index
    %8 = vector.load %arg1[%c0_17, %c0_18, %c1_19, %c1_20, %c0_21] : memref<1x1x18x18x4xf32, #tpu.memory_space<vmem>>, vector<1x1x16x16x4xf32>
    %9 = vector.shape_cast %8 : vector<1x1x16x16x4xf32> to vector<16x16x4xf32>
    %c0_22 = arith.constant 0 : index
    %c0_23 = arith.constant 0 : index
    %c1_24 = arith.constant 1 : index
    %c2_25 = arith.constant 2 : index
    %c0_26 = arith.constant 0 : index
    %10 = vector.load %arg1[%c0_22, %c0_23, %c1_24, %c2_25, %c0_26] : memref<1x1x18x18x4xf32, #tpu.memory_space<vmem>>, vector<1x1x16x16x4xf32>
    %11 = vector.shape_cast %10 : vector<1x1x16x16x4xf32> to vector<16x16x4xf32>
    %c0_27 = arith.constant 0 : index
    %c0_28 = arith.constant 0 : index
    %c2_29 = arith.constant 2 : index
    %c0_30 = arith.constant 0 : index
    %c0_31 = arith.constant 0 : index
    %12 = vector.load %arg1[%c0_27, %c0_28, %c2_29, %c0_30, %c0_31] : memref<1x1x18x18x4xf32, #tpu.memory_space<vmem>>, vector<1x1x16x16x4xf32>
    %13 = vector.shape_cast %12 : vector<1x1x16x16x4xf32> to vector<16x16x4xf32>
    %c0_32 = arith.constant 0 : index
    %c0_33 = arith.constant 0 : index
    %c2_34 = arith.constant 2 : index
    %c1_35 = arith.constant 1 : index
    %c0_36 = arith.constant 0 : index
    %14 = vector.load %arg1[%c0_32, %c0_33, %c2_34, %c1_35, %c0_36] : memref<1x1x18x18x4xf32, #tpu.memory_space<vmem>>, vector<1x1x16x16x4xf32>
    %15 = vector.shape_cast %14 : vector<1x1x16x16x4xf32> to vector<16x16x4xf32>
    %c0_37 = arith.constant 0 : index
    %c0_38 = arith.constant 0 : index
    %c2_39 = arith.constant 2 : index
    %c2_40 = arith.constant 2 : index
    %c0_41 = arith.constant 0 : index
    %16 = vector.load %arg1[%c0_37, %c0_38, %c2_39, %c2_40, %c0_41] : memref<1x1x18x18x4xf32, #tpu.memory_space<vmem>>, vector<1x1x16x16x4xf32>
    %17 = vector.shape_cast %16 : vector<1x1x16x16x4xf32> to vector<16x16x4xf32>
    %18 = tpu.concatenate %1, %3, %5, %7, %9, %11, %13, %15, %17 in 2 : vector<16x16x4xf32>, vector<16x16x4xf32>, vector<16x16x4xf32>, vector<16x16x4xf32>, vector<16x16x4xf32>, vector<16x16x4xf32>, vector<16x16x4xf32>, vector<16x16x4xf32>, vector<16x16x4xf32> -> vector<16x16x36xf32>
    %19 = vector.shape_cast %18 : vector<16x16x36xf32> to vector<256x36xf32>
    %c0_42 = arith.constant 0 : index
    %c0_43 = arith.constant 0 : index
    %20 = vector.load %arg2[%c0_42, %c0_43] : memref<36x8xf32, #tpu.memory_space<vmem>>, vector<36x8xf32>
    %cst = arith.constant dense<0.000000e+00> : vector<256x8xf32>
    %21 = tpu.matmul %19, %20, %cst {dimension_numbers = #tpu.dot_dimension_numbers<[1], [0], [0], [1], [0, 0, 1, 1], [], []>} : vector<256x36xf32>, vector<36x8xf32>, vector<256x8xf32> -> vector<256x8xf32>
    %c0_44 = arith.constant 0 : index
    %c0_45 = arith.constant 0 : index
    %22 = vector.load %arg3[%c0_44, %c0_45] : memref<1x8xf32, #tpu.memory_space<vmem>>, vector<1x8xf32>
    %23 = vector.broadcast %22 : vector<1x8xf32> to vector<256x8xf32>
    %24 = arith.addf %21, %23 : vector<256x8xf32>
    %cst_46 = arith.constant dense<0.000000e+00> : vector<8xf32>
    %25 = vector.multi_reduction <add>, %24, %cst_46 [0] : vector<256x8xf32> to vector<8xf32>
    %26 = vector.shape_cast %25 : vector<8xf32> to vector<1x8xf32>
    %cst_47 = arith.constant 3.906250e-03 : f32
    %27 = vector.broadcast %cst_47 : f32 to vector<1x8xf32>
    %28 = arith.mulf %26, %27 : vector<1x8xf32>
    %29 = arith.mulf %24, %24 : vector<256x8xf32>
    %cst_48 = arith.constant dense<0.000000e+00> : vector<8xf32>
    %30 = vector.multi_reduction <add>, %29, %cst_48 [0] : vector<256x8xf32> to vector<8xf32>
    %31 = vector.shape_cast %30 : vector<8xf32> to vector<1x8xf32>
    %cst_49 = arith.constant 3.906250e-03 : f32
    %32 = vector.broadcast %cst_49 : f32 to vector<1x8xf32>
    %33 = arith.mulf %31, %32 : vector<1x8xf32>
    %34 = arith.mulf %28, %28 : vector<1x8xf32>
    %35 = arith.subf %33, %34 : vector<1x8xf32>
    %cst_50 = arith.constant 0.000000e+00 : f32
    %36 = vector.broadcast %cst_50 : f32 to vector<1x8xf32>
    %37 = arith.maximumf %35, %36 : vector<1x8xf32>
    %38 = vector.broadcast %28 : vector<1x8xf32> to vector<256x8xf32>
    %39 = arith.subf %24, %38 : vector<256x8xf32>
    %cst_51 = arith.constant 9.99999974E-6 : f32
    %40 = vector.broadcast %cst_51 : f32 to vector<1x8xf32>
    %41 = arith.addf %37, %40 : vector<1x8xf32>
    %42 = math.rsqrt %41 : vector<1x8xf32>
    %c0_52 = arith.constant 0 : index
    %c0_53 = arith.constant 0 : index
    %43 = vector.load %arg4[%c0_52, %c0_53] : memref<1x8xf32, #tpu.memory_space<vmem>>, vector<1x8xf32>
    %44 = arith.mulf %42, %43 : vector<1x8xf32>
    %45 = vector.broadcast %44 : vector<1x8xf32> to vector<256x8xf32>
    %46 = arith.mulf %39, %45 : vector<256x8xf32>
    %c0_54 = arith.constant 0 : index
    %c0_55 = arith.constant 0 : index
    %47 = vector.load %arg5[%c0_54, %c0_55] : memref<1x8xf32, #tpu.memory_space<vmem>>, vector<1x8xf32>
    %48 = vector.broadcast %47 : vector<1x8xf32> to vector<256x8xf32>
    %49 = arith.addf %46, %48 : vector<256x8xf32>
    %cst_56 = arith.constant 0.000000e+00 : f32
    %50 = vector.broadcast %cst_56 : f32 to vector<256x8xf32>
    %51 = arith.cmpf oge, %49, %50 : vector<256x8xf32>
    %cst_57 = arith.constant 0.00999999977 : f32
    %52 = vector.broadcast %cst_57 : f32 to vector<256x8xf32>
    %53 = arith.mulf %52, %49 : vector<256x8xf32>
    %54 = arith.select %51, %49, %53 : vector<256x8xi1>, vector<256x8xf32>
    %cst_58 = arith.constant 0.000000e+00 : f32
    %55 = vector.broadcast %cst_58 : f32 to vector<18x18x8xf32>
    %c0_59 = arith.constant 0 : index
    %c0_60 = arith.constant 0 : index
    %c0_61 = arith.constant 0 : index
    %56 = vector.load %arg11[%c0_59, %c0_60, %c0_61] : memref<18x18x8xf32, #tpu.memory_space<vmem>>, vector<18x18x8xf32>
    tpu.vector_store %arg11[%c0_59, %c0_60, %c0_61], %55 {strides = array<i32>} : memref<18x18x8xf32, #tpu.memory_space<vmem>>, vector<18x18x8xf32>,
    %57 = vector.shape_cast %54 : vector<256x8xf32> to vector<16x16x8xf32>
    %c1_62 = arith.constant 1 : index
    %c1_63 = arith.constant 1 : index
    %c0_64 = arith.constant 0 : index
    %58 = vector.load %arg11[%c1_62, %c1_63, %c0_64] : memref<18x18x8xf32, #tpu.memory_space<vmem>>, vector<16x16x8xf32>
    tpu.vector_store %arg11[%c1_62, %c1_63, %c0_64], %57 {strides = array<i32>} : memref<18x18x8xf32, #tpu.memory_space<vmem>>, vector<16x16x8xf32>,
    %c0_65 = arith.constant 0 : index
    %c0_66 = arith.constant 0 : index
    %c0_67 = arith.constant 0 : index
    %59 = vector.load %arg11[%c0_65, %c0_66, %c0_67] : memref<18x18x8xf32, #tpu.memory_space<vmem>>, vector<16x16x8xf32>
    %c0_68 = arith.constant 0 : index
    %c1_69 = arith.constant 1 : index
    %c0_70 = arith.constant 0 : index
    %60 = vector.load %arg11[%c0_68, %c1_69, %c0_70] : memref<18x18x8xf32, #tpu.memory_space<vmem>>, vector<16x16x8xf32>
    %c0_71 = arith.constant 0 : index
    %c2_72 = arith.constant 2 : index
    %c0_73 = arith.constant 0 : index
    %61 = vector.load %arg11[%c0_71, %c2_72, %c0_73] : memref<18x18x8xf32, #tpu.memory_space<vmem>>, vector<16x16x8xf32>
    %c1_74 = arith.constant 1 : index
    %c0_75 = arith.constant 0 : index
    %c0_76 = arith.constant 0 : index
    %62 = vector.load %arg11[%c1_74, %c0_75, %c0_76] : memref<18x18x8xf32, #tpu.memory_space<vmem>>, vector<16x16x8xf32>
    %c1_77 = arith.constant 1 : index
    %c1_78 = arith.constant 1 : index
    %c0_79 = arith.constant 0 : index
    %63 = vector.load %arg11[%c1_77, %c1_78, %c0_79] : memref<18x18x8xf32, #tpu.memory_space<vmem>>, vector<16x16x8xf32>
    %c1_80 = arith.constant 1 : index
    %c2_81 = arith.constant 2 : index
    %c0_82 = arith.constant 0 : index
    %64 = vector.load %arg11[%c1_80, %c2_81, %c0_82] : memref<18x18x8xf32, #tpu.memory_space<vmem>>, vector<16x16x8xf32>
    %c2_83 = arith.constant 2 : index
    %c0_84 = arith.constant 0 : index
    %c0_85 = arith.constant 0 : index
    %65 = vector.load %arg11[%c2_83, %c0_84, %c0_85] : memref<18x18x8xf32, #tpu.memory_space<vmem>>, vector<16x16x8xf32>
    %c2_86 = arith.constant 2 : index
    %c1_87 = arith.constant 1 : index
    %c0_88 = arith.constant 0 : index
    %66 = vector.load %arg11[%c2_86, %c1_87, %c0_88] : memref<18x18x8xf32, #tpu.memory_space<vmem>>, vector<16x16x8xf32>
    %c2_89 = arith.constant 2 : index
    %c2_90 = arith.constant 2 : index
    %c0_91 = arith.constant 0 : index
    %67 = vector.load %arg11[%c2_89, %c2_90, %c0_91] : memref<18x18x8xf32, #tpu.memory_space<vmem>>, vector<16x16x8xf32>
    %68 = tpu.concatenate %59, %60, %61, %62, %63, %64, %65, %66, %67 in 2 : vector<16x16x8xf32>, vector<16x16x8xf32>, vector<16x16x8xf32>, vector<16x16x8xf32>, vector<16x16x8xf32>, vector<16x16x8xf32>, vector<16x16x8xf32>, vector<16x16x8xf32>, vector<16x16x8xf32> -> vector<16x16x72xf32>
    %69 = vector.shape_cast %68 : vector<16x16x72xf32> to vector<256x72xf32>
    %c0_92 = arith.constant 0 : index
    %c0_93 = arith.constant 0 : index
    %70 = vector.load %arg6[%c0_92, %c0_93] : memref<72x8xf32, #tpu.memory_space<vmem>>, vector<72x8xf32>
    %cst_94 = arith.constant dense<0.000000e+00> : vector<256x8xf32>
    %71 = tpu.matmul %69, %70, %cst_94 {dimension_numbers = #tpu.dot_dimension_numbers<[1], [0], [0], [1], [0, 0, 1, 1], [], []>} : vector<256x72xf32>, vector<72x8xf32>, vector<256x8xf32> -> vector<256x8xf32>
    %c0_95 = arith.constant 0 : index
    %c0_96 = arith.constant 0 : index
    %72 = vector.load %arg7[%c0_95, %c0_96] : memref<1x8xf32, #tpu.memory_space<vmem>>, vector<1x8xf32>
    %73 = vector.broadcast %72 : vector<1x8xf32> to vector<256x8xf32>
    %74 = arith.addf %71, %73 : vector<256x8xf32>
    %cst_97 = arith.constant dense<0.000000e+00> : vector<8xf32>
    %75 = vector.multi_reduction <add>, %74, %cst_97 [0] : vector<256x8xf32> to vector<8xf32>
    %76 = vector.shape_cast %75 : vector<8xf32> to vector<1x8xf32>
    %cst_98 = arith.constant 3.906250e-03 : f32
    %77 = vector.broadcast %cst_98 : f32 to vector<1x8xf32>
    %78 = arith.mulf %76, %77 : vector<1x8xf32>
    %79 = arith.mulf %74, %74 : vector<256x8xf32>
    %cst_99 = arith.constant dense<0.000000e+00> : vector<8xf32>
    %80 = vector.multi_reduction <add>, %79, %cst_99 [0] : vector<256x8xf32> to vector<8xf32>
    %81 = vector.shape_cast %80 : vector<8xf32> to vector<1x8xf32>
    %cst_100 = arith.constant 3.906250e-03 : f32
    %82 = vector.broadcast %cst_100 : f32 to vector<1x8xf32>
    %83 = arith.mulf %81, %82 : vector<1x8xf32>
    %84 = arith.mulf %78, %78 : vector<1x8xf32>
    %85 = arith.subf %83, %84 : vector<1x8xf32>
    %cst_101 = arith.constant 0.000000e+00 : f32
    %86 = vector.broadcast %cst_101 : f32 to vector<1x8xf32>
    %87 = arith.maximumf %85, %86 : vector<1x8xf32>
    %88 = vector.broadcast %78 : vector<1x8xf32> to vector<256x8xf32>
    %89 = arith.subf %74, %88 : vector<256x8xf32>
    %cst_102 = arith.constant 9.99999974E-6 : f32
    %90 = vector.broadcast %cst_102 : f32 to vector<1x8xf32>
    %91 = arith.addf %87, %90 : vector<1x8xf32>
    %92 = math.rsqrt %91 : vector<1x8xf32>
    %c0_103 = arith.constant 0 : index
    %c0_104 = arith.constant 0 : index
    %93 = vector.load %arg8[%c0_103, %c0_104] : memref<1x8xf32, #tpu.memory_space<vmem>>, vector<1x8xf32>
    %94 = arith.mulf %92, %93 : vector<1x8xf32>
    %95 = vector.broadcast %94 : vector<1x8xf32> to vector<256x8xf32>
    %96 = arith.mulf %89, %95 : vector<256x8xf32>
    %c0_105 = arith.constant 0 : index
    %c0_106 = arith.constant 0 : index
    %97 = vector.load %arg9[%c0_105, %c0_106] : memref<1x8xf32, #tpu.memory_space<vmem>>, vector<1x8xf32>
    %98 = vector.broadcast %97 : vector<1x8xf32> to vector<256x8xf32>
    %99 = arith.addf %96, %98 : vector<256x8xf32>
    %cst_107 = arith.constant 0.000000e+00 : f32
    %100 = vector.broadcast %cst_107 : f32 to vector<256x8xf32>
    %101 = arith.cmpf oge, %99, %100 : vector<256x8xf32>
    %cst_108 = arith.constant 0.00999999977 : f32
    %102 = vector.broadcast %cst_108 : f32 to vector<256x8xf32>
    %103 = arith.mulf %102, %99 : vector<256x8xf32>
    %104 = arith.select %101, %99, %103 : vector<256x8xi1>, vector<256x8xf32>
    %c0_109 = arith.constant 0 : index
    %c0_110 = arith.constant 0 : index
    %c0_111 = arith.constant 0 : index
    %105 = vector.load %arg10[%c0_109, %c0_110, %c0_111] : memref<1x256x8xf32, #tpu.memory_space<vmem>>, vector<1x256x8xf32>
    %106 = vector.shape_cast %105 : vector<1x256x8xf32> to vector<256x8xf32>
    %107 = vector.shape_cast %104 : vector<256x8xf32> to vector<1x256x8xf32>
    tpu.vector_store %arg10[%c0_109, %c0_110, %c0_111], %107 {strides = array<i32>} : memref<1x256x8xf32, #tpu.memory_space<vmem>>, vector<1x256x8xf32>,
    return
  }
  func.func @transform_0(%arg0: i32) -> (i32, i32, i32, i32, i32) {
    %c0_i32 = arith.constant 0 : i32
    %c0_i32_0 = arith.constant 0 : i32
    %c0_i32_1 = arith.constant 0 : i32
    %c0_i32_2 = arith.constant 0 : i32
    %c0_i32_3 = arith.constant 0 : i32
    return %arg0, %c0_i32, %c0_i32_0, %c0_i32_1, %c0_i32_2 : i32, i32, i32, i32, i32
  }
  func.func @transform_1(%arg0: i32) -> (i32, i32) {
    %c0_i32 = arith.constant 0 : i32
    %c0_i32_0 = arith.constant 0 : i32
    %c0_i32_1 = arith.constant 0 : i32
    return %c0_i32, %c0_i32_0 : i32, i32
  }
  func.func @transform_2(%arg0: i32) -> (i32, i32) {
    %c0_i32 = arith.constant 0 : i32
    %c0_i32_0 = arith.constant 0 : i32
    %c0_i32_1 = arith.constant 0 : i32
    return %c0_i32, %c0_i32_0 : i32, i32
  }
  func.func @transform_3(%arg0: i32) -> (i32, i32) {
    %c0_i32 = arith.constant 0 : i32
    %c0_i32_0 = arith.constant 0 : i32
    %c0_i32_1 = arith.constant 0 : i32
    return %c0_i32, %c0_i32_0 : i32, i32
  }
  func.func @transform_4(%arg0: i32) -> (i32, i32) {
    %c0_i32 = arith.constant 0 : i32
    %c0_i32_0 = arith.constant 0 : i32
    %c0_i32_1 = arith.constant 0 : i32
    return %c0_i32, %c0_i32_0 : i32, i32
  }
  func.func @transform_5(%arg0: i32) -> (i32, i32) {
    %c0_i32 = arith.constant 0 : i32
    %c0_i32_0 = arith.constant 0 : i32
    %c0_i32_1 = arith.constant 0 : i32
    return %c0_i32, %c0_i32_0 : i32, i32
  }
  func.func @transform_6(%arg0: i32) -> (i32, i32) {
    %c0_i32 = arith.constant 0 : i32
    %c0_i32_0 = arith.constant 0 : i32
    %c0_i32_1 = arith.constant 0 : i32
    return %c0_i32, %c0_i32_0 : i32, i32
  }
  func.func @transform_7(%arg0: i32) -> (i32, i32) {
    %c0_i32 = arith.constant 0 : i32
    %c0_i32_0 = arith.constant 0 : i32
    %c0_i32_1 = arith.constant 0 : i32
    return %c0_i32, %c0_i32_0 : i32, i32
  }
  func.func @transform_8(%arg0: i32) -> (i32, i32) {
    %c0_i32 = arith.constant 0 : i32
    %c0_i32_0 = arith.constant 0 : i32
    %c0_i32_1 = arith.constant 0 : i32
    return %c0_i32, %c0_i32_0 : i32, i32
  }
  func.func @transform_9(%arg0: i32) -> (i32, i32, i32) {
    %c0_i32 = arith.constant 0 : i32
    %c0_i32_0 = arith.constant 0 : i32
    %c0_i32_1 = arith.constant 0 : i32
    return %arg0, %c0_i32, %c0_i32_0 : i32, i32, i32
  }
}

module attributes {stable_mosaic.version = 11 : i64} {
  func.func @_stage_kernel(%arg0: i32, %arg1: memref<1x4x9x9x8xf32, #tpu.memory_space<vmem>>, %arg2: memref<72x16xf32, #tpu.memory_space<vmem>>, %arg3: memref<1x16xf32, #tpu.memory_space<vmem>>, %arg4: memref<1x16xf32, #tpu.memory_space<vmem>>, %arg5: memref<1x16xf32, #tpu.memory_space<vmem>>, %arg6: memref<144x16xf32, #tpu.memory_space<vmem>>, %arg7: memref<1x16xf32, #tpu.memory_space<vmem>>, %arg8: memref<1x16xf32, #tpu.memory_space<vmem>>, %arg9: memref<1x16xf32, #tpu.memory_space<vmem>>, %arg10: memref<1x64x16xf32, #tpu.memory_space<vmem>>, %arg11: memref<10x10x16xf32, #tpu.memory_space<vmem>>) attributes {dimension_semantics = [#tpu.dimension_semantics<parallel>], iteration_bounds = array<i64: 2>, scalar_prefetch = 0 : i64, scratch_operands = 1 : i64, tpu.core_type = #tpu.core_type<tc>, window_params = [{transform_indices = @transform_0, window_bounds = array<i64: 1, 4, 9, 9, 8>}, {pipeline_mode = #tpu.pipeline_mode<synchronous>, transform_indices = @transform_1, window_bounds = array<i64: 72, 16>}, {pipeline_mode = #tpu.pipeline_mode<synchronous>, transform_indices = @transform_2, window_bounds = array<i64: 1, 16>}, {pipeline_mode = #tpu.pipeline_mode<synchronous>, transform_indices = @transform_3, window_bounds = array<i64: 1, 16>}, {pipeline_mode = #tpu.pipeline_mode<synchronous>, transform_indices = @transform_4, window_bounds = array<i64: 1, 16>}, {pipeline_mode = #tpu.pipeline_mode<synchronous>, transform_indices = @transform_5, window_bounds = array<i64: 144, 16>}, {pipeline_mode = #tpu.pipeline_mode<synchronous>, transform_indices = @transform_6, window_bounds = array<i64: 1, 16>}, {pipeline_mode = #tpu.pipeline_mode<synchronous>, transform_indices = @transform_7, window_bounds = array<i64: 1, 16>}, {pipeline_mode = #tpu.pipeline_mode<synchronous>, transform_indices = @transform_8, window_bounds = array<i64: 1, 16>}, {transform_indices = @transform_9, window_bounds = array<i64: 1, 64, 16>}]} {
    %c0 = arith.constant 0 : index
    %c0_0 = arith.constant 0 : index
    %c0_1 = arith.constant 0 : index
    %c0_2 = arith.constant 0 : index
    %c0_3 = arith.constant 0 : index
    %0 = vector.load %arg1[%c0, %c0_0, %c0_1, %c0_2, %c0_3] : memref<1x4x9x9x8xf32, #tpu.memory_space<vmem>>, vector<1x1x8x8x8xf32>
    %1 = vector.shape_cast %0 : vector<1x1x8x8x8xf32> to vector<8x8x8xf32>
    %c0_4 = arith.constant 0 : index
    %c1 = arith.constant 1 : index
    %c0_5 = arith.constant 0 : index
    %c0_6 = arith.constant 0 : index
    %c0_7 = arith.constant 0 : index
    %2 = vector.load %arg1[%c0_4, %c1, %c0_5, %c0_6, %c0_7] : memref<1x4x9x9x8xf32, #tpu.memory_space<vmem>>, vector<1x1x8x8x8xf32>
    %3 = vector.shape_cast %2 : vector<1x1x8x8x8xf32> to vector<8x8x8xf32>
    %c0_8 = arith.constant 0 : index
    %c0_9 = arith.constant 0 : index
    %c0_10 = arith.constant 0 : index
    %c1_11 = arith.constant 1 : index
    %c0_12 = arith.constant 0 : index
    %4 = vector.load %arg1[%c0_8, %c0_9, %c0_10, %c1_11, %c0_12] : memref<1x4x9x9x8xf32, #tpu.memory_space<vmem>>, vector<1x1x8x8x8xf32>
    %5 = vector.shape_cast %4 : vector<1x1x8x8x8xf32> to vector<8x8x8xf32>
    %c0_13 = arith.constant 0 : index
    %c2 = arith.constant 2 : index
    %c0_14 = arith.constant 0 : index
    %c0_15 = arith.constant 0 : index
    %c0_16 = arith.constant 0 : index
    %6 = vector.load %arg1[%c0_13, %c2, %c0_14, %c0_15, %c0_16] : memref<1x4x9x9x8xf32, #tpu.memory_space<vmem>>, vector<1x1x8x8x8xf32>
    %7 = vector.shape_cast %6 : vector<1x1x8x8x8xf32> to vector<8x8x8xf32>
    %c0_17 = arith.constant 0 : index
    %c3 = arith.constant 3 : index
    %c0_18 = arith.constant 0 : index
    %c0_19 = arith.constant 0 : index
    %c0_20 = arith.constant 0 : index
    %8 = vector.load %arg1[%c0_17, %c3, %c0_18, %c0_19, %c0_20] : memref<1x4x9x9x8xf32, #tpu.memory_space<vmem>>, vector<1x1x8x8x8xf32>
    %9 = vector.shape_cast %8 : vector<1x1x8x8x8xf32> to vector<8x8x8xf32>
    %c0_21 = arith.constant 0 : index
    %c2_22 = arith.constant 2 : index
    %c0_23 = arith.constant 0 : index
    %c1_24 = arith.constant 1 : index
    %c0_25 = arith.constant 0 : index
    %10 = vector.load %arg1[%c0_21, %c2_22, %c0_23, %c1_24, %c0_25] : memref<1x4x9x9x8xf32, #tpu.memory_space<vmem>>, vector<1x1x8x8x8xf32>
    %11 = vector.shape_cast %10 : vector<1x1x8x8x8xf32> to vector<8x8x8xf32>
    %c0_26 = arith.constant 0 : index
    %c0_27 = arith.constant 0 : index
    %c1_28 = arith.constant 1 : index
    %c0_29 = arith.constant 0 : index
    %c0_30 = arith.constant 0 : index
    %12 = vector.load %arg1[%c0_26, %c0_27, %c1_28, %c0_29, %c0_30] : memref<1x4x9x9x8xf32, #tpu.memory_space<vmem>>, vector<1x1x8x8x8xf32>
    %13 = vector.shape_cast %12 : vector<1x1x8x8x8xf32> to vector<8x8x8xf32>
    %c0_31 = arith.constant 0 : index
    %c1_32 = arith.constant 1 : index
    %c1_33 = arith.constant 1 : index
    %c0_34 = arith.constant 0 : index
    %c0_35 = arith.constant 0 : index
    %14 = vector.load %arg1[%c0_31, %c1_32, %c1_33, %c0_34, %c0_35] : memref<1x4x9x9x8xf32, #tpu.memory_space<vmem>>, vector<1x1x8x8x8xf32>
    %15 = vector.shape_cast %14 : vector<1x1x8x8x8xf32> to vector<8x8x8xf32>
    %c0_36 = arith.constant 0 : index
    %c0_37 = arith.constant 0 : index
    %c1_38 = arith.constant 1 : index
    %c1_39 = arith.constant 1 : index
    %c0_40 = arith.constant 0 : index
    %16 = vector.load %arg1[%c0_36, %c0_37, %c1_38, %c1_39, %c0_40] : memref<1x4x9x9x8xf32, #tpu.memory_space<vmem>>, vector<1x1x8x8x8xf32>
    %17 = vector.shape_cast %16 : vector<1x1x8x8x8xf32> to vector<8x8x8xf32>
    %18 = tpu.concatenate %1, %3, %5, %7, %9, %11, %13, %15, %17 in 2 : vector<8x8x8xf32>, vector<8x8x8xf32>, vector<8x8x8xf32>, vector<8x8x8xf32>, vector<8x8x8xf32>, vector<8x8x8xf32>, vector<8x8x8xf32>, vector<8x8x8xf32>, vector<8x8x8xf32> -> vector<8x8x72xf32>
    %19 = vector.shape_cast %18 : vector<8x8x72xf32> to vector<64x72xf32>
    %c0_41 = arith.constant 0 : index
    %c0_42 = arith.constant 0 : index
    %20 = vector.load %arg2[%c0_41, %c0_42] : memref<72x16xf32, #tpu.memory_space<vmem>>, vector<72x16xf32>
    %cst = arith.constant dense<0.000000e+00> : vector<64x16xf32>
    %21 = tpu.matmul %19, %20, %cst {dimension_numbers = #tpu.dot_dimension_numbers<[1], [0], [0], [1], [0, 0, 1, 1], [], []>} : vector<64x72xf32>, vector<72x16xf32>, vector<64x16xf32> -> vector<64x16xf32>
    %c0_43 = arith.constant 0 : index
    %c0_44 = arith.constant 0 : index
    %22 = vector.load %arg3[%c0_43, %c0_44] : memref<1x16xf32, #tpu.memory_space<vmem>>, vector<1x16xf32>
    %23 = vector.broadcast %22 : vector<1x16xf32> to vector<64x16xf32>
    %24 = arith.addf %21, %23 : vector<64x16xf32>
    %cst_45 = arith.constant dense<0.000000e+00> : vector<16xf32>
    %25 = vector.multi_reduction <add>, %24, %cst_45 [0] : vector<64x16xf32> to vector<16xf32>
    %26 = vector.shape_cast %25 : vector<16xf32> to vector<1x16xf32>
    %cst_46 = arith.constant 1.562500e-02 : f32
    %27 = vector.broadcast %cst_46 : f32 to vector<1x16xf32>
    %28 = arith.mulf %26, %27 : vector<1x16xf32>
    %29 = arith.mulf %24, %24 : vector<64x16xf32>
    %cst_47 = arith.constant dense<0.000000e+00> : vector<16xf32>
    %30 = vector.multi_reduction <add>, %29, %cst_47 [0] : vector<64x16xf32> to vector<16xf32>
    %31 = vector.shape_cast %30 : vector<16xf32> to vector<1x16xf32>
    %cst_48 = arith.constant 1.562500e-02 : f32
    %32 = vector.broadcast %cst_48 : f32 to vector<1x16xf32>
    %33 = arith.mulf %31, %32 : vector<1x16xf32>
    %34 = arith.mulf %28, %28 : vector<1x16xf32>
    %35 = arith.subf %33, %34 : vector<1x16xf32>
    %cst_49 = arith.constant 0.000000e+00 : f32
    %36 = vector.broadcast %cst_49 : f32 to vector<1x16xf32>
    %37 = arith.maximumf %35, %36 : vector<1x16xf32>
    %38 = vector.broadcast %28 : vector<1x16xf32> to vector<64x16xf32>
    %39 = arith.subf %24, %38 : vector<64x16xf32>
    %cst_50 = arith.constant 9.99999974E-6 : f32
    %40 = vector.broadcast %cst_50 : f32 to vector<1x16xf32>
    %41 = arith.addf %37, %40 : vector<1x16xf32>
    %42 = math.rsqrt %41 : vector<1x16xf32>
    %c0_51 = arith.constant 0 : index
    %c0_52 = arith.constant 0 : index
    %43 = vector.load %arg4[%c0_51, %c0_52] : memref<1x16xf32, #tpu.memory_space<vmem>>, vector<1x16xf32>
    %44 = arith.mulf %42, %43 : vector<1x16xf32>
    %45 = vector.broadcast %44 : vector<1x16xf32> to vector<64x16xf32>
    %46 = arith.mulf %39, %45 : vector<64x16xf32>
    %c0_53 = arith.constant 0 : index
    %c0_54 = arith.constant 0 : index
    %47 = vector.load %arg5[%c0_53, %c0_54] : memref<1x16xf32, #tpu.memory_space<vmem>>, vector<1x16xf32>
    %48 = vector.broadcast %47 : vector<1x16xf32> to vector<64x16xf32>
    %49 = arith.addf %46, %48 : vector<64x16xf32>
    %cst_55 = arith.constant 0.000000e+00 : f32
    %50 = vector.broadcast %cst_55 : f32 to vector<64x16xf32>
    %51 = arith.cmpf oge, %49, %50 : vector<64x16xf32>
    %cst_56 = arith.constant 0.00999999977 : f32
    %52 = vector.broadcast %cst_56 : f32 to vector<64x16xf32>
    %53 = arith.mulf %52, %49 : vector<64x16xf32>
    %54 = arith.select %51, %49, %53 : vector<64x16xi1>, vector<64x16xf32>
    %cst_57 = arith.constant 0.000000e+00 : f32
    %55 = vector.broadcast %cst_57 : f32 to vector<10x10x16xf32>
    %c0_58 = arith.constant 0 : index
    %c0_59 = arith.constant 0 : index
    %c0_60 = arith.constant 0 : index
    %56 = vector.load %arg11[%c0_58, %c0_59, %c0_60] : memref<10x10x16xf32, #tpu.memory_space<vmem>>, vector<10x10x16xf32>
    tpu.vector_store %arg11[%c0_58, %c0_59, %c0_60], %55 {strides = array<i32>} : memref<10x10x16xf32, #tpu.memory_space<vmem>>, vector<10x10x16xf32>,
    %57 = vector.shape_cast %54 : vector<64x16xf32> to vector<8x8x16xf32>
    %c1_61 = arith.constant 1 : index
    %c1_62 = arith.constant 1 : index
    %c0_63 = arith.constant 0 : index
    %58 = vector.load %arg11[%c1_61, %c1_62, %c0_63] : memref<10x10x16xf32, #tpu.memory_space<vmem>>, vector<8x8x16xf32>
    tpu.vector_store %arg11[%c1_61, %c1_62, %c0_63], %57 {strides = array<i32>} : memref<10x10x16xf32, #tpu.memory_space<vmem>>, vector<8x8x16xf32>,
    %c0_64 = arith.constant 0 : index
    %c0_65 = arith.constant 0 : index
    %c0_66 = arith.constant 0 : index
    %59 = vector.load %arg11[%c0_64, %c0_65, %c0_66] : memref<10x10x16xf32, #tpu.memory_space<vmem>>, vector<8x8x16xf32>
    %c0_67 = arith.constant 0 : index
    %c1_68 = arith.constant 1 : index
    %c0_69 = arith.constant 0 : index
    %60 = vector.load %arg11[%c0_67, %c1_68, %c0_69] : memref<10x10x16xf32, #tpu.memory_space<vmem>>, vector<8x8x16xf32>
    %c0_70 = arith.constant 0 : index
    %c2_71 = arith.constant 2 : index
    %c0_72 = arith.constant 0 : index
    %61 = vector.load %arg11[%c0_70, %c2_71, %c0_72] : memref<10x10x16xf32, #tpu.memory_space<vmem>>, vector<8x8x16xf32>
    %c1_73 = arith.constant 1 : index
    %c0_74 = arith.constant 0 : index
    %c0_75 = arith.constant 0 : index
    %62 = vector.load %arg11[%c1_73, %c0_74, %c0_75] : memref<10x10x16xf32, #tpu.memory_space<vmem>>, vector<8x8x16xf32>
    %c1_76 = arith.constant 1 : index
    %c1_77 = arith.constant 1 : index
    %c0_78 = arith.constant 0 : index
    %63 = vector.load %arg11[%c1_76, %c1_77, %c0_78] : memref<10x10x16xf32, #tpu.memory_space<vmem>>, vector<8x8x16xf32>
    %c1_79 = arith.constant 1 : index
    %c2_80 = arith.constant 2 : index
    %c0_81 = arith.constant 0 : index
    %64 = vector.load %arg11[%c1_79, %c2_80, %c0_81] : memref<10x10x16xf32, #tpu.memory_space<vmem>>, vector<8x8x16xf32>
    %c2_82 = arith.constant 2 : index
    %c0_83 = arith.constant 0 : index
    %c0_84 = arith.constant 0 : index
    %65 = vector.load %arg11[%c2_82, %c0_83, %c0_84] : memref<10x10x16xf32, #tpu.memory_space<vmem>>, vector<8x8x16xf32>
    %c2_85 = arith.constant 2 : index
    %c1_86 = arith.constant 1 : index
    %c0_87 = arith.constant 0 : index
    %66 = vector.load %arg11[%c2_85, %c1_86, %c0_87] : memref<10x10x16xf32, #tpu.memory_space<vmem>>, vector<8x8x16xf32>
    %c2_88 = arith.constant 2 : index
    %c2_89 = arith.constant 2 : index
    %c0_90 = arith.constant 0 : index
    %67 = vector.load %arg11[%c2_88, %c2_89, %c0_90] : memref<10x10x16xf32, #tpu.memory_space<vmem>>, vector<8x8x16xf32>
    %68 = tpu.concatenate %59, %60, %61, %62, %63, %64, %65, %66, %67 in 2 : vector<8x8x16xf32>, vector<8x8x16xf32>, vector<8x8x16xf32>, vector<8x8x16xf32>, vector<8x8x16xf32>, vector<8x8x16xf32>, vector<8x8x16xf32>, vector<8x8x16xf32>, vector<8x8x16xf32> -> vector<8x8x144xf32>
    %69 = vector.shape_cast %68 : vector<8x8x144xf32> to vector<64x144xf32>
    %c0_91 = arith.constant 0 : index
    %c0_92 = arith.constant 0 : index
    %70 = vector.load %arg6[%c0_91, %c0_92] : memref<144x16xf32, #tpu.memory_space<vmem>>, vector<144x16xf32>
    %cst_93 = arith.constant dense<0.000000e+00> : vector<64x16xf32>
    %71 = tpu.matmul %69, %70, %cst_93 {dimension_numbers = #tpu.dot_dimension_numbers<[1], [0], [0], [1], [0, 0, 1, 1], [], []>} : vector<64x144xf32>, vector<144x16xf32>, vector<64x16xf32> -> vector<64x16xf32>
    %c0_94 = arith.constant 0 : index
    %c0_95 = arith.constant 0 : index
    %72 = vector.load %arg7[%c0_94, %c0_95] : memref<1x16xf32, #tpu.memory_space<vmem>>, vector<1x16xf32>
    %73 = vector.broadcast %72 : vector<1x16xf32> to vector<64x16xf32>
    %74 = arith.addf %71, %73 : vector<64x16xf32>
    %cst_96 = arith.constant dense<0.000000e+00> : vector<16xf32>
    %75 = vector.multi_reduction <add>, %74, %cst_96 [0] : vector<64x16xf32> to vector<16xf32>
    %76 = vector.shape_cast %75 : vector<16xf32> to vector<1x16xf32>
    %cst_97 = arith.constant 1.562500e-02 : f32
    %77 = vector.broadcast %cst_97 : f32 to vector<1x16xf32>
    %78 = arith.mulf %76, %77 : vector<1x16xf32>
    %79 = arith.mulf %74, %74 : vector<64x16xf32>
    %cst_98 = arith.constant dense<0.000000e+00> : vector<16xf32>
    %80 = vector.multi_reduction <add>, %79, %cst_98 [0] : vector<64x16xf32> to vector<16xf32>
    %81 = vector.shape_cast %80 : vector<16xf32> to vector<1x16xf32>
    %cst_99 = arith.constant 1.562500e-02 : f32
    %82 = vector.broadcast %cst_99 : f32 to vector<1x16xf32>
    %83 = arith.mulf %81, %82 : vector<1x16xf32>
    %84 = arith.mulf %78, %78 : vector<1x16xf32>
    %85 = arith.subf %83, %84 : vector<1x16xf32>
    %cst_100 = arith.constant 0.000000e+00 : f32
    %86 = vector.broadcast %cst_100 : f32 to vector<1x16xf32>
    %87 = arith.maximumf %85, %86 : vector<1x16xf32>
    %88 = vector.broadcast %78 : vector<1x16xf32> to vector<64x16xf32>
    %89 = arith.subf %74, %88 : vector<64x16xf32>
    %cst_101 = arith.constant 9.99999974E-6 : f32
    %90 = vector.broadcast %cst_101 : f32 to vector<1x16xf32>
    %91 = arith.addf %87, %90 : vector<1x16xf32>
    %92 = math.rsqrt %91 : vector<1x16xf32>
    %c0_102 = arith.constant 0 : index
    %c0_103 = arith.constant 0 : index
    %93 = vector.load %arg8[%c0_102, %c0_103] : memref<1x16xf32, #tpu.memory_space<vmem>>, vector<1x16xf32>
    %94 = arith.mulf %92, %93 : vector<1x16xf32>
    %95 = vector.broadcast %94 : vector<1x16xf32> to vector<64x16xf32>
    %96 = arith.mulf %89, %95 : vector<64x16xf32>
    %c0_104 = arith.constant 0 : index
    %c0_105 = arith.constant 0 : index
    %97 = vector.load %arg9[%c0_104, %c0_105] : memref<1x16xf32, #tpu.memory_space<vmem>>, vector<1x16xf32>
    %98 = vector.broadcast %97 : vector<1x16xf32> to vector<64x16xf32>
    %99 = arith.addf %96, %98 : vector<64x16xf32>
    %cst_106 = arith.constant 0.000000e+00 : f32
    %100 = vector.broadcast %cst_106 : f32 to vector<64x16xf32>
    %101 = arith.cmpf oge, %99, %100 : vector<64x16xf32>
    %cst_107 = arith.constant 0.00999999977 : f32
    %102 = vector.broadcast %cst_107 : f32 to vector<64x16xf32>
    %103 = arith.mulf %102, %99 : vector<64x16xf32>
    %104 = arith.select %101, %99, %103 : vector<64x16xi1>, vector<64x16xf32>
    %c0_108 = arith.constant 0 : index
    %c0_109 = arith.constant 0 : index
    %c0_110 = arith.constant 0 : index
    %105 = vector.load %arg10[%c0_108, %c0_109, %c0_110] : memref<1x64x16xf32, #tpu.memory_space<vmem>>, vector<1x64x16xf32>
    %106 = vector.shape_cast %105 : vector<1x64x16xf32> to vector<64x16xf32>
    %107 = vector.shape_cast %104 : vector<64x16xf32> to vector<1x64x16xf32>
    tpu.vector_store %arg10[%c0_108, %c0_109, %c0_110], %107 {strides = array<i32>} : memref<1x64x16xf32, #tpu.memory_space<vmem>>, vector<1x64x16xf32>,
    return
  }
  func.func @transform_0(%arg0: i32) -> (i32, i32, i32, i32, i32) {
    %c0_i32 = arith.constant 0 : i32
    %c0_i32_0 = arith.constant 0 : i32
    %c0_i32_1 = arith.constant 0 : i32
    %c0_i32_2 = arith.constant 0 : i32
    %c0_i32_3 = arith.constant 0 : i32
    return %arg0, %c0_i32, %c0_i32_0, %c0_i32_1, %c0_i32_2 : i32, i32, i32, i32, i32
  }
  func.func @transform_1(%arg0: i32) -> (i32, i32) {
    %c0_i32 = arith.constant 0 : i32
    %c0_i32_0 = arith.constant 0 : i32
    %c0_i32_1 = arith.constant 0 : i32
    return %c0_i32, %c0_i32_0 : i32, i32
  }
  func.func @transform_2(%arg0: i32) -> (i32, i32) {
    %c0_i32 = arith.constant 0 : i32
    %c0_i32_0 = arith.constant 0 : i32
    %c0_i32_1 = arith.constant 0 : i32
    return %c0_i32, %c0_i32_0 : i32, i32
  }
  func.func @transform_3(%arg0: i32) -> (i32, i32) {
    %c0_i32 = arith.constant 0 : i32
    %c0_i32_0 = arith.constant 0 : i32
    %c0_i32_1 = arith.constant 0 : i32
    return %c0_i32, %c0_i32_0 : i32, i32
  }
  func.func @transform_4(%arg0: i32) -> (i32, i32) {
    %c0_i32 = arith.constant 0 : i32
    %c0_i32_0 = arith.constant 0 : i32
    %c0_i32_1 = arith.constant 0 : i32
    return %c0_i32, %c0_i32_0 : i32, i32
  }
  func.func @transform_5(%arg0: i32) -> (i32, i32) {
    %c0_i32 = arith.constant 0 : i32
    %c0_i32_0 = arith.constant 0 : i32
    %c0_i32_1 = arith.constant 0 : i32
    return %c0_i32, %c0_i32_0 : i32, i32
  }
  func.func @transform_6(%arg0: i32) -> (i32, i32) {
    %c0_i32 = arith.constant 0 : i32
    %c0_i32_0 = arith.constant 0 : i32
    %c0_i32_1 = arith.constant 0 : i32
    return %c0_i32, %c0_i32_0 : i32, i32
  }
  func.func @transform_7(%arg0: i32) -> (i32, i32) {
    %c0_i32 = arith.constant 0 : i32
    %c0_i32_0 = arith.constant 0 : i32
    %c0_i32_1 = arith.constant 0 : i32
    return %c0_i32, %c0_i32_0 : i32, i32
  }
  func.func @transform_8(%arg0: i32) -> (i32, i32) {
    %c0_i32 = arith.constant 0 : i32
    %c0_i32_0 = arith.constant 0 : i32
    %c0_i32_1 = arith.constant 0 : i32
    return %c0_i32, %c0_i32_0 : i32, i32
  }
  func.func @transform_9(%arg0: i32) -> (i32, i32, i32) {
    %c0_i32 = arith.constant 0 : i32
    %c0_i32_0 = arith.constant 0 : i32
    %c0_i32_1 = arith.constant 0 : i32
    return %arg0, %c0_i32, %c0_i32_0 : i32, i32, i32
  }
}

</mosaic_0001>

<bundles_post_ra>
// kernel: _forward.3
= control target key start
LH: loop header
LB: loop body
LE: loop exit
PB: predicated region body
PF: predicated region fallthrough
CT: control target
= control target key end

     0   :  { %14 = vsyncpa [#allocation4], 0  ;;  %s3042_s0 = inlined_call_operand.vmem [shape: f32[2,4,9,9,8], index: 0, kind: input, shape index: {}]   ;;  %s3043_s1 = inlined_call_operand.vmem [shape: f32[72,16], index: 1, kind: input, shape index: {}]   ;;  %s3044_s2 = inlined_call_operand.vmem [shape: f32[1,16], index: 2, kind: input, shape index: {}]   ;;  %s3045_s3 = inlined_call_operand.vmem [shape: f32[1,16], index: 3, kind: input, shape index: {}]   ;;  %s3046_s4 = inlined_call_operand.vmem [shape: f32[1,16], index: 4, kind: input, shape index: {}]   ;;  %s3047_s5 = inlined_call_operand.vmem [shape: f32[144,16], index: 5, kind: input, shape index: {}]   ;;  %s3048_s6 = inlined_call_operand.vmem [shape: f32[1,16], index: 6, kind: input, shape index: {}]   ;;  %s3049_s7 = inlined_call_operand.vmem [shape: f32[1,16], index: 7, kind: input, shape index: {}]   ;;  %s3050_s8 = inlined_call_operand.vmem [shape: f32[1,16], index: 8, kind: input, shape index: {}]   ;;  %s3051_s9 = inlined_call_operand.hbm [shape: f32[2,64,16], index: 9, kind: output, shape index: {}]  }
   0x1   :  { %16 = vsyncpa [#allocation4 + $0x1], 0  ;;  %s2250_s30 = smov 0   ;;  %s2252_s10 = smov 0  }
   0x2   :  { %s2254_s11 = smov 0   ;;  %s2256_s12 = smov 0  }
   0x3 LB: > { %s2271_s13 = sadd.s32 4294967295, %s2183_s12   ;;  %s1742_s14 = sadd.s32 4294967294, %s2183_s12   ;;  %s2183_s12 = sphi %s2256_s12, %s3065_s12   ;;  %s2179_s11 = sphi %s2254_s11, %s3064_s11   ;;  %s2175_s10 = sphi %s2252_s10, %s3063_s10   ;;  %s2171_s30 = sphi %s2250_s30, %s3062_s30  }
   0x4   : > { %s2275_s15 = sadd.s32 1, %s2183_s12   ;;  %s223_s16 = sadd.s32 1, %s2179_s11 }
   0x5   : > { %s220_s17 = ssub.s32 %s2183_s12, %s2275_s15  ;;  %p233_p0 = scmp.ne.s32.totalorder %s2179_s11, %s2175_s10 }
   0x6   : > { %p221_p1 = scmp.eq.s32.totalorder %s220_s17, 0  ;;  %p234_p2 = scmp.eq.s32.totalorder %s2271_s13, 1 }
   0x7   : > { %p239_p3 = scmp.ne.s32.totalorder %s2175_s10, %s2171_s30  ;;  %p240_p4 = scmp.eq.s32.totalorder %s1742_s14, 1 }
   0x8   : > { %s2286_s18 = scalar_select %p221_p1, %s2179_s11, %s223_s16  }
   0x9   : > { %p2288_p5 = por %p234_p2, %p233_p0  ;;  %p2292_p6 = por %p240_p4, %p239_p3 }
   0xa   : > { %p1745_p7 = scmp.ge.s32.totalorder %s2183_s12, 1  ;;  %p290_p8 = scmp.lt.s32.totalorder %s2183_s12, 3 }
   0xc   : > { %p291_p9 = pnand %p1745_p7, %p290_p8 }
   0xd   : > { %p326_p10 = scmp.lt.s32.totalorder (!%p291_p9), %s2271_s13, 1  ;;  %s2185_s26 = smov (!%p291_p9), 16   ;;  %v736_v12 = vld [vmem:[%s3043_s1] sm:$0xff] (!%p291_p9)  ;;  %v737_v13 = vld [vmem:[%s3043_s1 + $0x8] sm:$0xff] (!%p291_p9)  ;;  %v738_v15 = vld [vmem:[%s3043_s1 + $0x10] sm:$0xff] (!%p291_p9)  ;;  %vm664_vm0 = vcmask (!%p291_p9), 64512  }
   0xe   : > { %294 = sbr.rel (%p291_p9) target bundleno = 1001 (0x3e9), region = 56  ;;  %s3056_s27 = smov (!%p291_p9), 8   ;;  %v1877_v14 = vpack.c.bf16 (!%p291_p9), %v737_v13, %v736_v12  ;;  %v739_v16 = vld [vmem:[%s3043_s1 + $0x18] sm:$0xff] (!%p291_p9)  ;;  %v740_v20 = vld [vmem:[%s3043_s1 + $0x20] sm:$0xff] (!%p291_p9)  ;;  %v741_v21 = vld [vmem:[%s3043_s1 + $0x28] sm:$0xff] (!%p291_p9)  ;;  %vm673_vm1 = vcmask (!%p291_p9), 130048  }
   0xf   : > { %s3052_s28 = smov (!%p291_p9), 24   ;;  %s2188_s29 = smov (!%p291_p9), 32   ;;  %v1881_v17 = vpack.c.bf16 (!%p291_p9), %v739_v16, %v738_v15  ;;  %v1885_v22 = vpack.c.bf16 (!%p291_p9), %v741_v21, %v740_v20  ;;  %v742_v25 = vld [vmem:[%s3043_s1 + $0x30] sm:$0xff] (!%p291_p9)  ;;  %v743_v26 = vld [vmem:[%s3043_s1 + $0x38] sm:$0xff] (!%p291_p9)  ;;  %v744_v29 = vld [vmem:[%s3043_s1 + $0x40] sm:$0xff] (!%p291_p9)  ;;  %vm682_vm2 = vcmask (!%p291_p9), 195584  }
  0x10   : > { %s3054_s14 = smov (!%p291_p9), 40   ;;  %1878 = vmatprep.subr.bf16.mxu0 (!%p291_p9), %v1877_v14  ;;  %v1889_v27 = vpack.c.bf16 (!%p291_p9), %v743_v26, %v742_v25  ;;  %s2192_s16 = smov (!%p291_p9), 64   ;;  %vm691_vm3 = vcmask (!%p291_p9), 261120   ;;  %vm700_vm4 = vcmask (!%p291_p9), 326656   ;;  %vm709_vm5 = vcmask (!%p291_p9), 392192  }
  0x11   : > { %1880 = vmatpush3.bf16.msra.mxu0 (!%p291_p9), %v1877_v14  ;;  %vm718_vm6 = vcmask (!%p291_p9), 457728   ;;  %vm727_vm7 = vcmask (!%p291_p9), 523264   ;;  %vm752_vm8 = vcmask (!%p291_p9), 588800   ;;  %vm1001_vm9 = vcmask (!%p291_p9), 123904   ;;  %s2195_s17 = smov (!%p291_p9), 96   ;;  %s323_s23 = sand.u32 (!%p291_p9), 1, %s2175_s10  }
  0x12   : > { %1882 = vmatprep.subr.bf16.mxu0 (!%p291_p9), %v1881_v17 }
  0x15   : > { %s327_s21 = scalar_select %p326_p10, %s2271_s13, 1  ;;  %1884 = vmatpush3.bf16.msra.mxu0 %v1881_v17 }
  0x16   : > { %1886 = vmatprep.subr.bf16.mxu0 %v1885_v22 }
  0x17   : > { %s1938_s22 = smul.u32 576, %s327_s21  ;;  %s2190_s21 = smov 48  }
  0x19   : > { %s2303_s25 = scalar_lea.vmem %s3042_s0, %s1938_s22  ;;  %s3059_s22 = smov 40   ;;  %1888 = vmatpush3.bf16.msra.mxu0 %v1885_v22 }
  0x1a   : > { %v348_v0 = vld [vmem:[%s2303_s25 + $0x1] sm:$0xff]  ;;  %v1748_v1 = vld [vmem:[%s2303_s25 + $0x90] sm:$0xff]  ;;  %1890 = vmatprep.subr.bf16.mxu0 %v1889_v27 }
  0x1b   : > { %448 = vrot.lane.b32.xlu1 %v348_v0, %s2185_s26  ;;  %416 = vrot.lane.b32.xlu0 %v1748_v1, %s3056_s27  ;;  %v2310_v2 = vld [vmem:[%s2303_s25 + $0x11] sm:$0xff]  ;;  %v1749_v3 = vld [vmem:[%s2303_s25 + $0xa0] sm:$0xff] }
  0x1c   : > { %v1757_v4 = vld [vmem:[%s2303_s25 + $0x130] sm:$0xff]  ;;  %v1756_v5 = vld [vmem:[%s2303_s25 + $0x120] sm:$0xff] }
  0x1d   : > { %v1750_v6 = vld [vmem:[%s2303_s25 + $0xb0] sm:$0xff]  ;;  %v1772_v8 = vld [vmem:[%s2303_s25 + $0x121] sm:$0xff]  ;;  %1892 = vmatpush3.bf16.msra.mxu0 %v1889_v27 }
  0x1e   : > { %v1764_v7 = vld [vmem:[%s2303_s25 + $0x1b0] sm:$0xff]  ;;  %v1765_v9 = vld [vmem:[%s2303_s25 + $0x1c0] sm:$0xff]  ;;  %1863 = vmatprep.subr.mxu0 %v744_v29 }
  0x1f   : > { %450 = vrot.lane.b32.xlu1 %v2310_v2, %s2185_s26  ;;  %418 = vrot.lane.b32.xlu0 %v1749_v3, %s3056_s27  ;;  %v350_v10 = vld [vmem:[%s2303_s25 + $0x21] sm:$0xff]  ;;  %v2348_v18 = vld [vmem:[%s2303_s25 + $0x10] sm:$0xff] }
  0x20   : > { %v2330_v11 = vld [vmem:[%s2303_s25 + $0xc0] sm:$0xff]  ;;  %v1773_v19 = vld [vmem:[%s2303_s25 + $0x131] sm:$0xff] }
  0x21   : > { %v1758_v23 = vld [vmem:[%s2303_s25 + $0x140] sm:$0xff]  ;;  %v351_v24 = vld [vmem:[%s2303_s25 + $0x31] sm:$0xff]  ;;  %1864 = vmatpush3.msra.mxu0 %v744_v29 }
  0x22   : > { %v2371_v28 = vld [vmem:[%s2303_s25 + $0x20] sm:$0xff]  ;;  %v1766_v30 = vld [vmem:[%s2303_s25 + $0x1d0] sm:$0xff] }
  0x23   : > { %482 = vrot.lane.b32.xlu1 %v1757_v4, %s3052_s28  ;;  %480 = vrot.lane.b32.xlu0 %v1756_v5, %s3052_s28  ;;  %s3060_s28 = smov 24   ;;  %v1759_v31 = vld [vmem:[%s2303_s25 + $0x150] sm:$0xff]  ;;  %v1767_v32 = vld [vmem:[%s2303_s25 + $0x1e0] sm:$0xff] }
  0x24   : > { %v1752_v33 = vld [vmem:[%s2303_s25 + $0xd0] sm:$0xff]  ;;  %v1774_v34 = vld [vmem:[%s2303_s25 + $0x141] sm:$0xff] }
  0x25   : > { %v352_v35 = vld [vmem:[%s2303_s25 + $0x41] sm:$0xff]  ;;  %v2398_v37 = vld [vmem:[%s2303_s25 + $0x30] sm:$0xff] }
  0x26   : > { %v1753_v36 = vld [vmem:[%s2303_s25 + $0xe0] sm:$0xff]  ;;  %v1775_v38 = vld [vmem:[%s2303_s25 + $0x151] sm:$0xff] }
  0x27   : > { %420 = vrot.lane.b32.xlu1 %v1750_v6, %s3056_s27  ;;  %512 = vrot.lane.b32.xlu0 %v1764_v7, %s2188_s29  ;;  %v1760_v39 = vld [vmem:[%s2303_s25 + $0x160] sm:$0xff]  ;;  %v353_v40 = vld [vmem:[%s2303_s25 + $0x51] sm:$0xff] }
  0x28   : > { %v2409_v41 = vld [vmem:[%s2303_s25 + $0x40] sm:$0xff]  ;;  %v1768_v42 = vld [vmem:[%s2303_s25 + $0x1f0] sm:$0xff] }
  0x29   : > { %v1761_v43 = vld [vmem:[%s2303_s25 + $0x170] sm:$0xff]  ;;  %v1769_v44 = vld [vmem:[%s2303_s25 + $0x200] sm:$0xff] }
  0x2a   : > { %v1754_v45 = vld [vmem:[%s2303_s25 + $0xf0] sm:$0xff]  ;;  %v1776_v46 = vld [vmem:[%s2303_s25 + $0x161] sm:$0xff] }
  0x2b   : > { %544 = vrot.lane.b32.xlu1 %v1772_v8, %s3054_s14  ;;  %514 = vrot.lane.b32.xlu0 %v1765_v9, %s2188_s29  ;;  %s2191_s14 = smov 56   ;;  %v354_v47 = vld [vmem:[%s2303_s25 + $0x61] sm:$0xff]  ;;  %v2433_v49 = vld [vmem:[%s2303_s25 + $0x50] sm:$0xff] }
  0x2c   : > { %v1755_v48 = vld [vmem:[%s2303_s25 + $0x100] sm:$0xff]  ;;  %v1777_v50 = vld [vmem:[%s2303_s25 + $0x171] sm:$0xff] }
  0x2d   : > { %v1762_v51 = vld [vmem:[%s2303_s25 + $0x180] sm:$0xff]  ;;  %v355_v52 = vld [vmem:[%s2303_s25 + $0x71] sm:$0xff] }
  0x2e   : > { %v2444_v53 = vld [vmem:[%s2303_s25 + $0x60] sm:$0xff]  ;;  %v1770_v54 = vld [vmem:[%s2303_s25 + $0x210] sm:$0xff] }
  0x2f   : > { %452 = vrot.lane.b32.xlu1 %v350_v10, %s2185_s26  ;;  %422 = vrot.lane.b32.xlu0 %v2330_v11, %s3056_s27  ;;  %v1763_v55 = vld [vmem:[%s2303_s25 + $0x190] sm:$0xff]  ;;  %v1778_v56 = vld [vmem:[%s2303_s25 + $0x181] sm:$0xff] }
  0x30   : > { %v1771_v57 = vld [vmem:[%s2303_s25 + $0x220] sm:$0xff]  ;;  %v1779_v58 = vld [vmem:[%s2303_s25 + $0x191] sm:$0xff] }
  0x31   : > { %v1787_v59 = vld [vmem:[%s2303_s25 + $0x80] sm:$0xff]  ;;  %v2464_v60 = vld [vmem:[%s2303_s25 + $0x70] sm:$0xff] }
  0x32   : > { %v1795_v63 = vld [vmem:[%s2303_s25 + $0x110] sm:$0xff]  ;;  %v331_v15 = vld [vmem:[%s2303_s25] sm:$0xff] }
  0x33   : > { %576 = vrot.lane.b32.xlu1 %v2348_v18, %s2190_s21  ;;  %546 = vrot.lane.b32.xlu0 %v1773_v19, %s3059_s22 }
  0x37   : > { %484 = vrot.lane.b32.xlu1 %v1758_v23, %s3060_s28  ;;  %454 = vrot.lane.b32.xlu0 %v351_v24, %s2185_s26 }
  0x3b   : > { %608 = vrot.lane.b32.xlu1 %v1749_v3, %s2191_s14  ;;  %578 = vrot.lane.b32.xlu0 %v2371_v28, %s2190_s21 }
  0x3f   : > { %516 = vrot.lane.b32.xlu1 %v1766_v30, %s2188_s29  ;;  %486 = vrot.lane.b32.xlu0 %v1759_v31, %s3060_s28 }
  0x43   : > { %640 = vrot.lane.b32.xlu1 %v2310_v2, %s2192_s16  ;;  %610 = vrot.lane.b32.xlu0 %v1750_v6, %s2191_s14  ;;  %v1803_v2 = vld [vmem:[%s2303_s25 + $0x81] sm:$0xff] }
  0x47   : > { %518 = vrot.lane.b32.xlu1 %v1767_v32, %s2188_s29  ;;  %424 = vrot.lane.b32.xlu0 %v1752_v33, %s3056_s27 }
  0x4b   : > { %642 = vrot.lane.b32.xlu1 %v350_v10, %s2192_s16  ;;  %548 = vrot.lane.b32.xlu0 %v1774_v34, %s3059_s22 }
  0x4f   : > { %456 = vrot.lane.b32.xlu1 %v352_v35, %s2185_s26  ;;  %426 = vrot.lane.b32.xlu0 %v1753_v36, %s3056_s27 }
  0x53   : > { %580 = vrot.lane.b32.xlu1 %v2398_v37, %s2190_s21  ;;  %550 = vrot.lane.b32.xlu0 %v1775_v38, %s3059_s22 }
  0x57   : > { %488 = vrot.lane.b32.xlu1 %v1760_v39, %s3060_s28  ;;  %458 = vrot.lane.b32.xlu0 %v353_v40, %s2185_s26 }
  0x5b   : > { %612 = vrot.lane.b32.xlu1 %v2330_v11, %s2191_s14  ;;  %582 = vrot.lane.b32.xlu0 %v2409_v41, %s2190_s21 }
  0x5f   : > { %520 = vrot.lane.b32.xlu1 %v1768_v42, %s2188_s29  ;;  %490 = vrot.lane.b32.xlu0 %v1761_v43, %s3060_s28 }
  0x63   : > { %644 = vrot.lane.b32.xlu1 %v351_v24, %s2192_s16  ;;  %614 = vrot.lane.b32.xlu0 %v1752_v33, %s2191_s14 }
  0x67   : > { %522 = vrot.lane.b32.xlu1 %v1769_v44, %s2188_s29  ;;  %428 = vrot.lane.b32.xlu0 %v1754_v45, %s3056_s27 }
  0x6b   : > { %646 = vrot.lane.b32.xlu1 %v352_v35, %s2192_s16  ;;  %552 = vrot.lane.b32.xlu0 %v1776_v46, %s3059_s22 }
  0x6f   : > { %460 = vrot.lane.b32.xlu1 %v354_v47, %s2185_s26  ;;  %430 = vrot.lane.b32.xlu0 %v1755_v48, %s3056_s27  ;;  %s1746_s27 = sshll.u32 %s323_s23, 6 }
  0x73   : > { %584 = vrot.lane.b32.xlu1 %v2433_v49, %s2190_s21  ;;  %554 = vrot.lane.b32.xlu0 %v1777_v50, %s3059_s22 }
  0x77   : > { %492 = vrot.lane.b32.xlu1 %v1762_v51, %s3060_s28  ;;  %462 = vrot.lane.b32.xlu0 %v355_v52, %s2185_s26 }
  0x7b   : > { %616 = vrot.lane.b32.xlu1 %v1753_v36, %s2191_s14  ;;  %586 = vrot.lane.b32.xlu0 %v2444_v53, %s2190_s21 }
  0x7f   : > { %524 = vrot.lane.b32.xlu1 %v1770_v54, %s2188_s29  ;;  %494 = vrot.lane.b32.xlu0 %v1763_v55, %s3060_s28  ;;  %s2196_s28 = smov 80  }
  0x83   : > { %648 = vrot.lane.b32.xlu1 %v353_v40, %s2192_s16  ;;  %618 = vrot.lane.b32.xlu0 %v1754_v45, %s2191_s14 }
  0x87   : > { %556 = vrot.lane.b32.xlu1 %v1778_v56, %s3059_s22  ;;  %526 = vrot.lane.b32.xlu0 %v1771_v57, %s2188_s29 }
  0x8b   : > { %558 = vrot.lane.b32.xlu1 %v1779_v58, %s3059_s22  ;;  %650 = vrot.lane.b32.xlu0 %v354_v47, %s2192_s16  ;;  %s1829_s22 = sshll.u32 %s2271_s13, 10  ;;  %s3000_s13 = scalar_lea.sflag [#allocation4], %s323_s23 }
  0x8d   : > { %v449_v61 = vpop.permute.xlu1 %448  ;;  %v417_v62 = vpop.permute.xlu0 %416 }
  0x8e   : > { %v665_v16 = vsel %vm664_vm0, %v331_v15, %v417_v62 }
  0x8f   : > { %590 = vrot.lane.b32.xlu1 %v1787_v59, %s2190_s21  ;;  %588 = vrot.lane.b32.xlu0 %v2464_v60, %s2190_s21  ;;  %v674_v20 = vsel %vm673_vm1, %v665_v16, %v449_v61 }
  0x91   : > { %v451_v0 = vpop.permute.xlu1 %450  ;;  %v419_v1 = vpop.permute.xlu0 %418 }
  0x92   : > { %v666_v27 = vsel %vm664_vm0, %v2348_v18, %v419_v1 }
  0x93   : > { %622 = vrot.lane.b32.xlu1 %v1795_v63, %s2191_s14  ;;  %620 = vrot.lane.b32.xlu0 %v1755_v48, %s2191_s14  ;;  %v675_v33 = vsel %vm673_vm1, %v666_v27, %v451_v0  ;;  %s2197_s14 = smov 112  }
  0x95   : > { %v483_v3 = vpop.permute.xlu1 %482  ;;  %v481_v4 = vpop.permute.xlu0 %480 }
  0x96   : > { %v683_v21 = vsel %vm682_vm2, %v674_v20, %v481_v4  ;;  %v684_v34 = vsel %vm682_vm2, %v675_v33, %v483_v3 }
  0x97   : > { %654 = vrot.lane.b32.xlu1 %v1803_v2, %s2192_s16  ;;  %652 = vrot.lane.b32.xlu0 %v355_v52, %s2192_s16 }
  0x99   : > { %v421_v5 = vpop.permute.xlu1 %420  ;;  %v513_v6 = vpop.permute.xlu0 %512 }
  0x9a   : > { %v692_v24 = vsel %vm691_vm3, %v683_v21, %v513_v6  ;;  %v667_v55 = vsel %vm664_vm0, %v2371_v28, %v421_v5 }
  0x9d   : > { %v545_v7 = vpop.permute.xlu1 %544  ;;  %v515_v8 = vpop.permute.xlu0 %514 }
  0x9e   : > { %v701_v25 = vsel %vm700_vm4, %v692_v24, %v545_v7  ;;  %v693_v38 = vsel %vm691_vm3, %v684_v34, %v515_v8 }
  0xa1   : > { %v453_v9 = vpop.permute.xlu1 %452  ;;  %v2475_v10 = vpop.permute.xlu0 %422 }
  0xa2   : > { %v676_v56 = vsel %vm673_vm1, %v667_v55, %v453_v9  ;;  %v668_v28 = vsel %vm664_vm0, %v2398_v37, %v2475_v10 }
  0xa5   : > { %v577_v11 = vpop.permute.xlu1 %576  ;;  %v547_v12 = vpop.permute.xlu0 %546 }
  0xa6   : > { %v710_v26 = vsel %vm709_vm5, %v701_v25, %v577_v11  ;;  %v702_v39 = vsel %vm700_vm4, %v693_v38, %v547_v12 }
  0xa9   : > { %v485_v13 = vpop.permute.xlu1 %484  ;;  %v455_v14 = vpop.permute.xlu0 %454 }
  0xaa   : > { %v685_v57 = vsel %vm682_vm2, %v676_v56, %v485_v13  ;;  %v677_v4 = vsel %vm673_vm1, %v668_v28, %v455_v14 }
  0xad   : > { %v609_v17 = vpop.permute.xlu1 %608  ;;  %v579_v19 = vpop.permute.xlu0 %578 }
  0xae   : > { %v719_v29 = vsel %vm718_vm6, %v710_v26, %v609_v17  ;;  %v711_v18 = vsel %vm709_vm5, %v702_v39, %v579_v19 }
  0xb1   : > { %v517_v22 = vpop.permute.xlu1 %516  ;;  %v487_v23 = vpop.permute.xlu0 %486 }
  0xb2   : > { %v694_v61 = vsel %vm691_vm3, %v685_v57, %v517_v22  ;;  %v686_v5 = vsel %vm682_vm2, %v677_v4, %v487_v23 }
  0xb5   : > { %v641_v30 = vpop.permute.xlu1 %640  ;;  %v611_v31 = vpop.permute.xlu0 %610 }
  0xb6   : > { %v728_v32 = vsel %vm727_vm7, %v719_v29, %v641_v30  ;;  %v720_v40 = vsel %vm718_vm6, %v711_v18, %v611_v31 }
  0xb7   : > { %1865 = vmatprep.mubr.msk.f32.mxu0 %vm752_vm8, %v728_v32 }
  0xb9   : > { %v519_v35 = vpop.permute.xlu1 %518  ;;  %v425_v36 = vpop.permute.xlu0 %424 }
  0xba   : > { %v695_v8 = vsel %vm691_vm3, %v686_v5, %v519_v35  ;;  %v669_v23 = vsel %vm664_vm0, %v2409_v41, %v425_v36  ;;  %v2561_v5 = vld [vmem:[%s3044_s2] ss:$0 sm:$0xff] }
  0xbd   : > { %v643_v42 = vpop.permute.xlu1 %642  ;;  %v549_v43 = vpop.permute.xlu0 %548 }
  0xbe   : > { %v729_v44 = vsel %vm727_vm7, %v720_v40, %v643_v42  ;;  %v703_v62 = vsel %vm700_vm4, %v694_v61, %v549_v43 }
  0xbf   : > { %1866 = vmatmul.mubr.msk.f32.vlgmr.msra.gmra.mrb[0].mxu0 %vm752_vm8, %v729_v44 }
  0xc1   : > { %v457_v45 = vpop.permute.xlu1 %456  ;;  %v427_v46 = vpop.permute.xlu0 %426 }
  0xc2   : > { %v678_v24 = vsel %vm673_vm1, %v669_v23, %v457_v45  ;;  %v670_v41 = vsel %vm664_vm0, %v2433_v49, %v427_v46 }
  0xc5   : > { %v581_v47 = vpop.permute.xlu1 %580  ;;  %v551_v48 = vpop.permute.xlu0 %550 }
  0xc6   : > { %v712_v63 = vsel %vm709_vm5, %v703_v62, %v581_v47  ;;  %v704_v9 = vsel %vm700_vm4, %v695_v8, %v551_v48 }
  0xc9   : > { %v489_v50 = vpop.permute.xlu1 %488  ;;  %v459_v51 = vpop.permute.xlu0 %458 }
  0xca   : > { %v687_v25 = vsel %vm682_vm2, %v678_v24, %v489_v50  ;;  %v679_v36 = vsel %vm673_vm1, %v670_v41, %v459_v51 }
  0xcd   : > { %v613_v52 = vpop.permute.xlu1 %612  ;;  %v583_v54 = vpop.permute.xlu0 %582 }
  0xce   : > { %v721_v0 = vsel %vm718_vm6, %v712_v63, %v613_v52  ;;  %v713_v11 = vsel %vm709_vm5, %v704_v9, %v583_v54 }
  0xd1   : > { %v521_v58 = vpop.permute.xlu1 %520  ;;  %v491_v59 = vpop.permute.xlu0 %490 }
  0xd2   : > { %v696_v29 = vsel %vm691_vm3, %v687_v25, %v521_v58  ;;  %v688_v38 = vsel %vm682_vm2, %v679_v36, %v491_v59 }
  0xd5   : > { %v645_v1 = vpop.permute.xlu1 %644  ;;  %v615_v2 = vpop.permute.xlu0 %614 }
  0xd6   : > { %v730_v3 = vsel %vm727_vm7, %v721_v0, %v645_v1  ;;  %v722_v12 = vsel %vm718_vm6, %v713_v11, %v615_v2 }
  0xd7   : > { %1868 = vmatprep.mubr.msk.f32.mxu0 %vm752_vm8, %v730_v3 }
  0xd9   : > { %v523_v6 = vpop.permute.xlu1 %522  ;;  %v429_v7 = vpop.permute.xlu0 %428 }
  0xda   : > { %v697_v40 = vsel %vm691_vm3, %v688_v38, %v523_v6  ;;  %v671_v50 = vsel %vm664_vm0, %v2444_v53, %v429_v7 }
  0xdd   : > { %v647_v13 = vpop.permute.xlu1 %646  ;;  %v553_v15 = vpop.permute.xlu0 %552 }
  0xde   : > { %v731_v37 = vsel %vm727_vm7, %v722_v12, %v647_v13  ;;  %v705_v30 = vsel %vm700_vm4, %v696_v29, %v553_v15  ;;  %v2193_v13 = vmov 0.0  }
  0xdf   : > { %1869 = vmatmul.mubr.msk.f32.gmra.mrb[2].mxu0 %vm752_vm8, %v731_v37  ;;  %1015 = vst.msk [vmem:[#allocation2 + $0x70] sm:$0xff] %vm673_vm1, %v2193_v13  ;;  %1000 = vst.msk [vmem:[#allocation2] sm:$0xff] %vm673_vm1, %v2193_v13 }
  0xe0   : > { %1016 = vst.msk [vmem:[#allocation2 + $0x78] sm:$0x3] %vm1001_vm9, %v2193_v13  ;;  %1002 = vst.msk [vmem:[#allocation2 + $0x8] sm:$0x3] %vm1001_vm9, %v2193_v13 }
  0xe1   : > { %v461_v10 = vpop.permute.xlu1 %460  ;;  %v431_v14 = vpop.permute.xlu0 %430  ;;  %1003 = vst.msk [vmem:[#allocation2 + $0x10] sm:$0xff] %vm673_vm1, %v2193_v13  ;;  %1005 = vst.msk [vmem:[#allocation2 + $0x20] sm:$0xff] %vm673_vm1, %v2193_v13 }
  0xe2   : > { %v672_v51 = vsel %vm664_vm0, %v2464_v60, %v431_v14  ;;  %v680_v52 = vsel %vm673_vm1, %v671_v50, %v461_v10  ;;  %1004 = vst.msk [vmem:[#allocation2 + $0x18] sm:$0x3] %vm1001_vm9, %v2193_v13  ;;  %1006 = vst.msk [vmem:[#allocation2 + $0x28] sm:$0x3] %vm1001_vm9, %v2193_v13  ;;  %v1388_v50 = vld [vmem:[%s3047_s5 + $0x10] sm:$0xff] }
  0xe3   : > { %1007 = vst.msk [vmem:[#allocation2 + $0x30] sm:$0xff] %vm673_vm1, %v2193_v13  ;;  %1009 = vst.msk [vmem:[#allocation2 + $0x40] sm:$0xff] %vm673_vm1, %v2193_v13 }
  0xe4   : > { %1008 = vst.msk [vmem:[#allocation2 + $0x38] sm:$0x3] %vm1001_vm9, %v2193_v13  ;;  %1010 = vst.msk [vmem:[#allocation2 + $0x48] sm:$0x3] %vm1001_vm9, %v2193_v13 }
  0xe5   : > { %v585_v16 = vpop.permute.xlu1 %584  ;;  %v555_v17 = vpop.permute.xlu0 %554  ;;  %1011 = vst.msk [vmem:[#allocation2 + $0x50] sm:$0xff] %vm673_vm1, %v2193_v13  ;;  %1013 = vst.msk [vmem:[#allocation2 + $0x60] sm:$0xff] %vm673_vm1, %v2193_v13 }
  0xe6   : > { %v714_v31 = vsel %vm709_vm5, %v705_v30, %v585_v16  ;;  %v706_v42 = vsel %vm700_vm4, %v697_v40, %v555_v17  ;;  %1012 = vst.msk [vmem:[#allocation2 + $0x58] sm:$0x3] %vm1001_vm9, %v2193_v13  ;;  %1014 = vst.msk [vmem:[#allocation2 + $0x68] sm:$0x3] %vm1001_vm9, %v2193_v13 }
  0xe7   : > { %1017 = vst.msk [vmem:[#allocation2 + $0x80] sm:$0xff] %vm673_vm1, %v2193_v13  ;;  %1019 = vst.msk [vmem:[#allocation2 + $0x90] sm:$0xff] %vm673_vm1, %v2193_v13 }
  0xe8   : > { %1018 = vst.msk [vmem:[#allocation2 + $0x88] sm:$0x3] %vm1001_vm9, %v2193_v13  ;;  %1020 = vst.msk [vmem:[#allocation2 + $0x98] sm:$0x3] %vm1001_vm9, %v2193_v13  ;;  %v1395_v13 = vld [vmem:[%s3047_s5 + $0x48] sm:$0xff] }
  0xe9   : > { %v493_v19 = vpop.permute.xlu1 %492  ;;  %v463_v20 = vpop.permute.xlu0 %462 }
  0xea   : > { %v681_v54 = vsel %vm673_vm1, %v672_v51, %v463_v20  ;;  %v689_v55 = vsel %vm682_vm2, %v680_v52, %v493_v19  ;;  %v2194_v51 = vmov 0.0|0.0  }
  0xeb   : > { %1920 = vmatprep.subr.bf16.mxu1 %v2194_v51  ;;  %1893 = vmatprep.subr.bf16.mxu0 %v2194_v51 }
  0xed   : > { %v617_v21 = vpop.permute.xlu1 %616  ;;  %v587_v22 = vpop.permute.xlu0 %586 }
  0xee   : > { %v723_v32 = vsel %vm718_vm6, %v714_v31, %v617_v21  ;;  %v715_v43 = vsel %vm709_vm5, %v706_v42, %v587_v22 }
  0xf1   : > { %v525_v26 = vpop.permute.xlu1 %524  ;;  %v495_v27 = vpop.permute.xlu0 %494 }
  0xf2   : > { %v690_v56 = vsel %vm682_vm2, %v681_v54, %v495_v27  ;;  %v698_v59 = vsel %vm691_vm3, %v689_v55, %v525_v26  ;;  %v1389_v54 = vld [vmem:[%s3047_s5 + $0x18] sm:$0xff] }
  0xf3   : > { %v1897_v55 = vpack.c.bf16 %v1389_v54, %v1388_v50 }
  0xf5   : > { %v649_v33 = vpop.permute.xlu1 %648  ;;  %v619_v34 = vpop.permute.xlu0 %618 }
  0xf6   : > { %v732_v35 = vsel %vm727_vm7, %v723_v32, %v649_v33  ;;  %v724_v44 = vsel %vm718_vm6, %v715_v43, %v619_v34 }
  0xf7   : > { %1871 = vmatprep.mubr.msk.f32.mxu0 %vm752_vm8, %v732_v35 }
  0xf9   : > { %v557_v39 = vpop.permute.xlu1 %556  ;;  %v527_v18 = vpop.permute.xlu0 %526 }
  0xfa   : > { %v699_v61 = vsel %vm691_vm3, %v690_v56, %v527_v18  ;;  %v707_v62 = vsel %vm700_vm4, %v698_v59, %v557_v39 }
  0xfd   : > { %v559_v45 = vpop.permute.xlu1 %558  ;;  %v651_v47 = vpop.permute.xlu0 %650 }
  0xfe   : > { %v733_v49 = vsel %vm727_vm7, %v724_v44, %v651_v47  ;;  %v708_v53 = vsel %vm700_vm4, %v699_v61, %v559_v45  ;;  %vm1359_vm4 = vcmask 654336  }
  0xff   : > { %1872 = vmatmul.mubr.msk.f32.gmra.mrb[4].mxu0 %vm752_vm8, %v733_v49 }
 0x101   : > { %v591_v46 = vpop.permute.xlu1 %590  ;;  %v589_v48 = vpop.permute.xlu0 %588 }
 0x102   : > { %v717_v60 = vsel %vm709_vm5, %v708_v53, %v591_v46  ;;  %v716_v63 = vsel %vm709_vm5, %v707_v62, %v589_v48  ;;  %v1386_v46 = vld [vmem:[%s3047_s5] sm:$0xff]  ;;  %v1387_v48 = vld [vmem:[%s3047_s5 + $0x8] sm:$0xff] }
 0x103   : > { %v1894_v52 = vpack.c.bf16 %v1387_v48, %v1386_v46 }
 0x105   : > { %v623_v57 = vpop.permute.xlu1 %622  ;;  %v621_v58 = vpop.permute.xlu0 %620  ;;  %1929 = vmatpush1.bf16.msra.mxu1 %v1894_v52  ;;  %1895 = vmatpush1.bf16.msra.mxu0 %v1894_v52 }
 0x106   : > { %v726_v0 = vsel %vm718_vm6, %v717_v60, %v623_v57  ;;  %v725_v1 = vsel %vm718_vm6, %v716_v63, %v621_v58  ;;  %1921 = vmatprep.subr.bf16.mxu1 %v2194_v51  ;;  %v1390_v57 = vld [vmem:[%s3047_s5 + $0x20] sm:$0xff]  ;;  %v1391_v58 = vld [vmem:[%s3047_s5 + $0x28] sm:$0xff]  ;;  %1896 = vmatprep.subr.bf16.mxu0 %v2194_v51  ;;  %vm1368_vm6 = vcmask 785408  }
 0x107   : > { %v1900_v53 = vpack.c.bf16 %v1391_v58, %v1390_v57 }
 0x109   : > { %v655_v2 = vpop.permute.xlu1 %654  ;;  %v653_v3 = vpop.permute.xlu0 %652  ;;  %1930 = vmatpush1.bf16.msra.mxu1 %v1897_v55  ;;  %1898 = vmatpush1.bf16.msra.mxu0 %v1897_v55 }
 0x10a   : > { %v735_v28 = vsel %vm727_vm7, %v726_v0, %v655_v2  ;;  %v734_v4 = vsel %vm727_vm7, %v725_v1, %v653_v3  ;;  %1922 = vmatprep.subr.bf16.mxu1 %v2194_v51  ;;  %v1392_v1 = vld [vmem:[%s3047_s5 + $0x30] sm:$0xff]  ;;  %v1393_v2 = vld [vmem:[%s3047_s5 + $0x38] sm:$0xff]  ;;  %1899 = vmatprep.subr.bf16.mxu0 %v2194_v51 }
 0x10b   : > { %1874 = vmatprep.mubr.msk.f32.mxu0 %vm752_vm8, %v734_v4 }
 0x10c   : > { %1875 = vmatmul.mubr.msk.f32.gmra.mrb[6].mxu0 %vm752_vm8, %v735_v28  ;;  %vm1377_vm8 = vcmask 916480  }
 0x10d   : > { %1931 = vmatpush1.bf16.msra.mxu1 %v1900_v53  ;;  %1901 = vmatpush1.bf16.msra.mxu0 %v1900_v53 }
 0x10e   : > { %1923 = vmatprep.subr.bf16.mxu1 %v2194_v51  ;;  %1902 = vmatprep.subr.bf16.mxu0 %v2194_v51 }
 0x192   : > { %v1867_v6 = vpop.f32.mrb[0].mxu0 }
 0x193   : > { %v2564_v7 = vadd.f32 %v1867_v6, %v2561_v5  ;;  %v843_v8 = vpop.f32.mrb[1].mxu0 }
 0x194   : > { %v2567_v9 = vadd.f32 %v2561_v5, %v843_v8  ;;  %v1903_v8 = vpack.c.bf16 %v1393_v2, %v1392_v1 }
 0x195   : > { %v883_v11 = vsel %vm673_vm1, %v2564_v7, 0.0  ;;  %v905_v12 = vmul.f32 %v2564_v7, %v2564_v7 }
 0x196   : > { %v882_v15 = vsel %vm673_vm1, %v2567_v9, 0.0  ;;  %v904_v37 = vmul.f32 %v2567_v9, %v2567_v9  ;;  %1932 = vmatpush1.bf16.msra.mxu1 %v1903_v8  ;;  %1904 = vmatpush1.bf16.msra.mxu0 %v1903_v8 }
 0x197   : > { %v913_v10 = vsel %vm673_vm1, %v905_v12, 0.0  ;;  %v884_v14 = vadd.f32 %v883_v11, %v882_v15  ;;  %v1394_v12 = vld [vmem:[%s3047_s5 + $0x40] sm:$0xff]  ;;  %1924 = vmatprep.subr.bf16.mxu1 %v2194_v51  ;;  %1905 = vmatprep.subr.bf16.mxu0 %v2194_v51 }
 0x198   : > { %v912_v16 = vsel %vm673_vm1, %v904_v37, 0.0 }
 0x199   : > { %v914_v17 = vadd.f32 %v913_v10, %v912_v16  ;;  %v1906_v16 = vpack.c.bf16 %v1395_v13, %v1394_v12  ;;  %v1396_v13 = vld [vmem:[%s3047_s5 + $0x50] sm:$0xff] }
 0x19b   : > { %1933 = vmatpush1.bf16.msra.mxu1 %v1906_v16  ;;  %1907 = vmatpush1.bf16.msra.mxu0 %v1906_v16 }
 0x19c   : > { %1925 = vmatprep.subr.bf16.mxu1 %v2194_v51  ;;  %1908 = vmatprep.subr.bf16.mxu0 %v2194_v51 }
 0x1b2   : > { %v1870_v19 = vpop.f32.mrb[2].mxu0 }
 0x1b3   : > { %v2600_v20 = vadd.f32 %v1870_v19, %v2561_v5  ;;  %v853_v21 = vpop.f32.mrb[3].mxu0 }
 0x1b4   : > { %v2603_v22 = vadd.f32 %v2561_v5, %v853_v21 }
 0x1b5   : > { %v907_v23 = vmul.f32 %v2600_v20, %v2600_v20  ;;  %v887_v27 = vsel %vm673_vm1, %v2600_v20, 0.0 }
 0x1b6   : > { %v885_v24 = vsel %vm673_vm1, %v2603_v22, 0.0  ;;  %v906_v25 = vmul.f32 %v2603_v22, %v2603_v22 }
 0x1b7   : > { %v886_v26 = vadd.f32 %v885_v24, %v884_v14  ;;  %v917_v32 = vsel %vm673_vm1, %v907_v23, 0.0 }
 0x1b8   : > { %v915_v29 = vsel %vm673_vm1, %v906_v25, 0.0 }
 0x1b9   : > { %v916_v30 = vadd.f32 %v915_v29, %v914_v17  ;;  %v888_v31 = vadd.f32 %v887_v27, %v886_v26 }
 0x1bb   : > { %v918_v33 = vadd.f32 %v917_v32, %v916_v30 }
 0x1d2   : > { %v1873_v34 = vpop.f32.mrb[4].mxu0 }
 0x1d3   : > { %v2616_v35 = vadd.f32 %v1873_v34, %v2561_v5  ;;  %v863_v41 = vpop.f32.mrb[5].mxu0 }
 0x1d4   : > { %v2619_v36 = vadd.f32 %v2561_v5, %v863_v41 }
 0x1d5   : > { %v909_v38 = vmul.f32 %v2616_v35, %v2616_v35  ;;  %v891_v42 = vsel %vm673_vm1, %v2616_v35, 0.0 }
 0x1d6   : > { %v889_v39 = vsel %vm673_vm1, %v2619_v36, 0.0  ;;  %v908_v18 = vmul.f32 %v2619_v36, %v2619_v36 }
 0x1d7   : > { %v890_v40 = vadd.f32 %v889_v39, %v888_v31  ;;  %v921_v47 = vsel %vm673_vm1, %v909_v38, 0.0 }
 0x1d8   : > { %v919_v43 = vsel %vm673_vm1, %v908_v18, 0.0 }
 0x1d9   : > { %v920_v44 = vadd.f32 %v919_v43, %v918_v33  ;;  %v892_v45 = vadd.f32 %v891_v42, %v890_v40 }
 0x1db   : > { %v922_v49 = vadd.f32 %v921_v47, %v920_v44  ;;  %v949_v47 = vlaneseq }
 0x1df   : > { %v1876_v56 = vpop.f32.mrb[6].mxu0 }
 0x1e0   : > { %v2654_v59 = vadd.f32 %v1876_v56, %v2561_v5  ;;  %v873_v61 = vpop.f32.mrb[7].mxu0 }
 0x1e1   : > { %v2657_v62 = vadd.f32 %v2561_v5, %v873_v61 }
 0x1e2   : > { %v911_v60 = vmul.f32 %v2654_v59, %v2654_v59  ;;  %v895_v28 = vsel %vm673_vm1, %v2654_v59, 0.0 }
 0x1e3   : > { %v893_v63 = vsel %vm673_vm1, %v2657_v62, 0.0  ;;  %v910_v0 = vmul.f32 %v2657_v62, %v2657_v62 }
 0x1e4   : > { %v894_v3 = vadd.f32 %v893_v63, %v892_v45  ;;  %v925_v11 = vsel %vm673_vm1, %v911_v60, 0.0 }
 0x1e5   : > { %v923_v4 = vsel %vm673_vm1, %v910_v0, 0.0 }
 0x1e6   : > { %v896_v5 = vadd.f32 %v895_v28, %v894_v3  ;;  %v924_v6 = vadd.f32 %v923_v4, %v922_v49 }
 0x1e8   : > { %v897_v15 = vrot.slane %v896_v5, 4  ;;  %v926_v37 = vadd.f32 %v925_v11, %v924_v6 }
 0x1ea   : > { %v898_v10 = vadd.f32 %v897_v15, %v896_v5  ;;  %v927_v14 = vrot.slane %v926_v37, 4  ;;  %v1397_v15 = vld [vmem:[%s3047_s5 + $0x58] sm:$0xff] }
 0x1ec   : > { %v899_v17 = vrot.slane %v898_v10, 2  ;;  %v928_v19 = vadd.f32 %v927_v14, %v926_v37 }
 0x1ee   : > { %v900_v21 = vadd.f32 %v899_v17, %v898_v10  ;;  %v929_v23 = vrot.slane %v928_v19, 2  ;;  %v1909_v17 = vpack.c.bf16 %v1397_v15, %v1396_v13 }
 0x1f0   : > { %v901_v24 = vrot.slane %v900_v21, 1  ;;  %v930_v25 = vadd.f32 %v929_v23, %v928_v19  ;;  %1934 = vmatpush1.bf16.msra.mxu1 %v1909_v17  ;;  %v1398_v23 = vld [vmem:[%s3047_s5 + $0x60] sm:$0xff]  ;;  %1910 = vmatpush1.bf16.msra.mxu0 %v1909_v17 }
 0x1f1   : > { %1926 = vmatprep.subr.bf16.mxu1 %v2194_v51  ;;  %1911 = vmatprep.subr.bf16.mxu0 %v2194_v51 }
 0x1f2   : > { %v902_v26 = vadd.f32 %v901_v24, %v900_v21  ;;  %v931_v27 = vrot.slane %v930_v25, 1  ;;  %v1399_v24 = vld [vmem:[%s3047_s5 + $0x68] sm:$0xff] }
 0x1f4   : > { %v903_v29 = vmul.f32 0.015625, %v902_v26  ;;  %v932_v30 = vadd.f32 %v931_v27, %v930_v25  ;;  %v1912_v25 = vpack.c.bf16 %v1399_v24, %v1398_v23  ;;  %v1400_v26 = vld [vmem:[%s3047_s5 + $0x70] sm:$0xff]  ;;  %v1401_v27 = vld [vmem:[%s3047_s5 + $0x78] sm:$0xff] }
 0x1f6   : > { %v933_v31 = vmul.f32 0.015625, %v932_v30  ;;  %v934_v32 = vmul.f32 %v903_v29, %v903_v29  ;;  %v937_v33 = vsub.f32 %v2567_v9, %v903_v29  ;;  %v938_v34 = vsub.f32 %v2564_v7, %v903_v29  ;;  %v947_v7 = vld [vmem:[%s3045_s3] sm:$0x1]  ;;  %1935 = vmatpush1.bf16.msra.mxu1 %v1912_v25  ;;  %1913 = vmatpush1.bf16.msra.mxu0 %v1912_v25 }
 0x1f7   : > { %v940_v41 = vsub.f32 %v2600_v20, %v903_v29  ;;  %v941_v38 = vsub.f32 %v2619_v36, %v903_v29  ;;  %v942_v39 = vsub.f32 %v2616_v35, %v903_v29  ;;  %v943_v18 = vsub.f32 %v2657_v62, %v903_v29  ;;  %1927 = vmatprep.subr.bf16.mxu1 %v2194_v51 }
 0x1f8   : > { %v935_v40 = vsub.f32 %v933_v31, %v934_v32  ;;  %v944_v42 = vsub.f32 %v2654_v59, %v903_v29  ;;  %v939_v43 = vsub.f32 %v2603_v22, %v903_v29  ;;  %v2697_v9 = vshrl.u32 %v949_v47, 7  ;;  %v1813_v22 = vld [vmem:[%s3046_s4] ss:$0 sm:$0xff]  ;;  %1914 = vmatprep.subr.bf16.mxu0 %v2194_v51  ;;  %v1403_v47 = vld [vmem:[%s3047_s5 + $0x88] sm:$0xff] }
 0x1fa   : > { %v936_v44 = vmax.f32 %v935_v40, 0.0  ;;  %v951_v20 = vsub.s32 0, %v2697_v9 }
 0x1fc   : > { %v945_v45 = vadd.f32 1e-05, %v936_v44 }
 0x1fe   : > { %2117 = vrsqrt.f32 %v945_v45  ;;  %v1402_v45 = vld [vmem:[%s3047_s5 + $0x80] sm:$0xff] }
 0x208   : > { %v2118_v35 = vpop.eup %2117 }
 0x209   : > { %v948_v36 = vmul.f32 %v2118_v35, %v947_v7  ;;  %v1918_v35 = vpack.c.bf16 %v1403_v47, %v1402_v45 }
 0x20b   : > { %v952_v49 = vrot.slane %v948_v36, %v951_v20 }
 0x20d   : > { %v953_v46 = vmul.f32 %v952_v49, %v937_v33  ;;  %v954_v48 = vmul.f32 %v952_v49, %v938_v34  ;;  %v956_v50 = vmul.f32 %v952_v49, %v940_v41  ;;  %v957_v52 = vmul.f32 %v952_v49, %v941_v38 }
 0x20e   : > { %v958_v54 = vmul.f32 %v952_v49, %v942_v39  ;;  %v959_v55 = vmul.f32 %v952_v49, %v943_v18  ;;  %v960_v56 = vmul.f32 %v952_v49, %v944_v42  ;;  %v955_v57 = vmul.f32 %v952_v49, %v939_v43  ;;  %v1038_v49 = vld [vmem:[#allocation2 + $0x1] sm:$0xff] }
 0x20f   : > { %v968_v58 = vadd.f32 %v1813_v22, %v953_v46  ;;  %v969_v59 = vadd.f32 %v1813_v22, %v954_v48  ;;  %v971_v61 = vadd.f32 %v1813_v22, %v956_v50  ;;  %v972_v62 = vadd.f32 %v1813_v22, %v957_v52  ;;  %v1046_v52 = vld [vmem:[#allocation2 + $0x2] sm:$0xff] }
 0x210   : > { %v973_v53 = vadd.f32 %v1813_v22, %v958_v54  ;;  %v974_v60 = vadd.f32 %v1813_v22, %v959_v55  ;;  %v975_v63 = vadd.f32 %v1813_v22, %v960_v56  ;;  %v970_v0 = vadd.f32 %v1813_v22, %v955_v57 }
 0x211   : > { %vm977_vm10 = vcmp.ge.f32.partialorder %v969_v59, 0.0  ;;  %v985_v1 = vmul.f32 0.01, %v969_v59  ;;  %vm976_vm11 = vcmp.ge.f32.partialorder %v968_v58, 0.0  ;;  %v984_v2 = vmul.f32 0.01, %v968_v58 }
 0x212   : > { %vm982_vm12 = vcmp.ge.f32.partialorder %v974_v60, 0.0  ;;  %v990_v3 = vmul.f32 0.01, %v974_v60  ;;  %vm978_vm13 = vcmp.ge.f32.partialorder %v970_v0, 0.0  ;;  %v986_v28 = vmul.f32 0.01, %v970_v0 }
 0x213   : > { %v993_v4 = vsel %vm977_vm10, %v969_v59, %v985_v1  ;;  %v992_v5 = vsel %vm976_vm11, %v968_v58, %v984_v2  ;;  %vm979_vm14 = vcmp.ge.f32.partialorder %v971_v61, 0.0  ;;  %v987_v6 = vmul.f32 0.01, %v971_v61 }
 0x214   : > { %v998_v8 = vsel %vm982_vm12, %v974_v60, %v990_v3  ;;  %1023 = vst.msk [vmem:[#allocation2 + $0x21] sm:$0xff] %vm673_vm1, %v993_v4  ;;  %v994_v11 = vsel %vm978_vm13, %v970_v0, %v986_v28  ;;  %1022 = vst.msk [vmem:[#allocation2 + $0x11] sm:$0xff] %vm673_vm1, %v992_v5  ;;  %vm980_vm15 = vcmp.ge.f32.partialorder %v972_v62, 0.0  ;;  %v988_v12 = vmul.f32 0.01, %v972_v62 }
 0x215   : > { %1028 = vst.msk [vmem:[#allocation2 + $0x71] sm:$0xff] %vm673_vm1, %v998_v8  ;;  %1024 = vst.msk [vmem:[#allocation2 + $0x31] sm:$0xff] %vm673_vm1, %v994_v11  ;;  %v995_v37 = vsel %vm979_vm14, %v971_v61, %v987_v6  ;;  %vm981_vm0 = vcmp.ge.f32.partialorder %v973_v53, 0.0  ;;  %v989_v10 = vmul.f32 0.01, %v973_v53  ;;  %vm983_vm2 = vcmp.ge.f32.partialorder %v975_v63, 0.0 }
 0x216   : > { %1025 = vst.msk [vmem:[#allocation2 + $0x41] sm:$0xff] %vm673_vm1, %v995_v37  ;;  %v996_v14 = vsel %vm980_vm15, %v972_v62, %v988_v12  ;;  %v991_v16 = vmul.f32 0.01, %v975_v63  ;;  %v1915_v41 = vpack.c.bf16 %v1401_v27, %v1400_v26 }
 0x217   : > { %1026 = vst.msk [vmem:[#allocation2 + $0x51] sm:$0xff] %vm673_vm1, %v996_v14  ;;  %v997_v19 = vsel %vm981_vm0, %v973_v53, %v989_v10 }
 0x218   : > { %1027 = vst.msk [vmem:[#allocation2 + $0x61] sm:$0xff] %vm673_vm1, %v997_v19  ;;  %v999_v21 = vsel %vm983_vm2, %v975_v63, %v991_v16  ;;  %1936 = vmatpush1.bf16.msra.mxu1 %v1915_v41  ;;  %1916 = vmatpush1.bf16.msra.mxu0 %v1915_v41  ;;  %v1086_v16 = vld [vmem:[#allocation2 + $0x90] sm:$0xff] }
 0x219   : > { %1029 = vst.msk [vmem:[#allocation2 + $0x81] sm:$0xff] %vm673_vm1, %v999_v21  ;;  %1928 = vmatprep.subr.bf16.mxu1 %v2194_v51  ;;  %1917 = vmatprep.subr.bf16.mxu0 %v2194_v51  ;;  %v1094_v19 = vld [vmem:[#allocation2 + $0x91] sm:$0xff] }
 0x21b   : > { %v1095_v29 = vld [vmem:[#allocation2 + $0x22] sm:$0xff]  ;;  %v2736_v30 = vld [vmem:[#allocation2 + $0x12] sm:$0xff] }
 0x21c   : > { %v1039_v31 = vld [vmem:[#allocation2 + $0x11] sm:$0xff]  ;;  %1815 = vmatprep.mubr.msk.f32.mxu0 %vm673_vm1, %v1095_v29  ;;  %v1997_v33 = vpack.i.bf16 %v1095_v29, %v2736_v30  ;;  %v2740_v34 = vld [vmem:[#allocation2 + $0x21] sm:$0xff]  ;;  %1937 = vmatpush1.bf16.msra.mxu1 %v1918_v35 }
 0x21d   : > { %v1096_v32 = vld [vmem:[#allocation2 + $0x32] sm:$0xff]  ;;  %v1992_v38 = vpack.i.bf16 %v2740_v34, %v1039_v31  ;;  %v2745_v18 = vld [vmem:[#allocation2 + $0x20] sm:$0xff]  ;;  %1919 = vmatpush1.bf16.msra.mxu0 %v1918_v35 }
 0x21e   : > { %1816 = vmatprep.mubr.msk.f32.mxu1 %vm673_vm1, %v1096_v32  ;;  %v1064_v39 = vld [vmem:[#allocation2 + $0x31] sm:$0xff]  ;;  %1998 = vrot.lane.b32.xlu1 %v1997_v33, %s2188_s29  ;;  %v2754_v44 = vld [vmem:[#allocation2 + $0x40] sm:$0xff]  ;;  %v2012_v36 = vpack.i.bf16 %v1096_v32, %v1095_v29  ;;  %v2032_v55 = vpack.i.bf16 %v1046_v52, %v1096_v32 }
 0x21f   : > { %v2747_v40 = vld [vmem:[#allocation2 + $0x30] sm:$0xff]  ;;  %1993 = vrot.lane.b32.xlu0 %v1992_v38, %s2185_s26  ;;  %v2007_v42 = vpack.i.bf16 %v1064_v39, %v2740_v34  ;;  %v1089_v22 = vld [vmem:[#allocation2 + $0x41] sm:$0xff]  ;;  %v2027_v46 = vpack.i.bf16 %v1038_v49, %v1064_v39 }
 0x220   : > { %v2002_v43 = vpack.i.bf16 %v2747_v40, %v2745_v18  ;;  %v2017_v7 = vpack.i.bf16 %v2754_v44, %v2747_v40  ;;  %v2022_v48 = vpack.i.bf16 %v1089_v22, %v1064_v39  ;;  %v2771_v50 = vld [vmem:[#allocation2 + $0x10] sm:$0xff]  ;;  %v2042_v57 = vpack.i.bf16 %v1039_v31, %v1089_v22  ;;  %v2779_v58 = vld [vmem:[#allocation2 + $0x42] sm:$0xff] }
 0x221   : > { %v2037_v54 = vpack.i.bf16 %v2771_v50, %v2754_v44  ;;  %v1043_v56 = vld [vmem:[#allocation2 + $0x51] sm:$0xff]  ;;  %v2052_v62 = vpack.i.bf16 %v2736_v30, %v2779_v58  ;;  %v2791_v60 = vld [vmem:[#allocation2 + $0x60] sm:$0xff] }
 0x222   : > { %2008 = vrot.lane.b32.xlu1 %v2007_v42, %s2192_s16  ;;  %v2047_v51 = vpack.i.bf16 %v1043_v56, %v1089_v22  ;;  %v2781_v59 = vld [vmem:[#allocation2 + $0x52] sm:$0xff]  ;;  %v1067_v1 = vld [vmem:[#allocation2 + $0x61] sm:$0xff]  ;;  %v2072_v3 = vpack.i.bf16 %v2740_v34, %v1043_v56 }
 0x223   : > { %2003 = vrot.lane.b32.xlu0 %v2002_v43, %s2190_s21  ;;  %v2057_v61 = vpack.i.bf16 %v2781_v59, %v2779_v58  ;;  %v2789_v53 = vld [vmem:[#allocation2 + $0x50] sm:$0xff]  ;;  %v2077_v2 = vpack.i.bf16 %v1067_v1, %v1043_v56  ;;  %v2805_v4 = vld [vmem:[#allocation2 + $0x62] sm:$0xff] }
 0x224   : > { %v2067_v63 = vpack.i.bf16 %v2791_v60, %v2789_v53  ;;  %v2062_v0 = vpack.i.bf16 %v2745_v18, %v2789_v53  ;;  %v2802_v28 = vld [vmem:[#allocation2 + $0x70] sm:$0xff]  ;;  %v2082_v6 = vpack.i.bf16 %v2805_v4, %v2781_v59  ;;  %v1061_v12 = vld [vmem:[#allocation2 + $0x80] sm:$0xff] }
 0x225   : > { %v2087_v5 = vpack.i.bf16 %v2802_v28, %v2791_v60  ;;  %v1045_v8 = vld [vmem:[#allocation2 + $0x71] sm:$0xff]  ;;  %v2107_v15 = vpack.i.bf16 %v1061_v12, %v2802_v28  ;;  %v1069_v10 = vld [vmem:[#allocation2 + $0x81] sm:$0xff] }
 0x226   : > { %2018 = vrot.lane.b32.xlu1 %v2017_v7, %s2195_s17  ;;  %v2097_v11 = vpack.i.bf16 %v1045_v8, %v1067_v1  ;;  %v2815_v13 = vld [vmem:[#allocation2 + $0x72] sm:$0xff]  ;;  %v2112_v14 = vpack.i.bf16 %v1069_v10, %v1045_v8  ;;  %v2828_v17 = vld [vmem:[#allocation2 + $0x82] sm:$0xff] }
 0x227   : > { %2013 = vrot.lane.b32.xlu0 %v2012_v36, %s2196_s28  ;;  %v2102_v37 = vpack.i.bf16 %v2815_v13, %v2805_v4 }
 0x22a   : > { %2028 = vrot.lane.b32.xlu1 %v2027_v46, %s2185_s26 }
 0x22b   : > { %2023 = vrot.lane.b32.xlu0 %v2022_v48, %s2197_s14 }
 0x22e   : > { %2038 = vrot.lane.b32.xlu1 %v2037_v54, %s2190_s21 }
 0x22f   : > { %2033 = vrot.lane.b32.xlu0 %v2032_v55, %s2188_s29 }
 0x232   : > { %2048 = vrot.lane.b32.xlu1 %v2047_v51, %s2185_s26 }
 0x233   : > { %2043 = vrot.lane.b32.xlu0 %v2042_v57, %s2192_s16 }
 0x236   : > { %2058 = vrot.lane.b32.xlu1 %v2057_v61, %s2188_s29 }
 0x237   : > { %2053 = vrot.lane.b32.xlu0 %v2052_v62, %s2196_s28 }
 0x23a   : > { %2068 = vrot.lane.b32.xlu1 %v2067_v63, %s2190_s21 }
 0x23b   : > { %2063 = vrot.lane.b32.xlu0 %v2062_v0, %s2195_s17 }
 0x23e   : > { %2078 = vrot.lane.b32.xlu1 %v2077_v2, %s2192_s16 }
 0x23f   : > { %2073 = vrot.lane.b32.xlu0 %v2072_v3, %s2197_s14 }
 0x242   : > { %2088 = vrot.lane.b32.xlu1 %v2087_v5, %s2195_s17  ;;  %v1030_v5 = vld [vmem:[#allocation2] sm:$0xff] }
 0x243   : > { %2083 = vrot.lane.b32.xlu0 %v2082_v6, %s2196_s28 }
 0x246   : > { %2098 = vrot.lane.b32.xlu1 %v2097_v11, %s2185_s26 }
 0x247   : > { %2093 = vrot.lane.b32.xlu0 %v2097_v11, %s2197_s14 }
 0x24a   : > { %2108 = vrot.lane.b32.xlu1 %v2107_v15, %s2190_s21 }
 0x24b   : > { %2103 = vrot.lane.b32.xlu0 %v2102_v37, %s2188_s29  ;;  %s2980_s29 = scalar_lea.hbm %s3051_s9, %s1829_s22 }
 0x24e   : > { %1251 = vrot.lane.b32.xlu1 %v2815_v13, %s2196_s28 }
 0x24f   : > { %2113 = vrot.lane.b32.xlu0 %v2112_v14, %s2192_s16  ;;  %s2198_s16 = smov [#allocation3]  }
 0x252   : > { %1315 = vrot.lane.b32.xlu1 %v1069_v10, %s2197_s14 }
 0x253   : > { %1283 = vrot.lane.b32.xlu0 %v1061_v12, %s2195_s17 }
 0x256   : > { %1285 = vrot.lane.b32.xlu1 %v1086_v16, %s2195_s17  ;;  %s325_s17 = scalar_lea.vmem [#allocation3], %s1746_s27  ;;  %s2125_s27 = sshll.u32 %s2198_s16, 4  ;;  %s2126_s27 = int_to_ptr.vmem [resolvable:$false] %s2125_s27 }
 0x257   : > { %1253 = vrot.lane.b32.xlu0 %v2828_v17, %s2196_s28  ;;  %s1680_s28 = sshll.u32 %s325_s17, 4  ;;  %s2127_s24 = scalar_lea.vmem %s2126_s27, 2048  ;;  %s2988_s28 = int_to_ptr.vmem [resolvable:$true] %s1680_s28 }
 0x258   : > { %s2121_s21 = scalar_lea.vmem %s2988_s28, 1024  ;;  %p2128_p0 = scmp.lt.s32.totalorder %s2988_s28, %s2126_s27 }
 0x259   : > { %p2122_p11 = scmp.ne.s32.totalorder %s2988_s28, %s2121_s21  ;;  %p2129_p1 = scmp.lt.s32.totalorder %s2127_s24, %s2121_s21 }
 0x25b   : > { %1317 = vrot.lane.b32.xlu0 %v1094_v19, %s2197_s14  ;;  %p2123_p12 = pnand %p2122_p11, %p2288_p5  ;;  %p2130_p2 = por %p2129_p1, %p2128_p0 }
 0x25d   : > { %p2124_p13 = pneg %p2123_p12 }
 0x25f   : > { %p2131_p3 = pnand %p2130_p2, %p2124_p13 }
 0x290   : > { %v1999_v21 = vpop.permute.xlu1 %1998 }
 0x291   : > { %v1994_v23 = vpop.permute.xlu0 %1993  ;;  %v2000_v25 = vunpack.i.l.bf16 %v1999_v21  ;;  %v2001_v32 = vunpack.i.h.bf16 %v1999_v21 }
 0x292   : > { %v1995_v24 = vunpack.i.l.bf16 %v1994_v23  ;;  %v1996_v26 = vunpack.i.h.bf16 %v1994_v23 }
 0x294   : > { %v1328_v27 = vsel %vm673_vm1, %v2771_v50, %v1995_v24  ;;  %v2009_v29 = vpop.permute.xlu1 %2008  ;;  %v1329_v41 = vsel %vm673_vm1, %v2745_v18, %v1996_v26 }
 0x295   : > { %v2004_v30 = vpop.permute.xlu0 %2003  ;;  %v2010_v33 = vunpack.i.l.bf16 %v2009_v29  ;;  %v1336_v34 = vsel %vm691_vm3, %v1328_v27, %v2000_v25  ;;  %v2011_v47 = vunpack.i.h.bf16 %v2009_v29  ;;  %v1337_v7 = vsel %vm691_vm3, %v1329_v41, %v2001_v32 }
 0x296   : > { %v2005_v31 = vunpack.i.l.bf16 %v2004_v30  ;;  %v2006_v38 = vunpack.i.h.bf16 %v2004_v30 }
 0x298   : > { %v1344_v39 = vsel %vm709_vm5, %v1336_v34, %v2005_v31  ;;  %v2019_v42 = vpop.permute.xlu1 %2018  ;;  %v1345_v49 = vsel %vm709_vm5, %v1337_v7, %v2006_v38 }
 0x299   : > { %v2014_v43 = vpop.permute.xlu0 %2013  ;;  %v2020_v35 = vunpack.i.l.bf16 %v2019_v42  ;;  %v1352_v36 = vsel %vm727_vm7, %v1344_v39, %v2010_v33  ;;  %v2021_v52 = vunpack.i.h.bf16 %v2019_v42  ;;  %v1353_v55 = vsel %vm727_vm7, %v1345_v49, %v2011_v47 }
 0x29a   : > { %v2015_v45 = vunpack.i.l.bf16 %v2014_v43  ;;  %v2016_v22 = vunpack.i.h.bf16 %v2014_v43 }
 0x29c   : > { %v2029_v46 = vpop.permute.xlu1 %2028  ;;  %v1361_v48 = vsel %vm1359_vm4, %v1352_v36, %v2015_v45  ;;  %v1362_v61 = vsel %vm1359_vm4, %v1353_v55, %v2016_v22 }
 0x29d   : > { %v2024_v18 = vpop.permute.xlu0 %2023  ;;  %v1370_v54 = vsel %vm1368_vm6, %v1361_v48, %v2020_v35  ;;  %v1371_v63 = vsel %vm1368_vm6, %v1362_v61, %v2021_v52  ;;  %v2031_v3 = vunpack.i.h.bf16 %v2029_v46  ;;  %v2030_v6 = vunpack.i.l.bf16 %v2029_v46 }
 0x29e   : > { %v2025_v50 = vunpack.i.l.bf16 %v2024_v18  ;;  %v2026_v56 = vunpack.i.h.bf16 %v2024_v18 }
 0x29f   : > { %v1327_v37 = vsel %vm673_vm1, %v1030_v5, %v2031_v3  ;;  %v1330_v10 = vsel %vm673_vm1, %v2747_v40, %v2030_v6 }
 0x2a0   : > { %v2039_v51 = vpop.permute.xlu1 %2038  ;;  %v1379_v57 = vsel %vm1377_vm8, %v1370_v54, %v2025_v50  ;;  %v1380_v1 = vsel %vm1377_vm8, %v1371_v63, %v2026_v56 }
 0x2a1   : > { %v2034_v62 = vpop.permute.xlu0 %2033  ;;  %1505 = vmatmul.mubr.f32.vlgmr.msra.gmra.mrb[0].mxu1 %v1379_v57  ;;  %v2040_v14 = vunpack.i.l.bf16 %v2039_v51 }
 0x2a2   : > { %1817 = vmatprep.mubr.msk.f32.mxu1 %vm673_vm1, %v2779_v58  ;;  %v2036_v8 = vunpack.i.h.bf16 %v2034_v62  ;;  %v2035_v12 = vunpack.i.l.bf16 %v2034_v62  ;;  %v2041_v58 = vunpack.i.h.bf16 %v2039_v51 }
 0x2a4   : > { %v2049_v0 = vpop.permute.xlu1 %2048  ;;  %v1335_v16 = vsel %vm691_vm3, %v1327_v37, %v2036_v8 }
 0x2a5   : > { %v2044_v2 = vpop.permute.xlu0 %2043  ;;  %1510 = vmatmul.mubr.f32.gmra.mrb[2].mxu1 %v1380_v1  ;;  %v1343_v27 = vsel %vm709_vm5, %v1335_v16, %v2041_v58  ;;  %v2050_v31 = vunpack.i.l.bf16 %v2049_v0  ;;  %v2051_v49 = vunpack.i.h.bf16 %v2049_v0 }
 0x2a6   : > { %1818 = vmatprep.mubr.msk.f32.mxu1 %vm673_vm1, %v2781_v59  ;;  %v2046_v19 = vunpack.i.h.bf16 %v2044_v2  ;;  %v1338_v59 = vsel %vm691_vm3, %v1330_v10, %v2035_v12  ;;  %v2045_v23 = vunpack.i.l.bf16 %v2044_v2 }
 0x2a7   : > { %v1346_v32 = vsel %vm709_vm5, %v1338_v59, %v2040_v14  ;;  %v1331_v22 = vsel %vm673_vm1, %v2754_v44, %v2050_v31  ;;  %v1332_v62 = vsel %vm673_vm1, %v2789_v53, %v2051_v49 }
 0x2a8   : > { %v2059_v11 = vpop.permute.xlu1 %2058  ;;  %v1351_v40 = vsel %vm727_vm7, %v1343_v27, %v2046_v19  ;;  %v1354_v34 = vsel %vm727_vm7, %v1346_v32, %v2045_v23 }
 0x2a9   : > { %v2054_v15 = vpop.permute.xlu0 %2053  ;;  %v2060_v41 = vunpack.i.l.bf16 %v2059_v11  ;;  %v2061_v50 = vunpack.i.h.bf16 %v2059_v11 }
 0x2aa   : > { %v2056_v24 = vunpack.i.h.bf16 %v2054_v15  ;;  %v2055_v26 = vunpack.i.l.bf16 %v2054_v15 }
 0x2ab   : > { %v1339_v52 = vsel %vm691_vm3, %v1331_v22, %v2060_v41  ;;  %v1340_v2 = vsel %vm691_vm3, %v1332_v62, %v2061_v50 }
 0x2ac   : > { %v2069_v21 = vpop.permute.xlu1 %2068  ;;  %v1360_v38 = vsel %vm1359_vm4, %v1351_v40, %v2056_v24  ;;  %v1363_v47 = vsel %vm1359_vm4, %v1354_v34, %v2055_v26 }
 0x2ad   : > { %v2064_v25 = vpop.permute.xlu0 %2063  ;;  %v2070_v42 = vunpack.i.l.bf16 %v2069_v21  ;;  %v2071_v55 = vunpack.i.h.bf16 %v2069_v21 }
 0x2ae   : > { %v2066_v29 = vunpack.i.h.bf16 %v2064_v25  ;;  %v2065_v30 = vunpack.i.l.bf16 %v2064_v25 }
 0x2af   : > { %v1347_v56 = vsel %vm709_vm5, %v1339_v52, %v2070_v42  ;;  %v1348_v5 = vsel %vm709_vm5, %v1340_v2, %v2071_v55 }
 0x2b0   : > { %v2079_v33 = vpop.permute.xlu1 %2078  ;;  %v1369_v7 = vsel %vm1368_vm6, %v1360_v38, %v2066_v29  ;;  %v1372_v36 = vsel %vm1368_vm6, %v1363_v47, %v2065_v30 }
 0x2b1   : > { %v2074_v39 = vpop.permute.xlu0 %2073  ;;  %v2080_v35 = vunpack.i.l.bf16 %v2079_v33  ;;  %v2081_v57 = vunpack.i.h.bf16 %v2079_v33 }
 0x2b2   : > { %v2076_v43 = vunpack.i.h.bf16 %v2074_v39  ;;  %v2075_v45 = vunpack.i.l.bf16 %v2074_v39  ;;  %v1102_v39 = vld [vmem:[#allocation2 + $0x92] sm:$0xff] }
 0x2b3   : > { %v1355_v44 = vsel %vm727_vm7, %v1347_v56, %v2080_v35  ;;  %v1356_v8 = vsel %vm727_vm7, %v1348_v5, %v2081_v57 }
 0x2b4   : > { %v2089_v46 = vpop.permute.xlu1 %2088  ;;  %v1378_v48 = vsel %vm1377_vm8, %v1369_v7, %v2076_v43  ;;  %v1381_v18 = vsel %vm1377_vm8, %v1372_v36, %v2075_v45 }
 0x2b5   : > { %v2084_v54 = vpop.permute.xlu0 %2083  ;;  %1500 = vmatmul.mubr.f32.vlgmr.msra.gmra.mrb[8].mxu0 %v1378_v48  ;;  %1515 = vmatmul.mubr.f32.gmra.mrb[4].mxu1 %v1381_v18  ;;  %v2090_v61 = vunpack.i.l.bf16 %v2089_v46  ;;  %v1814_v18 = vld [vmem:[%s3048_s6] ss:$0 sm:$0xff] }
 0x2b6   : > { %v2085_v51 = vunpack.i.l.bf16 %v2084_v54  ;;  %1819 = vmatprep.mubr.msk.f32.mxu1 %vm673_vm1, %v2805_v4  ;;  %v2086_v63 = vunpack.i.h.bf16 %v2084_v54  ;;  %v2091_v4 = vunpack.i.h.bf16 %v2089_v46 }
 0x2b8   : > { %v2099_v0 = vpop.permute.xlu1 %2098  ;;  %v1364_v1 = vsel %vm1359_vm4, %v1355_v44, %v2085_v51  ;;  %v1365_v58 = vsel %vm1359_vm4, %v1356_v8, %v2086_v63 }
 0x2b9   : > { %v2094_v3 = vpop.permute.xlu0 %2093  ;;  %v2100_v11 = vunpack.i.l.bf16 %v2099_v0  ;;  %v1373_v12 = vsel %vm1368_vm6, %v1364_v1, %v2090_v61  ;;  %v1374_v21 = vsel %vm1368_vm6, %v1365_v58, %v2091_v4  ;;  %v2101_v59 = vunpack.i.h.bf16 %v2099_v0 }
 0x2ba   : > { %v2095_v6 = vunpack.i.l.bf16 %v2094_v3  ;;  %v2096_v15 = vunpack.i.h.bf16 %v2094_v3 }
 0x2bb   : > { %v1333_v16 = vsel %vm673_vm1, %v2791_v60, %v2100_v11  ;;  %v1334_v60 = vsel %vm673_vm1, %v2802_v28, %v2101_v59 }
 0x2bc   : > { %v2109_v37 = vpop.permute.xlu1 %2108  ;;  %v1382_v53 = vsel %vm1377_vm8, %v1373_v12, %v2095_v6  ;;  %v1383_v25 = vsel %vm1377_vm8, %v1374_v21, %v2096_v15 }
 0x2bd   : > { %v2104_v10 = vpop.permute.xlu0 %2103  ;;  %1520 = vmatmul.mubr.f32.gmra.mrb[6].mxu1 %v1382_v53  ;;  %v2110_v19 = vunpack.i.l.bf16 %v2109_v37  ;;  %v2111_v30 = vunpack.i.h.bf16 %v2109_v37 }
 0x2be   : > { %v2105_v14 = vunpack.i.l.bf16 %v2104_v10  ;;  %1820 = vmatprep.mubr.msk.f32.mxu1 %vm673_vm1, %v2815_v13  ;;  %v2106_v26 = vunpack.i.h.bf16 %v2104_v10 }
 0x2c0   : > { %v1341_v23 = vsel %vm691_vm3, %v1333_v16, %v2105_v14  ;;  %v1252_v24 = vpop.permute.xlu1 %1251  ;;  %v1342_v40 = vsel %vm691_vm3, %v1334_v60, %v2106_v26 }
 0x2c1   : > { %v2114_v27 = vpop.permute.xlu0 %2113  ;;  %1525 = vmatmul.mubr.f32.gmra.mrb[8].mxu1 %v1383_v25  ;;  %v1349_v13 = vsel %vm709_vm5, %v1341_v23, %v2110_v19  ;;  %v1350_v42 = vsel %vm709_vm5, %v1342_v40, %v2111_v30 }
 0x2c2   : > { %v2115_v29 = vunpack.i.l.bf16 %v2114_v27  ;;  %1821 = vmatprep.mubr.msk.f32.mxu1 %vm673_vm1, %v2828_v17  ;;  %v2116_v33 = vunpack.i.h.bf16 %v2114_v27 }
 0x2c4   : > { %v1316_v31 = vpop.permute.xlu1 %1315  ;;  %v1357_v32 = vsel %vm727_vm7, %v1349_v13, %v2115_v29  ;;  %v1358_v28 = vsel %vm727_vm7, %v1350_v42, %v2116_v33 }
 0x2c5   : > { %v1284_v34 = vpop.permute.xlu0 %1283  ;;  %v1366_v41 = vsel %vm1359_vm4, %v1357_v32, %v1252_v24 }
 0x2c6   : > { %v1375_v38 = vsel %vm1368_vm6, %v1366_v41, %v1284_v34 }
 0x2c7   : > { %v1384_v17 = vsel %vm1377_vm8, %v1375_v38, %v1316_v31 }
 0x2c8   : > { %1530 = vmatmul.mubr.f32.gmra.mrb[10].mxu1 %v1384_v17  ;;  %v1286_v47 = vpop.permute.xlu1 %1285 }
 0x2c9   : > { %v1254_v43 = vpop.permute.xlu0 %1253  ;;  %1822 = vmatprep.mubr.msk.f32.mxu1 %vm673_vm1, %v1102_v39 }
 0x2ca   : > { %v1367_v45 = vsel %vm1359_vm4, %v1358_v28, %v1254_v43 }
 0x2cb   : > { %v1376_v7 = vsel %vm1368_vm6, %v1367_v45, %v1286_v47 }
 0x2cd   : > { %v1318_v35 = vpop.permute.xlu0 %1317 }
 0x2ce   : > { %v1385_v36 = vsel %vm1377_vm8, %v1376_v7, %v1318_v35 }
 0x2cf   : > { %1535 = vmatmul.mubr.f32.gmra.mrb[12].mxu1 %v1385_v36 }
 0x374   : > { %v1506_v49 = vpop.f32.mrb[0].mxu1 }
 0x375   : > { %v1508_v22 = vpop.f32.mrb[1].mxu1  ;;  %v2911_v50 = vadd.f32 %v1814_v18, %v1506_v49 }
 0x377   : > { %v1563_v56 = vmul.f32 %v2911_v50, %v2911_v50  ;;  %v1541_v62 = vsel %vm673_vm1, %v2911_v50, 0.0 }
 0x378   : > { %v1511_v46 = vpop.f32.mrb[2].mxu1 }
 0x379   : > { %v1513_v48 = vpop.f32.mrb[3].mxu1  ;;  %v2913_v52 = vadd.f32 %v1814_v18, %v1511_v46  ;;  %v1571_v3 = vsel %vm673_vm1, %v1563_v56, 0.0 }
 0x37b   : > { %v1564_v63 = vmul.f32 %v2913_v52, %v2913_v52  ;;  %v1543_v5 = vsel %vm673_vm1, %v2913_v52, 0.0 }
 0x37d   : > { %v1573_v12 = vsel %vm673_vm1, %v1564_v63, 0.0 }
 0x388   : > { %v1501_v54 = vpop.f32.mrb[8].mxu0  ;;  %v1516_v55 = vpop.f32.mrb[4].mxu1 }
 0x389   : > { %v2917_v51 = vadd.f32 %v1814_v18, %v1501_v54  ;;  %v2919_v57 = vadd.f32 %v1814_v18, %v1516_v55  ;;  %v1503_v44 = vpop.f32.mrb[9].mxu0  ;;  %v1518_v61 = vpop.f32.mrb[5].mxu1 }
 0x38b   : > { %v1540_v0 = vsel %vm673_vm1, %v2917_v51, 0.0  ;;  %v1562_v1 = vmul.f32 %v2917_v51, %v2917_v51  ;;  %v1565_v8 = vmul.f32 %v2919_v57, %v2919_v57  ;;  %v1545_v15 = vsel %vm673_vm1, %v2919_v57, 0.0 }
 0x38c   : > { %v1542_v2 = vadd.f32 %v1541_v62, %v1540_v0 }
 0x38d   : > { %v1570_v6 = vsel %vm673_vm1, %v1562_v1, 0.0  ;;  %v1575_v10 = vsel %vm673_vm1, %v1565_v8, 0.0 }
 0x38e   : > { %v1572_v4 = vadd.f32 %v1571_v3, %v1570_v6  ;;  %v1544_v11 = vadd.f32 %v1543_v5, %v1542_v2 }
 0x390   : > { %v1546_v37 = vadd.f32 %v1545_v15, %v1544_v11  ;;  %v1574_v53 = vadd.f32 %v1573_v12, %v1572_v4  ;;  %v1521_v58 = vpop.f32.mrb[6].mxu1 }
 0x391   : > { %v2939_v14 = vadd.f32 %v1814_v18, %v1521_v58  ;;  %v1523_v16 = vpop.f32.mrb[7].mxu1 }
 0x392   : > { %v1576_v19 = vadd.f32 %v1575_v10, %v1574_v53 }
 0x393   : > { %v1547_v21 = vsel %vm673_vm1, %v2939_v14, 0.0  ;;  %v1566_v59 = vmul.f32 %v2939_v14, %v2939_v14 }
 0x394   : > { %v1548_v23 = vadd.f32 %v1547_v21, %v1546_v37  ;;  %v1526_v24 = vpop.f32.mrb[8].mxu1 }
 0x395   : > { %v1577_v25 = vsel %vm673_vm1, %v1566_v59, 0.0  ;;  %v2946_v26 = vadd.f32 %v1814_v18, %v1526_v24  ;;  %v1528_v27 = vpop.f32.mrb[9].mxu1 }
 0x396   : > { %v1578_v29 = vadd.f32 %v1577_v25, %v1576_v19 }
 0x397   : > { %v1549_v13 = vsel %vm673_vm1, %v2946_v26, 0.0  ;;  %v1567_v60 = vmul.f32 %v2946_v26, %v2946_v26 }
 0x398   : > { %v1550_v30 = vadd.f32 %v1549_v13, %v1548_v23 }
 0x399   : > { %v1579_v31 = vsel %vm673_vm1, %v1567_v60, 0.0 }
 0x39a   : > { %v1580_v32 = vadd.f32 %v1579_v31, %v1578_v29 }
 0x39b   : > { %v1531_v40 = vpop.f32.mrb[10].mxu1 }
 0x39c   : > { %v1532_v33 = vadd.f32 %v1814_v18, %v1531_v40  ;;  %v1533_v34 = vpop.f32.mrb[11].mxu1 }
 0x39e   : > { %v1551_v41 = vsel %vm673_vm1, %v1532_v33, 0.0  ;;  %v1568_v38 = vmul.f32 %v1532_v33, %v1532_v33 }
 0x39f   : > { %v1552_v39 = vadd.f32 %v1551_v41, %v1550_v30 }
 0x3a0   : > { %v1581_v17 = vsel %vm673_vm1, %v1568_v38, 0.0 }
 0x3a1   : > { %v1582_v42 = vadd.f32 %v1581_v17, %v1580_v32 }
 0x3a2   : > { %v1536_v43 = vpop.f32.mrb[12].mxu1 }
 0x3a3   : > { %v1537_v28 = vadd.f32 %v1814_v18, %v1536_v43  ;;  %v1538_v45 = vpop.f32.mrb[13].mxu1 }
 0x3a5   : > { %v1553_v47 = vsel %vm673_vm1, %v1537_v28, 0.0  ;;  %v1569_v7 = vmul.f32 %v1537_v28, %v1537_v28 }
 0x3a6   : > { %v1554_v35 = vadd.f32 %v1553_v47, %v1552_v39 }
 0x3a7   : > { %v1583_v36 = vsel %vm673_vm1, %v1569_v7, 0.0 }
 0x3a8   : > { %v1555_v49 = vrot.slane %v1554_v35, 4  ;;  %v1584_v22 = vadd.f32 %v1583_v36, %v1582_v42 }
 0x3aa   : > { %v1556_v46 = vadd.f32 %v1555_v49, %v1554_v35  ;;  %v1585_v48 = vrot.slane %v1584_v22, 4 }
 0x3ac   : > { %v1557_v54 = vrot.slane %v1556_v46, 2  ;;  %v1586_v55 = vadd.f32 %v1585_v48, %v1584_v22 }
 0x3ae   : > { %v1558_v56 = vadd.f32 %v1557_v54, %v1556_v46  ;;  %v1587_v44 = vrot.slane %v1586_v55, 2 }
 0x3b0   : > { %v1559_v61 = vrot.slane %v1558_v56, 1  ;;  %v1588_v62 = vadd.f32 %v1587_v44, %v1586_v55 }
 0x3b2   : > { %v1560_v63 = vadd.f32 %v1559_v61, %v1558_v56  ;;  %v1589_v0 = vrot.slane %v1588_v62, 1 }
 0x3b4   : > { %v1561_v18 = vmul.f32 0.015625, %v1560_v63  ;;  %v1590_v1 = vadd.f32 %v1589_v0, %v1588_v62 }
 0x3b6   : > { %v1591_v2 = vmul.f32 0.015625, %v1590_v1  ;;  %v1592_v3 = vmul.f32 %v1561_v18, %v1561_v18  ;;  %v1595_v5 = vsub.f32 %v2917_v51, %v1561_v18  ;;  %v1596_v6 = vsub.f32 %v2911_v50, %v1561_v18  ;;  %v1605_v51 = vld [vmem:[%s3049_s7] sm:$0x1] }
 0x3b7   : > { %v1597_v8 = vsub.f32 %v2913_v52, %v1561_v18  ;;  %v1598_v4 = vsub.f32 %v2919_v57, %v1561_v18  ;;  %v1599_v11 = vsub.f32 %v2939_v14, %v1561_v18  ;;  %v1600_v12 = vsub.f32 %v2946_v26, %v1561_v18  ;;  %v1823_v57 = vld [vmem:[%s3050_s8] ss:$0 sm:$0xff] }
 0x3b8   : > { %v1593_v15 = vsub.f32 %v1591_v2, %v1592_v3  ;;  %v1601_v37 = vsub.f32 %v1532_v33, %v1561_v18  ;;  %v1602_v53 = vsub.f32 %v1537_v28, %v1561_v18 }
 0x3ba   : > { %v1594_v58 = vmax.f32 %v1593_v15, 0.0 }
 0x3bc   : > { %v1603_v10 = vadd.f32 1e-05, %v1594_v58 }
 0x3be   : > { %2119 = vrsqrt.f32 %v1603_v10 }
 0x3c8   : > { %v2120_v50 = vpop.eup %2119 }
 0x3c9   : > { %v1606_v16 = vmul.f32 %v2120_v50, %v1605_v51 }
 0x3cb   : > { %v1610_v52 = vrot.slane %v1606_v16, %v951_v20 }
 0x3cd   : > { %v1611_v14 = vmul.f32 %v1610_v52, %v1595_v5  ;;  %v1612_v19 = vmul.f32 %v1610_v52, %v1596_v6  ;;  %v1613_v21 = vmul.f32 %v1610_v52, %v1597_v8  ;;  %v1614_v59 = vmul.f32 %v1610_v52, %v1598_v4 }
 0x3ce   : > { %v1615_v23 = vmul.f32 %v1610_v52, %v1599_v11  ;;  %v1616_v24 = vmul.f32 %v1610_v52, %v1600_v12  ;;  %v1617_v25 = vmul.f32 %v1610_v52, %v1601_v37  ;;  %v1618_v26 = vmul.f32 %v1610_v52, %v1602_v53 }
 0x3cf   : > { %v1626_v27 = vadd.f32 %v1823_v57, %v1611_v14  ;;  %v1627_v29 = vadd.f32 %v1823_v57, %v1612_v19  ;;  %v1628_v13 = vadd.f32 %v1823_v57, %v1613_v21  ;;  %v1629_v9 = vadd.f32 %v1823_v57, %v1614_v59 }
 0x3d0   : > { %v1630_v20 = vadd.f32 %v1823_v57, %v1615_v23  ;;  %v1631_v60 = vadd.f32 %v1823_v57, %v1616_v24  ;;  %v1632_v30 = vadd.f32 %v1823_v57, %v1617_v25  ;;  %v1633_v31 = vadd.f32 %v1823_v57, %v1618_v26 }
 0x3d1   : > { %vm1634_vm3 = vcmp.ge.f32.partialorder %v1626_v27, 0.0  ;;  %vm1635_vm5 = vcmp.ge.f32.partialorder %v1627_v29, 0.0  ;;  %vm1636_vm7 = vcmp.ge.f32.partialorder %v1628_v13, 0.0  ;;  %vm1637_vm9 = vcmp.ge.f32.partialorder %v1629_v9, 0.0 }
 0x3d2   : > { %vm1638_vm10 = vcmp.ge.f32.partialorder %v1630_v20, 0.0  ;;  %vm1639_vm11 = vcmp.ge.f32.partialorder %v1631_v60, 0.0  ;;  %vm1640_vm12 = vcmp.ge.f32.partialorder %v1632_v30, 0.0  ;;  %vm1641_vm13 = vcmp.ge.f32.partialorder %v1633_v31, 0.0 }
 0x3d3   : > { %v1642_v32 = vmul.f32 0.01, %v1626_v27  ;;  %v1643_v40 = vmul.f32 0.01, %v1627_v29  ;;  %v1644_v33 = vmul.f32 0.01, %v1628_v13 }
 0x3d4   : > { %v1645_v34 = vmul.f32 0.01, %v1629_v9  ;;  %v1646_v41 = vmul.f32 0.01, %v1630_v20  ;;  %v1647_v38 = vmul.f32 0.01, %v1631_v60 }
 0x3d5   : > { %v1648_v39 = vmul.f32 0.01, %v1632_v30  ;;  %v1649_v17 = vmul.f32 0.01, %v1633_v31  ;;  %v1650_v42 = vsel %vm1634_vm3, %v1626_v27, %v1642_v32  ;;  %v1651_v43 = vsel %vm1635_vm5, %v1627_v29, %v1643_v40 }
 0x3d6   : > { %v1652_v28 = vsel %vm1636_vm7, %v1628_v13, %v1644_v33  ;;  %v1653_v45 = vsel %vm1637_vm9, %v1629_v9, %v1645_v34  ;;  %v1654_v47 = vsel %vm1638_vm10, %v1630_v20, %v1646_v41  ;;  %v1655_v7 = vsel %vm1639_vm11, %v1631_v60, %v1647_v38  ;;  %1658 = vst.msk [vmem:[%s325_s17] sm:$0xff] %vm673_vm1, %v1650_v42 }
 0x3d7   : > { %1659 = vst.msk [vmem:[%s325_s17 + $0x8] sm:$0xff] %vm673_vm1, %v1651_v43  ;;  %v1657_v35 = vsel %vm1641_vm13, %v1633_v31, %v1649_v17  ;;  %v1656_v36 = vsel %vm1640_vm12, %v1632_v30, %v1648_v39  ;;  %1660 = vst.msk [vmem:[%s325_s17 + $0x10] sm:$0xff] %vm673_vm1, %v1652_v28 }
 0x3d8   : > { %1661 = vst.msk [vmem:[%s325_s17 + $0x18] sm:$0xff] %vm673_vm1, %v1653_v45  ;;  %1662 = vst.msk [vmem:[%s325_s17 + $0x20] sm:$0xff] %vm673_vm1, %v1654_v47 }
 0x3d9   : > { %1663 = vst.msk [vmem:[%s325_s17 + $0x28] sm:$0xff] %vm673_vm1, %v1655_v7  ;;  %1665 = vst.msk [vmem:[%s325_s17 + $0x38] sm:$0xff] %vm673_vm1, %v1657_v35 }
 0x3da   : > { %1664 = vst.msk [vmem:[%s325_s17 + $0x30] sm:$0xff] %vm673_vm1, %v1656_v36 }
 0x3db   : > { %2134 = shalt.err (!%p2131_p3)
}
 0x3dc   : > { %s2135_s23 = scalar_lea.hbm %s2980_s29, 1024  ;;  %s2139_s17 = scalar_lea.hbm %s3051_s9, 2048 }
 0x3dd   : > { %p2136_p4 = scmp.ne.s32.totalorder %s2980_s29, %s2135_s23  ;;  %p2140_p9 = scmp.lt.u32.totalorder %s2980_s29, %s3051_s9 }
 0x3de   : > { %p2141_p10 = scmp.lt.u32.totalorder %s2139_s17, %s2135_s23  ;;  %p2143_p12 = scmp.lt.u32.totalorder %s2135_s23, %s2980_s29 }
 0x3df   : > { %p2137_p7 = pnand %p2136_p4, %p2288_p5 }
 0x3e0   : > { %p2142_p11 = por %p2141_p10, %p2140_p9 }
 0x3e1   : > { %p2138_p8 = pneg %p2137_p7 }
 0x3e2   : > { %p2144_p13 = por %p2143_p12, %p2142_p11 }
 0x3e4   : > { %p2145_p0 = pnand %p2144_p13, %p2138_p8 }
 0x3e6   : > { %2148 = shalt.err (!%p2145_p0)
}
 0x3e7   : > { %s2199_s21 = smov 128   ;;  %s3061_s16 = smov 8  }
 0x3e8   : > { %1939 = dma.vmem_to_hbm [thread:$0]  (%p2288_p5), %s2988_s28, 1024, %s2980_s29, %s3000_s13, %s2199_s21, %s2199_s21, %s3061_s16  }
 0x3e9 PF: > { %p1945_p1 = scmp.ge.s32.totalorder %s2183_s12, 2  ;;  %s1695_s27 = sand.u32 1, %s2171_s30  }
 0x3ea   : > { %s1696_s24 = scalar_lea.sflag [#allocation4], %s1695_s27 }
 0x3eb   : > { %p1942_p2 = pnand %p1945_p1, %p2292_p6 }
 0x3ed   : > { %2166 = dma.done.wait (!%p1942_p2), %s1696_s24, 1024  }
 0x3ee   : > { %2168 = vsyncadd (!%p1942_p2), %s1696_s24, 4294966272  ;;  %p19_p3 = scmp.ge.s32.totalorder %s2275_s15, 4   ;;  %s3062_s30 = smov %s2175_s10 }
 0x3ef   : > { %s3063_s10 = smov %s2179_s11  ;;  %s3064_s11 = smov %s2286_s18 }
 0x3f0   : > { %s3065_s12 = smov %s2275_s15  ;;  %21 = sbr.rel (!%p19_p3) target bundleno = 3 (0x3), region = 98 }
 0x3f7   :  { %1701 = vsyncpa [#allocation4], 1 }
 0x3f8   :  { %1703 = vsyncpa [#allocation4 + $0x1], 1 }

// kernel: _forward.2
= control target key start
LH: loop header
LB: loop body
LE: loop exit
PB: predicated region body
PF: predicated region fallthrough
CT: control target
= control target key end

     0   :  { %s5704_s30 = smov 0   ;;  %s9600_s0 = inlined_call_operand.vmem [shape: f32[2,1,18,18,4], index: 0, kind: input, shape index: {}]   ;;  %s9601_s1 = inlined_call_operand.vmem [shape: f32[36,8], index: 1, kind: input, shape index: {}]   ;;  %s9602_s2 = inlined_call_operand.vmem [shape: f32[1,8], index: 2, kind: input, shape index: {}]   ;;  %s9603_s3 = inlined_call_operand.vmem [shape: f32[1,8], index: 3, kind: input, shape index: {}]   ;;  %s9604_s4 = inlined_call_operand.vmem [shape: f32[1,8], index: 4, kind: input, shape index: {}]   ;;  %s9605_s5 = inlined_call_operand.vmem [shape: f32[72,8], index: 5, kind: input, shape index: {}]   ;;  %s9606_s6 = inlined_call_operand.vmem [shape: f32[1,8], index: 6, kind: input, shape index: {}]   ;;  %s9607_s7 = inlined_call_operand.vmem [shape: f32[1,8], index: 7, kind: input, shape index: {}]   ;;  %s9608_s8 = inlined_call_operand.vmem [shape: f32[1,8], index: 8, kind: input, shape index: {}]   ;;  %s9609_s9 = inlined_call_operand.vmem [shape: f32[2,256,8], index: 9, kind: output, shape index: {}]  }
   0x1 LB: > { %s5099_s10 = sadd.s32 4294967295, %s5639_s30   ;;  %p5103_p0 = scmp.ge.s32.totalorder %s5639_s30, 1  ;;  %s5639_s30 = sphi %s5704_s30, %s19_s30  }
   0x2   : > { %p287_p1 = scmp.lt.s32.totalorder %s5639_s30, 3 }
   0x4   : > { %p288_p2 = pnand %p5103_p0, %p287_p1 }
   0x6   : > { %291 = sbr.rel (%p288_p2) target bundleno = 1862 (0x746), region = 56 }
   0xd   : > { %p323_p3 = scmp.lt.s32.totalorder %s5099_s10, 1  ;;  %s5641_s15 = smov 4   ;;  %vm1647_vm0 = vcmask 31744   ;;  %vm2020_vm1 = vcmask 1043456   ;;  %vm1680_vm2 = vcmask 64512   ;;  %vm1713_vm3 = vcmask 97280  }
   0xe   : > { %s5642_s16 = smov 8   ;;  %s5643_s17 = smov 12   ;;  %vm9650_vm4 = vcmask 130048   ;;  %vm1779_vm5 = vcmask 162816   ;;  %vm9649_vm6 = vcmask 195584   ;;  %vm1845_vm7 = vcmask 228352  }
   0xf   : > { %s10009_s10 = smov (!%p323_p3, %s5099_s10), 1  ;;  %s5644_s18 = smov 16   ;;  %vm9648_vm8 = vcmask 261120   ;;  %vm1923_vm9 = vcmask 293888   ;;  %vm2633_vm10 = vcmask 58368  }
  0x10   : > { %s5607_s11 = smul.u32 432, %s10009_s10  ;;  %s5645_s27 = smov 20  }
  0x11   : > { %s5647_s12 = smov 28   ;;  %s5648_s13 = smov 32  }
  0x12   : > { %s5718_s14 = scalar_lea.vmem %s9600_s0, %s5607_s11  ;;  %s5646_s11 = smov 24  }
  0x13   : > { %v5721_v0 = vld [vmem:[%s5718_s14 + $0x19] sm:$0xff]  ;;  %v365_v1 = vld [vmem:[%s5718_s14 + $0x1] sm:$0xff]  ;;  %v366_v3 = vld [vmem:[%s5718_s14 + $0x9] sm:$0xff]  ;;  %s5652_s24 = smov 56  }
  0x14   : > { %659 = vrot.lane.b32.xlu1 %v5721_v0, %s5641_s15  ;;  %655 = vrot.lane.b32.xlu0 %v365_v1, %s5641_s15  ;;  %v5728_v2 = vld [vmem:[%s5718_s14 + $0x21] sm:$0xff]  ;;  %v5735_v4 = vld [vmem:[%s5718_s14 + $0x39] sm:$0xff] }
  0x15   : > { %v5738_v5 = vld [vmem:[%s5718_s14 + $0x31] sm:$0xff]  ;;  %v5748_v7 = vld [vmem:[%s5718_s14 + $0x49] sm:$0xff]  ;;  %v5758_v9 = vld [vmem:[%s5718_s14 + $0x61] sm:$0xff] }
  0x16   : > { %v5745_v6 = vld [vmem:[%s5718_s14 + $0x51] sm:$0xff]  ;;  %v5755_v8 = vld [vmem:[%s5718_s14 + $0x69] sm:$0xff]  ;;  %v5765_v10 = vld [vmem:[%s5718_s14 + $0x81] sm:$0xff] }
  0x17   : > { %v5768_v11 = vld [vmem:[%s5718_s14 + $0x79] sm:$0xff]  ;;  %v5778_v13 = vld [vmem:[%s5718_s14 + $0x91] sm:$0xff]  ;;  %v5788_v15 = vld [vmem:[%s5718_s14 + $0xa9] sm:$0xff] }
  0x18   : > { %661 = vrot.lane.b32.xlu1 %v5728_v2, %s5641_s15  ;;  %657 = vrot.lane.b32.xlu0 %v366_v3, %s5641_s15  ;;  %v5775_v12 = vld [vmem:[%s5718_s14 + $0x99] sm:$0xff]  ;;  %v5785_v14 = vld [vmem:[%s5718_s14 + $0xb1] sm:$0xff] }
  0x19   : > { %v5795_v16 = vld [vmem:[%s5718_s14 + $0xc9] sm:$0xff]  ;;  %v5798_v17 = vld [vmem:[%s5718_s14 + $0xc1] sm:$0xff]  ;;  %v5808_v19 = vld [vmem:[%s5718_s14 + $0xd9] sm:$0xff] }
  0x1a   : > { %v5805_v18 = vld [vmem:[%s5718_s14 + $0xe1] sm:$0xff]  ;;  %v5815_v20 = vld [vmem:[%s5718_s14 + $0xf9] sm:$0xff]  ;;  %v5818_v21 = vld [vmem:[%s5718_s14 + $0xf1] sm:$0xff] }
  0x1b   : > { %v5825_v22 = vld [vmem:[%s5718_s14 + $0x111] sm:$0xff]  ;;  %v5828_v23 = vld [vmem:[%s5718_s14 + $0x109] sm:$0xff]  ;;  %v5838_v25 = vld [vmem:[%s5718_s14 + $0x121] sm:$0xff] }
  0x1c   : > { %665 = vrot.lane.b32.xlu1 %v5735_v4, %s5641_s15  ;;  %663 = vrot.lane.b32.xlu0 %v5738_v5, %s5641_s15  ;;  %v5835_v24 = vld [vmem:[%s5718_s14 + $0x129] sm:$0xff]  ;;  %v392_v26 = vld [vmem:[%s5718_s14 + $0x141] sm:$0xff] }
  0x1d   : > { %v5846_v27 = vld [vmem:[%s5718_s14 + $0x139] sm:$0xff]  ;;  %v393_v29 = vld [vmem:[%s5718_s14 + $0x151] sm:$0xff]  ;;  %v395_v31 = vld [vmem:[%s5718_s14 + $0x169] sm:$0xff] }
  0x1e   : > { %v394_v28 = vld [vmem:[%s5718_s14 + $0x159] sm:$0xff]  ;;  %v396_v30 = vld [vmem:[%s5718_s14 + $0x171] sm:$0xff]  ;;  %v397_v33 = vld [vmem:[%s5718_s14 + $0x2] sm:$0xff] }
  0x1f   : > { %v398_v32 = vld [vmem:[%s5718_s14 + $0xa] sm:$0xff]  ;;  %v5864_v34 = vld [vmem:[%s5718_s14 + $0x22] sm:$0xff]  ;;  %v5867_v35 = vld [vmem:[%s5718_s14 + $0x1a] sm:$0xff] }
  0x20   : > { %669 = vrot.lane.b32.xlu1 %v5745_v6, %s5641_s15  ;;  %667 = vrot.lane.b32.xlu0 %v5748_v7, %s5641_s15  ;;  %v5874_v36 = vld [vmem:[%s5718_s14 + $0x3a] sm:$0xff]  ;;  %v5877_v37 = vld [vmem:[%s5718_s14 + $0x32] sm:$0xff] }
  0x21   : > { %v5884_v38 = vld [vmem:[%s5718_s14 + $0x52] sm:$0xff]  ;;  %v5887_v39 = vld [vmem:[%s5718_s14 + $0x4a] sm:$0xff]  ;;  %v5897_v41 = vld [vmem:[%s5718_s14 + $0x62] sm:$0xff] }
  0x22   : > { %9657 = vst [vmem:[#allocation3_spill] sm:$0xff] %v5884_v38  ;;  %v5894_v40 = vld [vmem:[%s5718_s14 + $0x6a] sm:$0xff]  ;;  %9659 = vst [vmem:[#allocation5_spill] sm:$0xff] %v5897_v41  ;;  %v5904_v42 = vld [vmem:[%s5718_s14 + $0x82] sm:$0xff] }
  0x23   : > { %9658 = vst [vmem:[#allocation4_spill] sm:$0xff] %v5894_v40  ;;  %9660 = vst [vmem:[#allocation6_spill] sm:$0xff] %v5904_v42  ;;  %v5907_v43 = vld [vmem:[%s5718_s14 + $0x7a] sm:$0xff]  ;;  %v5917_v45 = vld [vmem:[%s5718_s14 + $0x92] sm:$0xff] }
  0x24   : > { %673 = vrot.lane.b32.xlu1 %v5755_v8, %s5641_s15  ;;  %671 = vrot.lane.b32.xlu0 %v5758_v9, %s5641_s15  ;;  %9661 = vst [vmem:[#allocation7_spill] sm:$0xff] %v5907_v43  ;;  %v5914_v44 = vld [vmem:[%s5718_s14 + $0x9a] sm:$0xff]  ;;  %9663 = vst [vmem:[#allocation9_spill] sm:$0xff] %v5917_v45  ;;  %v5924_v46 = vld [vmem:[%s5718_s14 + $0xb2] sm:$0xff] }
  0x25   : > { %9662 = vst [vmem:[#allocation8_spill] sm:$0xff] %v5914_v44  ;;  %9664 = vst [vmem:[#allocation10_spill] sm:$0xff] %v5924_v46  ;;  %v5927_v47 = vld [vmem:[%s5718_s14 + $0xaa] sm:$0xff]  ;;  %v413_v49 = vld [vmem:[%s5718_s14 + $0xc2] sm:$0xff] }
  0x26   : > { %9665 = vst [vmem:[#allocation11_spill] sm:$0xff] %v5927_v47  ;;  %v414_v48 = vld [vmem:[%s5718_s14 + $0xca] sm:$0xff]  ;;  %v416_v50 = vld [vmem:[%s5718_s14 + $0xe2] sm:$0xff]  ;;  %v415_v51 = vld [vmem:[%s5718_s14 + $0xda] sm:$0xff] }
  0x27   : > { %v418_v52 = vld [vmem:[%s5718_s14 + $0xfa] sm:$0xff]  ;;  %v417_v53 = vld [vmem:[%s5718_s14 + $0xf2] sm:$0xff]  ;;  %v419_v55 = vld [vmem:[%s5718_s14 + $0x10a] sm:$0xff] }
  0x28   : > { %677 = vrot.lane.b32.xlu1 %v5765_v10, %s5641_s15  ;;  %675 = vrot.lane.b32.xlu0 %v5768_v11, %s5641_s15  ;;  %v420_v54 = vld [vmem:[%s5718_s14 + $0x112] sm:$0xff]  ;;  %v422_v56 = vld [vmem:[%s5718_s14 + $0x12a] sm:$0xff] }
  0x29   : > { %v421_v57 = vld [vmem:[%s5718_s14 + $0x122] sm:$0xff]  ;;  %v423_v59 = vld [vmem:[%s5718_s14 + $0x13a] sm:$0xff]  ;;  %v425_v63 = vld [vmem:[%s5718_s14 + $0x152] sm:$0xff] }
  0x2a   : > { %v424_v58 = vld [vmem:[%s5718_s14 + $0x142] sm:$0xff]  ;;  %v426_v62 = vld [vmem:[%s5718_s14 + $0x15a] sm:$0xff] }
  0x2c   : > { %681 = vrot.lane.b32.xlu1 %v5775_v12, %s5641_s15  ;;  %679 = vrot.lane.b32.xlu0 %v5778_v13, %s5641_s15 }
  0x30   : > { %685 = vrot.lane.b32.xlu1 %v5785_v14, %s5641_s15  ;;  %683 = vrot.lane.b32.xlu0 %v5788_v15, %s5641_s15 }
  0x34   : > { %689 = vrot.lane.b32.xlu1 %v5795_v16, %s5641_s15  ;;  %687 = vrot.lane.b32.xlu0 %v5798_v17, %s5641_s15 }
  0x38   : > { %693 = vrot.lane.b32.xlu1 %v5805_v18, %s5641_s15  ;;  %691 = vrot.lane.b32.xlu0 %v5808_v19, %s5641_s15 }
  0x3c   : > { %697 = vrot.lane.b32.xlu1 %v5815_v20, %s5641_s15  ;;  %695 = vrot.lane.b32.xlu0 %v5818_v21, %s5641_s15 }
  0x40   : > { %701 = vrot.lane.b32.xlu1 %v5825_v22, %s5641_s15  ;;  %699 = vrot.lane.b32.xlu0 %v5828_v23, %s5641_s15 }
  0x44   : > { %705 = vrot.lane.b32.xlu1 %v5835_v24, %s5641_s15  ;;  %703 = vrot.lane.b32.xlu0 %v5838_v25, %s5641_s15 }
  0x48   : > { %709 = vrot.lane.b32.xlu1 %v392_v26, %s5641_s15  ;;  %707 = vrot.lane.b32.xlu0 %v5846_v27, %s5641_s15  ;;  %v428_v26 = vld [vmem:[%s5718_s14 + $0x172] sm:$0xff] }
  0x4c   : > { %713 = vrot.lane.b32.xlu1 %v394_v28, %s5641_s15  ;;  %711 = vrot.lane.b32.xlu0 %v393_v29, %s5641_s15  ;;  %v427_v28 = vld [vmem:[%s5718_s14 + $0x16a] sm:$0xff] }
  0x50   : > { %717 = vrot.lane.b32.xlu1 %v396_v30, %s5641_s15  ;;  %715 = vrot.lane.b32.xlu0 %v395_v31, %s5641_s15 }
  0x54   : > { %785 = vrot.lane.b32.xlu1 %v398_v32, %s5642_s16  ;;  %783 = vrot.lane.b32.xlu0 %v397_v33, %s5642_s16  ;;  %v5982_v33 = vld [vmem:[%s5718_s14 + $0x18] sm:$0xff] }
  0x55   : > { %9674 = vst [vmem:[#allocation20_spill] sm:$0xff] %v5982_v33 }
  0x58   : > { %789 = vrot.lane.b32.xlu1 %v5864_v34, %s5642_s16  ;;  %787 = vrot.lane.b32.xlu0 %v5867_v35, %s5642_s16 }
  0x5c   : > { %793 = vrot.lane.b32.xlu1 %v5874_v36, %s5642_s16  ;;  %791 = vrot.lane.b32.xlu0 %v5877_v37, %s5642_s16 }
  0x60   : > { %797 = vrot.lane.b32.xlu1 %v5884_v38, %s5642_s16  ;;  %795 = vrot.lane.b32.xlu0 %v5887_v39, %s5642_s16  ;;  %v6127_v38 = vld [vmem:[%s5718_s14 + $0x108] sm:$0xff] }
  0x61   : > { %9696 = vst [vmem:[#allocation42_spill] sm:$0xff] %v6127_v38 }
  0x64   : > { %801 = vrot.lane.b32.xlu1 %v5894_v40, %s5642_s16  ;;  %799 = vrot.lane.b32.xlu0 %v5897_v41, %s5642_s16  ;;  %v6097_v40 = vld [vmem:[%s5718_s14 + $0xd8] sm:$0xff]  ;;  %v358_v41 = vld [vmem:[%s5718_s14 + $0x128] sm:$0xff] }
  0x65   : > { %9690 = vst [vmem:[#allocation36_spill] sm:$0xff] %v6097_v40 }
  0x68   : > { %805 = vrot.lane.b32.xlu1 %v5904_v42, %s5642_s16  ;;  %803 = vrot.lane.b32.xlu0 %v5907_v43, %s5642_s16  ;;  %v6094_v43 = vld [vmem:[%s5718_s14 + $0xe0] sm:$0xff] }
  0x69   : > { %9689 = vst [vmem:[#allocation35_spill] sm:$0xff] %v6094_v43 }
  0x6c   : > { %809 = vrot.lane.b32.xlu1 %v5914_v44, %s5642_s16  ;;  %807 = vrot.lane.b32.xlu0 %v5917_v45, %s5642_s16  ;;  %v6083_v44 = vld [vmem:[%s5718_s14 + $0xc0] sm:$0xff] }
  0x6d   : > { %9686 = vst [vmem:[#allocation32_spill] sm:$0xff] %v6083_v44 }
  0x70   : > { %813 = vrot.lane.b32.xlu1 %v5924_v46, %s5642_s16  ;;  %811 = vrot.lane.b32.xlu0 %v5927_v47, %s5642_s16  ;;  %v6080_v47 = vld [vmem:[%s5718_s14 + $0xc8] sm:$0xff] }
  0x71   : > { %9685 = vst [vmem:[#allocation31_spill] sm:$0xff] %v6080_v47 }
  0x74   : > { %817 = vrot.lane.b32.xlu1 %v414_v48, %s5642_s16  ;;  %815 = vrot.lane.b32.xlu0 %v413_v49, %s5642_s16  ;;  %v5985_v48 = vld [vmem:[%s5718_s14 + $0x20] sm:$0xff] }
  0x75   : > { %9675 = vst [vmem:[#allocation21_spill] sm:$0xff] %v5985_v48 }
  0x78   : > { %821 = vrot.lane.b32.xlu1 %v416_v50, %s5642_s16  ;;  %819 = vrot.lane.b32.xlu0 %v415_v51, %s5642_s16  ;;  %v5996_v51 = vld [vmem:[%s5718_s14 + $0x38] sm:$0xff] }
  0x79   : > { %9676 = vst [vmem:[#allocation22_spill] sm:$0xff] %v5996_v51 }
  0x7c   : > { %825 = vrot.lane.b32.xlu1 %v418_v52, %s5642_s16  ;;  %823 = vrot.lane.b32.xlu0 %v417_v53, %s5642_s16  ;;  %v5999_v52 = vld [vmem:[%s5718_s14 + $0x30] sm:$0xff] }
  0x80   : > { %829 = vrot.lane.b32.xlu1 %v420_v54, %s5642_s16  ;;  %827 = vrot.lane.b32.xlu0 %v419_v55, %s5642_s16  ;;  %v6010_v55 = vld [vmem:[%s5718_s14 + $0x50] sm:$0xff] }
  0x84   : > { %833 = vrot.lane.b32.xlu1 %v422_v56, %s5642_s16  ;;  %831 = vrot.lane.b32.xlu0 %v421_v57, %s5642_s16  ;;  %v6013_v56 = vld [vmem:[%s5718_s14 + $0x48] sm:$0xff] }
  0x86   : > { %v5955_v60 = vpop.permute.xlu1 %659  ;;  %v5957_v61 = vpop.permute.xlu0 %655 }
  0x87   : > { %9666 = vst [vmem:[#allocation12_spill] sm:$0xff] %v5955_v60  ;;  %9667 = vst [vmem:[#allocation13_spill] sm:$0xff] %v5957_v61  ;;  %v6066_v60 = vld [vmem:[%s5718_s14 + $0xb0] sm:$0xff] }
  0x88   : > { %837 = vrot.lane.b32.xlu1 %v424_v58, %s5642_s16  ;;  %835 = vrot.lane.b32.xlu0 %v423_v59, %s5642_s16  ;;  %v6024_v59 = vld [vmem:[%s5718_s14 + $0x68] sm:$0xff] }
  0x8a   : > { %v5963_v1 = vpop.permute.xlu1 %661  ;;  %v5965_v3 = vpop.permute.xlu0 %657 }
  0x8b   : > { %9668 = vst [vmem:[#allocation14_spill] sm:$0xff] %v5963_v1  ;;  %9669 = vst [vmem:[#allocation15_spill] sm:$0xff] %v5965_v3  ;;  %v6069_v3 = vld [vmem:[%s5718_s14 + $0xa8] sm:$0xff] }
  0x8c   : > { %841 = vrot.lane.b32.xlu1 %v426_v62, %s5642_s16  ;;  %839 = vrot.lane.b32.xlu0 %v425_v63, %s5642_s16  ;;  %v6027_v62 = vld [vmem:[%s5718_s14 + $0x60] sm:$0xff]  ;;  %9682 = vst [vmem:[#allocation28_spill] sm:$0xff] %v6069_v3 }
  0x8e   : > { %v5971_v29 = vpop.permute.xlu1 %665  ;;  %v5973_v30 = vpop.permute.xlu0 %663 }
  0x8f   : > { %9670 = vst [vmem:[#allocation16_spill] sm:$0xff] %v5971_v29  ;;  %9671 = vst [vmem:[#allocation17_spill] sm:$0xff] %v5973_v30  ;;  %v6052_v30 = vld [vmem:[%s5718_s14 + $0x98] sm:$0xff] }
  0x90   : > { %845 = vrot.lane.b32.xlu1 %v428_v26, %s5642_s16  ;;  %843 = vrot.lane.b32.xlu0 %v427_v28, %s5642_s16  ;;  %v6038_v28 = vld [vmem:[%s5718_s14 + $0x80] sm:$0xff] }
  0x92   : > { %v5977_v31 = vpop.permute.xlu1 %669  ;;  %v5979_v32 = vpop.permute.xlu0 %667 }
  0x93   : > { %9672 = vst [vmem:[#allocation18_spill] sm:$0xff] %v5977_v31  ;;  %9673 = vst [vmem:[#allocation19_spill] sm:$0xff] %v5979_v32  ;;  %v6041_v31 = vld [vmem:[%s5718_s14 + $0x78] sm:$0xff] }
  0x94   : > { %913 = vrot.lane.b32.xlu1 %v5985_v48, %s5643_s17  ;;  %911 = vrot.lane.b32.xlu0 %v5982_v33, %s5643_s17  ;;  %v6055_v48 = vld [vmem:[%s5718_s14 + $0x90] sm:$0xff] }
  0x96   : > { %v5991_v49 = vpop.permute.xlu1 %673  ;;  %v5993_v50 = vpop.permute.xlu0 %671 }
  0x98   : > { %917 = vrot.lane.b32.xlu1 %v5996_v51, %s5643_s17  ;;  %915 = vrot.lane.b32.xlu0 %v5999_v52, %s5643_s17 }
  0x9a   : > { %v6005_v53 = vpop.permute.xlu1 %677  ;;  %v6007_v54 = vpop.permute.xlu0 %675 }
  0x9c   : > { %921 = vrot.lane.b32.xlu1 %v6010_v55, %s5643_s17  ;;  %919 = vrot.lane.b32.xlu0 %v6013_v56, %s5643_s17 }
  0x9e   : > { %v6019_v57 = vpop.permute.xlu1 %681  ;;  %v6021_v58 = vpop.permute.xlu0 %679 }
  0xa0   : > { %925 = vrot.lane.b32.xlu1 %v6024_v59, %s5643_s17  ;;  %923 = vrot.lane.b32.xlu0 %v6027_v62, %s5643_s17 }
  0xa2   : > { %v6033_v63 = vpop.permute.xlu1 %685  ;;  %v6035_v26 = vpop.permute.xlu0 %683 }
  0xa3   : > { %9677 = vst [vmem:[#allocation23_spill] sm:$0xff] %v6035_v26 }
  0xa4   : > { %929 = vrot.lane.b32.xlu1 %v6038_v28, %s5643_s17  ;;  %927 = vrot.lane.b32.xlu0 %v6041_v31, %s5643_s17 }
  0xa6   : > { %v6047_v32 = vpop.permute.xlu1 %689  ;;  %v6049_v29 = vpop.permute.xlu0 %687 }
  0xa7   : > { %9678 = vst [vmem:[#allocation24_spill] sm:$0xff] %v6047_v32  ;;  %9679 = vst [vmem:[#allocation25_spill] sm:$0xff] %v6049_v29  ;;  %v6124_v32 = vld [vmem:[%s5718_s14 + $0x110] sm:$0xff] }
  0xa8   : > { %933 = vrot.lane.b32.xlu1 %v6052_v30, %s5643_s17  ;;  %931 = vrot.lane.b32.xlu0 %v6055_v48, %s5643_s17  ;;  %9695 = vst [vmem:[#allocation41_spill] sm:$0xff] %v6124_v32 }
  0xaa   : > { %v6061_v1 = vpop.permute.xlu1 %693  ;;  %v6063_v33 = vpop.permute.xlu0 %691 }
  0xab   : > { %9680 = vst [vmem:[#allocation26_spill] sm:$0xff] %v6061_v1  ;;  %9681 = vst [vmem:[#allocation27_spill] sm:$0xff] %v6063_v33  ;;  %v6109_v33 = vld [vmem:[%s5718_s14 + $0xf0] sm:$0xff] }
  0xac   : > { %937 = vrot.lane.b32.xlu1 %v6066_v60, %s5643_s17  ;;  %935 = vrot.lane.b32.xlu0 %v6069_v3, %s5643_s17  ;;  %9692 = vst [vmem:[#allocation38_spill] sm:$0xff] %v6109_v33 }
  0xae   : > { %v6075_v61 = vpop.permute.xlu1 %697  ;;  %v6077_v46 = vpop.permute.xlu0 %695 }
  0xaf   : > { %9683 = vst [vmem:[#allocation29_spill] sm:$0xff] %v6075_v61  ;;  %9684 = vst [vmem:[#allocation30_spill] sm:$0xff] %v6077_v46  ;;  %v357_v46 = vld [vmem:[%s5718_s14 + $0x120] sm:$0xff] }
  0xb0   : > { %941 = vrot.lane.b32.xlu1 %v6080_v47, %s5643_s17  ;;  %939 = vrot.lane.b32.xlu0 %v6083_v44, %s5643_s17  ;;  %v359_v44 = vld [vmem:[%s5718_s14 + $0x138] sm:$0xff] }
  0xb2   : > { %v6089_v45 = vpop.permute.xlu1 %701  ;;  %v6091_v42 = vpop.permute.xlu0 %699 }
  0xb3   : > { %9687 = vst [vmem:[#allocation33_spill] sm:$0xff] %v6089_v45  ;;  %9688 = vst [vmem:[#allocation34_spill] sm:$0xff] %v6091_v42  ;;  %v6106_v42 = vld [vmem:[%s5718_s14 + $0xf8] sm:$0xff] }
  0xb4   : > { %945 = vrot.lane.b32.xlu1 %v6094_v43, %s5643_s17  ;;  %943 = vrot.lane.b32.xlu0 %v6097_v40, %s5643_s17  ;;  %9691 = vst [vmem:[#allocation37_spill] sm:$0xff] %v6106_v42  ;;  %v360_v40 = vld [vmem:[%s5718_s14 + $0x140] sm:$0xff] }
  0xb6   : > { %v706_v45 = vpop.permute.xlu1 %705  ;;  %v704_v61 = vpop.permute.xlu0 %703 }
  0xb7   : > { %v6112_v1 = vsel %vm1647_vm0, %v358_v41, %v706_v45  ;;  %v6115_v43 = vsel %vm1647_vm0, %v357_v46, %v704_v61 }
  0xb8   : > { %9693 = vst [vmem:[#allocation39_spill] sm:$0xff] %v6112_v1  ;;  %9694 = vst [vmem:[#allocation40_spill] sm:$0xff] %v6115_v43  ;;  %949 = vrot.lane.b32.xlu1 %v6106_v42, %s5643_s17  ;;  %947 = vrot.lane.b32.xlu0 %v6109_v33, %s5643_s17  ;;  %v362_v43 = vld [vmem:[%s5718_s14 + $0x158] sm:$0xff]  ;;  %v361_v1 = vld [vmem:[%s5718_s14 + $0x150] sm:$0xff] }
  0xba   : > { %v710_v29 = vpop.permute.xlu1 %709  ;;  %v708_v47 = vpop.permute.xlu0 %707 }
  0xbb   : > { %v6130_v45 = vsel %vm1647_vm0, %v360_v40, %v710_v29  ;;  %v6133_v61 = vsel %vm1647_vm0, %v359_v44, %v708_v47  ;;  %v364_v47 = vld [vmem:[%s5718_s14 + $0x170] sm:$0xff]  ;;  %v363_v29 = vld [vmem:[%s5718_s14 + $0x168] sm:$0xff] }
  0xbc   : > { %9697 = vst [vmem:[#allocation43_spill] sm:$0xff] %v6130_v45  ;;  %9698 = vst [vmem:[#allocation44_spill] sm:$0xff] %v6133_v61  ;;  %953 = vrot.lane.b32.xlu1 %v6124_v32, %s5643_s17  ;;  %951 = vrot.lane.b32.xlu0 %v6127_v38, %s5643_s17 }
  0xbe   : > { %v714_v33 = vpop.permute.xlu1 %713  ;;  %v712_v42 = vpop.permute.xlu0 %711 }
  0xbf   : > { %v6142_v3 = vsel %vm1647_vm0, %v362_v43, %v714_v33  ;;  %v6145_v26 = vsel %vm1647_vm0, %v361_v1, %v712_v42 }
  0xc0   : > { %957 = vrot.lane.b32.xlu1 %v358_v41, %s5643_s17  ;;  %955 = vrot.lane.b32.xlu0 %v357_v46, %s5643_s17 }
  0xc2   : > { %v718_v61 = vpop.permute.xlu1 %717  ;;  %v716_v45 = vpop.permute.xlu0 %715 }
  0xc3   : > { %v6152_v38 = vsel %vm1647_vm0, %v364_v47, %v718_v61  ;;  %v6155_v32 = vsel %vm1647_vm0, %v363_v29, %v716_v45  ;;  %v5138_v45 = vld [vmem:[%s5718_s14 + $0x188] sm:$0xff] }
  0xc4   : > { %9699 = vst [vmem:[#allocation45_spill] sm:$0xff] %v6152_v38  ;;  %9700 = vst [vmem:[#allocation46_spill] sm:$0xff] %v6155_v32  ;;  %961 = vrot.lane.b32.xlu1 %v360_v40, %s5643_s17  ;;  %959 = vrot.lane.b32.xlu0 %v359_v44, %s5643_s17  ;;  %v5137_v40 = vld [vmem:[%s5718_s14 + $0x180] sm:$0xff]  ;;  %v1913_v38 = vld [vmem:[%s9601_s1 + $0x10] sm:$0xff] }
  0xc6   : > { %v6159_v42 = vpop.permute.xlu1 %785  ;;  %v6161_v41 = vpop.permute.xlu0 %783 }
  0xc7   : > { %9701 = vst [vmem:[#allocation47_spill] sm:$0xff] %v6159_v42  ;;  %9702 = vst [vmem:[#allocation48_spill] sm:$0xff] %v6161_v41 }
  0xc8   : > { %965 = vrot.lane.b32.xlu1 %v362_v43, %s5643_s17  ;;  %963 = vrot.lane.b32.xlu0 %v361_v1, %s5643_s17 }
  0xca   : > { %v6165_v46 = vpop.permute.xlu1 %789  ;;  %v6167_v33 = vpop.permute.xlu0 %787 }
  0xcb   : > { %9703 = vst [vmem:[#allocation49_spill] sm:$0xff] %v6165_v46  ;;  %9704 = vst [vmem:[#allocation50_spill] sm:$0xff] %v6167_v33 }
  0xcc   : > { %969 = vrot.lane.b32.xlu1 %v364_v47, %s5643_s17  ;;  %967 = vrot.lane.b32.xlu0 %v363_v29, %s5643_s17 }
  0xce   : > { %v6173_v61 = vpop.permute.xlu1 %793  ;;  %v6175_v44 = vpop.permute.xlu0 %791 }
  0xcf   : > { %9705 = vst [vmem:[#allocation51_spill] sm:$0xff] %v6173_v61  ;;  %9706 = vst [vmem:[#allocation52_spill] sm:$0xff] %v6175_v44 }
  0xd0   : > { %973 = vrot.lane.b32.xlu1 %v5138_v45, %s5643_s17  ;;  %971 = vrot.lane.b32.xlu0 %v5137_v40, %s5643_s17 }
  0xd2   : > { %v6179_v43 = vpop.permute.xlu1 %797  ;;  %v6181_v1 = vpop.permute.xlu0 %795 }
  0xd3   : > { %9707 = vst [vmem:[#allocation53_spill] sm:$0xff] %v6179_v43  ;;  %9708 = vst [vmem:[#allocation54_spill] sm:$0xff] %v6181_v1 }
  0xd4   : > { %1041 = vrot.lane.b32.xlu1 %v5728_v2, %s5644_s18  ;;  %1039 = vrot.lane.b32.xlu0 %v5721_v0, %s5644_s18 }
  0xd6   : > { %v6187_v47 = vpop.permute.xlu1 %801  ;;  %v6189_v29 = vpop.permute.xlu0 %799 }
  0xd8   : > { %1045 = vrot.lane.b32.xlu1 %v5735_v4, %s5644_s18  ;;  %1043 = vrot.lane.b32.xlu0 %v5738_v5, %s5644_s18 }
  0xda   : > { %v6195_v45 = vpop.permute.xlu1 %805  ;;  %v6197_v40 = vpop.permute.xlu0 %803 }
  0xdc   : > { %1049 = vrot.lane.b32.xlu1 %v5745_v6, %s5644_s18  ;;  %1047 = vrot.lane.b32.xlu0 %v5748_v7, %s5644_s18 }
  0xde   : > { %v6203_v0 = vpop.permute.xlu1 %809  ;;  %v6205_v2 = vpop.permute.xlu0 %807 }
  0xe0   : > { %1053 = vrot.lane.b32.xlu1 %v5755_v8, %s5644_s18  ;;  %1051 = vrot.lane.b32.xlu0 %v5758_v9, %s5644_s18 }
  0xe2   : > { %v6211_v43 = vpop.permute.xlu1 %813  ;;  %v6213_v1 = vpop.permute.xlu0 %811 }
  0xe4   : > { %1057 = vrot.lane.b32.xlu1 %v5765_v10, %s5644_s18  ;;  %1055 = vrot.lane.b32.xlu0 %v5768_v11, %s5644_s18 }
  0xe6   : > { %v6219_v61 = vpop.permute.xlu1 %817  ;;  %v6221_v44 = vpop.permute.xlu0 %815 }
  0xe8   : > { %1061 = vrot.lane.b32.xlu1 %v5775_v12, %s5644_s18  ;;  %1059 = vrot.lane.b32.xlu0 %v5778_v13, %s5644_s18 }
  0xea   : > { %v6227_v46 = vpop.permute.xlu1 %821  ;;  %v6229_v33 = vpop.permute.xlu0 %819 }
  0xec   : > { %1065 = vrot.lane.b32.xlu1 %v5785_v14, %s5644_s18  ;;  %1063 = vrot.lane.b32.xlu0 %v5788_v15, %s5644_s18 }
  0xee   : > { %v6235_v42 = vpop.permute.xlu1 %825  ;;  %v6237_v41 = vpop.permute.xlu0 %823 }
  0xf0   : > { %1069 = vrot.lane.b32.xlu1 %v5795_v16, %s5644_s18  ;;  %1067 = vrot.lane.b32.xlu0 %v5798_v17, %s5644_s18 }
  0xf2   : > { %v6243_v12 = vpop.permute.xlu1 %829  ;;  %v6245_v13 = vpop.permute.xlu0 %827 }
  0xf4   : > { %1073 = vrot.lane.b32.xlu1 %v5805_v18, %s5644_s18  ;;  %1071 = vrot.lane.b32.xlu0 %v5808_v19, %s5644_s18  ;;  %v1911_v18 = vld [vmem:[%s9601_s1] sm:$0xff]  ;;  %v1912_v19 = vld [vmem:[%s9601_s1 + $0x8] sm:$0xff] }
  0xf6   : > { %v6251_v14 = vpop.permute.xlu1 %833  ;;  %v6253_v15 = vpop.permute.xlu0 %831 }
  0xf8   : > { %1077 = vrot.lane.b32.xlu1 %v5815_v20, %s5644_s18  ;;  %1075 = vrot.lane.b32.xlu0 %v5818_v21, %s5644_s18  ;;  %v5573_v20 = vpack.c.bf16 %v1912_v19, %v1911_v18 }
  0xfa   : > { %v6259_v16 = vpop.permute.xlu1 %837  ;;  %v6261_v17 = vpop.permute.xlu0 %835  ;;  %5574 = vmatprep.subr.bf16.mxu0 %v5573_v20 }
  0xfb   : > { %5576 = vmatpush3.bf16.msra.mxu0 %v5573_v20 }
  0xfc   : > { %1081 = vrot.lane.b32.xlu1 %v5825_v22, %s5644_s18  ;;  %1079 = vrot.lane.b32.xlu0 %v5828_v23, %s5644_s18  ;;  %v1914_v22 = vld [vmem:[%s9601_s1 + $0x18] sm:$0xff] }
  0xfd   : > { %v5577_v23 = vpack.c.bf16 %v1914_v22, %v1913_v38 }
  0xfe   : > { %v6273_v21 = vpop.permute.xlu1 %841  ;;  %v6275_v32 = vpop.permute.xlu0 %839 }
  0xff   : > { %5578 = vmatprep.subr.bf16.mxu0 %v5577_v23 }
 0x100   : > { %1085 = vrot.lane.b32.xlu1 %v5835_v24, %s5644_s18  ;;  %1083 = vrot.lane.b32.xlu0 %v5838_v25, %s5644_s18  ;;  %v1915_v24 = vld [vmem:[%s9601_s1 + $0x20] sm:$0xf] }
 0x101   : > { %5580 = vmatpush3.bf16.msra.mxu0 %v5577_v23 }
 0x102   : > { %v6287_v18 = vpop.permute.xlu1 %845  ;;  %v6289_v19 = vpop.permute.xlu0 %843  ;;  %5457 = vmatprep.subr.msk.mxu0 %vm2020_vm1, %v1915_v24 }
 0x104   : > { %1167 = vrot.lane.b32.xlu1 %v5867_v35, %s5645_s27  ;;  %1087 = vrot.lane.b32.xlu0 %v5846_v27, %s5644_s18 }
 0x105   : > { %5458 = vmatpush3.msk.msra.mxu0 %vm2020_vm1, %v1915_v24  ;;  %v1656_v24 = vsel %vm1647_vm0, %v6027_v62, %v5993_v50  ;;  %v1658_v50 = vsel %vm1647_vm0, %v6041_v31, %v6007_v54  ;;  %v1660_v54 = vsel %vm1647_vm0, %v6055_v48, %v6021_v58  ;;  %v9712_v58 = vld [vmem:[#allocation23_spill] sm:$0xff] }
 0x106   : > { %v6298_v25 = vpop.permute.xlu1 %913  ;;  %v6300_v38 = vpop.permute.xlu0 %911 }
 0x108   : > { %1295 = vrot.lane.b32.xlu1 %v5999_v52, %s5646_s11  ;;  %1169 = vrot.lane.b32.xlu0 %v5864_v34, %s5645_s27 }
 0x10a   : > { %v6306_v27 = vpop.permute.xlu1 %917  ;;  %v6308_v35 = vpop.permute.xlu0 %915 }
 0x10c   : > { %1423 = vrot.lane.b32.xlu1 %v5738_v5, %s5647_s12  ;;  %1297 = vrot.lane.b32.xlu0 %v5996_v51, %s5646_s11  ;;  %v1657_v5 = vsel %vm1647_vm0, %v6024_v59, %v5991_v49  ;;  %v1659_v49 = vsel %vm1647_vm0, %v6038_v28, %v6005_v53  ;;  %v1661_v53 = vsel %vm1647_vm0, %v6052_v30, %v6019_v57 }
 0x10d   : > { %v1663_v57 = vsel %vm1647_vm0, %v6066_v60, %v6033_v63  ;;  %v9714_v63 = vld [vmem:[#allocation3_spill] sm:$0xff] }
 0x10e   : > { %v6314_v20 = vpop.permute.xlu1 %921  ;;  %v6316_v22 = vpop.permute.xlu0 %919 }
 0x10f   : > { %9709 = vst [vmem:[#allocation55_spill] sm:$0xff] %v6314_v20 }
 0x110   : > { %1551 = vrot.lane.b32.xlu1 %v5877_v37, %s5648_s13  ;;  %1425 = vrot.lane.b32.xlu0 %v5735_v4, %s5647_s12  ;;  %v1690_v4 = vsel %vm1680_vm2, %v1657_v5, %v6187_v47  ;;  %v1692_v47 = vsel %vm1680_vm2, %v1659_v49, %v6195_v45  ;;  %v1694_v45 = vsel %vm1680_vm2, %v1661_v53, %v6203_v0  ;;  %v9713_v0 = vld [vmem:[#allocation28_spill] sm:$0xff]  ;;  %v9716_v53 = vld [vmem:[#allocation31_spill] sm:$0xff] }
 0x111   : > { %v1696_v49 = vsel %vm1680_vm2, %v1663_v57, %v6211_v43 }
 0x112   : > { %v6322_v34 = vpop.permute.xlu1 %925  ;;  %v6324_v23 = vpop.permute.xlu0 %923 }
 0x113   : > { %9710 = vst [vmem:[#allocation56_spill] sm:$0xff] %v6322_v34  ;;  %9711 = vst [vmem:[#allocation57_spill] sm:$0xff] %v6324_v23  ;;  %v1689_v34 = vsel %vm1680_vm2, %v1656_v24, %v6189_v29  ;;  %v1691_v29 = vsel %vm1680_vm2, %v1658_v50, %v6197_v40  ;;  %v1693_v40 = vsel %vm1680_vm2, %v1660_v54, %v6205_v2  ;;  %v9717_v54 = vld [vmem:[#allocation25_spill] sm:$0xff] }
 0x114   : > { %1553 = vrot.lane.b32.xlu1 %v5874_v36, %s5648_s13  ;;  %1171 = vrot.lane.b32.xlu0 %v5877_v37, %s5645_s27  ;;  %v1662_v2 = vsel %vm1647_vm0, %v9713_v0, %v9712_v58 }
 0x115   : > { %v1695_v50 = vsel %vm1680_vm2, %v1662_v2, %v6213_v1  ;;  %v9718_v1 = vld [vmem:[#allocation32_spill] sm:$0xff]  ;;  %v9719_v2 = vld [vmem:[#allocation26_spill] sm:$0xff] }
 0x116   : > { %v930_v23 = vpop.permute.xlu1 %929  ;;  %v928_v20 = vpop.permute.xlu0 %927 }
 0x117   : > { %v6341_v37 = vsel %vm1713_vm3, %v1690_v4, %v930_v23  ;;  %v6344_v51 = vsel %vm1713_vm3, %v1689_v34, %v928_v20 }
 0x118   : > { %1299 = vrot.lane.b32.xlu1 %v6013_v56, %s5646_s11  ;;  %1173 = vrot.lane.b32.xlu0 %v5874_v36, %s5645_s27 }
 0x11a   : > { %v934_v20 = vpop.permute.xlu1 %933  ;;  %v932_v34 = vpop.permute.xlu0 %931 }
 0x11b   : > { %v6361_v23 = vsel %vm1713_vm3, %v1692_v47, %v934_v20  ;;  %v6364_v36 = vsel %vm1713_vm3, %v1691_v29, %v932_v34  ;;  %v9715_v34 = vld [vmem:[#allocation24_spill] sm:$0xff] }
 0x11c   : > { %1427 = vrot.lane.b32.xlu1 %v5748_v7, %s5647_s12  ;;  %1301 = vrot.lane.b32.xlu0 %v6010_v55, %s5646_s11  ;;  %v1665_v43 = vsel %vm1647_vm0, %v9716_v53, %v9715_v34 }
 0x11e   : > { %v938_v5 = vpop.permute.xlu1 %937  ;;  %v936_v24 = vpop.permute.xlu0 %935 }
 0x11f   : > { %v6381_v7 = vsel %vm1713_vm3, %v1694_v45, %v938_v5  ;;  %v6384_v4 = vsel %vm1713_vm3, %v1693_v40, %v936_v24  ;;  %v1664_v45 = vsel %vm1647_vm0, %v9718_v1, %v9717_v54  ;;  %v1698_v40 = vsel %vm1680_vm2, %v1665_v43, %v6219_v61 }
 0x120   : > { %1555 = vrot.lane.b32.xlu1 %v5887_v39, %s5648_s13  ;;  %1429 = vrot.lane.b32.xlu0 %v5745_v6, %s5647_s12  ;;  %v1697_v5 = vsel %vm1680_vm2, %v1664_v45, %v6221_v44  ;;  %v9722_v44 = vld [vmem:[#allocation36_spill] sm:$0xff]  ;;  %v9723_v45 = vld [vmem:[#allocation29_spill] sm:$0xff] }
 0x122   : > { %v942_v47 = vpop.permute.xlu1 %941  ;;  %v940_v29 = vpop.permute.xlu0 %939 }
 0x123   : > { %v6401_v20 = vsel %vm1713_vm3, %v1696_v49, %v942_v47  ;;  %v6404_v6 = vsel %vm1713_vm3, %v1695_v50, %v940_v29  ;;  %v9720_v49 = vld [vmem:[#allocation35_spill] sm:$0xff] }
 0x124   : > { %1557 = vrot.lane.b32.xlu1 %v9714_v63, %s5648_s13  ;;  %1175 = vrot.lane.b32.xlu0 %v5887_v39, %s5645_s27  ;;  %v1667_v61 = vsel %vm1647_vm0, %v9720_v49, %v9719_v2  ;;  %v9721_v50 = vld [vmem:[#allocation27_spill] sm:$0xff] }
 0x125   : > { %v1666_v47 = vsel %vm1647_vm0, %v9722_v44, %v9721_v50  ;;  %v1700_v29 = vsel %vm1680_vm2, %v1667_v61, %v6227_v46 }
 0x126   : > { %v946_v24 = vpop.permute.xlu1 %945  ;;  %v944_v57 = vpop.permute.xlu0 %943  ;;  %v1699_v34 = vsel %vm1680_vm2, %v1666_v47, %v6229_v33  ;;  %v9726_v33 = vld [vmem:[#allocation38_spill] sm:$0xff]  ;;  %v9728_v47 = vld [vmem:[#allocation5_spill] sm:$0xff] }
 0x127   : > { %v6421_v58 = vsel %vm1713_vm3, %v1698_v40, %v946_v24  ;;  %v6424_v39 = vsel %vm1713_vm3, %v1697_v5, %v944_v57  ;;  %v9724_v40 = vld [vmem:[#allocation37_spill] sm:$0xff]  ;;  %v9725_v5 = vld [vmem:[#allocation30_spill] sm:$0xff] }
 0x128   : > { %1303 = vrot.lane.b32.xlu1 %v6027_v62, %s5646_s11  ;;  %1177 = vrot.lane.b32.xlu0 %v9714_v63, %s5645_s27  ;;  %v1669_v46 = vsel %vm1647_vm0, %v9724_v40, %v9723_v45  ;;  %v1668_v24 = vsel %vm1647_vm0, %v9726_v33, %v9725_v5 }
 0x129   : > { %v1702_v57 = vsel %vm1680_vm2, %v1669_v46, %v6235_v42  ;;  %v1701_v2 = vsel %vm1680_vm2, %v1668_v24, %v6237_v41  ;;  %v9732_v41 = vld [vmem:[#allocation42_spill] sm:$0xff] }
 0x12a   : > { %v950_v43 = vpop.permute.xlu1 %949  ;;  %v948_v54 = vpop.permute.xlu0 %947 }
 0x12b   : > { %v6441_v62 = vsel %vm1713_vm3, %v1700_v29, %v950_v43  ;;  %v6444_v63 = vsel %vm1713_vm3, %v1699_v34, %v948_v54  ;;  %v9729_v29 = vld [vmem:[#allocation33_spill] sm:$0xff]  ;;  %v9731_v43 = vld [vmem:[#allocation34_spill] sm:$0xff] }
 0x12c   : > { %1431 = vrot.lane.b32.xlu1 %v5758_v9, %s5647_s12  ;;  %1305 = vrot.lane.b32.xlu0 %v6024_v59, %s5646_s11  ;;  %v9730_v34 = vld [vmem:[#allocation41_spill] sm:$0xff]  ;;  %v1670_v54 = vsel %vm1647_vm0, %v9732_v41, %v9731_v43 }
 0x12d   : > { %v1671_v42 = vsel %vm1647_vm0, %v9730_v34, %v9729_v29  ;;  %v1703_v46 = vsel %vm1680_vm2, %v1670_v54, %v6245_v13  ;;  %v9737_v13 = vld [vmem:[#allocation40_spill] sm:$0xff] }
 0x12e   : > { %v954_v61 = vpop.permute.xlu1 %953  ;;  %v952_v50 = vpop.permute.xlu0 %951  ;;  %v1704_v45 = vsel %vm1680_vm2, %v1671_v42, %v6243_v12 }
 0x12f   : > { %v6461_v9 = vsel %vm1713_vm3, %v1702_v57, %v954_v61  ;;  %v6464_v59 = vsel %vm1713_vm3, %v1701_v2, %v952_v50  ;;  %v9735_v2 = vld [vmem:[#allocation4_spill] sm:$0xff]  ;;  %v9736_v61 = vld [vmem:[#allocation39_spill] sm:$0xff]  ;;  %v1705_v50 = vsel %vm1680_vm2, %v9737_v13, %v6253_v15 }
 0x130   : > { %9727 = vst [vmem:[#allocation23_spill] sm:$0xff] %v6461_v9  ;;  %1559 = vrot.lane.b32.xlu1 %v9728_v47, %s5648_s13  ;;  %1433 = vrot.lane.b32.xlu0 %v5755_v8, %s5647_s12  ;;  %v1706_v12 = vsel %vm1680_vm2, %v9736_v61, %v6251_v14  ;;  %v9740_v14 = vld [vmem:[#allocation43_spill] sm:$0xff]  ;;  %v9741_v15 = vld [vmem:[#allocation44_spill] sm:$0xff] }
 0x132   : > { %v958_v5 = vpop.permute.xlu1 %957  ;;  %v956_v24 = vpop.permute.xlu0 %955 }
 0x133   : > { %v6481_v57 = vsel %vm1713_vm3, %v1704_v45, %v958_v5  ;;  %v6484_v8 = vsel %vm1713_vm3, %v1703_v46, %v956_v24  ;;  %v1707_v45 = vsel %vm1680_vm2, %v9741_v15, %v6261_v17 }
 0x134   : > { %9733 = vst [vmem:[#allocation28_spill] sm:$0xff] %v6481_v57  ;;  %9734 = vst [vmem:[#allocation3_spill] sm:$0xff] %v6484_v8  ;;  %1561 = vrot.lane.b32.xlu1 %v9735_v2, %s5648_s13  ;;  %1179 = vrot.lane.b32.xlu0 %v9728_v47, %s5645_s27  ;;  %v1708_v47 = vsel %vm1680_vm2, %v9740_v14, %v6259_v16  ;;  %v1709_v16 = vsel %vm1680_vm2, %v6145_v26, %v6275_v32  ;;  %v9748_v32 = vld [vmem:[#allocation46_spill] sm:$0xff] }
 0x135   : > { %v1711_v26 = vsel %vm1680_vm2, %v9748_v32, %v6289_v19  ;;  %v9751_v14 = vld [vmem:[#allocation6_spill] sm:$0xff]  ;;  %v5243_v19 = vld [vmem:[%s5718_s14 + $0x91] sm:$0xff] }
 0x136   : > { %v962_v29 = vpop.permute.xlu1 %961  ;;  %v960_v42 = vpop.permute.xlu0 %959  ;;  %v5246_v32 = vld [vmem:[%s5718_s14 + $0xb1] sm:$0xff] }
 0x137   : > { %v6497_v43 = vsel %vm1713_vm3, %v1706_v12, %v962_v29  ;;  %v6500_v54 = vsel %vm1713_vm3, %v1705_v50, %v960_v42 }
 0x138   : > { %9738 = vst [vmem:[#allocation24_spill] sm:$0xff] %v6497_v43  ;;  %9739 = vst [vmem:[#allocation31_spill] sm:$0xff] %v6500_v54  ;;  %1307 = vrot.lane.b32.xlu1 %v6041_v31, %s5646_s11  ;;  %1181 = vrot.lane.b32.xlu0 %v9735_v2, %s5645_s27  ;;  %v1710_v31 = vsel %vm1680_vm2, %v6142_v3, %v6273_v21  ;;  %v9747_v3 = vld [vmem:[#allocation45_spill] sm:$0xff] }
 0x139   : > { %v9759_v43 = vld [vmem:[#allocation13_spill] sm:$0xff] }
 0x13a   : > { %v966_v46 = vpop.permute.xlu1 %965  ;;  %v964_v5 = vpop.permute.xlu0 %963 }
 0x13b   : > { %v6513_v24 = vsel %vm1713_vm3, %v1708_v47, %v966_v46  ;;  %v6516_v61 = vsel %vm1713_vm3, %v1707_v45, %v964_v5  ;;  %v5244_v45 = vld [vmem:[%s5718_s14 + $0x99] sm:$0xff] }
 0x13c   : > { %9742 = vst [vmem:[#allocation25_spill] sm:$0xff] %v6513_v24  ;;  %9743 = vst [vmem:[#allocation32_spill] sm:$0xff] %v6516_v61  ;;  %1435 = vrot.lane.b32.xlu1 %v5768_v11, %s5647_s12  ;;  %1309 = vrot.lane.b32.xlu0 %v6038_v28, %s5646_s11  ;;  %v9746_v11 = vld [vmem:[#allocation7_spill] sm:$0xff]  ;;  %v1712_v28 = vsel %vm1680_vm2, %v9747_v3, %v6287_v18 }
 0x13e   : > { %v970_v17 = vpop.permute.xlu1 %969  ;;  %v968_v2 = vpop.permute.xlu0 %967 }
 0x13f   : > { %v6529_v12 = vsel %vm1713_vm3, %v1710_v31, %v970_v17  ;;  %v6532_v13 = vsel %vm1713_vm3, %v1709_v16, %v968_v2  ;;  %v9753_v17 = vld [vmem:[#allocation8_spill] sm:$0xff] }
 0x140   : > { %9744 = vst [vmem:[#allocation26_spill] sm:$0xff] %v6529_v12  ;;  %9745 = vst [vmem:[#allocation35_spill] sm:$0xff] %v6532_v13  ;;  %1563 = vrot.lane.b32.xlu1 %v9746_v11, %s5648_s13  ;;  %1437 = vrot.lane.b32.xlu0 %v5765_v10, %s5647_s12  ;;  %v5249_v13 = vld [vmem:[%s5718_s14 + $0xd9] sm:$0xff] }
 0x142   : > { %v974_v21 = vpop.permute.xlu1 %973  ;;  %v972_v50 = vpop.permute.xlu0 %971 }
 0x143   : > { %v6545_v29 = vsel %vm1713_vm3, %v1712_v28, %v974_v21  ;;  %v6548_v42 = vsel %vm1713_vm3, %v1711_v26, %v972_v50 }
 0x144   : > { %9749 = vst [vmem:[#allocation27_spill] sm:$0xff] %v6545_v29  ;;  %9750 = vst [vmem:[#allocation36_spill] sm:$0xff] %v6548_v42  ;;  %1565 = vrot.lane.b32.xlu1 %v9751_v14, %s5648_s13  ;;  %1183 = vrot.lane.b32.xlu0 %v9746_v11, %s5645_s27  ;;  %v5245_v11 = vld [vmem:[%s5718_s14 + $0xa9] sm:$0xff] }
 0x146   : > { %v6554_v10 = vpop.permute.xlu1 %1041  ;;  %v6556_v18 = vpop.permute.xlu0 %1039 }
 0x148   : > { %1311 = vrot.lane.b32.xlu1 %v6055_v48, %s5646_s11  ;;  %1185 = vrot.lane.b32.xlu0 %v9751_v14, %s5645_s27  ;;  %v9752_v48 = vld [vmem:[#allocation9_spill] sm:$0xff] }
 0x14a   : > { %v6563_v47 = vpop.permute.xlu1 %1045  ;;  %v6565_v15 = vpop.permute.xlu0 %1043 }
 0x14c   : > { %1439 = vrot.lane.b32.xlu1 %v5243_v19, %s5647_s12  ;;  %1313 = vrot.lane.b32.xlu0 %v6052_v30, %s5646_s11  ;;  %v9755_v19 = vld [vmem:[#allocation10_spill] sm:$0xff] }
 0x14e   : > { %v6571_v46 = vpop.permute.xlu1 %1049  ;;  %v6573_v5 = vpop.permute.xlu0 %1047 }
 0x150   : > { %1567 = vrot.lane.b32.xlu1 %v9752_v48, %s5648_s13  ;;  %1441 = vrot.lane.b32.xlu0 %v5244_v45, %s5647_s12 }
 0x152   : > { %v6578_v31 = vpop.permute.xlu1 %1053  ;;  %v6580_v16 = vpop.permute.xlu0 %1051 }
 0x154   : > { %1569 = vrot.lane.b32.xlu1 %v9753_v17, %s5648_s13  ;;  %1187 = vrot.lane.b32.xlu0 %v9752_v48, %s5645_s27 }
 0x156   : > { %v6586_v30 = vpop.permute.xlu1 %1057  ;;  %v6588_v2 = vpop.permute.xlu0 %1055 }
 0x158   : > { %1315 = vrot.lane.b32.xlu1 %v9713_v0, %s5646_s11  ;;  %1189 = vrot.lane.b32.xlu0 %v9753_v17, %s5645_s27  ;;  %v9754_v0 = vld [vmem:[#allocation11_spill] sm:$0xff]  ;;  %v5247_v17 = vld [vmem:[%s5718_s14 + $0xc1] sm:$0xff] }
 0x15a   : > { %v6595_v3 = vpop.permute.xlu1 %1061  ;;  %v6597_v28 = vpop.permute.xlu0 %1059 }
 0x15c   : > { %1443 = vrot.lane.b32.xlu1 %v5245_v11, %s5647_s12  ;;  %1317 = vrot.lane.b32.xlu0 %v6066_v60, %s5646_s11  ;;  %v5184_v60 = vld [vmem:[%s5718_s14 + $0xb2] sm:$0xff] }
 0x15e   : > { %v6603_v26 = vpop.permute.xlu1 %1065  ;;  %v6605_v21 = vpop.permute.xlu0 %1063 }
 0x160   : > { %1571 = vrot.lane.b32.xlu1 %v9754_v0, %s5648_s13  ;;  %1445 = vrot.lane.b32.xlu0 %v5246_v32, %s5647_s12 }
 0x162   : > { %v6610_v50 = vpop.permute.xlu1 %1069  ;;  %v6612_v14 = vpop.permute.xlu0 %1067 }
 0x164   : > { %1573 = vrot.lane.b32.xlu1 %v9755_v19, %s5648_s13  ;;  %1191 = vrot.lane.b32.xlu0 %v9754_v0, %s5645_s27  ;;  %v5279_v0 = vld [vmem:[%s5718_s14 + $0xc2] sm:$0xff] }
 0x165   : > { %v5248_v19 = vld [vmem:[%s5718_s14 + $0xc9] sm:$0xff] }
 0x166   : > { %v6619_v45 = vpop.permute.xlu1 %1073  ;;  %v6621_v48 = vpop.permute.xlu0 %1071 }
 0x168   : > { %1319 = vrot.lane.b32.xlu1 %v9718_v1, %s5646_s11  ;;  %1193 = vrot.lane.b32.xlu0 %v5184_v60, %s5645_s27  ;;  %v5280_v1 = vld [vmem:[%s5718_s14 + $0xca] sm:$0xff] }
 0x16a   : > { %v6627_v11 = vpop.permute.xlu1 %1077  ;;  %v6629_v32 = vpop.permute.xlu0 %1075 }
 0x16c   : > { %1447 = vrot.lane.b32.xlu1 %v5247_v17, %s5647_s12  ;;  %1321 = vrot.lane.b32.xlu0 %v9716_v53, %s5646_s11 }
 0x16e   : > { %v6636_v29 = vpop.permute.xlu1 %1081  ;;  %v6638_v42 = vpop.permute.xlu0 %1079 }
 0x170   : > { %1575 = vrot.lane.b32.xlu1 %v5279_v0, %s5648_s13  ;;  %1449 = vrot.lane.b32.xlu0 %v5248_v19, %s5647_s12  ;;  %v333_v19 = vld [vmem:[%s5718_s14] sm:$0xff] }
 0x171   : > { %v1648_v54 = vsel %vm1647_vm0, %v333_v19, %v9759_v43  ;;  %v9761_v19 = vld [vmem:[#allocation15_spill] sm:$0xff] }
 0x172   : > { %v6643_v60 = vpop.permute.xlu1 %1085  ;;  %v6645_v17 = vpop.permute.xlu0 %1083 }
 0x173   : > { %9756 = vst [vmem:[#allocation29_spill] sm:$0xff] %v6643_v60  ;;  %9757 = vst [vmem:[#allocation37_spill] sm:$0xff] %v6645_v17 }
 0x174   : > { %1577 = vrot.lane.b32.xlu1 %v5280_v1, %s5648_s13  ;;  %1195 = vrot.lane.b32.xlu0 %v5279_v0, %s5645_s27  ;;  %v334_v0 = vld [vmem:[%s5718_s14 + $0x8] sm:$0xff] }
 0x176   : > { %v1168_v53 = vpop.permute.xlu1 %1167  ;;  %v6649_v12 = vpop.permute.xlu0 %1087 }
 0x177   : > { %9758 = vst [vmem:[#allocation30_spill] sm:$0xff] %v6649_v12  ;;  %v9760_v12 = vld [vmem:[#allocation48_spill] sm:$0xff] }
 0x178   : > { %1323 = vrot.lane.b32.xlu1 %v9722_v44, %s5646_s11  ;;  %1197 = vrot.lane.b32.xlu0 %v5280_v1, %s5645_s27  ;;  %v1681_v57 = vsel %vm1680_vm2, %v1648_v54, %v9760_v12  ;;  %v5281_v44 = vld [vmem:[%s5718_s14 + $0xda] sm:$0xff]  ;;  %v9762_v54 = vld [vmem:[#allocation47_spill] sm:$0xff]  ;;  %v5282_v12 = vld [vmem:[%s5718_s14 + $0xe2] sm:$0xff] }
 0x179   : > { %v5250_v1 = vld [vmem:[%s5718_s14 + $0xe1] sm:$0xff]  ;;  %v1714_v60 = vsel %vm1713_vm3, %v1681_v57, %v6300_v38 }
 0x17a   : > { %v1296_v24 = vpop.permute.xlu1 %1295  ;;  %v1170_v61 = vpop.permute.xlu0 %1169 }
 0x17c   : > { %1451 = vrot.lane.b32.xlu1 %v5249_v13, %s5647_s12  ;;  %1325 = vrot.lane.b32.xlu0 %v9720_v49, %s5646_s11  ;;  %v1747_v13 = vsel %vm9650_vm4, %v1714_v60, %v6556_v18  ;;  %v1649_v49 = vsel %vm1647_vm0, %v334_v0, %v9761_v19  ;;  %v9764_v19 = vld [vmem:[#allocation20_spill] sm:$0xff] }
 0x17d   : > { %v1780_v17 = vsel %vm1779_vm5, %v1747_v13, %v1168_v53  ;;  %v1682_v38 = vsel %vm1680_vm2, %v1649_v49, %v9762_v54  ;;  %v9765_v54 = vld [vmem:[#allocation50_spill] sm:$0xff] }
 0x17e   : > { %v1424_v8 = vpop.permute.xlu1 %1423  ;;  %v1298_v43 = vpop.permute.xlu0 %1297  ;;  %v1813_v57 = vsel %vm9649_vm6, %v1780_v17, %v1296_v24  ;;  %v1715_v18 = vsel %vm1713_vm3, %v1682_v38, %v6298_v25  ;;  %v5283_v38 = vld [vmem:[%s5718_s14 + $0xf2] sm:$0xff] }
 0x17f   : > { %v1846_v60 = vsel %vm1845_vm7, %v1813_v57, %v1424_v8  ;;  %v1748_v53 = vsel %vm9650_vm4, %v1715_v18, %v6554_v10  ;;  %v5252_v57 = vld [vmem:[%s5718_s14 + $0xf9] sm:$0xff] }
 0x180   : > { %1579 = vrot.lane.b32.xlu1 %v5281_v44, %s5648_s13  ;;  %1453 = vrot.lane.b32.xlu0 %v5250_v1, %s5647_s12  ;;  %v1781_v13 = vsel %vm1779_vm5, %v1748_v53, %v1170_v61  ;;  %v9766_v53 = vld [vmem:[#allocation14_spill] sm:$0xff] }
 0x181   : > { %v1814_v24 = vsel %vm9649_vm6, %v1781_v13, %v1298_v43  ;;  %v9763_v43 = vld [vmem:[#allocation12_spill] sm:$0xff] }
 0x182   : > { %v1552_v9 = vpop.permute.xlu1 %1551  ;;  %v1426_v0 = vpop.permute.xlu0 %1425  ;;  %v1650_v49 = vsel %vm1647_vm0, %v9764_v19, %v9763_v43 }
 0x183   : > { %v1879_v1 = vsel %vm9648_vm8, %v1846_v60, %v1552_v9  ;;  %v1847_v25 = vsel %vm1845_vm7, %v1814_v24, %v1426_v0  ;;  %v5251_v9 = vld [vmem:[%s5718_s14 + $0xf1] sm:$0xff] }
 0x184   : > { %1581 = vrot.lane.b32.xlu1 %v5282_v12, %s5648_s13  ;;  %1199 = vrot.lane.b32.xlu0 %v5281_v44, %s5645_s27 }
 0x185   : > { %5459 = vmatprep.mubr.msk.f32.mxu0 %vm1923_vm9, %v1879_v1  ;;  %v9767_v1 = vld [vmem:[#allocation21_spill] sm:$0xff] }
 0x186   : > { %v1554_v8 = vpop.permute.xlu1 %1553  ;;  %v1172_v17 = vpop.permute.xlu0 %1171  ;;  %v1651_v13 = vsel %vm1647_vm0, %v9767_v1, %v9766_v53  ;;  %v5254_v53 = vld [vmem:[%s5718_s14 + $0x111] sm:$0xff] }
 0x187   : > { %v1880_v10 = vsel %vm9648_vm8, %v1847_v25, %v1554_v8  ;;  %v5284_v8 = vld [vmem:[%s5718_s14 + $0xfa] sm:$0xff] }
 0x188   : > { %1327 = vrot.lane.b32.xlu1 %v9726_v33, %s5646_s11  ;;  %1201 = vrot.lane.b32.xlu0 %v5282_v12, %s5645_s27  ;;  %v1683_v33 = vsel %vm1680_vm2, %v1650_v49, %v9765_v54 }
 0x189   : > { %5460 = vmatmul.mubr.msk.f32.vlgmr.msra.gmra.mrb[0].mxu0 %vm1923_vm9, %v1880_v10  ;;  %v1716_v12 = vsel %vm1713_vm3, %v1683_v33, %v6308_v35 }
 0x18a   : > { %v1300_v61 = vpop.permute.xlu1 %1299  ;;  %v1174_v44 = vpop.permute.xlu0 %1173  ;;  %v1749_v0 = vsel %vm9650_vm4, %v1716_v12, %v6565_v15  ;;  %v9769_v12 = vld [vmem:[#allocation17_spill] sm:$0xff] }
 0x18b   : > { %v1782_v24 = vsel %vm1779_vm5, %v1749_v0, %v1172_v17  ;;  %v5285_v0 = vld [vmem:[%s5718_s14 + $0x10a] sm:$0xff] }
 0x18c   : > { %1455 = vrot.lane.b32.xlu1 %v5251_v9, %s5647_s12  ;;  %1329 = vrot.lane.b32.xlu0 %v9724_v40, %s5646_s11  ;;  %v9768_v40 = vld [vmem:[#allocation49_spill] sm:$0xff]  ;;  %v1815_v35 = vsel %vm9649_vm6, %v1782_v24, %v1300_v61 }
 0x18d   : > { %v1684_v25 = vsel %vm1680_vm2, %v1651_v13, %v9768_v40 }
 0x18e   : > { %v1428_v18 = vpop.permute.xlu1 %1427  ;;  %v1302_v60 = vpop.permute.xlu0 %1301  ;;  %v1717_v10 = vsel %vm1713_vm3, %v1684_v25, %v6306_v27  ;;  %v9772_v25 = vld [vmem:[#allocation22_spill] sm:$0xff] }
 0x18f   : > { %v1848_v15 = vsel %vm1845_vm7, %v1815_v35, %v1428_v18  ;;  %v1750_v17 = vsel %vm9650_vm4, %v1717_v10, %v6563_v47  ;;  %v1652_v18 = vsel %vm1647_vm0, %v5999_v52, %v9769_v12  ;;  %v9771_v52 = vld [vmem:[#allocation16_spill] sm:$0xff]  ;;  %v5224_v12 = vld [vmem:[%s5718_s14 + $0x128] sm:$0xff] }
 0x190   : > { %1583 = vrot.lane.b32.xlu1 %v5283_v38, %s5648_s13  ;;  %1457 = vrot.lane.b32.xlu0 %v5252_v57, %s5647_s12  ;;  %v1783_v49 = vsel %vm1779_vm5, %v1750_v17, %v1174_v44  ;;  %v5253_v44 = vld [vmem:[%s5718_s14 + $0x109] sm:$0xff]  ;;  %v1653_v35 = vsel %vm1647_vm0, %v9772_v25, %v9771_v52 }
 0x191   : > { %v1816_v61 = vsel %vm9649_vm6, %v1783_v49, %v1302_v60  ;;  %v9770_v60 = vld [vmem:[#allocation52_spill] sm:$0xff] }
 0x192   : > { %v1556_v9 = vpop.permute.xlu1 %1555  ;;  %v1430_v43 = vpop.permute.xlu0 %1429 }
 0x193   : > { %v1881_v19 = vsel %vm9648_vm8, %v1848_v15, %v1556_v9  ;;  %v1849_v27 = vsel %vm1845_vm7, %v1816_v61, %v1430_v43  ;;  %v5286_v15 = vld [vmem:[%s5718_s14 + $0x112] sm:$0xff] }
 0x194   : > { %1585 = vrot.lane.b32.xlu1 %v5284_v8, %s5648_s13  ;;  %1203 = vrot.lane.b32.xlu0 %v5283_v38, %s5645_s27  ;;  %v9774_v9 = vld [vmem:[#allocation55_spill] sm:$0xff] }
 0x195   : > { %5462 = vmatprep.mubr.msk.f32.mxu0 %vm1923_vm9, %v1881_v19 }
 0x196   : > { %v1558_v54 = vpop.permute.xlu1 %1557  ;;  %v1176_v33 = vpop.permute.xlu0 %1175 }
 0x197   : > { %v1882_v47 = vsel %vm9648_vm8, %v1849_v27, %v1558_v54 }
 0x198   : > { %1331 = vrot.lane.b32.xlu1 %v9732_v41, %s5646_s11  ;;  %1205 = vrot.lane.b32.xlu0 %v5284_v8, %s5645_s27  ;;  %v1685_v41 = vsel %vm1680_vm2, %v1652_v18, %v9770_v60 }
 0x199   : > { %5463 = vmatmul.mubr.msk.f32.gmra.mrb[2].mxu0 %vm1923_vm9, %v1882_v47  ;;  %v1718_v1 = vsel %vm1713_vm3, %v1685_v41, %v6316_v22  ;;  %v9775_v41 = vld [vmem:[#allocation19_spill] sm:$0xff] }
 0x19a   : > { %v1304_v38 = vpop.permute.xlu1 %1303  ;;  %v1178_v57 = vpop.permute.xlu0 %1177  ;;  %v1751_v40 = vsel %vm9650_vm4, %v1718_v1, %v6573_v5 }
 0x19b   : > { %v1784_v8 = vsel %vm1779_vm5, %v1751_v40, %v1176_v33  ;;  %v5223_v33 = vld [vmem:[%s5718_s14 + $0x120] sm:$0xff] }
 0x19c   : > { %1459 = vrot.lane.b32.xlu1 %v5253_v44, %s5647_s12  ;;  %1333 = vrot.lane.b32.xlu0 %v9730_v34, %s5646_s11  ;;  %v9773_v34 = vld [vmem:[#allocation51_spill] sm:$0xff]  ;;  %v1817_v22 = vsel %vm9649_vm6, %v1784_v8, %v1304_v38  ;;  %v9777_v40 = vld [vmem:[#allocation57_spill] sm:$0xff] }
 0x19d   : > { %v1686_v10 = vsel %vm1680_vm2, %v1653_v35, %v9773_v34  ;;  %v9778_v34 = vld [vmem:[#allocation18_spill] sm:$0xff] }
 0x19e   : > { %v1432_v13 = vpop.permute.xlu1 %1431  ;;  %v1306_v24 = vpop.permute.xlu0 %1305  ;;  %v1719_v5 = vsel %vm1713_vm3, %v1686_v10, %v9774_v9 }
 0x19f   : > { %v1850_v43 = vsel %vm1845_vm7, %v1817_v22, %v1432_v13  ;;  %v1752_v49 = vsel %vm9650_vm4, %v1719_v5, %v6571_v46  ;;  %v5287_v13 = vld [vmem:[%s5718_s14 + $0x122] sm:$0xff]  ;;  %v5288_v5 = vld [vmem:[%s5718_s14 + $0x12a] sm:$0xff] }
 0x1a0   : > { %1587 = vrot.lane.b32.xlu1 %v5285_v0, %s5648_s13  ;;  %1461 = vrot.lane.b32.xlu0 %v5254_v53, %s5647_s12  ;;  %v1785_v27 = vsel %vm1779_vm5, %v1752_v49, %v1178_v57  ;;  %v5255_v57 = vld [vmem:[%s5718_s14 + $0x121] sm:$0xff] }
 0x1a1   : > { %v1818_v54 = vsel %vm9649_vm6, %v1785_v27, %v1306_v24  ;;  %v9776_v53 = vld [vmem:[#allocation54_spill] sm:$0xff]  ;;  %v9779_v22 = vld [vmem:[#allocation53_spill] sm:$0xff] }
 0x1a2   : > { %v1560_v17 = vpop.permute.xlu1 %1559  ;;  %v1434_v19 = vpop.permute.xlu0 %1433  ;;  %v5256_v24 = vld [vmem:[%s5718_s14 + $0x129] sm:$0xff] }
 0x1a3   : > { %v1883_v61 = vsel %vm9648_vm8, %v1850_v43, %v1560_v17  ;;  %v1851_v47 = vsel %vm1845_vm7, %v1818_v54, %v1434_v19  ;;  %v9780_v43 = vld [vmem:[#allocation56_spill] sm:$0xff] }
 0x1a4   : > { %1589 = vrot.lane.b32.xlu1 %v5286_v15, %s5648_s13  ;;  %1207 = vrot.lane.b32.xlu0 %v5285_v0, %s5645_s27  ;;  %v1654_v0 = vsel %vm1647_vm0, %v6013_v56, %v9775_v41  ;;  %v1655_v56 = vsel %vm1647_vm0, %v6010_v55, %v9778_v34  ;;  %v5258_v41 = vld [vmem:[%s5718_s14 + $0x141] sm:$0xff] }
 0x1a5   : > { %5465 = vmatprep.mubr.msk.f32.mxu0 %vm1923_vm9, %v1883_v61  ;;  %v1687_v1 = vsel %vm1680_vm2, %v1654_v0, %v9776_v53  ;;  %v5196_v34 = vld [vmem:[%s5718_s14 + $0x142] sm:$0xff] }
 0x1a6   : > { %v1562_v44 = vpop.permute.xlu1 %1561  ;;  %v1180_v46 = vpop.permute.xlu0 %1179  ;;  %v1720_v52 = vsel %vm1713_vm3, %v1687_v1, %v9777_v40  ;;  %v1755_v1 = vsel %vm9650_vm4, %v6344_v51, %v6588_v2 }
 0x1a7   : > { %v1884_v38 = vsel %vm9648_vm8, %v1851_v47, %v1562_v44  ;;  %v1753_v8 = vsel %vm9650_vm4, %v1720_v52, %v6580_v16 }
 0x1a8   : > { %1335 = vrot.lane.b32.xlu1 %v5223_v33, %s5646_s11  ;;  %1209 = vrot.lane.b32.xlu0 %v5286_v15, %s5645_s27  ;;  %v1786_v10 = vsel %vm1779_vm5, %v1753_v8, %v1180_v46  ;;  %v1688_v15 = vsel %vm1680_vm2, %v1655_v56, %v9779_v22  ;;  %v5225_v33 = vld [vmem:[%s5718_s14 + $0x138] sm:$0xff] }
 0x1a9   : > { %5466 = vmatmul.mubr.msk.f32.gmra.mrb[4].mxu0 %vm1923_vm9, %v1884_v38  ;;  %v1721_v16 = vsel %vm1713_vm3, %v1688_v15, %v9780_v43  ;;  %v5257_v38 = vld [vmem:[%s5718_s14 + $0x139] sm:$0xff]  ;;  %v5227_v15 = vld [vmem:[%s5718_s14 + $0x150] sm:$0xff] }
 0x1aa   : > { %v1308_v18 = vpop.permute.xlu1 %1307  ;;  %v1182_v60 = vpop.permute.xlu0 %1181  ;;  %v1754_v49 = vsel %vm9650_vm4, %v1721_v16, %v6578_v31  ;;  %v5165_v43 = vld [vmem:[%s5718_s14 + $0x151] sm:$0xff] }
 0x1ab   : > { %v1819_v9 = vsel %vm9649_vm6, %v1786_v10, %v1308_v18  ;;  %v1787_v27 = vsel %vm1779_vm5, %v1754_v49, %v1182_v60  ;;  %v5289_v60 = vld [vmem:[%s5718_s14 + $0x13a] sm:$0xff] }
 0x1ac   : > { %1463 = vrot.lane.b32.xlu1 %v5255_v57, %s5647_s12  ;;  %1337 = vrot.lane.b32.xlu0 %v5224_v12, %s5646_s11  ;;  %v5226_v57 = vld [vmem:[%s5718_s14 + $0x140] sm:$0xff] }
 0x1ae   : > { %v1436_v25 = vpop.permute.xlu1 %1435  ;;  %v1310_v35 = vpop.permute.xlu0 %1309 }
 0x1af   : > { %v1852_v17 = vsel %vm1845_vm7, %v1819_v9, %v1436_v25  ;;  %v1820_v54 = vsel %vm9649_vm6, %v1787_v27, %v1310_v35  ;;  %v1756_v35 = vsel %vm9650_vm4, %v6341_v37, %v6586_v30  ;;  %v5228_v30 = vld [vmem:[%s5718_s14 + $0x158] sm:$0xff] }
 0x1b0   : > { %1591 = vrot.lane.b32.xlu1 %v5287_v13, %s5648_s13  ;;  %1465 = vrot.lane.b32.xlu0 %v5256_v24, %s5647_s12  ;;  %v5260_v27 = vld [vmem:[%s5718_s14 + $0x159] sm:$0xff] }
 0x1b2   : > { %v1564_v19 = vpop.permute.xlu1 %1563  ;;  %v1438_v55 = vpop.permute.xlu0 %1437 }
 0x1b3   : > { %v1885_v61 = vsel %vm9648_vm8, %v1852_v17, %v1564_v19  ;;  %v1853_v47 = vsel %vm1845_vm7, %v1820_v54, %v1438_v55  ;;  %v1757_v19 = vsel %vm9650_vm4, %v6364_v36, %v6597_v28 }
 0x1b4   : > { %1593 = vrot.lane.b32.xlu1 %v5288_v5, %s5648_s13  ;;  %1211 = vrot.lane.b32.xlu0 %v5287_v13, %s5645_s27 }
 0x1b5   : > { %5468 = vmatprep.mubr.msk.f32.mxu0 %vm1923_vm9, %v1885_v61  ;;  %v5291_v61 = vld [vmem:[%s5718_s14 + $0x152] sm:$0xff] }
 0x1b6   : > { %v1566_v44 = vpop.permute.xlu1 %1565  ;;  %v1184_v31 = vpop.permute.xlu0 %1183 }
 0x1b7   : > { %v1886_v46 = vsel %vm9648_vm8, %v1853_v47, %v1566_v44  ;;  %v1788_v13 = vsel %vm1779_vm5, %v1755_v1, %v1184_v31  ;;  %v1758_v44 = vsel %vm9650_vm4, %v6361_v23, %v6595_v3  ;;  %v5198_v3 = vld [vmem:[%s5718_s14 + $0x15a] sm:$0xff]  ;;  %v1759_v1 = vsel %vm9650_vm4, %v6384_v4, %v6605_v21 }
 0x1b8   : > { %1339 = vrot.lane.b32.xlu1 %v5225_v33, %s5646_s11  ;;  %1213 = vrot.lane.b32.xlu0 %v5288_v5, %s5645_s27  ;;  %v1760_v4 = vsel %vm9650_vm4, %v6381_v7, %v6603_v26 }
 0x1b9   : > { %5469 = vmatmul.mubr.msk.f32.gmra.mrb[6].mxu0 %vm1923_vm9, %v1886_v46 }
 0x1ba   : > { %v1312_v12 = vpop.permute.xlu1 %1311  ;;  %v1186_v18 = vpop.permute.xlu0 %1185 }
 0x1bb   : > { %v1821_v24 = vsel %vm9649_vm6, %v1788_v13, %v1312_v12  ;;  %v1789_v2 = vsel %vm1779_vm5, %v1756_v35, %v1186_v18 }
 0x1bc   : > { %1467 = vrot.lane.b32.xlu1 %v5257_v38, %s5647_s12  ;;  %1341 = vrot.lane.b32.xlu0 %v5226_v57, %s5646_s11 }
 0x1be   : > { %v1440_v0 = vpop.permute.xlu1 %1439  ;;  %v1314_v53 = vpop.permute.xlu0 %1313 }
 0x1bf   : > { %v1854_v40 = vsel %vm1845_vm7, %v1821_v24, %v1440_v0  ;;  %v1822_v8 = vsel %vm9649_vm6, %v1789_v2, %v1314_v53 }
 0x1c0   : > { %1595 = vrot.lane.b32.xlu1 %v5289_v60, %s5648_s13  ;;  %1469 = vrot.lane.b32.xlu0 %v5258_v41, %s5647_s12 }
 0x1c2   : > { %v1568_v52 = vpop.permute.xlu1 %1567  ;;  %v1442_v25 = vpop.permute.xlu0 %1441 }
 0x1c3   : > { %v1887_v51 = vsel %vm9648_vm8, %v1854_v40, %v1568_v52  ;;  %v1855_v56 = vsel %vm1845_vm7, %v1822_v8, %v1442_v25  ;;  %v6897_v40 = vld [vmem:[%s5718_s14 + $0x169] sm:$0xff] }
 0x1c4   : > { %1215 = vrot.lane.b32.xlu1 %v5289_v60, %s5645_s27  ;;  %1089 = vrot.lane.b32.xlu0 %v5258_v41, %s5644_s18  ;;  %v5230_v60 = vld [vmem:[%s5718_s14 + $0x170] sm:$0xff]  ;;  %v5229_v41 = vld [vmem:[%s5718_s14 + $0x168] sm:$0xff] }
 0x1c5   : > { %5471 = vmatprep.mubr.msk.f32.mxu0 %vm1923_vm9, %v1887_v51  ;;  %v5649_v51 = vmov 0.0  }
 0x1c6   : > { %v1570_v10 = vpop.permute.xlu1 %1569  ;;  %v1188_v22 = vpop.permute.xlu0 %1187  ;;  %2636 = vst.msk [vmem:[#allocation2 + $0x20] sm:$0xff] %vm1680_vm2, %v5649_v51  ;;  %2631 = vst.msk [vmem:[#allocation2] sm:$0xff] %vm1680_vm2, %v5649_v51 }
 0x1c7   : > { %v1888_v37 = vsel %vm9648_vm8, %v1855_v56, %v1570_v10  ;;  %v1790_v55 = vsel %vm1779_vm5, %v1757_v19, %v1188_v22  ;;  %2637 = vst.msk [vmem:[#allocation2 + $0x28] sm:$0x3] %vm2633_vm10, %v5649_v51  ;;  %2634 = vst.msk [vmem:[#allocation2 + $0x10] sm:$0x3] %vm2633_vm10, %v5649_v51  ;;  %v5262_v56 = vld [vmem:[%s5718_s14 + $0x171] sm:$0xff]  ;;  %v5232_v19 = vld [vmem:[%s5718_s14 + $0x188] sm:$0xff] }
 0x1c8   : > { %1217 = vrot.lane.b32.xlu1 %v5196_v34, %s5645_s27  ;;  %1597 = vrot.lane.b32.xlu0 %v5196_v34, %s5648_s13  ;;  %2632 = vst.msk [vmem:[#allocation2 + $0x8] sm:$0xff] %vm1680_vm2, %v5649_v51  ;;  %2635 = vst.msk [vmem:[#allocation2 + $0x18] sm:$0xff] %vm1680_vm2, %v5649_v51  ;;  %v5293_v34 = vld [vmem:[%s5718_s14 + $0x16a] sm:$0xff] }
 0x1c9   : > { %5472 = vmatmul.mubr.msk.f32.gmra.mrb[8].mxu0 %vm1923_vm9, %v1888_v37  ;;  %2638 = vst.msk [vmem:[#allocation2 + $0x30] sm:$0xff] %vm1680_vm2, %v5649_v51  ;;  %2639 = vst.msk [vmem:[#allocation2 + $0x38] sm:$0xff] %vm1680_vm2, %v5649_v51 }
 0x1ca   : > { %v1316_v9 = vpop.permute.xlu1 %1315  ;;  %v1190_v5 = vpop.permute.xlu0 %1189  ;;  %2640 = vst.msk [vmem:[#allocation2 + $0x40] sm:$0x3] %vm2633_vm10, %v5649_v51  ;;  %2643 = vst.msk [vmem:[#allocation2 + $0x58] sm:$0x3] %vm2633_vm10, %v5649_v51 }
 0x1cb   : > { %v1823_v49 = vsel %vm9649_vm6, %v1790_v55, %v1316_v9  ;;  %v1791_v28 = vsel %vm1779_vm5, %v1758_v44, %v1190_v5  ;;  %2641 = vst.msk [vmem:[#allocation2 + $0x48] sm:$0xff] %vm1680_vm2, %v5649_v51  ;;  %2642 = vst.msk [vmem:[#allocation2 + $0x50] sm:$0xff] %vm1680_vm2, %v5649_v51  ;;  %v5231_v55 = vld [vmem:[%s5718_s14 + $0x180] sm:$0xff] }
 0x1cc   : > { %1345 = vrot.lane.b32.xlu1 %v5228_v30, %s5646_s11  ;;  %1343 = vrot.lane.b32.xlu0 %v5227_v15, %s5646_s11  ;;  %2644 = vst.msk [vmem:[#allocation2 + $0x60] sm:$0xff] %vm1680_vm2, %v5649_v51  ;;  %2645 = vst.msk [vmem:[#allocation2 + $0x68] sm:$0xff] %vm1680_vm2, %v5649_v51  ;;  %v5200_v15 = vld [vmem:[%s5718_s14 + $0x172] sm:$0xff] }
 0x1cd   : > { %2646 = vst.msk [vmem:[#allocation2 + $0x70] sm:$0x3] %vm2633_vm10, %v5649_v51  ;;  %2649 = vst.msk [vmem:[#allocation2 + $0x88] sm:$0x3] %vm2633_vm10, %v5649_v51 }
 0x1ce   : > { %v1444_v16 = vpop.permute.xlu1 %1443  ;;  %v1318_v17 = vpop.permute.xlu0 %1317  ;;  %2647 = vst.msk [vmem:[#allocation2 + $0x78] sm:$0xff] %vm1680_vm2, %v5649_v51  ;;  %2648 = vst.msk [vmem:[#allocation2 + $0x80] sm:$0xff] %vm1680_vm2, %v5649_v51 }
 0x1cf   : > { %v1856_v54 = vsel %vm1845_vm7, %v1823_v49, %v1444_v16  ;;  %v1824_v31 = vsel %vm9649_vm6, %v1791_v28, %v1318_v17  ;;  %2650 = vst.msk [vmem:[#allocation2 + $0x90] sm:$0xff] %vm1680_vm2, %v5649_v51  ;;  %2651 = vst.msk [vmem:[#allocation2 + $0x98] sm:$0xff] %vm1680_vm2, %v5649_v51 }
 0x1d0   : > { %1091 = vrot.lane.b32.xlu1 %v5165_v43, %s5644_s18  ;;  %1471 = vrot.lane.b32.xlu0 %v5165_v43, %s5647_s12  ;;  %2652 = vst.msk [vmem:[#allocation2 + $0xa0] sm:$0x3] %vm2633_vm10, %v5649_v51  ;;  %2655 = vst.msk [vmem:[#allocation2 + $0xb8] sm:$0x3] %vm2633_vm10, %v5649_v51  ;;  %v1761_v43 = vsel %vm9650_vm4, %v6404_v6, %v6612_v14  ;;  %v1762_v6 = vsel %vm9650_vm4, %v6401_v20, %v6610_v50  ;;  %v5295_v50 = vld [vmem:[%s5718_s14 + $0x182] sm:$0xff] }
 0x1d1   : > { %2653 = vst.msk [vmem:[#allocation2 + $0xa8] sm:$0xff] %vm1680_vm2, %v5649_v51  ;;  %2654 = vst.msk [vmem:[#allocation2 + $0xb0] sm:$0xff] %vm1680_vm2, %v5649_v51 }
 0x1d2   : > { %v1572_v33 = vpop.permute.xlu1 %1571  ;;  %v1446_v47 = vpop.permute.xlu0 %1445  ;;  %2656 = vst.msk [vmem:[#allocation2 + $0xc0] sm:$0xff] %vm1680_vm2, %v5649_v51  ;;  %2657 = vst.msk [vmem:[#allocation2 + $0xc8] sm:$0xff] %vm1680_vm2, %v5649_v51 }
 0x1d3   : > { %v1889_v36 = vsel %vm9648_vm8, %v1856_v54, %v1572_v33  ;;  %v1857_v46 = vsel %vm1845_vm7, %v1824_v31, %v1446_v47  ;;  %2658 = vst.msk [vmem:[#allocation2 + $0xd0] sm:$0x3] %vm2633_vm10, %v5649_v51  ;;  %2661 = vst.msk [vmem:[#allocation2 + $0xe8] sm:$0x3] %vm2633_vm10, %v5649_v51  ;;  %v5169_v47 = vld [vmem:[%s5718_s14 + $0x181] sm:$0xff]  ;;  %v5264_v31 = vld [vmem:[%s5718_s14 + $0x189] sm:$0xff] }
 0x1d4   : > { %1599 = vrot.lane.b32.xlu1 %v5291_v61, %s5648_s13  ;;  %1473 = vrot.lane.b32.xlu0 %v5260_v27, %s5647_s12  ;;  %2659 = vst.msk [vmem:[#allocation2 + $0xd8] sm:$0xff] %vm1680_vm2, %v5649_v51  ;;  %2660 = vst.msk [vmem:[#allocation2 + $0xe0] sm:$0xff] %vm1680_vm2, %v5649_v51 }
 0x1d5   : > { %5474 = vmatprep.mubr.msk.f32.mxu0 %vm1923_vm9, %v1889_v36  ;;  %2662 = vst.msk [vmem:[#allocation2 + $0xf0] sm:$0xff] %vm1680_vm2, %v5649_v51  ;;  %2663 = vst.msk [vmem:[#allocation2 + $0xf8] sm:$0xff] %vm1680_vm2, %v5649_v51 }
 0x1d6   : > { %v1574_v38 = vpop.permute.xlu1 %1573  ;;  %v1192_v57 = vpop.permute.xlu0 %1191  ;;  %2664 = vst.msk [vmem:[#allocation2 + $0x100] sm:$0x3] %vm2633_vm10, %v5649_v51  ;;  %2667 = vst.msk [vmem:[#allocation2 + $0x118] sm:$0x3] %vm2633_vm10, %v5649_v51 }
 0x1d7   : > { %v1890_v23 = vsel %vm9648_vm8, %v1857_v46, %v1574_v38  ;;  %v1792_v13 = vsel %vm1779_vm5, %v1759_v1, %v1192_v57  ;;  %2665 = vst.msk [vmem:[#allocation2 + $0x108] sm:$0xff] %vm1680_vm2, %v5649_v51  ;;  %2666 = vst.msk [vmem:[#allocation2 + $0x110] sm:$0xff] %vm1680_vm2, %v5649_v51  ;;  %v1764_v1 = vsel %vm9650_vm4, %v6421_v58, %v6619_v45 }
 0x1d8   : > { %1219 = vrot.lane.b32.xlu1 %v5291_v61, %s5645_s27  ;;  %1093 = vrot.lane.b32.xlu0 %v5260_v27, %s5644_s18  ;;  %2668 = vst.msk [vmem:[#allocation2 + $0x120] sm:$0xff] %vm1680_vm2, %v5649_v51  ;;  %2669 = vst.msk [vmem:[#allocation2 + $0x128] sm:$0xff] %vm1680_vm2, %v5649_v51 }
 0x1d9   : > { %5475 = vmatmul.mubr.msk.f32.gmra.mrb[10].mxu0 %vm1923_vm9, %v1890_v23  ;;  %2670 = vst.msk [vmem:[#allocation2 + $0x130] sm:$0x3] %vm2633_vm10, %v5649_v51  ;;  %2673 = vst.msk [vmem:[#allocation2 + $0x148] sm:$0x3] %vm2633_vm10, %v5649_v51 }
 0x1da   : > { %v1320_v12 = vpop.permute.xlu1 %1319  ;;  %v6881_v18 = vpop.permute.xlu0 %1193  ;;  %2671 = vst.msk [vmem:[#allocation2 + $0x138] sm:$0xff] %vm1680_vm2, %v5649_v51  ;;  %2672 = vst.msk [vmem:[#allocation2 + $0x140] sm:$0xff] %vm1680_vm2, %v5649_v51 }
 0x1db   : > { %v1825_v24 = vsel %vm9649_vm6, %v1792_v13, %v1320_v12  ;;  %2674 = vst.msk [vmem:[#allocation2 + $0x150] sm:$0xff] %vm1680_vm2, %v5649_v51  ;;  %2675 = vst.msk [vmem:[#allocation2 + $0x158] sm:$0xff] %vm1680_vm2, %v5649_v51  ;;  %v1793_v2 = vsel %vm1779_vm5, %v1760_v4, %v6881_v18 }
 0x1dc   : > { %1221 = vrot.lane.b32.xlu1 %v5198_v3, %s5645_s27  ;;  %1601 = vrot.lane.b32.xlu0 %v5198_v3, %s5648_s13  ;;  %2676 = vst.msk [vmem:[#allocation2 + $0x160] sm:$0x3] %vm2633_vm10, %v5649_v51  ;;  %2679 = vst.msk [vmem:[#allocation2 + $0x178] sm:$0x3] %vm2633_vm10, %v5649_v51  ;;  %v1763_v3 = vsel %vm9650_vm4, %v6424_v39, %v6621_v48 }
 0x1dd   : > { %2677 = vst.msk [vmem:[#allocation2 + $0x168] sm:$0xff] %vm1680_vm2, %v5649_v51  ;;  %2678 = vst.msk [vmem:[#allocation2 + $0x170] sm:$0xff] %vm1680_vm2, %v5649_v51 }
 0x1de   : > { %v1448_v0 = vpop.permute.xlu1 %1447  ;;  %v6887_v53 = vpop.permute.xlu0 %1321  ;;  %2680 = vst.msk [vmem:[#allocation2 + $0x180] sm:$0xff] %vm1680_vm2, %v5649_v51  ;;  %2681 = vst.msk [vmem:[#allocation2 + $0x188] sm:$0xff] %vm1680_vm2, %v5649_v51 }
 0x1df   : > { %v1858_v52 = vsel %vm1845_vm7, %v1825_v24, %v1448_v0  ;;  %2682 = vst.msk [vmem:[#allocation2 + $0x190] sm:$0x3] %vm2633_vm10, %v5649_v51  ;;  %2685 = vst.msk [vmem:[#allocation2 + $0x1a8] sm:$0x3] %vm2633_vm10, %v5649_v51  ;;  %v1826_v8 = vsel %vm9649_vm6, %v1793_v2, %v6887_v53  ;;  %v5234_v24 = vld [vmem:[%s5718_s14 + $0x1a0] sm:$0xff] }
 0x1e0   : > { %1349 = vrot.lane.b32.xlu1 %v5230_v60, %s5646_s11  ;;  %1347 = vrot.lane.b32.xlu0 %v5229_v41, %s5646_s11  ;;  %2683 = vst.msk [vmem:[#allocation2 + $0x198] sm:$0xff] %vm1680_vm2, %v5649_v51  ;;  %2684 = vst.msk [vmem:[#allocation2 + $0x1a0] sm:$0xff] %vm1680_vm2, %v5649_v51  ;;  %v5202_v60 = vld [vmem:[%s5718_s14 + $0x18a] sm:$0xff]  ;;  %v5265_v51 = vld [vmem:[%s5718_s14 + $0x199] sm:$0xff] }
 0x1e1   : > { %v5298_v2 = vld [vmem:[%s5718_s14 + $0x1a2] sm:$0xff] }
 0x1e2   : > { %v1576_v25 = vpop.permute.xlu1 %1575  ;;  %v6900_v35 = vpop.permute.xlu0 %1449 }
 0x1e3   : > { %v1891_v21 = vsel %vm9648_vm8, %v1858_v52, %v1576_v25  ;;  %v1859_v7 = vsel %vm1845_vm7, %v1826_v8, %v6900_v35  ;;  %v5266_v35 = vld [vmem:[%s5718_s14 + $0x1a1] sm:$0xff] }
 0x1e4   : > { %1095 = vrot.lane.b32.xlu1 %v6897_v40, %s5644_s18  ;;  %1475 = vrot.lane.b32.xlu0 %v6897_v40, %s5647_s12  ;;  %v5233_v40 = vld [vmem:[%s5718_s14 + $0x198] sm:$0xff] }
 0x1e5   : > { %5477 = vmatprep.mubr.msk.f32.mxu0 %vm1923_vm9, %v1891_v21  ;;  %v5297_v8 = vld [vmem:[%s5718_s14 + $0x19a] sm:$0xff] }
 0x1e6   : > { %v1578_v26 = vpop.permute.xlu1 %1577  ;;  %v1196_v10 = vpop.permute.xlu0 %1195 }
 0x1e7   : > { %v1892_v22 = vsel %vm9648_vm8, %v1859_v7, %v1578_v26  ;;  %v1794_v16 = vsel %vm1779_vm5, %v1761_v43, %v1196_v10  ;;  %v1765_v7 = vsel %vm9650_vm4, %v6444_v63, %v6629_v32 }
 0x1e8   : > { %1603 = vrot.lane.b32.xlu1 %v5293_v34, %s5648_s13  ;;  %1477 = vrot.lane.b32.xlu0 %v5262_v56, %s5647_s12 }
 0x1e9   : > { %5478 = vmatmul.mubr.msk.f32.gmra.mrb[12].mxu0 %vm1923_vm9, %v1892_v22 }
 0x1ea   : > { %v1324_v37 = vpop.permute.xlu1 %1323  ;;  %v1198_v30 = vpop.permute.xlu0 %1197 }
 0x1eb   : > { %v1827_v17 = vsel %vm9649_vm6, %v1794_v16, %v1324_v37  ;;  %v1795_v54 = vsel %vm1779_vm5, %v1762_v6, %v1198_v30 }
 0x1ec   : > { %1223 = vrot.lane.b32.xlu1 %v5293_v34, %s5645_s27  ;;  %1097 = vrot.lane.b32.xlu0 %v5262_v56, %s5644_s18 }
 0x1ee   : > { %v1452_v9 = vpop.permute.xlu1 %1451  ;;  %v1326_v5 = vpop.permute.xlu0 %1325 }
 0x1ef   : > { %v1860_v49 = vsel %vm1845_vm7, %v1827_v17, %v1452_v9  ;;  %v1828_v33 = vsel %vm9649_vm6, %v1795_v54, %v1326_v5 }
 0x1f0   : > { %1225 = vrot.lane.b32.xlu1 %v5200_v15, %s5645_s27  ;;  %1605 = vrot.lane.b32.xlu0 %v5200_v15, %s5648_s13  ;;  %v1766_v15 = vsel %vm9650_vm4, %v6441_v62, %v6627_v11  ;;  %v1767_v11 = vsel %vm9650_vm4, %v6464_v59, %v6638_v42 }
 0x1f2   : > { %v1580_v61 = vpop.permute.xlu1 %1579  ;;  %v1454_v27 = vpop.permute.xlu0 %1453 }
 0x1f3   : > { %v1893_v14 = vsel %vm9648_vm8, %v1860_v49, %v1580_v61  ;;  %v1861_v44 = vsel %vm1845_vm7, %v1828_v33, %v1454_v27  ;;  %v9781_v33 = vld [vmem:[#allocation23_spill] sm:$0xff] }
 0x1f4   : > { %1353 = vrot.lane.b32.xlu1 %v5232_v19, %s5646_s11  ;;  %1351 = vrot.lane.b32.xlu0 %v5231_v55, %s5646_s11 }
 0x1f5   : > { %5480 = vmatprep.mubr.msk.f32.mxu0 %vm1923_vm9, %v1893_v14 }
 0x1f6   : > { %v1582_v36 = vpop.permute.xlu1 %1581  ;;  %v1200_v28 = vpop.permute.xlu0 %1199 }
 0x1f7   : > { %v1894_v20 = vsel %vm9648_vm8, %v1861_v44, %v1582_v36  ;;  %v1796_v12 = vsel %vm1779_vm5, %v1763_v3, %v1200_v28 }
 0x1f8   : > { %1099 = vrot.lane.b32.xlu1 %v5169_v47, %s5644_s18  ;;  %1479 = vrot.lane.b32.xlu0 %v5169_v47, %s5647_s12  ;;  %v1768_v47 = vsel %vm9650_vm4, %v9781_v33, %v6636_v29 }
 0x1f9   : > { %5481 = vmatmul.mubr.msk.f32.gmra.mrb[14].mxu0 %vm1923_vm9, %v1894_v20 }
 0x1fa   : > { %v1328_v46 = vpop.permute.xlu1 %1327  ;;  %v1202_v38 = vpop.permute.xlu0 %1201 }
 0x1fb   : > { %v1829_v18 = vsel %vm9649_vm6, %v1796_v12, %v1328_v46  ;;  %v1797_v48 = vsel %vm1779_vm5, %v1764_v1, %v1202_v38 }
 0x1fc   : > { %1607 = vrot.lane.b32.xlu1 %v5295_v50, %s5648_s13  ;;  %1481 = vrot.lane.b32.xlu0 %v5264_v31, %s5647_s12 }
 0x1fe   : > { %v1456_v57 = vpop.permute.xlu1 %1455  ;;  %v1330_v23 = vpop.permute.xlu0 %1329 }
 0x1ff   : > { %v1862_v41 = vsel %vm1845_vm7, %v1829_v18, %v1456_v57  ;;  %v1830_v13 = vsel %vm9649_vm6, %v1797_v48, %v1330_v23  ;;  %v9782_v57 = vld [vmem:[#allocation37_spill] sm:$0xff]  ;;  %v9783_v23 = vld [vmem:[#allocation3_spill] sm:$0xff] }
 0x200   : > { %1227 = vrot.lane.b32.xlu1 %v5295_v50, %s5645_s27  ;;  %1101 = vrot.lane.b32.xlu0 %v5264_v31, %s5644_s18  ;;  %v1769_v3 = vsel %vm9650_vm4, %v9783_v23, %v9782_v57  ;;  %v9784_v48 = vld [vmem:[#allocation29_spill] sm:$0xff] }
 0x202   : > { %v1584_v0 = vpop.permute.xlu1 %1583  ;;  %v1458_v53 = vpop.permute.xlu0 %1457 }
 0x203   : > { %v1895_v39 = vsel %vm9648_vm8, %v1862_v41, %v1584_v0  ;;  %v1863_v58 = vsel %vm1845_vm7, %v1830_v13, %v1458_v53  ;;  %v9785_v13 = vld [vmem:[#allocation28_spill] sm:$0xff] }
 0x204   : > { %1229 = vrot.lane.b32.xlu1 %v5202_v60, %s5645_s27  ;;  %1609 = vrot.lane.b32.xlu0 %v5202_v60, %s5648_s13  ;;  %s5653_s27 = smov 64  }
 0x205   : > { %5483 = vmatprep.mubr.msk.f32.mxu0 %vm1923_vm9, %v1895_v39 }
 0x206   : > { %v1586_v45 = vpop.permute.xlu1 %1585  ;;  %v1204_v52 = vpop.permute.xlu0 %1203 }
 0x207   : > { %v1896_v25 = vsel %vm9648_vm8, %v1863_v58, %v1586_v45  ;;  %v1798_v26 = vsel %vm1779_vm5, %v1765_v7, %v1204_v52 }
 0x208   : > { %1357 = vrot.lane.b32.xlu1 %v5234_v24, %s5646_s11  ;;  %1355 = vrot.lane.b32.xlu0 %v5233_v40, %s5646_s11  ;;  %v1770_v24 = vsel %vm9650_vm4, %v9785_v13, %v9784_v48 }
 0x209   : > { %5484 = vmatmul.mubr.msk.f32.gmra.mrb[16].mxu0 %vm1923_vm9, %v1896_v25 }
 0x20a   : > { %v1332_v4 = vpop.permute.xlu1 %1331  ;;  %v1206_v21 = vpop.permute.xlu0 %1205 }
 0x20b   : > { %v1831_v10 = vsel %vm9649_vm6, %v1798_v26, %v1332_v4  ;;  %v1799_v63 = vsel %vm1779_vm5, %v1766_v15, %v1206_v21 }
 0x20c   : > { %1485 = vrot.lane.b32.xlu1 %v5266_v35, %s5647_s12  ;;  %1483 = vrot.lane.b32.xlu0 %v5265_v51, %s5647_s12  ;;  %s5651_s12 = smov 48  }
 0x20e   : > { %v1460_v34 = vpop.permute.xlu1 %1459  ;;  %v1334_v56 = vpop.permute.xlu0 %1333 }
 0x20f   : > { %v1864_v22 = vsel %vm1845_vm7, %v1831_v10, %v1460_v34  ;;  %v1832_v32 = vsel %vm9649_vm6, %v1799_v63, %v1334_v56  ;;  %v9787_v34 = vld [vmem:[#allocation31_spill] sm:$0xff]  ;;  %v9788_v63 = vld [vmem:[#allocation24_spill] sm:$0xff] }
 0x210   : > { %1613 = vrot.lane.b32.xlu1 %v5298_v2, %s5648_s13  ;;  %1611 = vrot.lane.b32.xlu0 %v5297_v8, %s5648_s13  ;;  %v9786_v8 = vld [vmem:[#allocation30_spill] sm:$0xff] }
 0x211   : > { %v1771_v56 = vsel %vm9650_vm4, %v9787_v34, %v9786_v8 }
 0x212   : > { %v1588_v37 = vpop.permute.xlu1 %1587  ;;  %v1462_v30 = vpop.permute.xlu0 %1461 }
 0x213   : > { %v1897_v9 = vsel %vm9648_vm8, %v1864_v22, %v1588_v37  ;;  %v1865_v5 = vsel %vm1845_vm7, %v1832_v32, %v1462_v30 }
 0x214   : > { %5486 = vmatprep.mubr.msk.f32.mxu0 %vm1923_vm9, %v1897_v9 }
 0x216   : > { %v1590_v43 = vpop.permute.xlu1 %1589  ;;  %v1208_v16 = vpop.permute.xlu0 %1207 }
 0x217   : > { %v1898_v17 = vsel %vm9648_vm8, %v1865_v5, %v1590_v43  ;;  %v1800_v61 = vsel %vm1779_vm5, %v1767_v11, %v1208_v16 }
 0x218   : > { %5487 = vmatmul.mubr.msk.f32.gmra.mrb[18].mxu0 %vm1923_vm9, %v1898_v17 }
 0x21a   : > { %v1336_v19 = vpop.permute.xlu1 %1335  ;;  %v1210_v55 = vpop.permute.xlu0 %1209 }
 0x21b   : > { %v1833_v27 = vsel %vm9649_vm6, %v1800_v61, %v1336_v19  ;;  %v1801_v36 = vsel %vm1779_vm5, %v1768_v47, %v1210_v55 }
 0x21e   : > { %v1464_v49 = vpop.permute.xlu1 %1463  ;;  %v1338_v62 = vpop.permute.xlu0 %1337 }
 0x21f   : > { %v1866_v6 = vsel %vm1845_vm7, %v1833_v27, %v1464_v49  ;;  %v1834_v59 = vsel %vm9649_vm6, %v1801_v36, %v1338_v62  ;;  %v9789_v27 = vld [vmem:[#allocation32_spill] sm:$0xff] }
 0x222   : > { %v1592_v14 = vpop.permute.xlu1 %1591  ;;  %v1466_v54 = vpop.permute.xlu0 %1465 }
 0x223   : > { %v1899_v44 = vsel %vm9648_vm8, %v1866_v6, %v1592_v14  ;;  %v1867_v42 = vsel %vm1845_vm7, %v1834_v59, %v1466_v54 }
 0x224   : > { %5489 = vmatprep.mubr.msk.f32.mxu0 %vm1923_vm9, %v1899_v44 }
 0x226   : > { %v1594_v28 = vpop.permute.xlu1 %1593  ;;  %v1212_v20 = vpop.permute.xlu0 %1211 }
 0x227   : > { %v1900_v50 = vsel %vm9648_vm8, %v1867_v42, %v1594_v28  ;;  %v1802_v12 = vsel %vm1779_vm5, %v1769_v3, %v1212_v20 }
 0x228   : > { %5490 = vmatmul.mubr.msk.f32.gmra.mrb[20].mxu0 %vm1923_vm9, %v1900_v50  ;;  %v9790_v50 = vld [vmem:[#allocation25_spill] sm:$0xff] }
 0x22a   : > { %v1340_v31 = vpop.permute.xlu1 %1339  ;;  %v1214_v46 = vpop.permute.xlu0 %1213 }
 0x22b   : > { %v1835_v18 = vsel %vm9649_vm6, %v1802_v12, %v1340_v31  ;;  %v1803_v40 = vsel %vm1779_vm5, %v1770_v24, %v1214_v46 }
 0x22e   : > { %v1468_v38 = vpop.permute.xlu1 %1467  ;;  %v1342_v29 = vpop.permute.xlu0 %1341 }
 0x22f   : > { %v1868_v60 = vsel %vm1845_vm7, %v1835_v18, %v1468_v38  ;;  %v1836_v58 = vsel %vm9649_vm6, %v1803_v40, %v1342_v29 }
 0x232   : > { %v1596_v41 = vpop.permute.xlu1 %1595  ;;  %v1470_v0 = vpop.permute.xlu0 %1469 }
 0x233   : > { %v1901_v53 = vsel %vm9648_vm8, %v1868_v60, %v1596_v41  ;;  %v1869_v45 = vsel %vm1845_vm7, %v1836_v58, %v1470_v0  ;;  %v9791_v0 = vld [vmem:[#allocation35_spill] sm:$0xff] }
 0x234   : > { %5492 = vmatprep.mubr.msk.f32.mxu0 %vm1923_vm9, %v1901_v53 }
 0x236   : > { %v1216_v1 = vpop.permute.xlu1 %1215  ;;  %v1090_v39 = vpop.permute.xlu0 %1089 }
 0x237   : > { %v1804_v7 = vsel %vm1779_vm5, %v1771_v56, %v1216_v1  ;;  %v1772_v32 = vsel %vm9650_vm4, %v9788_v63, %v1090_v39  ;;  %v9794_v63 = vld [vmem:[#allocation27_spill] sm:$0xff] }
 0x23a   : > { %v1218_v52 = vpop.permute.xlu1 %1217  ;;  %v1598_v25 = vpop.permute.xlu0 %1597 }
 0x23b   : > { %v1902_v35 = vsel %vm9648_vm8, %v1869_v45, %v1598_v25  ;;  %v1805_v5 = vsel %vm1779_vm5, %v1772_v32, %v1218_v52 }
 0x23c   : > { %5493 = vmatmul.mubr.msk.f32.gmra.mrb[22].mxu0 %vm1923_vm9, %v1902_v35  ;;  %v9792_v35 = vld [vmem:[#allocation26_spill] sm:$0xff] }
 0x23e   : > { %v1346_v51 = vpop.permute.xlu1 %1345  ;;  %v1344_v4 = vpop.permute.xlu0 %1343 }
 0x23f   : > { %v1837_v26 = vsel %vm9649_vm6, %v1804_v7, %v1344_v4  ;;  %v1838_v43 = vsel %vm9649_vm6, %v1805_v5, %v1346_v51 }
 0x242   : > { %v1092_v21 = vpop.permute.xlu1 %1091  ;;  %v1472_v2 = vpop.permute.xlu0 %1471 }
 0x243   : > { %v1870_v10 = vsel %vm1845_vm7, %v1837_v26, %v1472_v2  ;;  %v1773_v6 = vsel %vm9650_vm4, %v9789_v27, %v1092_v21 }
 0x246   : > { %v1600_v22 = vpop.permute.xlu1 %1599  ;;  %v1474_v37 = vpop.permute.xlu0 %1473 }
 0x247   : > { %v1903_v30 = vsel %vm9648_vm8, %v1870_v10, %v1600_v22  ;;  %v1871_v16 = vsel %vm1845_vm7, %v1838_v43, %v1474_v37 }
 0x248   : > { %5495 = vmatprep.mubr.msk.f32.mxu0 %vm1923_vm9, %v1903_v30 }
 0x24a   : > { %v1220_v15 = vpop.permute.xlu1 %1219  ;;  %v1094_v9 = vpop.permute.xlu0 %1093 }
 0x24b   : > { %v1806_v14 = vsel %vm1779_vm5, %v1773_v6, %v1220_v15  ;;  %v1774_v31 = vsel %vm9650_vm4, %v9790_v50, %v1094_v9  ;;  %v9793_v15 = vld [vmem:[#allocation36_spill] sm:$0xff] }
 0x24e   : > { %v1222_v17 = vpop.permute.xlu1 %1221  ;;  %v1602_v19 = vpop.permute.xlu0 %1601 }
 0x24f   : > { %v1904_v55 = vsel %vm9648_vm8, %v1871_v16, %v1602_v19  ;;  %v1807_v46 = vsel %vm1779_vm5, %v1774_v31, %v1222_v17 }
 0x250   : > { %5496 = vmatmul.mubr.msk.f32.gmra.mrb[24].mxu0 %vm1923_vm9, %v1904_v55 }
 0x252   : > { %v1350_v49 = vpop.permute.xlu1 %1349  ;;  %v1348_v62 = vpop.permute.xlu0 %1347 }
 0x253   : > { %v1839_v54 = vsel %vm9649_vm6, %v1806_v14, %v1348_v62  ;;  %v1840_v38 = vsel %vm9649_vm6, %v1807_v46, %v1350_v49  ;;  %v7170_v46 = vld [vmem:[%s9602_s2] ss:$0 sm:$0xff] }
 0x256   : > { %v1096_v11 = vpop.permute.xlu1 %1095  ;;  %v1476_v61 = vpop.permute.xlu0 %1475 }
 0x257   : > { %v1872_v33 = vsel %vm1845_vm7, %v1839_v54, %v1476_v61  ;;  %v1775_v53 = vsel %vm9650_vm4, %v9791_v0, %v1096_v11 }
 0x25a   : > { %v1604_v47 = vpop.permute.xlu1 %1603  ;;  %v1478_v44 = vpop.permute.xlu0 %1477 }
 0x25b   : > { %v1905_v36 = vsel %vm9648_vm8, %v1872_v33, %v1604_v47  ;;  %v1873_v29 = vsel %vm1845_vm7, %v1840_v38, %v1478_v44 }
 0x25c   : > { %v7111_v59 = vpop.f32.mrb[0].mxu0  ;;  %5498 = vmatprep.mubr.msk.f32.mxu0 %vm1923_vm9, %v1905_v36 }
 0x25d   : > { %v7114_v42 = vpop.f32.mrb[1].mxu0  ;;  %v7174_v38 = vadd.f32 %v7111_v59, %v7170_v46 }
 0x25e   : > { %v1224_v28 = vpop.permute.xlu1 %1223  ;;  %v1098_v20 = vpop.permute.xlu0 %1097 }
 0x25f   : > { %v1808_v1 = vsel %vm1779_vm5, %v1775_v53, %v1224_v28  ;;  %v1776_v51 = vsel %vm9650_vm4, %v9792_v35, %v1098_v20  ;;  %v2250_v59 = vsel %vm1680_vm2, %v7174_v38, 0.0 }
 0x262   : > { %v1226_v57 = vpop.permute.xlu1 %1225  ;;  %v1606_v23 = vpop.permute.xlu0 %1605 }
 0x263   : > { %v1906_v3 = vsel %vm9648_vm8, %v1873_v29, %v1606_v23  ;;  %v1809_v4 = vsel %vm1779_vm5, %v1776_v51, %v1226_v57  ;;  %v7178_v29 = vadd.f32 %v7170_v46, %v7114_v42 }
 0x264   : > { %5499 = vmatmul.mubr.msk.f32.gmra.mrb[26].mxu0 %vm1923_vm9, %v1906_v3  ;;  %v2320_v3 = vmul.f32 %v7174_v38, %v7174_v38 }
 0x265   : > { %v2249_v42 = vsel %vm1680_vm2, %v7178_v29, 0.0 }
 0x266   : > { %v1354_v12 = vpop.permute.xlu1 %1353  ;;  %v1352_v18 = vpop.permute.xlu0 %1351 }
 0x267   : > { %v1841_v48 = vsel %vm9649_vm6, %v1808_v1, %v1352_v18  ;;  %v1842_v21 = vsel %vm9649_vm6, %v1809_v4, %v1354_v12  ;;  %v2319_v18 = vmul.f32 %v7178_v29, %v7178_v29 }
 0x269   : > { %v2351_v0 = vsel %vm1680_vm2, %v2319_v18, 0.0 }
 0x26a   : > { %v1100_v60 = vpop.permute.xlu1 %1099  ;;  %v1480_v41 = vpop.permute.xlu0 %1479 }
 0x26b   : > { %v1874_v24 = vsel %vm1845_vm7, %v1841_v48, %v1480_v41  ;;  %v1777_v9 = vsel %vm9650_vm4, %v9793_v15, %v1100_v60  ;;  %v2352_v41 = vsel %vm1680_vm2, %v2320_v3, 0.0 }
 0x26c   : > { %v7126_v39 = vpop.f32.mrb[2].mxu0 }
 0x26d   : > { %v2100_v13 = vpop.f32.mrb[3].mxu0  ;;  %v7201_v53 = vadd.f32 %v7126_v39, %v7170_v46 }
 0x26e   : > { %v1608_v40 = vpop.permute.xlu1 %1607  ;;  %v1482_v58 = vpop.permute.xlu0 %1481  ;;  %v7181_v57 = vadd.f32 %v7170_v46, %v2100_v13  ;;  %v2251_v13 = vadd.f32 %v2250_v59, %v2249_v42 }
 0x26f   : > { %v1907_v45 = vsel %vm9648_vm8, %v1874_v24, %v1608_v40  ;;  %v1875_v2 = vsel %vm1845_vm7, %v1842_v21, %v1482_v58  ;;  %v2353_v40 = vadd.f32 %v2352_v41, %v2351_v0  ;;  %v2254_v39 = vsel %vm1680_vm2, %v7201_v53, 0.0 }
 0x270   : > { %5501 = vmatprep.mubr.msk.f32.mxu0 %vm1923_vm9, %v1907_v45  ;;  %v2321_v60 = vmul.f32 %v7181_v57, %v7181_v57  ;;  %v2252_v1 = vsel %vm1680_vm2, %v7181_v57, 0.0  ;;  %v2322_v45 = vmul.f32 %v7201_v53, %v7201_v53 }
 0x271   : > { %v2253_v58 = vadd.f32 %v2252_v1, %v2251_v13 }
 0x272   : > { %v1228_v52 = vpop.permute.xlu1 %1227  ;;  %v1102_v25 = vpop.permute.xlu0 %1101  ;;  %v2354_v24 = vsel %vm1680_vm2, %v2321_v60, 0.0 }
 0x273   : > { %v1778_v32 = vsel %vm9650_vm4, %v9794_v63, %v1102_v25  ;;  %v1810_v5 = vsel %vm1779_vm5, %v1777_v9, %v1228_v52  ;;  %v2355_v25 = vadd.f32 %v2354_v24, %v2353_v40  ;;  %v2255_v21 = vadd.f32 %v2254_v39, %v2253_v58 }
 0x276   : > { %v1230_v8 = vpop.permute.xlu1 %1229  ;;  %v1610_v34 = vpop.permute.xlu0 %1609 }
 0x277   : > { %v1908_v56 = vsel %vm9648_vm8, %v1875_v2, %v1610_v34  ;;  %v1811_v43 = vsel %vm1779_vm5, %v1778_v32, %v1230_v8  ;;  %v2356_v2 = vsel %vm1680_vm2, %v2322_v45, 0.0 }
 0x278   : > { %5502 = vmatmul.mubr.msk.f32.gmra.mrb[28].mxu0 %vm1923_vm9, %v1908_v56  ;;  %v2357_v56 = vadd.f32 %v2356_v2, %v2355_v25  ;;  %v2752_v25 = vld [vmem:[#allocation2 + $0x9] sm:$0xff] }
 0x279   : > { %3042 = vrot.lane.b32.xlu1 %v2752_v25, %s5642_s16 }
 0x27a   : > { %v1358_v7 = vpop.permute.xlu1 %1357  ;;  %v1356_v26 = vpop.permute.xlu0 %1355 }
 0x27b   : > { %v1844_v16 = vsel %vm9649_vm6, %v1811_v43, %v1358_v7  ;;  %v1843_v17 = vsel %vm9649_vm6, %v1810_v5, %v1356_v26 }
 0x27c   : > { %v5467_v10 = vpop.f32.mrb[4].mxu0 }
 0x27d   : > { %v2110_v22 = vpop.f32.mrb[5].mxu0  ;;  %v7216_v35 = vadd.f32 %v5467_v10, %v7170_v46 }
 0x27e   : > { %v1486_v37 = vpop.permute.xlu1 %1485  ;;  %v1484_v30 = vpop.permute.xlu0 %1483  ;;  %v7206_v48 = vadd.f32 %v7170_v46, %v2110_v22 }
 0x27f   : > { %v1877_v19 = vsel %vm1845_vm7, %v1844_v16, %v1486_v37  ;;  %v1876_v55 = vsel %vm1845_vm7, %v1843_v17, %v1484_v30  ;;  %v2324_v7 = vmul.f32 %v7216_v35, %v7216_v35  ;;  %v2258_v30 = vsel %vm1680_vm2, %v7216_v35, 0.0 }
 0x280   : > { %v2323_v52 = vmul.f32 %v7206_v48, %v7206_v48  ;;  %v2256_v51 = vsel %vm1680_vm2, %v7206_v48, 0.0 }
 0x281   : > { %v2257_v34 = vadd.f32 %v2256_v51, %v2255_v21  ;;  %v2360_v5 = vsel %vm1680_vm2, %v2324_v7, 0.0  ;;  %v2751_v51 = vld [vmem:[#allocation2 + $0x1] sm:$0xff] }
 0x282   : > { %v1614_v49 = vpop.permute.xlu1 %1613  ;;  %v1612_v62 = vpop.permute.xlu0 %1611  ;;  %v2358_v8 = vsel %vm1680_vm2, %v2323_v52, 0.0  ;;  %3040 = vrot.lane.b32.xlu0 %v2751_v51, %s5642_s16 }
 0x283   : > { %v1910_v11 = vsel %vm9648_vm8, %v1877_v19, %v1614_v49  ;;  %v1909_v61 = vsel %vm9648_vm8, %v1876_v55, %v1612_v62  ;;  %v2359_v22 = vadd.f32 %v2358_v8, %v2357_v56  ;;  %v2259_v32 = vadd.f32 %v2258_v30, %v2257_v34 }
 0x284   : > { %5504 = vmatprep.mubr.msk.f32.mxu0 %vm1923_vm9, %v1909_v61 }
 0x285   : > { %5505 = vmatmul.mubr.msk.f32.gmra.mrb[30].mxu0 %vm1923_vm9, %v1910_v11  ;;  %v2361_v17 = vadd.f32 %v2360_v5, %v2359_v22 }
 0x28c   : > { %v5470_v27 = vpop.f32.mrb[6].mxu0 }
 0x28d   : > { %v2120_v6 = vpop.f32.mrb[7].mxu0  ;;  %v7236_v15 = vadd.f32 %v5470_v27, %v7170_v46 }
 0x28e   : > { %v7221_v4 = vadd.f32 %v7170_v46, %v2120_v6 }
 0x28f   : > { %v2326_v19 = vmul.f32 %v7236_v15, %v7236_v15  ;;  %v2262_v62 = vsel %vm1680_vm2, %v7236_v15, 0.0 }
 0x290   : > { %v2325_v26 = vmul.f32 %v7221_v4, %v7221_v4  ;;  %v2260_v9 = vsel %vm1680_vm2, %v7221_v4, 0.0 }
 0x291   : > { %v2261_v16 = vadd.f32 %v2260_v9, %v2259_v32 }
 0x292   : > { %v2362_v43 = vsel %vm1680_vm2, %v2325_v26, 0.0 }
 0x293   : > { %v2363_v49 = vadd.f32 %v2362_v43, %v2361_v17  ;;  %v2263_v6 = vadd.f32 %v2262_v62, %v2261_v16 }
 0x29c   : > { %v5473_v14 = vpop.f32.mrb[8].mxu0 }
 0x29d   : > { %v2130_v54 = vpop.f32.mrb[9].mxu0  ;;  %v7252_v11 = vadd.f32 %v5473_v14, %v7170_v46 }
 0x29e   : > { %v7241_v63 = vadd.f32 %v7170_v46, %v2130_v54  ;;  %v2364_v54 = vsel %vm1680_vm2, %v2326_v19, 0.0 }
 0x29f   : > { %v2365_v59 = vadd.f32 %v2364_v54, %v2363_v49  ;;  %v2328_v42 = vmul.f32 %v7252_v11, %v7252_v11  ;;  %v2266_v41 = vsel %vm1680_vm2, %v7252_v11, 0.0 }
 0x2a0   : > { %v2327_v55 = vmul.f32 %v7241_v63, %v7241_v63  ;;  %v2264_v61 = vsel %vm1680_vm2, %v7241_v63, 0.0 }
 0x2a1   : > { %v2265_v18 = vadd.f32 %v2264_v61, %v2263_v6  ;;  %v2368_v24 = vsel %vm1680_vm2, %v2328_v42, 0.0 }
 0x2a2   : > { %v2366_v3 = vsel %vm1680_vm2, %v2327_v55, 0.0 }
 0x2a3   : > { %v2367_v60 = vadd.f32 %v2366_v3, %v2365_v59  ;;  %v2267_v13 = vadd.f32 %v2266_v41, %v2265_v18 }
 0x2a5   : > { %v2369_v45 = vadd.f32 %v2368_v24, %v2367_v60 }
 0x2ac   : > { %v7153_v33 = vpop.f32.mrb[10].mxu0 }
 0x2ad   : > { %v2140_v47 = vpop.f32.mrb[11].mxu0 }
 0x2ae   : > { %v7257_v27 = vadd.f32 %v7170_v46, %v2140_v47  ;;  %v7269_v47 = vadd.f32 %v7153_v33, %v7170_v46 }
 0x2b0   : > { %v2329_v14 = vmul.f32 %v7257_v27, %v7257_v27  ;;  %v2268_v0 = vsel %vm1680_vm2, %v7257_v27, 0.0  ;;  %v2330_v52 = vmul.f32 %v7269_v47, %v7269_v47 }
 0x2b1   : > { %v2269_v58 = vadd.f32 %v2268_v0, %v2267_v13 }
 0x2b2   : > { %v2370_v40 = vsel %vm1680_vm2, %v2329_v14, 0.0  ;;  %v2372_v26 = vsel %vm1680_vm2, %v2330_v52, 0.0 }
 0x2b3   : > { %v2371_v39 = vadd.f32 %v2370_v40, %v2369_v45 }
 0x2b5   : > { %v2373_v9 = vadd.f32 %v2372_v26, %v2371_v39 }
 0x2bc   : > { %v7155_v44 = vpop.f32.mrb[12].mxu0 }
 0x2bd   : > { %v7157_v36 = vpop.f32.mrb[13].mxu0  ;;  %v7288_v21 = vadd.f32 %v7155_v44, %v7170_v46 }
 0x2be   : > { %v7275_v1 = vadd.f32 %v7170_v46, %v7157_v36  ;;  %v2270_v36 = vsel %vm1680_vm2, %v7269_v47, 0.0 }
 0x2bf   : > { %v2271_v56 = vadd.f32 %v2270_v36, %v2269_v58  ;;  %v2332_v44 = vmul.f32 %v7288_v21, %v7288_v21 }
 0x2c0   : > { %v2331_v33 = vmul.f32 %v7275_v1, %v7275_v1  ;;  %v2272_v2 = vsel %vm1680_vm2, %v7275_v1, 0.0 }
 0x2c1   : > { %v2273_v30 = vadd.f32 %v2272_v2, %v2271_v56  ;;  %v2376_v55 = vsel %vm1680_vm2, %v2332_v44, 0.0 }
 0x2c2   : > { %v2374_v22 = vsel %vm1680_vm2, %v2331_v33, 0.0 }
 0x2c3   : > { %v2375_v5 = vadd.f32 %v2374_v22, %v2373_v9 }
 0x2c5   : > { %v2377_v61 = vadd.f32 %v2376_v55, %v2375_v5 }
 0x2cc   : > { %v7159_v28 = vpop.f32.mrb[14].mxu0 }
 0x2cd   : > { %v7161_v20 = vpop.f32.mrb[15].mxu0  ;;  %v7307_v43 = vadd.f32 %v7159_v28, %v7170_v46 }
 0x2ce   : > { %v7294_v8 = vadd.f32 %v7170_v46, %v7161_v20  ;;  %v2274_v20 = vsel %vm1680_vm2, %v7288_v21, 0.0 }
 0x2cf   : > { %v2275_v19 = vadd.f32 %v2274_v20, %v2273_v30  ;;  %v2334_v6 = vmul.f32 %v7307_v43, %v7307_v43  ;;  %v2278_v3 = vsel %vm1680_vm2, %v7307_v43, 0.0 }
 0x2d0   : > { %v2333_v32 = vmul.f32 %v7294_v8, %v7294_v8  ;;  %v2276_v16 = vsel %vm1680_vm2, %v7294_v8, 0.0 }
 0x2d1   : > { %v2277_v62 = vadd.f32 %v2276_v16, %v2275_v19  ;;  %v2380_v14 = vsel %vm1680_vm2, %v2334_v6, 0.0 }
 0x2d2   : > { %v2378_v49 = vsel %vm1680_vm2, %v2333_v32, 0.0 }
 0x2d3   : > { %v2379_v54 = vadd.f32 %v2378_v49, %v2377_v61  ;;  %v2279_v42 = vadd.f32 %v2278_v3, %v2277_v62 }
 0x2d5   : > { %v2381_v0 = vadd.f32 %v2380_v14, %v2379_v54 }
 0x2dc   : > { %v7163_v50 = vpop.f32.mrb[16].mxu0 }
 0x2dd   : > { %v7165_v31 = vpop.f32.mrb[17].mxu0 }
 0x2de   : > { %v7313_v17 = vadd.f32 %v7170_v46, %v7165_v31  ;;  %v7325_v31 = vadd.f32 %v7163_v50, %v7170_v46 }
 0x2e0   : > { %v2335_v28 = vmul.f32 %v7313_v17, %v7313_v17  ;;  %v2280_v18 = vsel %vm1680_vm2, %v7313_v17, 0.0  ;;  %v2336_v13 = vmul.f32 %v7325_v31, %v7325_v31  ;;  %v2282_v40 = vsel %vm1680_vm2, %v7325_v31, 0.0 }
 0x2e1   : > { %v2281_v41 = vadd.f32 %v2280_v18, %v2279_v42 }
 0x2e2   : > { %v2382_v60 = vsel %vm1680_vm2, %v2335_v28, 0.0  ;;  %v2384_v33 = vsel %vm1680_vm2, %v2336_v13, 0.0 }
 0x2e3   : > { %v2383_v24 = vadd.f32 %v2382_v60, %v2381_v0  ;;  %v2283_v52 = vadd.f32 %v2282_v40, %v2281_v41 }
 0x2e5   : > { %v2385_v36 = vadd.f32 %v2384_v33, %v2383_v24 }
 0x2eb   : > { %v7183_v23 = vpop.f32.mrb[18].mxu0 }
 0x2ec   : > { %v7187_v12 = vpop.f32.mrb[19].mxu0 }
 0x2ed   : > { %v7331_v59 = vadd.f32 %v7170_v46, %v7187_v12  ;;  %v7343_v12 = vadd.f32 %v7183_v23, %v7170_v46 }
 0x2ef   : > { %v2337_v50 = vmul.f32 %v7331_v59, %v7331_v59  ;;  %v2284_v58 = vsel %vm1680_vm2, %v7331_v59, 0.0  ;;  %v2338_v23 = vmul.f32 %v7343_v12, %v7343_v12 }
 0x2f0   : > { %v2285_v51 = vadd.f32 %v2284_v58, %v2283_v52 }
 0x2f1   : > { %v2386_v25 = vsel %vm1680_vm2, %v2337_v50, 0.0  ;;  %v2388_v32 = vsel %vm1680_vm2, %v2338_v23, 0.0 }
 0x2f2   : > { %v2387_v26 = vadd.f32 %v2386_v25, %v2385_v36 }
 0x2f4   : > { %v2389_v16 = vadd.f32 %v2388_v32, %v2387_v26 }
 0x2fb   : > { %v7229_v10 = vpop.f32.mrb[20].mxu0 }
 0x2fc   : > { %v7231_v37 = vpop.f32.mrb[21].mxu0  ;;  %v7361_v22 = vadd.f32 %v7229_v10, %v7170_v46 }
 0x2fd   : > { %v7349_v45 = vadd.f32 %v7170_v46, %v7231_v37  ;;  %v2286_v37 = vsel %vm1680_vm2, %v7343_v12, 0.0 }
 0x2fe   : > { %v2287_v44 = vadd.f32 %v2286_v37, %v2285_v51  ;;  %v2340_v19 = vmul.f32 %v7361_v22, %v7361_v22  ;;  %v2290_v49 = vsel %vm1680_vm2, %v7361_v22, 0.0 }
 0x2ff   : > { %v2339_v56 = vmul.f32 %v7349_v45, %v7349_v45  ;;  %v2288_v30 = vsel %vm1680_vm2, %v7349_v45, 0.0 }
 0x300   : > { %v2289_v20 = vadd.f32 %v2288_v30, %v2287_v44  ;;  %v2392_v28 = vsel %vm1680_vm2, %v2340_v19, 0.0 }
 0x301   : > { %v2390_v5 = vsel %vm1680_vm2, %v2339_v56, 0.0 }
 0x302   : > { %v2391_v55 = vadd.f32 %v2390_v5, %v2389_v16  ;;  %v2291_v6 = vadd.f32 %v2290_v49, %v2289_v20 }
 0x304   : > { %v2393_v18 = vadd.f32 %v2392_v28, %v2391_v55 }
 0x30f   : > { %v5494_v34 = vpop.f32.mrb[22].mxu0 }
 0x310   : > { %v2200_v7 = vpop.f32.mrb[23].mxu0 }
 0x311   : > { %v7366_v9 = vadd.f32 %v7170_v46, %v2200_v7  ;;  %v7377_v7 = vadd.f32 %v5494_v34, %v7170_v46 }
 0x313   : > { %v2341_v10 = vmul.f32 %v7366_v9, %v7366_v9  ;;  %v2292_v62 = vsel %vm1680_vm2, %v7366_v9, 0.0  ;;  %v2342_v42 = vmul.f32 %v7377_v7, %v7377_v7  ;;  %v2294_v60 = vsel %vm1680_vm2, %v7377_v7, 0.0 }
 0x314   : > { %v2293_v3 = vadd.f32 %v2292_v62, %v2291_v6 }
 0x315   : > { %v2394_v54 = vsel %vm1680_vm2, %v2341_v10, 0.0  ;;  %v2396_v50 = vsel %vm1680_vm2, %v2342_v42, 0.0 }
 0x316   : > { %v2395_v14 = vadd.f32 %v2394_v54, %v2393_v18  ;;  %v2295_v13 = vadd.f32 %v2294_v60, %v2293_v3 }
 0x318   : > { %v2397_v58 = vadd.f32 %v2396_v50, %v2395_v14 }
 0x323   : > { %v5497_v39 = vpop.f32.mrb[24].mxu0 }
 0x324   : > { %v2210_v2 = vpop.f32.mrb[25].mxu0  ;;  %v7393_v41 = vadd.f32 %v5497_v39, %v7170_v46 }
 0x325   : > { %v7382_v61 = vadd.f32 %v7170_v46, %v2210_v2 }
 0x326   : > { %v2344_v52 = vmul.f32 %v7393_v41, %v7393_v41  ;;  %v2298_v36 = vsel %vm1680_vm2, %v7393_v41, 0.0 }
 0x327   : > { %v2343_v34 = vmul.f32 %v7382_v61, %v7382_v61  ;;  %v2296_v0 = vsel %vm1680_vm2, %v7382_v61, 0.0 }
 0x328   : > { %v2297_v40 = vadd.f32 %v2296_v0, %v2295_v13  ;;  %v2400_v56 = vsel %vm1680_vm2, %v2344_v52, 0.0 }
 0x329   : > { %v2398_v24 = vsel %vm1680_vm2, %v2343_v34, 0.0 }
 0x32a   : > { %v2399_v25 = vadd.f32 %v2398_v24, %v2397_v58  ;;  %v2299_v23 = vadd.f32 %v2298_v36, %v2297_v40 }
 0x32c   : > { %v2401_v32 = vadd.f32 %v2400_v56, %v2399_v25 }
 0x337   : > { %v5500_v33 = vpop.f32.mrb[26].mxu0 }
 0x338   : > { %v7402_v51 = vadd.f32 %v5500_v33, %v7170_v46  ;;  %v2220_v39 = vpop.f32.mrb[27].mxu0 }
 0x339   : > { %v7407_v2 = vadd.f32 %v7170_v46, %v2220_v39 }
 0x33a   : > { %v2346_v26 = vmul.f32 %v7402_v51, %v7402_v51  ;;  %v2302_v5 = vsel %vm1680_vm2, %v7402_v51, 0.0 }
 0x33b   : > { %v2300_v37 = vsel %vm1680_vm2, %v7407_v2, 0.0  ;;  %v2345_v30 = vmul.f32 %v7407_v2, %v7407_v2 }
 0x33c   : > { %v2301_v44 = vadd.f32 %v2300_v37, %v2299_v23  ;;  %v2404_v10 = vsel %vm1680_vm2, %v2346_v26, 0.0 }
 0x33d   : > { %v2402_v20 = vsel %vm1680_vm2, %v2345_v30, 0.0 }
 0x33e   : > { %v2403_v16 = vadd.f32 %v2402_v20, %v2401_v32  ;;  %v2303_v19 = vadd.f32 %v2302_v5, %v2301_v44 }
 0x340   : > { %v2405_v55 = vadd.f32 %v2404_v10, %v2403_v16 }
 0x34b   : > { %v5503_v49 = vpop.f32.mrb[28].mxu0 }
 0x34c   : > { %v7421_v62 = vadd.f32 %v5503_v49, %v7170_v46  ;;  %v2230_v6 = vpop.f32.mrb[29].mxu0 }
 0x34d   : > { %v7424_v28 = vadd.f32 %v7170_v46, %v2230_v6 }
 0x34e   : > { %v2348_v54 = vmul.f32 %v7421_v62, %v7421_v62  ;;  %v2306_v34 = vsel %vm1680_vm2, %v7421_v62, 0.0 }
 0x34f   : > { %v2304_v3 = vsel %vm1680_vm2, %v7424_v28, 0.0  ;;  %v2347_v18 = vmul.f32 %v7424_v28, %v7424_v28 }
 0x350   : > { %v2305_v42 = vadd.f32 %v2304_v3, %v2303_v19  ;;  %v2408_v13 = vsel %vm1680_vm2, %v2348_v54, 0.0 }
 0x351   : > { %v2406_v14 = vsel %vm1680_vm2, %v2347_v18, 0.0 }
 0x352   : > { %v2407_v60 = vadd.f32 %v2406_v14, %v2405_v55  ;;  %v2307_v0 = vadd.f32 %v2306_v34, %v2305_v42 }
 0x354   : > { %v2409_v50 = vadd.f32 %v2408_v13, %v2407_v60 }
 0x358   : > { %v5506_v24 = vpop.f32.mrb[30].mxu0 }
 0x359   : > { %v7437_v40 = vadd.f32 %v5506_v24, %v7170_v46  ;;  %v2240_v58 = vpop.f32.mrb[31].mxu0 }
 0x35a   : > { %v7440_v52 = vadd.f32 %v7170_v46, %v2240_v58 }
 0x35b   : > { %v2350_v33 = vmul.f32 %v7437_v40, %v7437_v40  ;;  %v2310_v23 = vsel %vm1680_vm2, %v7437_v40, 0.0 }
 0x35c   : > { %v2308_v25 = vsel %vm1680_vm2, %v7440_v52, 0.0  ;;  %v2349_v39 = vmul.f32 %v7440_v52, %v7440_v52 }
 0x35d   : > { %v2309_v36 = vadd.f32 %v2308_v25, %v2307_v0  ;;  %v2412_v46 = vsel %vm1680_vm2, %v2350_v33, 0.0 }
 0x35e   : > { %v2410_v56 = vsel %vm1680_vm2, %v2349_v39, 0.0 }
 0x35f   : > { %v2311_v26 = vadd.f32 %v2310_v23, %v2309_v36  ;;  %v2411_v37 = vadd.f32 %v2410_v56, %v2409_v50  ;;  %v2460_v50 = vlaneseq  ;;  %v2458_v23 = vld [vmem:[%s9603_s3] sm:$0x1] }
 0x361   : > { %v2312_v30 = vrot.slane %v2311_v26, 4  ;;  %v2413_v44 = vadd.f32 %v2412_v46, %v2411_v37  ;;  %v7468_v39 = vshrl.u32 %v2460_v50, 7 }
 0x363   : > { %v2313_v32 = vadd.f32 %v2312_v30, %v2311_v26  ;;  %v2414_v5 = vrot.slane %v2413_v44, 4  ;;  %9795 = vst [vmem:[#allocation38_spill] sm:$0xff] %v7468_v39  ;;  %v9651_v36 = vsub.s32 0, %v7468_v39 }
 0x365   : > { %v2314_v20 = vrot.slane %v2313_v32, 2  ;;  %v2415_v16 = vadd.f32 %v2414_v5, %v2413_v44 }
 0x367   : > { %v2315_v19 = vadd.f32 %v2314_v20, %v2313_v32  ;;  %v2416_v10 = vrot.slane %v2415_v16, 2 }
 0x369   : > { %v2316_v55 = vrot.slane %v2315_v19, 1  ;;  %v2417_v49 = vadd.f32 %v2416_v10, %v2415_v16 }
 0x36b   : > { %v2317_v6 = vadd.f32 %v2316_v55, %v2315_v19  ;;  %v2418_v54 = vrot.slane %v2417_v49, 1 }
 0x36d   : > { %v7452_v3 = vmul.f32 0.00390625, %v2317_v6  ;;  %v2419_v18 = vadd.f32 %v2418_v54, %v2417_v49 }
 0x36f   : > { %v2420_v42 = vmul.f32 0.00390625, %v2419_v18  ;;  %v2421_v34 = vmul.f32 %v7452_v3, %v7452_v3  ;;  %v2454_v14 = vsub.f32 %v7440_v52, %v7452_v3  ;;  %v2450_v24 = vsub.f32 %v7407_v2, %v7452_v3 }
 0x370   : > { %v2451_v58 = vsub.f32 %v7402_v51, %v7452_v3  ;;  %v2452_v33 = vsub.f32 %v7424_v28, %v7452_v3  ;;  %v2453_v25 = vsub.f32 %v7421_v62, %v7452_v3  ;;  %v2455_v52 = vsub.f32 %v7437_v40, %v7452_v3 }
 0x371   : > { %v2422_v60 = vsub.f32 %v2420_v42, %v2421_v34  ;;  %v2424_v56 = vsub.f32 %v7178_v29, %v7452_v3  ;;  %v2425_v26 = vsub.f32 %v7174_v38, %v7452_v3  ;;  %v2426_v37 = vsub.f32 %v7181_v57, %v7452_v3 }
 0x372   : > { %v2427_v46 = vsub.f32 %v7201_v53, %v7452_v3  ;;  %v2428_v30 = vsub.f32 %v7206_v48, %v7452_v3  ;;  %v2429_v44 = vsub.f32 %v7216_v35, %v7452_v3  ;;  %v2430_v32 = vsub.f32 %v7221_v4, %v7452_v3 }
 0x373   : > { %v2423_v0 = vmax.f32 %v2422_v60, 0.0  ;;  %v2431_v29 = vsub.f32 %v7236_v15, %v7452_v3  ;;  %v2432_v38 = vsub.f32 %v7241_v63, %v7452_v3  ;;  %v2433_v57 = vsub.f32 %v7252_v11, %v7452_v3 }
 0x374   : > { %v2434_v53 = vsub.f32 %v7257_v27, %v7452_v3  ;;  %v2435_v48 = vsub.f32 %v7269_v47, %v7452_v3  ;;  %v2436_v4 = vsub.f32 %v7275_v1, %v7452_v3  ;;  %v2437_v15 = vsub.f32 %v7288_v21, %v7452_v3 }
 0x375   : > { %v2456_v13 = vadd.f32 1e-05, %v2423_v0  ;;  %v2438_v20 = vsub.f32 %v7294_v8, %v7452_v3  ;;  %v2439_v63 = vsub.f32 %v7307_v43, %v7452_v3  ;;  %v2440_v11 = vsub.f32 %v7313_v17, %v7452_v3  ;;  %v7523_v17 = vld [vmem:[%s9604_s4] ss:$0 sm:$0xff] }
 0x376   : > { %v2441_v27 = vsub.f32 %v7325_v31, %v7452_v3  ;;  %v2442_v47 = vsub.f32 %v7331_v59, %v7452_v3  ;;  %v2443_v21 = vsub.f32 %v7343_v12, %v7452_v3  ;;  %v2444_v8 = vsub.f32 %v7349_v45, %v7452_v3 }
 0x377   : > { %5629 = vrsqrt.f32 %v2456_v13  ;;  %v2445_v43 = vsub.f32 %v7361_v22, %v7452_v3  ;;  %v2446_v31 = vsub.f32 %v7366_v9, %v7452_v3  ;;  %v2447_v59 = vsub.f32 %v7377_v7, %v7452_v3 }
 0x378   : > { %v2448_v12 = vsub.f32 %v7382_v61, %v7452_v3  ;;  %v2449_v45 = vsub.f32 %v7393_v41, %v7452_v3 }
 0x381   : > { %v5630_v5 = vpop.eup %5629 }
 0x382   : > { %v2459_v35 = vmul.f32 %v5630_v5, %v2458_v23 }
 0x384   : > { %v2463_v1 = vrot.slane %v2459_v35, %v9651_v36 }
 0x386   : > { %v2494_v16 = vmul.f32 %v2463_v1, %v2454_v14  ;;  %v2464_v19 = vmul.f32 %v2463_v1, %v2424_v56  ;;  %v2465_v22 = vmul.f32 %v2463_v1, %v2425_v26  ;;  %v2466_v10 = vmul.f32 %v2463_v1, %v2426_v37 }
 0x387   : > { %v2467_v55 = vmul.f32 %v2463_v1, %v2427_v46  ;;  %v2468_v49 = vmul.f32 %v2463_v1, %v2428_v30  ;;  %v2469_v6 = vmul.f32 %v2463_v1, %v2429_v44  ;;  %v2470_v54 = vmul.f32 %v2463_v1, %v2430_v32 }
 0x388   : > { %v2533_v18 = vadd.f32 %v7523_v17, %v2494_v16  ;;  %v2471_v9 = vmul.f32 %v2463_v1, %v2431_v29  ;;  %v2472_v42 = vmul.f32 %v2463_v1, %v2432_v38  ;;  %v2473_v34 = vmul.f32 %v2463_v1, %v2433_v57 }
 0x389   : > { %v2474_v7 = vmul.f32 %v2463_v1, %v2434_v53  ;;  %v2475_v60 = vmul.f32 %v2463_v1, %v2435_v48  ;;  %v2476_v0 = vmul.f32 %v2463_v1, %v2436_v4  ;;  %v2477_v61 = vmul.f32 %v2463_v1, %v2437_v15 }
 0x38a   : > { %vm2565_vm11 = vcmp.ge.f32.partialorder %v2533_v18, 0.0  ;;  %v2597_v13 = vmul.f32 0.01, %v2533_v18  ;;  %v2478_v41 = vmul.f32 %v2463_v1, %v2438_v20  ;;  %v2479_v14 = vmul.f32 %v2463_v1, %v2439_v63 }
 0x38b   : > { %v2480_v50 = vmul.f32 %v2463_v1, %v2440_v11  ;;  %v2481_v23 = vmul.f32 %v2463_v1, %v2441_v27  ;;  %v2482_v56 = vmul.f32 %v2463_v1, %v2442_v47  ;;  %v2483_v26 = vmul.f32 %v2463_v1, %v2443_v21 }
 0x38c   : > { %v2629_v37 = vsel %vm2565_vm11, %v2533_v18, %v2597_v13  ;;  %v2484_v46 = vmul.f32 %v2463_v1, %v2444_v8  ;;  %v2485_v30 = vmul.f32 %v2463_v1, %v2445_v43  ;;  %v2486_v44 = vmul.f32 %v2463_v1, %v2446_v31 }
 0x38d   : > { %2717 = vst.msk [vmem:[#allocation2 + $0x181] sm:$0xff] %vm1680_vm2, %v2629_v37  ;;  %v2487_v32 = vmul.f32 %v2463_v1, %v2447_v59  ;;  %v2488_v29 = vmul.f32 %v2463_v1, %v2448_v12  ;;  %v2489_v5 = vmul.f32 %v2463_v1, %v2449_v45  ;;  %v2490_v38 = vmul.f32 %v2463_v1, %v2450_v24 }
 0x38e   : > { %v2491_v57 = vmul.f32 %v2463_v1, %v2451_v58  ;;  %v2492_v53 = vmul.f32 %v2463_v1, %v2452_v33  ;;  %v2493_v48 = vmul.f32 %v2463_v1, %v2453_v25  ;;  %v2495_v35 = vmul.f32 %v2463_v1, %v2455_v52 }
 0x38f   : > { %v2504_v4 = vadd.f32 %v7523_v17, %v2465_v22  ;;  %v7552_v2 = vadd.f32 %v7523_v17, %v2464_v19  ;;  %v7555_v51 = vadd.f32 %v7523_v17, %v2466_v10  ;;  %v7558_v24 = vadd.f32 %v7523_v17, %v2467_v55 }
 0x390   : > { %v7561_v28 = vadd.f32 %v7523_v17, %v2468_v49  ;;  %v7564_v62 = vadd.f32 %v7523_v17, %v2469_v6  ;;  %v7567_v40 = vadd.f32 %v7523_v17, %v2470_v54  ;;  %v7570_v3 = vadd.f32 %v7523_v17, %v2471_v9 }
 0x391   : > { %v7573_v58 = vadd.f32 %v7523_v17, %v2472_v42  ;;  %v7576_v33 = vadd.f32 %v7523_v17, %v2473_v34  ;;  %v7579_v25 = vadd.f32 %v7523_v17, %v2474_v7  ;;  %v7582_v52 = vadd.f32 %v7523_v17, %v2475_v60 }
 0x392   : > { %vm2536_vm12 = vcmp.ge.f32.partialorder %v2504_v4, 0.0  ;;  %v7585_v15 = vadd.f32 %v7523_v17, %v2476_v0  ;;  %v7588_v20 = vadd.f32 %v7523_v17, %v2477_v61  ;;  %v7591_v63 = vadd.f32 %v7523_v17, %v2478_v41 }
 0x393   : > { %v2568_v11 = vmul.f32 0.01, %v2504_v4  ;;  %v7594_v27 = vadd.f32 %v7523_v17, %v2479_v14  ;;  %v7597_v47 = vadd.f32 %v7523_v17, %v2480_v50  ;;  %v7600_v1 = vadd.f32 %v7523_v17, %v2481_v23 }
 0x394   : > { %v7603_v21 = vadd.f32 %v7523_v17, %v2482_v56  ;;  %v7606_v8 = vadd.f32 %v7523_v17, %v2483_v26  ;;  %v7609_v43 = vadd.f32 %v7523_v17, %v2484_v46  ;;  %v7612_v31 = vadd.f32 %v7523_v17, %v2485_v30 }
 0x395   : > { %v2600_v59 = vsel %vm2536_vm12, %v2504_v4, %v2568_v11  ;;  %v7615_v12 = vadd.f32 %v7523_v17, %v2486_v44  ;;  %v7618_v45 = vadd.f32 %v7523_v17, %v2487_v32  ;;  %v7621_v16 = vadd.f32 %v7523_v17, %v2488_v29 }
 0x396   : > { %v7624_v19 = vadd.f32 %v7523_v17, %v2489_v5  ;;  %2688 = vst.msk [vmem:[#allocation2 + $0x21] sm:$0xff] %vm1680_vm2, %v2600_v59  ;;  %v7628_v22 = vadd.f32 %v7523_v17, %v2490_v38  ;;  %v7631_v10 = vadd.f32 %v7523_v17, %v2491_v57  ;;  %v7634_v55 = vadd.f32 %v7523_v17, %v2492_v53 }
 0x397   : > { %v7637_v49 = vadd.f32 %v7523_v17, %v2493_v48  ;;  %vm2535_vm13 = vcmp.ge.f32.partialorder %v7552_v2, 0.0  ;;  %vm2537_vm14 = vcmp.ge.f32.partialorder %v7555_v51, 0.0  ;;  %vm2538_vm15 = vcmp.ge.f32.partialorder %v7558_v24, 0.0 }
 0x398   : > { %vm2539_vm0 = vcmp.ge.f32.partialorder %v7561_v28, 0.0  ;;  %vm2540_vm1 = vcmp.ge.f32.partialorder %v7564_v62, 0.0  ;;  %vm2541_vm3 = vcmp.ge.f32.partialorder %v7567_v40, 0.0  ;;  %vm2543_vm7 = vcmp.ge.f32.partialorder %v7573_v58, 0.0 }
 0x399   : > { %vm2544_vm9 = vcmp.ge.f32.partialorder %v7576_v33, 0.0  ;;  %v7652_v6 = vadd.f32 %v7523_v17, %v2495_v35  ;;  %vm2549_vm6 = vcmp.ge.f32.partialorder %v7591_v63, 0.0  ;;  %v2567_v54 = vmul.f32 0.01, %v7552_v2 }
 0x39a   : > { %v2569_v18 = vmul.f32 0.01, %v7555_v51  ;;  %v2570_v9 = vmul.f32 0.01, %v7558_v24  ;;  %vm2554_vm10 = vcmp.ge.f32.partialorder %v7606_v8, 0.0  ;;  %vm2555_vm8 = vcmp.ge.f32.partialorder %v7609_v43, 0.0 }
 0x39b   : > { %v2571_v17 = vmul.f32 0.01, %v7561_v28  ;;  %v2572_v42 = vmul.f32 0.01, %v7564_v62  ;;  %v2573_v34 = vmul.f32 0.01, %v7567_v40  ;;  %v2599_v61 = vsel %vm2535_vm13, %v7552_v2, %v2567_v54 }
 0x39c   : > { %v2574_v60 = vmul.f32 0.01, %v7570_v3  ;;  %v2575_v0 = vmul.f32 0.01, %v7573_v58  ;;  %v2601_v13 = vsel %vm2537_vm14, %v7555_v51, %v2569_v18  ;;  %vm2560_vm4 = vcmp.ge.f32.partialorder %v7624_v19, 0.0  ;;  %2687 = vst.msk [vmem:[#allocation2 + $0x19] sm:$0xff] %vm1680_vm2, %v2599_v61 }
 0x39d   : > { %v7668_v7 = vld [vmem:[#allocation2 + $0x21] sm:$0xff]  ;;  %vm2561_vm11 = vcmp.ge.f32.partialorder %v7628_v22, 0.0  ;;  %vm2562_vm12 = vcmp.ge.f32.partialorder %v7631_v10, 0.0  ;;  %vm2563_vm5 = vcmp.ge.f32.partialorder %v7634_v55, 0.0  ;;  %v2576_v41 = vmul.f32 0.01, %v7576_v33 }
 0x39e   : > { %3046 = vrot.lane.b32.xlu1 %v7668_v7, %s5642_s16  ;;  %v2577_v14 = vmul.f32 0.01, %v7579_v25  ;;  %v2578_v50 = vmul.f32 0.01, %v7582_v52  ;;  %v2602_v23 = vsel %vm2538_vm15, %v7558_v24, %v2570_v9  ;;  %2689 = vst.msk [vmem:[#allocation2 + $0x31] sm:$0xff] %vm1680_vm2, %v2601_v13  ;;  %vm2564_vm13 = vcmp.ge.f32.partialorder %v7637_v49, 0.0 }
 0x39f   : > { %vm2566_vm14 = vcmp.ge.f32.partialorder %v7652_v6, 0.0  ;;  %v2579_v56 = vmul.f32 0.01, %v7585_v15  ;;  %v2580_v26 = vmul.f32 0.01, %v7588_v20  ;;  %v2603_v46 = vsel %vm2539_vm0, %v7561_v28, %v2571_v17  ;;  %2690 = vst.msk [vmem:[#allocation2 + $0x39] sm:$0xff] %vm1680_vm2, %v2602_v23 }
 0x3a0   : > { %v2581_v37 = vmul.f32 0.01, %v7591_v63  ;;  %v2582_v30 = vmul.f32 0.01, %v7594_v27  ;;  %v2583_v44 = vmul.f32 0.01, %v7597_v47  ;;  %v2604_v29 = vsel %vm2540_vm1, %v7564_v62, %v2572_v42 }
 0x3a1   : > { %v2584_v32 = vmul.f32 0.01, %v7600_v1  ;;  %2691 = vst.msk [vmem:[#allocation2 + $0x49] sm:$0xff] %vm1680_vm2, %v2603_v46  ;;  %v2585_v5 = vmul.f32 0.01, %v7603_v21  ;;  %v2605_v53 = vsel %vm2541_vm3, %v7567_v40, %v2573_v34  ;;  %2692 = vst.msk [vmem:[#allocation2 + $0x51] sm:$0xff] %vm1680_vm2, %v2604_v29  ;;  %v2607_v62 = vsel %vm2543_vm7, %v7573_v58, %v2575_v0 }
 0x3a2   : > { %v2586_v38 = vmul.f32 0.01, %v7606_v8  ;;  %v2587_v57 = vmul.f32 0.01, %v7609_v43  ;;  %v2588_v48 = vmul.f32 0.01, %v7612_v31  ;;  %v2608_v59 = vsel %vm2544_vm9, %v7576_v33, %v2576_v41 }
 0x3a3   : > { %v2589_v35 = vmul.f32 0.01, %v7615_v12  ;;  %v2590_v4 = vmul.f32 0.01, %v7618_v45  ;;  %vm9796_vm15 = vcmp.ge.f32.partialorder %v7570_v3, 0.0  ;;  %2693 = vst.msk [vmem:[#allocation2 + $0x61] sm:$0xff] %vm1680_vm2, %v2605_v53 }
 0x3a4   : > { %v2606_v2 = vsel %vm9796_vm15, %v7570_v3, %v2574_v60  ;;  %v2591_v51 = vmul.f32 0.01, %v7621_v16  ;;  %v2592_v24 = vmul.f32 0.01, %v7624_v19  ;;  %v2593_v28 = vmul.f32 0.01, %v7628_v22 }
 0x3a5   : > { %2694 = vst.msk [vmem:[#allocation2 + $0x69] sm:$0xff] %vm1680_vm2, %v2606_v2  ;;  %v2594_v40 = vmul.f32 0.01, %v7631_v10  ;;  %v2595_v11 = vmul.f32 0.01, %v7634_v55  ;;  %2695 = vst.msk [vmem:[#allocation2 + $0x79] sm:$0xff] %vm1680_vm2, %v2607_v62 }
 0x3a6   : > { %v2596_v3 = vmul.f32 0.01, %v7637_v49  ;;  %v2598_v54 = vmul.f32 0.01, %v7652_v6  ;;  %v7741_v18 = vld [vmem:[#allocation2 + $0x19] sm:$0xff]  ;;  %vm9797_vm0 = vcmp.ge.f32.partialorder %v7579_v25, 0.0 }
 0x3a7   : > { %v2609_v58 = vsel %vm9797_vm0, %v7579_v25, %v2577_v14  ;;  %vm9798_vm1 = vcmp.ge.f32.partialorder %v7582_v52, 0.0  ;;  %vm9799_vm3 = vcmp.ge.f32.partialorder %v7585_v15, 0.0  ;;  %2696 = vst.msk [vmem:[#allocation2 + $0x81] sm:$0xff] %vm1680_vm2, %v2608_v59  ;;  %3044 = vrot.lane.b32.xlu0 %v7741_v18, %s5642_s16  ;;  %vm9800_vm7 = vcmp.ge.f32.partialorder %v7588_v20, 0.0  ;;  %v7767_v42 = vld [vmem:[#allocation2 + $0x39] sm:$0xff]  ;;  %v2783_v2 = vld [vmem:[#allocation2 + $0x2] sm:$0xff] }
 0x3a8   : > { %v2610_v9 = vsel %vm9798_vm1, %v7582_v52, %v2578_v50  ;;  %v2611_v17 = vsel %vm9799_vm3, %v7585_v15, %v2579_v56  ;;  %v2612_v33 = vsel %vm9800_vm7, %v7588_v20, %v2580_v26  ;;  %v2613_v25 = vsel %vm2549_vm6, %v7591_v63, %v2581_v37  ;;  %2697 = vst.msk [vmem:[#allocation2 + $0x91] sm:$0xff] %vm1680_vm2, %v2609_v58  ;;  %v7911_v62 = vld [vmem:[#allocation2 + $0x32] sm:$0xff] }
 0x3a9   : > { %vm9801_vm9 = vcmp.ge.f32.partialorder %v7594_v27, 0.0  ;;  %vm9802_vm15 = vcmp.ge.f32.partialorder %v7597_v47, 0.0  ;;  %2698 = vst.msk [vmem:[#allocation2 + $0x99] sm:$0xff] %vm1680_vm2, %v2610_v9  ;;  %2699 = vst.msk [vmem:[#allocation2 + $0xa9] sm:$0xff] %vm1680_vm2, %v2611_v17  ;;  %vm9803_vm0 = vcmp.ge.f32.partialorder %v7600_v1, 0.0  ;;  %vm9804_vm6 = vcmp.ge.f32.partialorder %v7603_v21, 0.0  ;;  %3050 = vrot.lane.b32.xlu1 %v7767_v42, %s5642_s16 }
 0x3aa   : > { %v2614_v52 = vsel %vm9801_vm9, %v7594_v27, %v2582_v30  ;;  %v2615_v15 = vsel %vm9802_vm15, %v7597_v47, %v2583_v44  ;;  %v2616_v20 = vsel %vm9803_vm0, %v7600_v1, %v2584_v32  ;;  %v2617_v63 = vsel %vm9804_vm6, %v7603_v21, %v2585_v5  ;;  %2700 = vst.msk [vmem:[#allocation2 + $0xb1] sm:$0xff] %vm1680_vm2, %v2612_v33  ;;  %v7850_v34 = vld [vmem:[#allocation2 + $0x61] sm:$0xff] }
 0x3ab   : > { %v2618_v27 = vsel %vm2554_vm10, %v7606_v8, %v2586_v38  ;;  %v2619_v47 = vsel %vm2555_vm8, %v7609_v43, %v2587_v57  ;;  %2701 = vst.msk [vmem:[#allocation2 + $0xc1] sm:$0xff] %vm1680_vm2, %v2613_v25  ;;  %2702 = vst.msk [vmem:[#allocation2 + $0xc9] sm:$0xff] %vm1680_vm2, %v2614_v52  ;;  %vm9805_vm1 = vcmp.ge.f32.partialorder %v7612_v31, 0.0  ;;  %vm9806_vm10 = vcmp.ge.f32.partialorder %v7615_v12, 0.0 }
 0x3ac   : > { %2703 = vst.msk [vmem:[#allocation2 + $0xd9] sm:$0xff] %vm1680_vm2, %v2615_v15  ;;  %v2620_v1 = vsel %vm9805_vm1, %v7612_v31, %v2588_v48  ;;  %v2621_v21 = vsel %vm9806_vm10, %v7615_v12, %v2589_v35  ;;  %vm9807_vm8 = vcmp.ge.f32.partialorder %v7618_v45, 0.0  ;;  %vm9808_vm3 = vcmp.ge.f32.partialorder %v7621_v16, 0.0  ;;  %2704 = vst.msk [vmem:[#allocation2 + $0xe1] sm:$0xff] %vm1680_vm2, %v2616_v20  ;;  %v7858_v0 = vld [vmem:[#allocation2 + $0x79] sm:$0xff]  ;;  %v2784_v35 = vld [vmem:[#allocation2 + $0xa] sm:$0xff] }
 0x3ad   : > { %v2622_v8 = vsel %vm9807_vm8, %v7618_v45, %v2590_v4  ;;  %v2623_v43 = vsel %vm9808_vm3, %v7621_v16, %v2591_v51  ;;  %2705 = vst.msk [vmem:[#allocation2 + $0xf1] sm:$0xff] %vm1680_vm2, %v2617_v63  ;;  %2706 = vst.msk [vmem:[#allocation2 + $0xf9] sm:$0xff] %vm1680_vm2, %v2618_v27  ;;  %v2624_v31 = vsel %vm2560_vm4, %v7624_v19, %v2592_v24  ;;  %v7822_v19 = vld [vmem:[#allocation2 + $0x31] sm:$0xff]  ;;  %v7899_v51 = vld [vmem:[#allocation2 + $0x22] sm:$0xff]  ;;  %vm9853_vm4 = vcmask 130048  }
 0x3ae   : > { %2707 = vst.msk [vmem:[#allocation2 + $0x109] sm:$0xff] %vm1680_vm2, %v2619_v47  ;;  %v2625_v12 = vsel %vm2561_vm11, %v7628_v22, %v2593_v28  ;;  %v2626_v45 = vsel %vm2562_vm12, %v7631_v10, %v2594_v40  ;;  %v2627_v16 = vsel %vm2563_vm5, %v7634_v55, %v2595_v11  ;;  %2708 = vst.msk [vmem:[#allocation2 + $0x111] sm:$0xff] %vm1680_vm2, %v2620_v1  ;;  %3048 = vrot.lane.b32.xlu0 %v7822_v19, %s5642_s16  ;;  %v7836_v55 = vld [vmem:[#allocation2 + $0x51] sm:$0xff]  ;;  %v7854_v60 = vld [vmem:[#allocation2 + $0x81] sm:$0xff]  ;;  %vm4160_vm5 = vcmask 326656  }
 0x3af   : > { %2709 = vst.msk [vmem:[#allocation2 + $0x121] sm:$0xff] %vm1680_vm2, %v2621_v21  ;;  %2710 = vst.msk [vmem:[#allocation2 + $0x129] sm:$0xff] %vm1680_vm2, %v2622_v8  ;;  %v2628_v22 = vsel %vm2564_vm13, %v7637_v49, %v2596_v3  ;;  %v2630_v10 = vsel %vm2566_vm14, %v7652_v6, %v2598_v54  ;;  %3054 = vrot.lane.b32.xlu1 %v7836_v55, %s5642_s16  ;;  %v7842_v49 = vld [vmem:[#allocation2 + $0x49] sm:$0xff]  ;;  %v7866_v13 = vld [vmem:[#allocation2 + $0x91] sm:$0xff]  ;;  %v7971_v8 = vpop.permute.xlu1 %3042  ;;  %vm9854_vm11 = vcmask 195584   ;;  %vm4193_vm12 = vcmask 392192  }
 0x3b0   : > { %2711 = vst.msk [vmem:[#allocation2 + $0x139] sm:$0xff] %vm1680_vm2, %v2623_v43  ;;  %2712 = vst.msk [vmem:[#allocation2 + $0x141] sm:$0xff] %vm1680_vm2, %v2624_v31  ;;  %v7846_v6 = vld [vmem:[#allocation2 + $0x69] sm:$0xff]  ;;  %v7862_v61 = vld [vmem:[#allocation2 + $0x99] sm:$0xff]  ;;  %vm9855_vm13 = vcmask 261120   ;;  %vm4226_vm14 = vcmask 457728  }
 0x3b1   : > { %2713 = vst.msk [vmem:[#allocation2 + $0x151] sm:$0xff] %vm1680_vm2, %v2625_v12  ;;  %2714 = vst.msk [vmem:[#allocation2 + $0x159] sm:$0xff] %vm1680_vm2, %v2626_v45  ;;  %v7870_v41 = vld [vmem:[#allocation2 + $0xb1] sm:$0xff]  ;;  %v7874_v14 = vld [vmem:[#allocation2 + $0xa9] sm:$0xff]  ;;  %v7976_v12 = vpop.permute.xlu0 %3040  ;;  %vm4259_vm7 = vcmask 523264   ;;  %vm4308_vm9 = vcmask 588800  }
 0x3b2   : > { %2715 = vst.msk [vmem:[#allocation2 + $0x169] sm:$0xff] %vm1680_vm2, %v2627_v16  ;;  %2716 = vst.msk [vmem:[#allocation2 + $0x171] sm:$0xff] %vm1680_vm2, %v2628_v22  ;;  %3052 = vrot.lane.b32.xlu0 %v7842_v49, %s5642_s16  ;;  %v2768_v50 = vld [vmem:[#allocation2 + $0xc9] sm:$0xff]  ;;  %v7879_v23 = vld [vmem:[#allocation2 + $0xc1] sm:$0xff] }
 0x3b3   : > { %2718 = vst.msk [vmem:[#allocation2 + $0x189] sm:$0xff] %vm1680_vm2, %v2630_v10  ;;  %3058 = vrot.lane.b32.xlu1 %v7846_v6, %s5642_s16  ;;  %v2770_v56 = vld [vmem:[#allocation2 + $0xe1] sm:$0xff]  ;;  %v2769_v26 = vld [vmem:[#allocation2 + $0xd9] sm:$0xff]  ;;  %v7919_v11 = vld [vmem:[#allocation2 + $0x4a] sm:$0xff] }
 0x3b4   : > { %v2772_v37 = vld [vmem:[#allocation2 + $0xf9] sm:$0xff]  ;;  %v2771_v46 = vld [vmem:[#allocation2 + $0xf1] sm:$0xff]  ;;  %v7927_v59 = vld [vmem:[#allocation2 + $0x62] sm:$0xff] }
 0x3b5   : > { %v2774_v30 = vld [vmem:[#allocation2 + $0x111] sm:$0xff]  ;;  %v2773_v44 = vld [vmem:[#allocation2 + $0x109] sm:$0xff]  ;;  %v7903_v24 = vld [vmem:[#allocation2 + $0x1a] sm:$0xff] }
 0x3b6   : > { %3056 = vrot.lane.b32.xlu0 %v7850_v34, %s5642_s16  ;;  %v2776_v32 = vld [vmem:[#allocation2 + $0x129] sm:$0xff]  ;;  %v2775_v29 = vld [vmem:[#allocation2 + $0x121] sm:$0xff]  ;;  %v7915_v40 = vld [vmem:[#allocation2 + $0x52] sm:$0xff] }
 0x3b7   : > { %3062 = vrot.lane.b32.xlu1 %v7854_v60, %s5642_s16  ;;  %v2778_v5 = vld [vmem:[#allocation2 + $0x141] sm:$0xff]  ;;  %v2777_v38 = vld [vmem:[#allocation2 + $0x139] sm:$0xff]  ;;  %v7923_v3 = vld [vmem:[#allocation2 + $0x6a] sm:$0xff] }
 0x3b8   : > { %v2780_v57 = vld [vmem:[#allocation2 + $0x159] sm:$0xff]  ;;  %v2779_v53 = vld [vmem:[#allocation2 + $0x151] sm:$0xff]  ;;  %v7931_v54 = vld [vmem:[#allocation2 + $0x82] sm:$0xff] }
 0x3b9   : > { %v2782_v48 = vld [vmem:[#allocation2 + $0x171] sm:$0xff]  ;;  %v2781_v4 = vld [vmem:[#allocation2 + $0x169] sm:$0xff]  ;;  %v7907_v28 = vld [vmem:[#allocation2 + $0x3a] sm:$0xff] }
 0x3ba   : > { %3060 = vrot.lane.b32.xlu0 %v7858_v0, %s5642_s16  ;;  %v7935_v58 = vld [vmem:[#allocation2 + $0x7a] sm:$0xff]  ;;  %v7943_v17 = vld [vmem:[#allocation2 + $0x92] sm:$0xff]  ;;  %v7951_v25 = vld [vmem:[#allocation2 + $0xaa] sm:$0xff] }
 0x3bb   : > { %3066 = vrot.lane.b32.xlu1 %v7862_v61, %s5642_s16  ;;  %v7939_v9 = vld [vmem:[#allocation2 + $0x9a] sm:$0xff]  ;;  %v7947_v33 = vld [vmem:[#allocation2 + $0xb2] sm:$0xff]  ;;  %v7955_v52 = vld [vmem:[#allocation2 + $0xca] sm:$0xff] }
 0x3bc   : > { %v7959_v15 = vld [vmem:[#allocation2 + $0xc2] sm:$0xff]  ;;  %v7964_v63 = vld [vmem:[#allocation2 + $0xda] sm:$0xff]  ;;  %v2803_v47 = vld [vmem:[#allocation2 + $0xf2] sm:$0xff] }
 0x3bd   : > { %v2802_v20 = vld [vmem:[#allocation2 + $0xe2] sm:$0xff]  ;;  %v2804_v27 = vld [vmem:[#allocation2 + $0xfa] sm:$0xff]  ;;  %v2806_v1 = vld [vmem:[#allocation2 + $0x112] sm:$0xff] }
 0x3be   : > { %3064 = vrot.lane.b32.xlu0 %v7866_v13, %s5642_s16  ;;  %v2805_v21 = vld [vmem:[#allocation2 + $0x10a] sm:$0xff]  ;;  %v2807_v31 = vld [vmem:[#allocation2 + $0x122] sm:$0xff]  ;;  %v2809_v22 = vld [vmem:[#allocation2 + $0x13a] sm:$0xff] }
 0x3bf   : > { %3070 = vrot.lane.b32.xlu1 %v7870_v41, %s5642_s16  ;;  %v2808_v43 = vld [vmem:[#allocation2 + $0x12a] sm:$0xff]  ;;  %v2810_v45 = vld [vmem:[#allocation2 + $0x142] sm:$0xff]  ;;  %v2812_v10 = vld [vmem:[#allocation2 + $0x15a] sm:$0xff] }
 0x3c0   : > { %vm9856_vm15 = vmmov %vm9853_vm4 }
 0x3c1   : > { %vm9857_vm0 = vmmov %vm9854_vm11 }
 0x3c2   : > { %3068 = vrot.lane.b32.xlu0 %v7874_v14, %s5642_s16  ;;  %vm9858_vm6 = vmmov %vm9855_vm13 }
 0x3c3   : > { %3074 = vrot.lane.b32.xlu1 %v2768_v50, %s5642_s16  ;;  %vm9859_vm1 = vmmov %vm9853_vm4 }
 0x3c4   : > { %vm9860_vm10 = vmmov %vm9859_vm1 }
 0x3c5   : > { %vm9861_vm8 = vmmov %vm9857_vm0 }
 0x3c6   : > { %3072 = vrot.lane.b32.xlu0 %v7879_v23, %s5642_s16  ;;  %vm9862_vm3 = vmmov %vm9857_vm0 }
 0x3c7   : > { %3078 = vrot.lane.b32.xlu1 %v2770_v56, %s5642_s16  ;;  %v2811_v56 = vld [vmem:[#allocation2 + $0x152] sm:$0xff] }
 0x3ca   : > { %3076 = vrot.lane.b32.xlu0 %v2769_v26, %s5642_s16 }
 0x3cb   : > { %3082 = vrot.lane.b32.xlu1 %v2772_v37, %s5642_s16  ;;  %v7987_v37 = vld [vmem:[#allocation2 + $0x18] sm:$0xff] }
 0x3ce   : > { %3080 = vrot.lane.b32.xlu0 %v2771_v46, %s5642_s16 }
 0x3cf   : > { %3086 = vrot.lane.b32.xlu1 %v2774_v30, %s5642_s16  ;;  %v2813_v30 = vld [vmem:[#allocation2 + $0x16a] sm:$0xff] }
 0x3d2   : > { %3084 = vrot.lane.b32.xlu0 %v2773_v44, %s5642_s16 }
 0x3d3   : > { %3090 = vrot.lane.b32.xlu1 %v2776_v32, %s5642_s16 }
 0x3d6   : > { %3088 = vrot.lane.b32.xlu0 %v2775_v29, %s5642_s16  ;;  %v8001_v29 = vld [vmem:[#allocation2 + $0x20] sm:$0xff] }
 0x3d7   : > { %3094 = vrot.lane.b32.xlu1 %v2778_v5, %s5642_s16 }
 0x3da   : > { %3092 = vrot.lane.b32.xlu0 %v2777_v38, %s5642_s16 }
 0x3db   : > { %3098 = vrot.lane.b32.xlu1 %v2780_v57, %s5642_s16  ;;  %v8011_v57 = vld [vmem:[#allocation2 + $0x30] sm:$0xff] }
 0x3de   : > { %3096 = vrot.lane.b32.xlu0 %v2779_v53, %s5642_s16 }
 0x3df   : > { %3102 = vrot.lane.b32.xlu1 %v2782_v48, %s5642_s16  ;;  %v8015_v48 = vld [vmem:[#allocation2 + $0x38] sm:$0xff] }
 0x3e2   : > { %3100 = vrot.lane.b32.xlu0 %v2781_v4, %s5642_s16  ;;  %s5650_s16 = smov 40   ;;  %v4293_v4 = vld [vmem:[%s9605_s5 + $0x8] sm:$0xff] }
 0x3e3   : > { %3170 = vrot.lane.b32.xlu1 %v2784_v35, %s5644_s18 }
 0x3e6   : > { %3168 = vrot.lane.b32.xlu0 %v2783_v2, %s5644_s18 }
 0x3e7   : > { %3174 = vrot.lane.b32.xlu1 %v7899_v51, %s5644_s18 }
 0x3ea   : > { %3172 = vrot.lane.b32.xlu0 %v7903_v24, %s5644_s18 }
 0x3eb   : > { %3178 = vrot.lane.b32.xlu1 %v7907_v28, %s5644_s18 }
 0x3ee   : > { %3176 = vrot.lane.b32.xlu0 %v7911_v62, %s5644_s18 }
 0x3ef   : > { %3182 = vrot.lane.b32.xlu1 %v7915_v40, %s5644_s18 }
 0x3f2   : > { %3180 = vrot.lane.b32.xlu0 %v7919_v11, %s5644_s18 }
 0x3f3   : > { %3186 = vrot.lane.b32.xlu1 %v7923_v3, %s5644_s18 }
 0x3f6   : > { %3184 = vrot.lane.b32.xlu0 %v7927_v59, %s5644_s18 }
 0x3f7   : > { %3190 = vrot.lane.b32.xlu1 %v7931_v54, %s5644_s18 }
 0x3fa   : > { %3188 = vrot.lane.b32.xlu0 %v7935_v58, %s5644_s18 }
 0x3fb   : > { %3194 = vrot.lane.b32.xlu1 %v7939_v9, %s5644_s18 }
 0x3fe   : > { %3192 = vrot.lane.b32.xlu0 %v7943_v17, %s5644_s18 }
 0x3ff   : > { %3198 = vrot.lane.b32.xlu1 %v7947_v33, %s5644_s18 }
 0x402   : > { %3196 = vrot.lane.b32.xlu0 %v7951_v25, %s5644_s18 }
 0x403   : > { %3202 = vrot.lane.b32.xlu1 %v7955_v52, %s5644_s18 }
 0x406   : > { %3200 = vrot.lane.b32.xlu0 %v7959_v15, %s5644_s18 }
 0x407   : > { %3206 = vrot.lane.b32.xlu1 %v2802_v20, %s5644_s18 }
 0x40a   : > { %3204 = vrot.lane.b32.xlu0 %v7964_v63, %s5644_s18 }
 0x40b   : > { %3210 = vrot.lane.b32.xlu1 %v2804_v27, %s5644_s18 }
 0x40e   : > { %3208 = vrot.lane.b32.xlu0 %v2803_v47, %s5644_s18  ;;  %v4295_v47 = vld [vmem:[%s9605_s5 + $0x18] sm:$0xff] }
 0x40f   : > { %3214 = vrot.lane.b32.xlu1 %v2806_v1, %s5644_s18 }
 0x410   : > { %v7979_v16 = vpop.permute.xlu1 %3046 }
 0x412   : > { %3212 = vrot.lane.b32.xlu0 %v2805_v21, %s5644_s18 }
 0x413   : > { %3218 = vrot.lane.b32.xlu1 %v2808_v43, %s5644_s18  ;;  %v4296_v43 = vld [vmem:[%s9605_s5 + $0x20] sm:$0xff] }
 0x416   : > { %3216 = vrot.lane.b32.xlu0 %v2807_v31, %s5644_s18  ;;  %v4297_v31 = vld [vmem:[%s9605_s5 + $0x28] sm:$0xff] }
 0x417   : > { %3222 = vrot.lane.b32.xlu1 %v2810_v45, %s5644_s18  ;;  %v5589_v45 = vpack.c.bf16 %v4297_v31, %v4296_v43 }
 0x419   : > { %v7983_v50 = vpop.permute.xlu0 %3044 }
 0x41a   : > { %3220 = vrot.lane.b32.xlu0 %v2809_v22, %s5644_s18 }
 0x41b   : > { %3226 = vrot.lane.b32.xlu1 %v2812_v10, %s5644_s18  ;;  %v7985_v26 = vpop.permute.xlu1 %3050 }
 0x41e   : > { %3224 = vrot.lane.b32.xlu0 %v2811_v56, %s5644_s18  ;;  %v4298_v56 = vld [vmem:[%s9605_s5 + $0x30] sm:$0xff] }
 0x41f   : > { %3296 = vrot.lane.b32.xlu1 %v7987_v37, %s5646_s11 }
 0x420   : > { %v7992_v46 = vpop.permute.xlu0 %3048 }
 0x421   : > { %v7994_v44 = vpop.permute.xlu1 %3054 }
 0x422   : > { %3228 = vrot.lane.b32.xlu0 %v2813_v30, %s5644_s18  ;;  %v4299_v30 = vld [vmem:[%s9605_s5 + $0x38] sm:$0xff] }
 0x423   : > { %3424 = vrot.lane.b32.xlu1 %v7741_v18, %s5648_s13 }
 0x424   : > { %v7999_v32 = vpop.permute.xlu0 %3052 }
 0x425   : > { %v8003_v5 = vpop.permute.xlu1 %3058 }
 0x426   : > { %3298 = vrot.lane.b32.xlu0 %v8001_v29, %s5646_s11 }
 0x427   : > { %3426 = vrot.lane.b32.xlu1 %v7668_v7, %s5648_s13  ;;  %v4292_v7 = vld [vmem:[%s9605_s5] sm:$0xff] }
 0x428   : > { %v8009_v38 = vpop.permute.xlu0 %3056  ;;  %v5581_v2 = vpack.c.bf16 %v4293_v4, %v4292_v7  ;;  %v5593_v7 = vpack.c.bf16 %v4299_v30, %v4298_v56 }
 0x429   : > { %v8013_v53 = vpop.permute.xlu1 %3062 }
 0x42a   : > { %3300 = vrot.lane.b32.xlu0 %v8011_v57, %s5646_s11  ;;  %5582 = vmatprep.subr.bf16.mxu0 %v5581_v2 }
 0x42b   : > { %3302 = vrot.lane.b32.xlu1 %v8015_v48, %s5646_s11  ;;  %5597 = vmatprep.subr.bf16.mxu1 %v5581_v2 }
 0x42c   : > { %v8021_v18 = vpop.permute.xlu0 %3060  ;;  %5584 = vmatpush3.bf16.msra.mxu0 %v5581_v2  ;;  %5602 = vmatpush3.bf16.msra.mxu1 %v5581_v2 }
 0x42d   : > { %v8023_v35 = vpop.permute.xlu1 %3066 }
 0x42e   : > { %9809 = vst [vmem:[#allocation5_spill] sm:$0xff] %v8023_v35  ;;  %3552 = vrot.lane.b32.xlu0 %v7903_v24, %s5650_s16  ;;  %v4294_v24 = vld [vmem:[%s9605_s5 + $0x10] sm:$0xff] }
 0x42f   : > { %3554 = vrot.lane.b32.xlu1 %v7899_v51, %s5650_s16  ;;  %v5585_v51 = vpack.c.bf16 %v4295_v47, %v4294_v24  ;;  %v4300_v24 = vld [vmem:[%s9605_s5 + $0x40] sm:$0xff] }
 0x430   : > { %v8035_v20 = vpop.permute.xlu0 %3064 }
 0x431   : > { %9810 = vst [vmem:[#allocation33_spill] sm:$0xff] %v8035_v20  ;;  %v8037_v27 = vpop.permute.xlu1 %3070  ;;  %5586 = vmatprep.subr.bf16.mxu0 %v5585_v51  ;;  %5598 = vmatprep.subr.bf16.mxu1 %v5585_v51 }
 0x432   : > { %9811 = vst [vmem:[#allocation41_spill] sm:$0xff] %v8037_v27  ;;  %3428 = vrot.lane.b32.xlu0 %v7822_v19, %s5648_s13  ;;  %5588 = vmatpush3.bf16.msra.mxu0 %v5585_v51 }
 0x433   : > { %3430 = vrot.lane.b32.xlu1 %v7767_v42, %s5648_s13  ;;  %5603 = vmatpush3.bf16.msra.mxu1 %v5585_v51  ;;  %v8090_v51 = vld [vmem:[#allocation2 + $0x48] sm:$0xff] }
 0x434   : > { %v8049_v1 = vpop.permute.xlu0 %3068  ;;  %5590 = vmatprep.subr.bf16.mxu0 %v5589_v45  ;;  %5599 = vmatprep.subr.bf16.mxu1 %v5589_v45 }
 0x435   : > { %9812 = vst [vmem:[#allocation34_spill] sm:$0xff] %v8049_v1  ;;  %v8051_v21 = vpop.permute.xlu1 %3074 }
 0x436   : > { %9813 = vst [vmem:[#allocation42_spill] sm:$0xff] %v8051_v21  ;;  %3680 = vrot.lane.b32.xlu0 %v8011_v57, %s5651_s12  ;;  %5592 = vmatpush3.bf16.msra.mxu0 %v5589_v45 }
 0x437   : > { %3682 = vrot.lane.b32.xlu1 %v8015_v48, %s5651_s12  ;;  %5604 = vmatpush3.bf16.msra.mxu1 %v5589_v45  ;;  %v8108_v45 = vld [vmem:[#allocation2 + $0x50] sm:$0xff] }
 0x438   : > { %v8063_v22 = vpop.permute.xlu0 %3072  ;;  %5594 = vmatprep.subr.bf16.mxu0 %v5593_v7  ;;  %5600 = vmatprep.subr.bf16.mxu1 %v5593_v7 }
 0x439   : > { %9814 = vst [vmem:[#allocation4_spill] sm:$0xff] %v8063_v22  ;;  %v8065_v10 = vpop.permute.xlu1 %3078 }
 0x43a   : > { %9815 = vst [vmem:[#allocation39_spill] sm:$0xff] %v8065_v10  ;;  %3556 = vrot.lane.b32.xlu0 %v7911_v62, %s5650_s16  ;;  %5596 = vmatpush3.bf16.msra.mxu0 %v5593_v7  ;;  %v8206_v10 = vld [vmem:[#allocation2 + $0x80] sm:$0xff] }
 0x43b   : > { %3558 = vrot.lane.b32.xlu1 %v7907_v28, %s5650_s16  ;;  %5523 = vmatprep.subr.mxu0 %v4300_v24 }
 0x43c   : > { %v8077_v4 = vpop.permute.xlu0 %3076  ;;  %5605 = vmatpush3.bf16.msra.mxu1 %v5593_v7 }
 0x43d   : > { %9816 = vst [vmem:[#allocation40_spill] sm:$0xff] %v8077_v4  ;;  %v8079_v2 = vpop.permute.xlu1 %3082  ;;  %5601 = vmatprep.subr.mxu1 %v4300_v24 }
 0x43e   : > { %9817 = vst [vmem:[#allocation43_spill] sm:$0xff] %v8079_v2  ;;  %3808 = vrot.lane.b32.xlu0 %v7822_v19, %s5652_s24  ;;  %5524 = vmatpush3.msra.mxu0 %v4300_v24 }
 0x43f   : > { %3810 = vrot.lane.b32.xlu1 %v7767_v42, %s5652_s24 }
 0x440   : > { %v8088_v47 = vpop.permute.xlu0 %3080  ;;  %5606 = vmatpush3.msra.mxu1 %v4300_v24 }
 0x441   : > { %9818 = vst [vmem:[#allocation44_spill] sm:$0xff] %v8088_v47  ;;  %v8092_v43 = vpop.permute.xlu1 %3086  ;;  %v8196_v47 = vld [vmem:[#allocation2 + $0x78] sm:$0xff] }
 0x442   : > { %9819 = vst [vmem:[#allocation7_spill] sm:$0xff] %v8092_v43  ;;  %3684 = vrot.lane.b32.xlu0 %v8090_v51, %s5651_s12 }
 0x443   : > { %3304 = vrot.lane.b32.xlu1 %v8090_v51, %s5646_s11 }
 0x444   : > { %v8098_v19 = vpop.permute.xlu0 %3084 }
 0x445   : > { %9820 = vst [vmem:[#allocation45_spill] sm:$0xff] %v8098_v19  ;;  %v8100_v42 = vpop.permute.xlu1 %3090 }
 0x446   : > { %9821 = vst [vmem:[#allocation46_spill] sm:$0xff] %v8100_v42  ;;  %3936 = vrot.lane.b32.xlu0 %v7911_v62, %s5653_s27 }
 0x447   : > { %3812 = vrot.lane.b32.xlu1 %v7842_v49, %s5652_s24 }
 0x448   : > { %v8106_v31 = vpop.permute.xlu0 %3088 }
 0x449   : > { %9822 = vst [vmem:[#allocation6_spill] sm:$0xff] %v8106_v31  ;;  %v8110_v56 = vpop.permute.xlu1 %3094 }
 0x44a   : > { %9823 = vst [vmem:[#allocation9_spill] sm:$0xff] %v8110_v56  ;;  %3686 = vrot.lane.b32.xlu0 %v8108_v45, %s5651_s12 }
 0x44b   : > { %3306 = vrot.lane.b32.xlu1 %v8108_v45, %s5646_s11 }
 0x44c   : > { %v8116_v30 = vpop.permute.xlu0 %3092 }
 0x44d   : > { %9824 = vst [vmem:[#allocation8_spill] sm:$0xff] %v8116_v30  ;;  %v8118_v7 = vpop.permute.xlu1 %3098 }
 0x44e   : > { %9825 = vst [vmem:[#allocation11_spill] sm:$0xff] %v8118_v7  ;;  %3938 = vrot.lane.b32.xlu0 %v7907_v28, %s5653_s27 }
 0x44f   : > { %3814 = vrot.lane.b32.xlu1 %v7836_v55, %s5652_s24 }
 0x450   : > { %v8124_v62 = vpop.permute.xlu0 %3096 }
 0x451   : > { %9826 = vst [vmem:[#allocation10_spill] sm:$0xff] %v8124_v62  ;;  %v8126_v24 = vpop.permute.xlu1 %3102 }
 0x452   : > { %9827 = vst [vmem:[#allocation13_spill] sm:$0xff] %v8126_v24  ;;  %3432 = vrot.lane.b32.xlu0 %v7842_v49, %s5648_s13  ;;  %v8144_v24 = vld [vmem:[#allocation2 + $0x60] sm:$0xff] }
 0x453   : > { %3434 = vrot.lane.b32.xlu1 %v7836_v55, %s5648_s13 }
 0x454   : > { %v8132_v36 = vpop.permute.xlu0 %3100 }
 0x455   : > { %9828 = vst [vmem:[#allocation48_spill] sm:$0xff] %v8132_v36  ;;  %v8134_v39 = vpop.permute.xlu1 %3170  ;;  %v8154_v36 = vld [vmem:[#allocation2 + $0x68] sm:$0xff] }
 0x456   : > { %3940 = vrot.lane.b32.xlu0 %v7919_v11, %s5653_s27 }
 0x457   : > { %3942 = vrot.lane.b32.xlu1 %v7915_v40, %s5653_s27 }
 0x458   : > { %v8140_v28 = vpop.permute.xlu0 %3168 }
 0x459   : > { %v8142_v7 = vpop.permute.xlu1 %3174 }
 0x45a   : > { %3560 = vrot.lane.b32.xlu0 %v7919_v11, %s5650_s16 }
 0x45b   : > { %3688 = vrot.lane.b32.xlu1 %v8144_v24, %s5651_s12 }
 0x45c   : > { %v8150_v55 = vpop.permute.xlu0 %3172 }
 0x45d   : > { %v8152_v49 = vpop.permute.xlu1 %3178 }
 0x45e   : > { %3562 = vrot.lane.b32.xlu0 %v7915_v40, %s5650_s16 }
 0x45f   : > { %3690 = vrot.lane.b32.xlu1 %v8154_v36, %s5651_s12 }
 0x460   : > { %v8160_v62 = vpop.permute.xlu0 %3176 }
 0x461   : > { %v8162_v56 = vpop.permute.xlu1 %3182 }
 0x462   : > { %3308 = vrot.lane.b32.xlu0 %v8144_v24, %s5646_s11 }
 0x463   : > { %3310 = vrot.lane.b32.xlu1 %v8154_v36, %s5646_s11 }
 0x464   : > { %v8168_v11 = vpop.permute.xlu0 %3180 }
 0x465   : > { %v8170_v30 = vpop.permute.xlu1 %3186 }
 0x466   : > { %3816 = vrot.lane.b32.xlu0 %v7850_v34, %s5652_s24 }
 0x467   : > { %3818 = vrot.lane.b32.xlu1 %v7846_v6, %s5652_s24 }
 0x468   : > { %v8176_v40 = vpop.permute.xlu0 %3184 }
 0x469   : > { %v8178_v42 = vpop.permute.xlu1 %3190 }
 0x46a   : > { %9829 = vst [vmem:[#allocation15_spill] sm:$0xff] %v8178_v42  ;;  %3436 = vrot.lane.b32.xlu0 %v7850_v34, %s5648_s13 }
 0x46b   : > { %3438 = vrot.lane.b32.xlu1 %v7846_v6, %s5648_s13 }
 0x46c   : > { %v8184_v31 = vpop.permute.xlu0 %3188 }
 0x46d   : > { %v8186_v43 = vpop.permute.xlu1 %3194 }
 0x46e   : > { %9830 = vst [vmem:[#allocation47_spill] sm:$0xff] %v8186_v43  ;;  %3944 = vrot.lane.b32.xlu0 %v7927_v59, %s5653_s27 }
 0x46f   : > { %3946 = vrot.lane.b32.xlu1 %v7923_v3, %s5653_s27 }
 0x470   : > { %v8192_v19 = vpop.permute.xlu0 %3192 }
 0x471   : > { %9831 = vst [vmem:[#allocation12_spill] sm:$0xff] %v8192_v19  ;;  %v8194_v2 = vpop.permute.xlu1 %3198  ;;  %v2719_v19 = vld [vmem:[#allocation2] sm:$0xff] }
 0x472   : > { %9832 = vst [vmem:[#allocation20_spill] sm:$0xff] %v8194_v2  ;;  %3564 = vrot.lane.b32.xlu0 %v7927_v59, %s5650_s16  ;;  %v8288_v2 = vld [vmem:[#allocation2 + $0xa8] sm:$0xff]  ;;  %v4032_v35 = vsel %vm1680_vm2, %v2719_v19, %v7976_v12 }
 0x473   : > { %3692 = vrot.lane.b32.xlu1 %v8196_v47, %s5651_s12  ;;  %9851 = vst [vmem:[#allocation3_spill] sm:$0xff] %v8288_v2 }
 0x474   : > { %v8202_v6 = vpop.permute.xlu0 %3196 }
 0x475   : > { %9833 = vst [vmem:[#allocation50_spill] sm:$0xff] %v8202_v6  ;;  %v8204_v34 = vpop.permute.xlu1 %3202  ;;  %v8298_v6 = vld [vmem:[#allocation2 + $0xb0] sm:$0xff] }
 0x476   : > { %9834 = vst [vmem:[#allocation14_spill] sm:$0xff] %v8204_v34  ;;  %3566 = vrot.lane.b32.xlu0 %v7923_v3, %s5650_s16  ;;  %9852 = vst [vmem:[#allocation29_spill] sm:$0xff] %v8298_v6 }
 0x477   : > { %3694 = vrot.lane.b32.xlu1 %v8206_v10, %s5651_s12 }
 0x478   : > { %v8212_v4 = vpop.permute.xlu0 %3200 }
 0x479   : > { %9835 = vst [vmem:[#allocation21_spill] sm:$0xff] %v8212_v4  ;;  %v8214_v21 = vpop.permute.xlu1 %3206 }
 0x47a   : > { %9836 = vst [vmem:[#allocation49_spill] sm:$0xff] %v8214_v21  ;;  %3312 = vrot.lane.b32.xlu0 %v8196_v47, %s5646_s11 }
 0x47b   : > { %3314 = vrot.lane.b32.xlu1 %v8206_v10, %s5646_s11 }
 0x47c   : > { %v8220_v59 = vpop.permute.xlu0 %3204 }
 0x47d   : > { %9837 = vst [vmem:[#allocation17_spill] sm:$0xff] %v8220_v59  ;;  %v8222_v34 = vpop.permute.xlu1 %3210 }
 0x47e   : > { %9838 = vst [vmem:[#allocation52_spill] sm:$0xff] %v8222_v34  ;;  %3820 = vrot.lane.b32.xlu0 %v7858_v0, %s5652_s24 }
 0x47f   : > { %3822 = vrot.lane.b32.xlu1 %v7854_v60, %s5652_s24 }
 0x480   : > { %v8228_v3 = vpop.permute.xlu0 %3208 }
 0x481   : > { %9839 = vst [vmem:[#allocation16_spill] sm:$0xff] %v8228_v3  ;;  %v8230_v4 = vpop.permute.xlu1 %3214 }
 0x482   : > { %9840 = vst [vmem:[#allocation22_spill] sm:$0xff] %v8230_v4  ;;  %3440 = vrot.lane.b32.xlu0 %v7858_v0, %s5648_s13  ;;  %v8248_v4 = vld [vmem:[#allocation2 + $0x90] sm:$0xff] }
 0x483   : > { %3442 = vrot.lane.b32.xlu1 %v7854_v60, %s5648_s13  ;;  %9845 = vst [vmem:[#allocation57_spill] sm:$0xff] %v8248_v4 }
 0x484   : > { %v8236_v21 = vpop.permute.xlu0 %3212 }
 0x485   : > { %9841 = vst [vmem:[#allocation51_spill] sm:$0xff] %v8236_v21  ;;  %v8238_v59 = vpop.permute.xlu1 %3218 }
 0x486   : > { %9842 = vst [vmem:[#allocation55_spill] sm:$0xff] %v8238_v59  ;;  %3948 = vrot.lane.b32.xlu0 %v7935_v58, %s5653_s27  ;;  %v8258_v59 = vld [vmem:[#allocation2 + $0x98] sm:$0xff] }
 0x487   : > { %3950 = vrot.lane.b32.xlu1 %v7931_v54, %s5653_s27  ;;  %9848 = vst [vmem:[#allocation56_spill] sm:$0xff] %v8258_v59 }
 0x488   : > { %v8244_v34 = vpop.permute.xlu0 %3216 }
 0x489   : > { %9843 = vst [vmem:[#allocation19_spill] sm:$0xff] %v8244_v34  ;;  %v8246_v3 = vpop.permute.xlu1 %3222 }
 0x48a   : > { %9844 = vst [vmem:[#allocation54_spill] sm:$0xff] %v8246_v3  ;;  %3568 = vrot.lane.b32.xlu0 %v7935_v58, %s5650_s16 }
 0x48b   : > { %3696 = vrot.lane.b32.xlu1 %v8248_v4, %s5651_s12 }
 0x48c   : > { %v8254_v60 = vpop.permute.xlu0 %3220 }
 0x48d   : > { %9846 = vst [vmem:[#allocation18_spill] sm:$0xff] %v8254_v60  ;;  %v8256_v0 = vpop.permute.xlu1 %3226 }
 0x48e   : > { %9847 = vst [vmem:[#allocation53_spill] sm:$0xff] %v8256_v0  ;;  %3570 = vrot.lane.b32.xlu0 %v7931_v54, %s5650_s16 }
 0x48f   : > { %3698 = vrot.lane.b32.xlu1 %v8258_v59, %s5651_s12 }
 0x490   : > { %v8264_v3 = vpop.permute.xlu0 %3224 }
 0x491   : > { %9849 = vst [vmem:[#allocation23_spill] sm:$0xff] %v8264_v3  ;;  %v3297_v34 = vpop.permute.xlu1 %3296 }
 0x492   : > { %3316 = vrot.lane.b32.xlu0 %v8248_v4, %s5646_s11 }
 0x493   : > { %3318 = vrot.lane.b32.xlu1 %v8258_v59, %s5646_s11 }
 0x494   : > { %v8270_v58 = vpop.permute.xlu0 %3228 }
 0x495   : > { %9850 = vst [vmem:[#allocation37_spill] sm:$0xff] %v8270_v58  ;;  %v3425_v0 = vpop.permute.xlu1 %3424 }
 0x496   : > { %3824 = vrot.lane.b32.xlu0 %v7866_v13, %s5652_s24 }
 0x497   : > { %3826 = vrot.lane.b32.xlu1 %v7862_v61, %s5652_s24 }
 0x498   : > { %v3299_v54 = vpop.permute.xlu0 %3298 }
 0x499   : > { %v3427_v60 = vpop.permute.xlu1 %3426 }
 0x49a   : > { %3444 = vrot.lane.b32.xlu0 %v7866_v13, %s5648_s13 }
 0x49b   : > { %3446 = vrot.lane.b32.xlu1 %v7862_v61, %s5648_s13 }
 0x49c   : > { %v8280_v3 = vpop.permute.xlu0 %3300 }
 0x49d   : > { %v8282_v21 = vpop.permute.xlu1 %3302 }
 0x49e   : > { %3952 = vrot.lane.b32.xlu0 %v7943_v17, %s5653_s27 }
 0x49f   : > { %3954 = vrot.lane.b32.xlu1 %v7939_v9, %s5653_s27 }
 0x4a0   : > { %v3553_v58 = vpop.permute.xlu0 %3552 }
 0x4a1   : > { %v3555_v22 = vpop.permute.xlu1 %3554 }
 0x4a2   : > { %3572 = vrot.lane.b32.xlu0 %v7943_v17, %s5650_s16 }
 0x4a3   : > { %3700 = vrot.lane.b32.xlu1 %v8288_v2, %s5651_s12 }
 0x4a4   : > { %v8294_v61 = vpop.permute.xlu0 %3428 }
 0x4a5   : > { %v8296_v13 = vpop.permute.xlu1 %3430 }
 0x4a6   : > { %3574 = vrot.lane.b32.xlu0 %v7939_v9, %s5650_s16 }
 0x4a7   : > { %3702 = vrot.lane.b32.xlu1 %v8298_v6, %s5651_s12 }
 0x4a8   : > { %v3681_v27 = vpop.permute.xlu0 %3680 }
 0x4a9   : > { %v3683_v1 = vpop.permute.xlu1 %3682 }
 0x4aa   : > { %3320 = vrot.lane.b32.xlu0 %v8288_v2, %s5646_s11 }
 0x4ab   : > { %3322 = vrot.lane.b32.xlu1 %v8298_v6, %s5646_s11  ;;  %v4064_v6 = vsel %vm9853_vm4, %v4032_v35, %v8140_v28  ;;  %vm9863_vm4 = vmmov %vm9858_vm6 }
 0x4ac   : > { %v3557_v17 = vpop.permute.xlu0 %3556  ;;  %v4096_v2 = vsel %vm9854_vm11, %v4064_v6, %v3297_v34  ;;  %v8336_v6 = vld [vmem:[#allocation2 + $0xc0] sm:$0xff]  ;;  %vm9864_vm11 = vmmov %vm9863_vm4 }
 0x4ad   : > { %v8308_v43 = vpop.permute.xlu1 %3558  ;;  %v4128_v20 = vsel %vm9855_vm13, %v4096_v2, %v3425_v0  ;;  %vm9865_vm13 = vmmov %vm9859_vm1 }
 0x4ae   : > { %3828 = vrot.lane.b32.xlu0 %v7874_v14, %s5652_s24  ;;  %v4161_v12 = vsel %vm4160_vm5, %v4128_v20, %v3553_v58 }
 0x4af   : > { %3830 = vrot.lane.b32.xlu1 %v7870_v41, %s5652_s24  ;;  %v4194_v35 = vsel %vm4193_vm12, %v4161_v12, %v3681_v27 }
 0x4b0   : > { %v3809_v9 = vpop.permute.xlu0 %3808 }
 0x4b1   : > { %v3811_v59 = vpop.permute.xlu1 %3810 }
 0x4b2   : > { %3448 = vrot.lane.b32.xlu0 %v7874_v14, %s5648_s13  ;;  %v2720_v14 = vld [vmem:[#allocation2 + $0x8] sm:$0xff] }
 0x4b3   : > { %3450 = vrot.lane.b32.xlu1 %v7870_v41, %s5648_s13  ;;  %v4227_v41 = vsel %vm4226_vm14, %v4194_v35, %v3809_v9  ;;  %v4033_v20 = vsel %vm1680_vm2, %v2720_v14, %v7971_v8  ;;  %v8349_v8 = vld [vmem:[#allocation2 + $0xc8] sm:$0xff]  ;;  %v4034_v35 = vsel %vm1680_vm2, %v7987_v37, %v7983_v50 }
 0x4b4   : > { %v3685_v4 = vpop.permute.xlu0 %3684  ;;  %v4065_v27 = vsel %vm9856_vm15, %v4033_v20, %v8134_v39  ;;  %v2861_v20 = vld [vmem:[#allocation2 + $0xc1] sm:$0xff]  ;;  %vm9866_vm15 = vmmov %vm9859_vm1 }
 0x4b5   : > { %v8324_v42 = vpop.permute.xlu1 %3304  ;;  %v4097_v34 = vsel %vm9857_vm0, %v4065_v27, %v3299_v54 }
 0x4b6   : > { %3956 = vrot.lane.b32.xlu0 %v7951_v25, %s5653_s27  ;;  %v4129_v58 = vsel %vm9858_vm6, %v4097_v34, %v3427_v60  ;;  %vm9867_vm6 = vmmov %vm9857_vm0 }
 0x4b7   : > { %3958 = vrot.lane.b32.xlu1 %v7947_v33, %s5653_s27  ;;  %v4162_v12 = vsel %vm4160_vm5, %v4129_v58, %v3555_v22 }
 0x4b8   : > { %v3937_v19 = vpop.permute.xlu0 %3936 }
 0x4b9   : > { %v4260_v2 = vsel %vm4259_vm7, %v4227_v41, %v3937_v19  ;;  %v3813_v28 = vpop.permute.xlu1 %3812 }
 0x4ba   : > { %3576 = vrot.lane.b32.xlu0 %v7951_v25, %s5650_s16  ;;  %5525 = vmatprep.mubr.msk.f32.mxu0 %vm4308_vm9, %v4260_v2  ;;  %v4195_v25 = vsel %vm4193_vm12, %v4162_v12, %v3683_v1  ;;  %v4066_v1 = vsel %vm9859_vm1, %v4034_v35, %v8150_v55  ;;  %vm9868_vm1 = vmmov %vm9863_vm4 }
 0x4bb   : > { %3704 = vrot.lane.b32.xlu1 %v8336_v6, %s5651_s12  ;;  %v4228_v39 = vsel %vm4226_vm14, %v4195_v25, %v3811_v59  ;;  %v4098_v50 = vsel %vm9861_vm8, %v4066_v1, %v8280_v3  ;;  %v8410_v25 = vld [vmem:[#allocation2 + $0xe0] sm:$0xff]  ;;  %vm9870_vm8 = vmmov %vm9865_vm13 }
 0x4bc   : > { %v3687_v0 = vpop.permute.xlu0 %3686  ;;  %v4130_v41 = vsel %vm9863_vm4, %v4098_v50, %v8294_v61  ;;  %v2958_v1 = vld [vmem:[#allocation2 + $0xd9] sm:$0xff]  ;;  %vm9872_vm4 = vmmov %vm9857_vm0 }
 0x4bd   : > { %v8347_v9 = vpop.permute.xlu1 %3306  ;;  %v4163_v55 = vsel %vm4160_vm5, %v4130_v41, %v3557_v17 }
 0x4be   : > { %3578 = vrot.lane.b32.xlu0 %v7947_v33, %s5650_s16  ;;  %v4035_v33 = vsel %vm1680_vm2, %v8001_v29, %v7979_v16  ;;  %v4196_v19 = vsel %vm4193_vm12, %v4163_v55, %v3685_v4 }
 0x4bf   : > { %3706 = vrot.lane.b32.xlu1 %v8349_v8, %s5651_s12  ;;  %v4067_v22 = vsel %vm9860_vm10, %v4035_v33, %v8142_v7  ;;  %v2957_v7 = vld [vmem:[#allocation2 + $0xc9] sm:$0xff]  ;;  %vm9869_vm10 = vmmov %vm9868_vm1 }
 0x4c0   : > { %v3939_v54 = vpop.permute.xlu0 %3938  ;;  %v4099_v59 = vsel %vm9862_vm3, %v4067_v22, %v8282_v21  ;;  %v4229_v21 = vsel %vm4226_vm14, %v4196_v19, %v3813_v28  ;;  %v2959_v22 = vld [vmem:[#allocation2 + $0xe1] sm:$0xff]  ;;  %vm9871_vm3 = vmmov %vm9870_vm8 }
 0x4c1   : > { %v4261_v14 = vsel %vm4259_vm7, %v4228_v39, %v3939_v54  ;;  %v3815_v60 = vpop.permute.xlu1 %3814  ;;  %v4131_v29 = vsel %vm9864_vm11, %v4099_v59, %v8296_v13  ;;  %vm9873_vm11 = vmmov %vm9857_vm0 }
 0x4c2   : > { %3324 = vrot.lane.b32.xlu0 %v8336_v6, %s5646_s11  ;;  %5526 = vmatmul.mubr.msk.f32.vlgmr.msra.gmra.mrb[32].mxu0 %vm4308_vm9, %v4261_v14  ;;  %v4164_v3 = vsel %vm4160_vm5, %v4131_v29, %v8308_v43  ;;  %v4037_v14 = vsel %vm1680_vm2, %v8015_v48, %v7985_v26 }
 0x4c3   : > { %3326 = vrot.lane.b32.xlu1 %v8349_v8, %s5646_s11  ;;  %v4197_v61 = vsel %vm4193_vm12, %v4164_v3, %v3687_v0  ;;  %v8402_v0 = vld [vmem:[#allocation2 + $0xd8] sm:$0xff]  ;;  %v2991_v3 = vld [vmem:[#allocation2 + $0xe2] sm:$0xff] }
 0x4c4   : > { %v3433_v37 = vpop.permute.xlu0 %3432  ;;  %v4230_v13 = vsel %vm4226_vm14, %v4197_v61, %v3815_v60 }
 0x4c5   : > { %v3435_v16 = vpop.permute.xlu1 %3434 }
 0x4c6   : > { %3832 = vrot.lane.b32.xlu0 %v7879_v23, %s5652_s24 }
 0x4c7   : > { %3834 = vrot.lane.b32.xlu1 %v2957_v7, %s5652_s24 }
 0x4c8   : > { %v3941_v2 = vpop.permute.xlu0 %3940 }
 0x4c9   : > { %v4262_v17 = vsel %vm4259_vm7, %v4229_v21, %v3941_v2  ;;  %v3943_v27 = vpop.permute.xlu1 %3942  ;;  %v2895_v21 = vld [vmem:[#allocation2 + $0xda] sm:$0xff]  ;;  %v8453_v2 = vld [vmem:[#allocation2 + $0xf0] sm:$0xff] }
 0x4ca   : > { %3452 = vrot.lane.b32.xlu0 %v2861_v20, %s5648_s13  ;;  %5528 = vmatprep.mubr.msk.f32.mxu1 %vm4308_vm9, %v4262_v17  ;;  %v4263_v23 = vsel %vm4259_vm7, %v4230_v13, %v3943_v27  ;;  %v8460_v17 = vld [vmem:[#allocation2 + $0xf8] sm:$0xff] }
 0x4cb   : > { %3454 = vrot.lane.b32.xlu1 %v2957_v7, %s5648_s13  ;;  %5529 = vmatmul.mubr.msk.f32.vlgmr.msra.gmra.mrb[0].mxu1 %vm4308_vm9, %v4263_v23  ;;  %v4038_v23 = vsel %vm1680_vm2, %v8090_v51, %v7999_v32 }
 0x4cc   : > { %v3561_v4 = vpop.permute.xlu0 %3560 }
 0x4cd   : > { %v3689_v43 = vpop.permute.xlu1 %3688 }
 0x4ce   : > { %3960 = vrot.lane.b32.xlu0 %v7959_v15, %s5653_s27 }
 0x4cf   : > { %3962 = vrot.lane.b32.xlu1 %v7955_v52, %s5653_s27 }
 0x4d0   : > { %v3563_v28 = vpop.permute.xlu0 %3562 }
 0x4d1   : > { %v3691_v34 = vpop.permute.xlu1 %3690 }
 0x4d2   : > { %3580 = vrot.lane.b32.xlu0 %v7959_v15, %s5650_s16  ;;  %v4036_v15 = vsel %vm1680_vm2, %v8011_v57, %v7992_v46 }
 0x4d3   : > { %3708 = vrot.lane.b32.xlu1 %v8402_v0, %s5651_s12  ;;  %v4068_v60 = vsel %vm9865_vm13, %v4036_v15, %v8160_v62  ;;  %vm9874_vm13 = vmmov %vm9868_vm1 }
 0x4d4   : > { %v3309_v58 = vpop.permute.xlu0 %3308  ;;  %v4100_v35 = vsel %vm9857_vm0, %v4068_v60, %v8324_v42  ;;  %vm9876_vm0 = vmmov %vm9871_vm3 }
 0x4d5   : > { %v8408_v12 = vpop.permute.xlu1 %3310  ;;  %v4132_v33 = vsel %vm9868_vm1, %v4100_v35, %v3433_v37 }
 0x4d6   : > { %3582 = vrot.lane.b32.xlu0 %v7955_v52, %s5650_s16  ;;  %v4069_v52 = vsel %vm9866_vm15, %v4037_v14, %v8152_v49  ;;  %v4165_v62 = vsel %vm4160_vm5, %v4132_v33, %v3561_v4  ;;  %v4039_v4 = vsel %vm1680_vm2, %v8108_v45, %v7994_v44  ;;  %vm9875_vm15 = vmmov %vm9868_vm1 }
 0x4d7   : > { %3710 = vrot.lane.b32.xlu1 %v8410_v25, %s5651_s12  ;;  %v4101_v57 = vsel %vm9867_vm6, %v4069_v52, %v8347_v9  ;;  %v4198_v49 = vsel %vm4193_vm12, %v4165_v62, %v3689_v43  ;;  %v4070_v43 = vsel %vm9870_vm8, %v4038_v23, %v8168_v11  ;;  %v2961_v11 = vld [vmem:[#allocation2 + $0xf9] sm:$0xff]  ;;  %vm9877_vm6 = vmmov %vm9876_vm0 }
 0x4d8   : > { %v3817_v39 = vpop.permute.xlu0 %3816  ;;  %v4133_v48 = vsel %vm9869_vm10, %v4101_v57, %v3435_v16  ;;  %vm9878_vm1 = vmmov %vm9872_vm4 }
 0x4d9   : > { %v3819_v54 = vpop.permute.xlu1 %3818  ;;  %v4166_v50 = vsel %vm4160_vm5, %v4133_v48, %v3563_v28  ;;  %v4231_v9 = vsel %vm4226_vm14, %v4198_v49, %v3817_v39  ;;  %v4071_v28 = vsel %vm9871_vm3, %v4039_v4, %v8162_v56  ;;  %v2993_v48 = vld [vmem:[#allocation2 + $0xfa] sm:$0xff]  ;;  %v8500_v49 = vld [vmem:[#allocation2 + $0x108] sm:$0xff]  ;;  %vm9879_vm10 = vmmov %vm9878_vm1 }
 0x4da   : > { %3328 = vrot.lane.b32.xlu0 %v8402_v0, %s5646_s11  ;;  %v4199_v42 = vsel %vm4193_vm12, %v4166_v50, %v3691_v34  ;;  %v4102_v34 = vsel %vm9872_vm4, %v4070_v43, %v3309_v58  ;;  %v4103_v32 = vsel %vm9873_vm11, %v4071_v28, %v8408_v12  ;;  %vm9880_vm8 = vmmov %vm9874_vm13 }
 0x4db   : > { %3330 = vrot.lane.b32.xlu1 %v8410_v25, %s5646_s11  ;;  %v4232_v59 = vsel %vm4226_vm14, %v4199_v42, %v3819_v54  ;;  %v2960_v54 = vld [vmem:[#allocation2 + $0xf1] sm:$0xff]  ;;  %vm9881_vm3 = vmmov %vm9880_vm8 }
 0x4dc   : > { %v3437_v46 = vpop.permute.xlu0 %3436  ;;  %vm9882_vm4 = vmmov %vm9876_vm0 }
 0x4dd   : > { %v3439_v26 = vpop.permute.xlu1 %3438  ;;  %v4134_v51 = vsel %vm9874_vm13, %v4102_v34, %v3437_v46  ;;  %v2994_v34 = vld [vmem:[#allocation2 + $0x10a] sm:$0xff]  ;;  %vm9884_vm11 = vmmov %vm9876_vm0 }
 0x4de   : > { %3836 = vrot.lane.b32.xlu0 %v2958_v1, %s5652_s24  ;;  %v4135_v44 = vsel %vm9875_vm15, %v4103_v32, %v3439_v26  ;;  %v2995_v32 = vld [vmem:[#allocation2 + $0x112] sm:$0xff]  ;;  %vm9885_vm13 = vmmov %vm9878_vm1 }
 0x4df   : > { %3838 = vrot.lane.b32.xlu1 %v2959_v22, %s5652_s24  ;;  %vm9886_vm15 = vmmov %vm9878_vm1 }
 0x4e0   : > { %v3945_v37 = vpop.permute.xlu0 %3944 }
 0x4e1   : > { %v4264_v41 = vsel %vm4259_vm7, %v4231_v9, %v3945_v37  ;;  %v3947_v16 = vpop.permute.xlu1 %3946  ;;  %v8507_v9 = vld [vmem:[#allocation2 + $0x110] sm:$0xff] }
 0x4e2   : > { %3456 = vrot.lane.b32.xlu0 %v2958_v1, %s5648_s13  ;;  %5531 = vmatprep.mubr.msk.f32.mxu1 %vm4308_vm9, %v4264_v41  ;;  %v4265_v29 = vsel %vm4259_vm7, %v4232_v59, %v3947_v16  ;;  %v2992_v1 = vld [vmem:[#allocation2 + $0xf2] sm:$0xff]  ;;  %v4040_v41 = vsel %vm1680_vm2, %v8144_v24, %v8009_v38  ;;  %v4041_v16 = vsel %vm1680_vm2, %v8154_v36, %v8003_v5 }
 0x4e3   : > { %3458 = vrot.lane.b32.xlu1 %v2959_v22, %s5648_s13  ;;  %5532 = vmatmul.mubr.msk.f32.gmra.mrb[2].mxu1 %vm4308_vm9, %v4265_v29  ;;  %v4072_v29 = vsel %vm9876_vm0, %v4040_v41, %v8176_v40  ;;  %v2963_v40 = vld [vmem:[#allocation2 + $0x111] sm:$0xff]  ;;  %vm9887_vm0 = vmmov %vm9881_vm3 }
 0x4e4   : > { %v3565_v55 = vpop.permute.xlu0 %3564 }
 0x4e5   : > { %v3693_v7 = vpop.permute.xlu1 %3692  ;;  %v4167_v45 = vsel %vm4160_vm5, %v4134_v51, %v3565_v55  ;;  %v4073_v55 = vsel %vm9877_vm6, %v4041_v16, %v8170_v30  ;;  %vm9888_vm6 = vmmov %vm9887_vm0 }
 0x4e6   : > { %3964 = vrot.lane.b32.xlu0 %v7964_v63, %s5653_s27  ;;  %v4200_v14 = vsel %vm4193_vm12, %v4167_v45, %v3693_v7 }
 0x4e7   : > { %3966 = vrot.lane.b32.xlu1 %v2991_v3, %s5653_s27 }
 0x4e8   : > { %v3567_v19 = vpop.permute.xlu0 %3566 }
 0x4e9   : > { %v3695_v61 = vpop.permute.xlu1 %3694  ;;  %v4168_v56 = vsel %vm4160_vm5, %v4135_v44, %v3567_v19  ;;  %v2962_v19 = vld [vmem:[#allocation2 + $0x109] sm:$0xff] }
 0x4ea   : > { %3584 = vrot.lane.b32.xlu0 %v2895_v21, %s5650_s16  ;;  %v4201_v58 = vsel %vm4193_vm12, %v4168_v56, %v3695_v61 }
 0x4eb   : > { %3712 = vrot.lane.b32.xlu1 %v8453_v2, %s5651_s12 }
 0x4ec   : > { %v3313_v13 = vpop.permute.xlu0 %3312 }
 0x4ed   : > { %v8458_v20 = vpop.permute.xlu1 %3314  ;;  %v4104_v7 = vsel %vm9878_vm1, %v4072_v29, %v3313_v13  ;;  %v2996_v29 = vld [vmem:[#allocation2 + $0x122] sm:$0xff]  ;;  %vm9894_vm1 = vmmov %vm9882_vm4 }
 0x4ee   : > { %3586 = vrot.lane.b32.xlu0 %v2991_v3, %s5650_s16  ;;  %v4105_v38 = vsel %vm9879_vm10, %v4073_v55, %v8458_v20  ;;  %vm9896_vm10 = vmmov %vm9894_vm1 }
 0x4ef   : > { %3714 = vrot.lane.b32.xlu1 %v8460_v17, %s5651_s12 }
 0x4f0   : > { %v3821_v63 = vpop.permute.xlu0 %3820 }
 0x4f1   : > { %v3823_v27 = vpop.permute.xlu1 %3822  ;;  %v4233_v12 = vsel %vm4226_vm14, %v4200_v14, %v3821_v63 }
 0x4f2   : > { %3332 = vrot.lane.b32.xlu0 %v8453_v2, %s5646_s11  ;;  %v4234_v52 = vsel %vm4226_vm14, %v4201_v58, %v3823_v27  ;;  %v4042_v58 = vsel %vm1680_vm2, %v8196_v47, %v8021_v18 }
 0x4f3   : > { %3334 = vrot.lane.b32.xlu1 %v8460_v17, %s5646_s11 }
 0x4f4   : > { %v3441_v39 = vpop.permute.xlu0 %3440 }
 0x4f5   : > { %v3443_v15 = vpop.permute.xlu1 %3442  ;;  %v4136_v24 = vsel %vm9880_vm8, %v4104_v7, %v3441_v39  ;;  %v2997_v7 = vld [vmem:[#allocation2 + $0x12a] sm:$0xff]  ;;  %vm9897_vm8 = vmmov %vm9885_vm13 }
 0x4f6   : > { %3840 = vrot.lane.b32.xlu0 %v2960_v54, %s5652_s24  ;;  %v4137_v36 = vsel %vm9881_vm3, %v4105_v38, %v3443_v15  ;;  %v8547_v15 = vld [vmem:[#allocation2 + $0x120] sm:$0xff]  ;;  %vm9898_vm3 = vmmov %vm9897_vm8 }
 0x4f7   : > { %3842 = vrot.lane.b32.xlu1 %v2961_v11, %s5652_s24 }
 0x4f8   : > { %v3949_v60 = vpop.permute.xlu0 %3948 }
 0x4f9   : > { %v4266_v35 = vsel %vm4259_vm7, %v4233_v12, %v3949_v60  ;;  %v3951_v46 = vpop.permute.xlu1 %3950  ;;  %v4043_v12 = vsel %vm1680_vm2, %v8206_v10, %v8013_v53  ;;  %v4074_v60 = vsel %vm9882_vm4, %v4042_v58, %v8184_v31  ;;  %v2965_v31 = vld [vmem:[#allocation2 + $0x129] sm:$0xff]  ;;  %vm9899_vm4 = vmmov %vm9887_vm0 }
 0x4fa   : > { %3460 = vrot.lane.b32.xlu0 %v2960_v54, %s5648_s13  ;;  %5534 = vmatprep.mubr.msk.f32.mxu1 %vm4308_vm9, %v4266_v35  ;;  %v4267_v57 = vsel %vm4259_vm7, %v4234_v52, %v3951_v46  ;;  %v9883_v52 = vld [vmem:[#allocation15_spill] sm:$0xff] }
 0x4fb   : > { %3462 = vrot.lane.b32.xlu1 %v2961_v11, %s5648_s13  ;;  %5535 = vmatmul.mubr.msk.f32.gmra.mrb[4].mxu1 %vm4308_vm9, %v4267_v57  ;;  %v8554_v11 = vld [vmem:[#allocation2 + $0x128] sm:$0xff]  ;;  %v4075_v35 = vsel %vm9884_vm11, %v4043_v12, %v9883_v52  ;;  %vm9900_vm11 = vmmov %vm9887_vm0 }
 0x4fc   : > { %v3569_v33 = vpop.permute.xlu0 %3568  ;;  %v2967_v12 = vld [vmem:[#allocation2 + $0x141] sm:$0xff] }
 0x4fd   : > { %v3697_v26 = vpop.permute.xlu1 %3696  ;;  %v4169_v5 = vsel %vm4160_vm5, %v4136_v24, %v3569_v33  ;;  %v2964_v33 = vld [vmem:[#allocation2 + $0x121] sm:$0xff]  ;;  %v2934_v24 = vld [vmem:[#allocation2 + $0x138] sm:$0xff] }
 0x4fe   : > { %3968 = vrot.lane.b32.xlu0 %v2992_v1, %s5653_s27  ;;  %v4202_v61 = vsel %vm4193_vm12, %v4169_v5, %v3697_v26 }
 0x4ff   : > { %3970 = vrot.lane.b32.xlu1 %v2993_v48, %s5653_s27 }
 0x500   : > { %v3571_v62 = vpop.permute.xlu0 %3570 }
 0x501   : > { %v3699_v22 = vpop.permute.xlu1 %3698  ;;  %v4170_v30 = vsel %vm4160_vm5, %v4137_v36, %v3571_v62  ;;  %v2935_v36 = vld [vmem:[#allocation2 + $0x140] sm:$0xff] }
 0x502   : > { %3588 = vrot.lane.b32.xlu0 %v2992_v1, %s5650_s16  ;;  %v4203_v13 = vsel %vm4193_vm12, %v4170_v30, %v3699_v22  ;;  %v9890_v30 = vld [vmem:[#allocation57_spill] sm:$0xff] }
 0x503   : > { %3716 = vrot.lane.b32.xlu1 %v8500_v49, %s5651_s12 }
 0x504   : > { %v3317_v50 = vpop.permute.xlu0 %3316 }
 0x505   : > { %v8505_v42 = vpop.permute.xlu1 %3318  ;;  %v4106_v46 = vsel %vm9885_vm13, %v4074_v60, %v3317_v50  ;;  %vm9906_vm13 = vmmov %vm9894_vm1 }
 0x506   : > { %3590 = vrot.lane.b32.xlu0 %v2993_v48, %s5650_s16  ;;  %v4107_v18 = vsel %vm9886_vm15, %v4075_v35, %v8505_v42  ;;  %vm9908_vm15 = vmmov %vm9894_vm1 }
 0x507   : > { %3718 = vrot.lane.b32.xlu1 %v8507_v9, %s5651_s12 }
 0x508   : > { %v3825_v37 = vpop.permute.xlu0 %3824 }
 0x509   : > { %v3827_v59 = vpop.permute.xlu1 %3826  ;;  %v4235_v20 = vsel %vm4226_vm14, %v4202_v61, %v3825_v37  ;;  %v9889_v61 = vld [vmem:[#allocation33_spill] sm:$0xff] }
 0x50a   : > { %3336 = vrot.lane.b32.xlu0 %v8500_v49, %s5646_s11  ;;  %v4236_v27 = vsel %vm4226_vm14, %v4203_v13, %v3827_v59  ;;  %v4044_v13 = vsel %vm1680_vm2, %v9890_v30, %v9889_v61 }
 0x50b   : > { %3338 = vrot.lane.b32.xlu1 %v8507_v9, %s5646_s11 }
 0x50c   : > { %v3445_v3 = vpop.permute.xlu0 %3444 }
 0x50d   : > { %v3447_v21 = vpop.permute.xlu1 %3446  ;;  %v4138_v47 = vsel %vm9887_vm0, %v4106_v46, %v3445_v3  ;;  %vm9909_vm0 = vmmov %vm9898_vm3 }
 0x50e   : > { %3844 = vrot.lane.b32.xlu0 %v2962_v19, %s5652_s24  ;;  %v4139_v53 = vsel %vm9888_vm6, %v4107_v18, %v3447_v21  ;;  %vm9910_vm6 = vmmov %vm9909_vm0 }
 0x50f   : > { %3846 = vrot.lane.b32.xlu1 %v2963_v40, %s5652_s24 }
 0x510   : > { %v3953_v63 = vpop.permute.xlu0 %3952 }
 0x511   : > { %v4268_v23 = vsel %vm4259_vm7, %v4235_v20, %v3953_v63  ;;  %v3955_v4 = vpop.permute.xlu1 %3954  ;;  %v9891_v20 = vld [vmem:[#allocation5_spill] sm:$0xff]  ;;  %v9892_v63 = vld [vmem:[#allocation56_spill] sm:$0xff] }
 0x512   : > { %3464 = vrot.lane.b32.xlu0 %v2962_v19, %s5648_s13  ;;  %5537 = vmatprep.mubr.msk.f32.mxu1 %vm4308_vm9, %v4268_v23  ;;  %v4269_v43 = vsel %vm4259_vm7, %v4236_v27, %v3955_v4  ;;  %v4045_v27 = vsel %vm1680_vm2, %v9892_v63, %v9891_v20  ;;  %v9893_v23 = vld [vmem:[#allocation12_spill] sm:$0xff] }
 0x513   : > { %3466 = vrot.lane.b32.xlu1 %v2963_v40, %s5648_s13  ;;  %5538 = vmatmul.mubr.msk.f32.gmra.mrb[6].mxu1 %vm4308_vm9, %v4269_v43  ;;  %v4076_v4 = vsel %vm9894_vm1, %v4044_v13, %v9893_v23  ;;  %v9895_v43 = vld [vmem:[#allocation47_spill] sm:$0xff]  ;;  %vm9911_vm1 = vmmov %vm9899_vm4  ;;  %v2969_v23 = vld [vmem:[#allocation2 + $0x159] sm:$0xff] }
 0x514   : > { %v3573_v28 = vpop.permute.xlu0 %3572  ;;  %v2968_v13 = vld [vmem:[#allocation2 + $0x151] sm:$0xff] }
 0x515   : > { %v3701_v39 = vpop.permute.xlu1 %3700  ;;  %v4171_v10 = vsel %vm4160_vm5, %v4138_v47, %v3573_v28  ;;  %v4077_v28 = vsel %vm9896_vm10, %v4045_v27, %v9895_v43  ;;  %vm9912_vm10 = vmmov %vm9911_vm1 }
 0x516   : > { %3972 = vrot.lane.b32.xlu0 %v2994_v34, %s5653_s27  ;;  %v4204_v26 = vsel %vm4193_vm12, %v4171_v10, %v3701_v39  ;;  %v2999_v10 = vld [vmem:[#allocation2 + $0x142] sm:$0xff] }
 0x517   : > { %3974 = vrot.lane.b32.xlu1 %v2995_v32, %s5653_s27 }
 0x518   : > { %v3575_v51 = vpop.permute.xlu0 %3574 }
 0x519   : > { %v3703_v54 = vpop.permute.xlu1 %3702  ;;  %v4172_v48 = vsel %vm4160_vm5, %v4139_v53, %v3575_v51 }
 0x51a   : > { %3592 = vrot.lane.b32.xlu0 %v2994_v34, %s5650_s16  ;;  %v4205_v62 = vsel %vm4193_vm12, %v4172_v48, %v3703_v54  ;;  %v2966_v54 = vld [vmem:[#allocation2 + $0x139] sm:$0xff]  ;;  %v2936_v48 = vld [vmem:[#allocation2 + $0x150] sm:$0xff] }
 0x51b   : > { %3720 = vrot.lane.b32.xlu1 %v8547_v15, %s5651_s12 }
 0x51c   : > { %v3321_v44 = vpop.permute.xlu0 %3320 }
 0x51d   : > { %v8552_v45 = vpop.permute.xlu1 %3322  ;;  %v4108_v34 = vsel %vm9897_vm8, %v4076_v4, %v3321_v44  ;;  %vm9916_vm8 = vmmov %vm9906_vm13 }
 0x51e   : > { %3594 = vrot.lane.b32.xlu0 %v2995_v32, %s5650_s16  ;;  %v4109_v32 = vsel %vm9898_vm3, %v4077_v28, %v8552_v45  ;;  %vm9918_vm3 = vmmov %vm9916_vm8 }
 0x51f   : > { %3722 = vrot.lane.b32.xlu1 %v8554_v11, %s5651_s12 }
 0x520   : > { %v3829_v14 = vpop.permute.xlu0 %3828 }
 0x521   : > { %v3831_v56 = vpop.permute.xlu1 %3830  ;;  %v4237_v22 = vsel %vm4226_vm14, %v4204_v26, %v3829_v14 }
 0x522   : > { %3340 = vrot.lane.b32.xlu0 %v8547_v15, %s5646_s11  ;;  %v4238_v42 = vsel %vm4226_vm14, %v4205_v62, %v3831_v56 }
 0x523   : > { %3342 = vrot.lane.b32.xlu1 %v8554_v11, %s5646_s11 }
 0x524   : > { %v3449_v57 = vpop.permute.xlu0 %3448 }
 0x525   : > { %v3451_v1 = vpop.permute.xlu1 %3450  ;;  %v4140_v51 = vsel %vm9899_vm4, %v4108_v34, %v3449_v57  ;;  %vm9919_vm4 = vmmov %vm9909_vm0 }
 0x526   : > { %3848 = vrot.lane.b32.xlu0 %v2964_v33, %s5652_s24  ;;  %v4141_v56 = vsel %vm9900_vm11, %v4109_v32, %v3451_v1  ;;  %v2998_v1 = vld [vmem:[#allocation2 + $0x13a] sm:$0xff]  ;;  %vm9920_vm11 = vmmov %vm9909_vm0 }
 0x527   : > { %3850 = vrot.lane.b32.xlu1 %v2965_v31, %s5652_s24 }
 0x528   : > { %v3957_v50 = vpop.permute.xlu0 %3956 }
 0x529   : > { %v4270_v37 = vsel %vm4259_vm7, %v4237_v22, %v3957_v50  ;;  %v3959_v59 = vpop.permute.xlu1 %3958  ;;  %v2937_v50 = vld [vmem:[#allocation2 + $0x158] sm:$0xff] }
 0x52a   : > { %3468 = vrot.lane.b32.xlu0 %v2964_v33, %s5648_s13  ;;  %5540 = vmatprep.mubr.msk.f32.mxu1 %vm4308_vm9, %v4270_v37  ;;  %v4271_v41 = vsel %vm4259_vm7, %v4238_v42, %v3959_v59  ;;  %v9901_v59 = vld [vmem:[#allocation34_spill] sm:$0xff] }
 0x52b   : > { %3470 = vrot.lane.b32.xlu1 %v2965_v31, %s5648_s13  ;;  %5541 = vmatmul.mubr.msk.f32.gmra.mrb[8].mxu1 %vm4308_vm9, %v4271_v41  ;;  %v9902_v41 = vld [vmem:[#allocation3_spill] sm:$0xff] }
 0x52c   : > { %v3577_v16 = vpop.permute.xlu0 %3576 }
 0x52d   : > { %v3705_v55 = vpop.permute.xlu1 %3704  ;;  %v4173_v58 = vsel %vm4160_vm5, %v4140_v51, %v3577_v16  ;;  %v4046_v16 = vsel %vm1680_vm2, %v9902_v41, %v9901_v59 }
 0x52e   : > { %3976 = vrot.lane.b32.xlu0 %v2996_v29, %s5653_s27  ;;  %v4206_v60 = vsel %vm4193_vm12, %v4173_v58, %v3705_v55  ;;  %v9904_v55 = vld [vmem:[#allocation29_spill] sm:$0xff] }
 0x52f   : > { %3978 = vrot.lane.b32.xlu1 %v2997_v7, %s5653_s27  ;;  %v3001_v58 = vld [vmem:[#allocation2 + $0x15a] sm:$0xff] }
 0x530   : > { %v3579_v3 = vpop.permute.xlu0 %3578 }
 0x531   : > { %v3707_v38 = vpop.permute.xlu1 %3706  ;;  %v4174_v52 = vsel %vm4160_vm5, %v4141_v56, %v3579_v3  ;;  %v9905_v3 = vld [vmem:[#allocation50_spill] sm:$0xff] }
 0x532   : > { %3596 = vrot.lane.b32.xlu0 %v2996_v29, %s5650_s16  ;;  %v4207_v44 = vsel %vm4193_vm12, %v4174_v52, %v3707_v38  ;;  %v9903_v29 = vld [vmem:[#allocation41_spill] sm:$0xff]  ;;  %v4078_v38 = vsel %vm9906_vm13, %v4046_v16, %v9905_v3  ;;  %v2938_v52 = vld [vmem:[#allocation2 + $0x168] sm:$0xff]  ;;  %vm9921_vm13 = vmmov %vm9911_vm1 }
 0x533   : > { %3724 = vrot.lane.b32.xlu1 %v2934_v24, %s5651_s12  ;;  %v2971_v16 = vld [vmem:[#allocation2 + $0x171] sm:$0xff] }
 0x534   : > { %v3325_v19 = vpop.permute.xlu0 %3324 }
 0x535   : > { %v8596_v21 = vpop.permute.xlu1 %3326 }
 0x536   : > { %3598 = vrot.lane.b32.xlu0 %v2997_v7, %s5650_s16  ;;  %v4047_v7 = vsel %vm1680_vm2, %v9904_v55, %v9903_v29 }
 0x537   : > { %3726 = vrot.lane.b32.xlu1 %v2935_v36, %s5651_s12 }
 0x538   : > { %v3833_v5 = vpop.permute.xlu0 %3832 }
 0x539   : > { %v3835_v40 = vpop.permute.xlu1 %3834  ;;  %v4239_v45 = vsel %vm4226_vm14, %v4206_v60, %v3833_v5  ;;  %v4110_v5 = vsel %vm9909_vm0, %v4078_v38, %v3325_v19  ;;  %vm9926_vm0 = vmmov %vm9918_vm3 }
 0x53a   : > { %3344 = vrot.lane.b32.xlu0 %v2934_v24, %s5646_s11  ;;  %v4240_v46 = vsel %vm4226_vm14, %v4207_v44, %v3835_v40  ;;  %v9907_v24 = vld [vmem:[#allocation20_spill] sm:$0xff] }
 0x53b   : > { %3346 = vrot.lane.b32.xlu1 %v2935_v36, %s5646_s11  ;;  %v4079_v36 = vsel %vm9908_vm15, %v4047_v7, %v9907_v24  ;;  %vm9922_vm15 = vmmov %vm9911_vm1 }
 0x53c   : > { %v3453_v39 = vpop.permute.xlu0 %3452  ;;  %v4111_v61 = vsel %vm9910_vm6, %v4079_v36, %v8596_v21  ;;  %vm9928_vm6 = vmmov %vm9926_vm0 }
 0x53d   : > { %v3455_v14 = vpop.permute.xlu1 %3454  ;;  %v4142_v30 = vsel %vm9911_vm1, %v4110_v5, %v3453_v39  ;;  %vm9929_vm1 = vmmov %vm9919_vm4 }
 0x53e   : > { %3852 = vrot.lane.b32.xlu0 %v2966_v54, %s5652_s24  ;;  %v4143_v63 = vsel %vm9912_vm10, %v4111_v61, %v3455_v14  ;;  %v3000_v14 = vld [vmem:[#allocation2 + $0x152] sm:$0xff]  ;;  %vm9930_vm10 = vmmov %vm9929_vm1 }
 0x53f   : > { %3854 = vrot.lane.b32.xlu1 %v2967_v12, %s5652_s24 }
 0x540   : > { %v3961_v35 = vpop.permute.xlu0 %3960 }
 0x541   : > { %v4272_v57 = vsel %vm4259_vm7, %v4239_v45, %v3961_v35  ;;  %v3963_v18 = vpop.permute.xlu1 %3962  ;;  %v2939_v35 = vld [vmem:[#allocation2 + $0x170] sm:$0xff] }
 0x542   : > { %3472 = vrot.lane.b32.xlu0 %v2966_v54, %s5648_s13  ;;  %5543 = vmatprep.mubr.msk.f32.mxu1 %vm4308_vm9, %v4272_v57  ;;  %v4273_v47 = vsel %vm4259_vm7, %v4240_v46, %v3963_v18  ;;  %v9913_v18 = vld [vmem:[#allocation4_spill] sm:$0xff] }
 0x543   : > { %3474 = vrot.lane.b32.xlu1 %v2967_v12, %s5648_s13  ;;  %5544 = vmatmul.mubr.msk.f32.gmra.mrb[10].mxu1 %vm4308_vm9, %v4273_v47  ;;  %v4048_v47 = vsel %vm1680_vm2, %v8336_v6, %v9913_v18 }
 0x544   : > { %v3581_v33 = vpop.permute.xlu0 %3580 }
 0x545   : > { %v3709_v53 = vpop.permute.xlu1 %3708  ;;  %v4175_v27 = vsel %vm4160_vm5, %v4142_v30, %v3581_v33  ;;  %v9914_v33 = vld [vmem:[#allocation42_spill] sm:$0xff]  ;;  %v3003_v30 = vld [vmem:[#allocation2 + $0x172] sm:$0xff] }
 0x546   : > { %3980 = vrot.lane.b32.xlu0 %v2998_v1, %s5653_s27  ;;  %v4208_v4 = vsel %vm4193_vm12, %v4175_v27, %v3709_v53  ;;  %v9915_v53 = vld [vmem:[#allocation21_spill] sm:$0xff] }
 0x547   : > { %3982 = vrot.lane.b32.xlu1 %v2999_v10, %s5653_s27 }
 0x548   : > { %v3583_v31 = vpop.permute.xlu0 %3582 }
 0x549   : > { %v3711_v26 = vpop.permute.xlu1 %3710  ;;  %v4176_v43 = vsel %vm4160_vm5, %v4143_v63, %v3583_v31  ;;  %v9917_v31 = vld [vmem:[#allocation14_spill] sm:$0xff]  ;;  %v2940_v63 = vld [vmem:[#allocation2 + $0x180] sm:$0xff] }
 0x54a   : > { %3600 = vrot.lane.b32.xlu0 %v2998_v1, %s5650_s16  ;;  %v4209_v19 = vsel %vm4193_vm12, %v4176_v43, %v3711_v26  ;;  %v4049_v1 = vsel %vm1680_vm2, %v8349_v8, %v9914_v33 }
 0x54b   : > { %3728 = vrot.lane.b32.xlu1 %v2936_v48, %s5651_s12  ;;  %v4081_v26 = vsel %vm9918_vm3, %v4049_v1, %v9917_v31 }
 0x54c   : > { %v3329_v62 = vpop.permute.xlu0 %3328 }
 0x54d   : > { %v8635_v22 = vpop.permute.xlu1 %3330 }
 0x54e   : > { %3602 = vrot.lane.b32.xlu0 %v2999_v10, %s5650_s16  ;;  %v4080_v10 = vsel %vm9916_vm8, %v4048_v47, %v9915_v53  ;;  %v4113_v6 = vsel %vm9920_vm11, %v4081_v26, %v8635_v22  ;;  %vm9931_vm8 = vmmov %vm9921_vm13  ;;  %v2973_v26 = vld [vmem:[#allocation2 + $0x189] sm:$0xff] }
 0x54f   : > { %3730 = vrot.lane.b32.xlu1 %v2937_v50, %s5651_s12  ;;  %vm9932_vm3 = vmmov %vm9931_vm8 }
 0x550   : > { %v3837_v42 = vpop.permute.xlu0 %3836  ;;  %vm9938_vm11 = vmmov %vm9926_vm0 }
 0x551   : > { %v3839_v37 = vpop.permute.xlu1 %3838  ;;  %v4241_v21 = vsel %vm4226_vm14, %v4208_v4, %v3837_v42 }
 0x552   : > { %3348 = vrot.lane.b32.xlu0 %v2936_v48, %s5646_s11  ;;  %v4242_v34 = vsel %vm4226_vm14, %v4209_v19, %v3839_v37  ;;  %v4112_v48 = vsel %vm9919_vm4, %v4080_v10, %v3329_v62  ;;  %v2970_v37 = vld [vmem:[#allocation2 + $0x169] sm:$0xff]  ;;  %v9923_v19 = vld [vmem:[#allocation40_spill] sm:$0xff]  ;;  %vm9936_vm4 = vmmov %vm9926_vm0 }
 0x553   : > { %3350 = vrot.lane.b32.xlu1 %v2937_v50, %s5646_s11  ;;  %v3004_v10 = vld [vmem:[#allocation2 + $0x182] sm:$0xff] }
 0x554   : > { %v3457_v40 = vpop.permute.xlu0 %3456 }
 0x555   : > { %v3459_v20 = vpop.permute.xlu1 %3458  ;;  %v4144_v42 = vsel %vm9921_vm13, %v4112_v48, %v3457_v40  ;;  %v3002_v40 = vld [vmem:[#allocation2 + $0x16a] sm:$0xff]  ;;  %vm9939_vm13 = vmmov %vm9929_vm1 }
 0x556   : > { %3856 = vrot.lane.b32.xlu0 %v2968_v13, %s5652_s24  ;;  %v4145_v8 = vsel %vm9922_vm15, %v4113_v6, %v3459_v20  ;;  %vm9940_vm15 = vmmov %vm9929_vm1 }
 0x557   : > { %3858 = vrot.lane.b32.xlu1 %v2969_v23, %s5652_s24 }
 0x558   : > { %v3965_v28 = vpop.permute.xlu0 %3964 }
 0x559   : > { %v4274_v39 = vsel %vm4259_vm7, %v4241_v21, %v3965_v28  ;;  %v3967_v32 = vpop.permute.xlu1 %3966  ;;  %v4050_v21 = vsel %vm1680_vm2, %v8402_v0, %v9923_v19  ;;  %v2972_v28 = vld [vmem:[#allocation2 + $0x181] sm:$0xff] }
 0x55a   : > { %3476 = vrot.lane.b32.xlu0 %v2968_v13, %s5648_s13  ;;  %5546 = vmatprep.mubr.msk.f32.mxu1 %vm4308_vm9, %v4274_v39  ;;  %v4275_v51 = vsel %vm4259_vm7, %v4242_v34, %v3967_v32  ;;  %v9924_v34 = vld [vmem:[#allocation39_spill] sm:$0xff]  ;;  %v9925_v32 = vld [vmem:[#allocation17_spill] sm:$0xff] }
 0x55b   : > { %3478 = vrot.lane.b32.xlu1 %v2969_v23, %s5648_s13  ;;  %5547 = vmatmul.mubr.msk.f32.gmra.mrb[12].mxu1 %vm4308_vm9, %v4275_v51  ;;  %v4051_v39 = vsel %vm1680_vm2, %v8410_v25, %v9924_v34  ;;  %v4082_v51 = vsel %vm9926_vm0, %v4050_v21, %v9925_v32  ;;  %vm9941_vm0 = vmmov %vm9932_vm3  ;;  %v3006_v34 = vld [vmem:[#allocation2 + $0x19a] sm:$0xff] }
 0x55c   : > { %v3585_v54 = vpop.permute.xlu0 %3584 }
 0x55d   : > { %v3713_v56 = vpop.permute.xlu1 %3712  ;;  %v4177_v41 = vsel %vm4160_vm5, %v4144_v42, %v3585_v54  ;;  %v9927_v54 = vld [vmem:[#allocation49_spill] sm:$0xff]  ;;  %v2910_v42 = vld [vmem:[#allocation2 + $0x18a] sm:$0xff] }
 0x55e   : > { %3984 = vrot.lane.b32.xlu0 %v3000_v14, %s5653_s27  ;;  %v4210_v29 = vsel %vm4193_vm12, %v4177_v41, %v3713_v56 }
 0x55f   : > { %3986 = vrot.lane.b32.xlu1 %v3001_v58, %s5653_s27 }
 0x560   : > { %v3587_v12 = vpop.permute.xlu0 %3586 }
 0x561   : > { %v3715_v60 = vpop.permute.xlu1 %3714  ;;  %v4178_v55 = vsel %vm4160_vm5, %v4145_v8, %v3587_v12 }
 0x562   : > { %3604 = vrot.lane.b32.xlu0 %v3000_v14, %s5650_s16  ;;  %v4211_v62 = vsel %vm4193_vm12, %v4178_v55, %v3715_v60  ;;  %v4083_v14 = vsel %vm9928_vm6, %v4051_v39, %v9927_v54  ;;  %v2941_v60 = vld [vmem:[#allocation2 + $0x188] sm:$0xff]  ;;  %vm9942_vm6 = vmmov %vm9941_vm0 }
 0x563   : > { %3732 = vrot.lane.b32.xlu1 %v2938_v52, %s5651_s12 }
 0x564   : > { %v3333_v44 = vpop.permute.xlu0 %3332 }
 0x565   : > { %v8674_v45 = vpop.permute.xlu1 %3334  ;;  %v4114_v56 = vsel %vm9929_vm1, %v4082_v51, %v3333_v44  ;;  %vm9946_vm1 = vmmov %vm9936_vm4 }
 0x566   : > { %3606 = vrot.lane.b32.xlu0 %v3001_v58, %s5650_s16  ;;  %v4115_v0 = vsel %vm9930_vm10, %v4083_v14, %v8674_v45  ;;  %vm9948_vm10 = vmmov %vm9946_vm1 }
 0x567   : > { %3734 = vrot.lane.b32.xlu1 %v2939_v35, %s5651_s12 }
 0x568   : > { %v3841_v46 = vpop.permute.xlu0 %3840 }
 0x569   : > { %v3843_v57 = vpop.permute.xlu1 %3842  ;;  %v4243_v22 = vsel %vm4226_vm14, %v4210_v29, %v3841_v46  ;;  %v2942_v29 = vld [vmem:[#allocation2 + $0x198] sm:$0xff] }
 0x56a   : > { %3352 = vrot.lane.b32.xlu0 %v2938_v52, %s5646_s11  ;;  %v4244_v3 = vsel %vm4226_vm14, %v4211_v62, %v3843_v57  ;;  %v2975_v62 = vld [vmem:[#allocation2 + $0x1a1] sm:$0xff] }
 0x56b   : > { %3354 = vrot.lane.b32.xlu1 %v2939_v35, %s5646_s11 }
 0x56c   : > { %v3461_v50 = vpop.permute.xlu0 %3460 }
 0x56d   : > { %v3463_v59 = vpop.permute.xlu1 %3462  ;;  %v4146_v12 = vsel %vm9931_vm8, %v4114_v56, %v3461_v50  ;;  %vm9949_vm8 = vmmov %vm9939_vm13 }
 0x56e   : > { %3860 = vrot.lane.b32.xlu0 %v2970_v37, %s5652_s24  ;;  %v4147_v25 = vsel %vm9932_vm3, %v4115_v0, %v3463_v59  ;;  %v2943_v59 = vld [vmem:[#allocation2 + $0x1a0] sm:$0xff]  ;;  %vm9950_vm3 = vmmov %vm9949_vm8 }
 0x56f   : > { %3862 = vrot.lane.b32.xlu1 %v2971_v16, %s5652_s24 }
 0x570   : > { %v3969_v7 = vpop.permute.xlu0 %3968 }
 0x571   : > { %v4276_v38 = vsel %vm4259_vm7, %v4243_v22, %v3969_v7  ;;  %v3971_v24 = vpop.permute.xlu1 %3970  ;;  %v9933_v7 = vld [vmem:[#allocation44_spill] sm:$0xff] }
 0x572   : > { %3480 = vrot.lane.b32.xlu0 %v2970_v37, %s5648_s13  ;;  %5549 = vmatprep.mubr.msk.f32.mxu1 %vm4308_vm9, %v4276_v38  ;;  %v4277_v36 = vsel %vm4259_vm7, %v4244_v3, %v3971_v24  ;;  %v4052_v3 = vsel %vm1680_vm2, %v8453_v2, %v9933_v7  ;;  %v9934_v38 = vld [vmem:[#allocation43_spill] sm:$0xff]  ;;  %v3007_v2 = vld [vmem:[#allocation2 + $0x1a2] sm:$0xff] }
 0x573   : > { %3482 = vrot.lane.b32.xlu1 %v2971_v16, %s5648_s13  ;;  %5550 = vmatmul.mubr.msk.f32.gmra.mrb[14].mxu1 %vm4308_vm9, %v4277_v36  ;;  %v4053_v24 = vsel %vm1680_vm2, %v8460_v17, %v9934_v38  ;;  %v9935_v36 = vld [vmem:[#allocation16_spill] sm:$0xff] }
 0x574   : > { %v3589_v5 = vpop.permute.xlu0 %3588 }
 0x575   : > { %v3717_v61 = vpop.permute.xlu1 %3716  ;;  %v4179_v35 = vsel %vm4160_vm5, %v4146_v12, %v3589_v5  ;;  %v4084_v5 = vsel %vm9936_vm4, %v4052_v3, %v9935_v36  ;;  %vm9951_vm4 = vmmov %vm9941_vm0 }
 0x576   : > { %3988 = vrot.lane.b32.xlu0 %v3002_v40, %s5653_s27  ;;  %v4212_v46 = vsel %vm4193_vm12, %v4179_v35, %v3717_v61  ;;  %v9937_v61 = vld [vmem:[#allocation52_spill] sm:$0xff] }
 0x577   : > { %3990 = vrot.lane.b32.xlu1 %v3003_v30, %s5653_s27 }
 0x578   : > { %v3591_v13 = vpop.permute.xlu0 %3590 }
 0x579   : > { %v3719_v20 = vpop.permute.xlu1 %3718  ;;  %v4180_v57 = vsel %vm4160_vm5, %v4147_v25, %v3591_v13 }
 0x57a   : > { %3608 = vrot.lane.b32.xlu0 %v3002_v40, %s5650_s16  ;;  %v4213_v44 = vsel %vm4193_vm12, %v4180_v57, %v3719_v20  ;;  %v2974_v40 = vld [vmem:[#allocation2 + $0x199] sm:$0xff] }
 0x57b   : > { %3736 = vrot.lane.b32.xlu1 %v2940_v63, %s5651_s12 }
 0x57c   : > { %v8713_v27 = vpop.permute.xlu0 %3336 }
 0x57d   : > { %v8715_v23 = vpop.permute.xlu1 %3338  ;;  %v4116_v13 = vsel %vm9939_vm13, %v4084_v5, %v8713_v27  ;;  %vm9956_vm13 = vmmov %vm9946_vm1 }
 0x57e   : > { %3610 = vrot.lane.b32.xlu0 %v3003_v30, %s5650_s16 }
 0x57f   : > { %3356 = vrot.lane.b32.xlu1 %v2940_v63, %s5646_s11 }
 0x580   : > { %v3845_v4 = vpop.permute.xlu0 %3844 }
 0x581   : > { %v3847_v43 = vpop.permute.xlu1 %3846  ;;  %v4245_v45 = vsel %vm4226_vm14, %v4212_v46, %v3845_v4 }
 0x582   : > { %3230 = vrot.lane.b32.xlu0 %v3003_v30, %s5644_s18  ;;  %v4246_v47 = vsel %vm4226_vm14, %v4213_v44, %v3847_v43  ;;  %v4085_v30 = vsel %vm9938_vm11, %v4053_v24, %v9937_v61  ;;  %v9943_v44 = vld [vmem:[#allocation45_spill] sm:$0xff]  ;;  %vm9952_vm11 = vmmov %vm9941_vm0 }
 0x583   : > { %3864 = vrot.lane.b32.xlu1 %v2972_v28, %s5652_s24  ;;  %v4117_v63 = vsel %vm9940_vm15, %v4085_v30, %v8715_v23  ;;  %vm9958_vm15 = vmmov %vm9946_vm1 }
 0x584   : > { %v3465_v58 = vpop.permute.xlu0 %3464 }
 0x585   : > { %v3467_v52 = vpop.permute.xlu1 %3466  ;;  %v4148_v4 = vsel %vm9941_vm0, %v4116_v13, %v3465_v58  ;;  %vm9959_vm0 = vmmov %vm9950_vm3 }
 0x586   : > { %3738 = vrot.lane.b32.xlu0 %v2941_v60, %s5651_s12  ;;  %v4149_v43 = vsel %vm9942_vm6, %v4117_v63, %v3467_v52  ;;  %vm9960_vm6 = vmmov %vm9959_vm0 }
 0x587   : > { %3484 = vrot.lane.b32.xlu1 %v2972_v28, %s5648_s13 }
 0x588   : > { %v3973_v18 = vpop.permute.xlu0 %3972 }
 0x589   : > { %v4278_v33 = vsel %vm4259_vm7, %v4245_v45, %v3973_v18  ;;  %v3975_v1 = vpop.permute.xlu1 %3974  ;;  %v4054_v45 = vsel %vm1680_vm2, %v8500_v49, %v9943_v44  ;;  %v9944_v18 = vld [vmem:[#allocation7_spill] sm:$0xff] }
 0x58a   : > { %3358 = vrot.lane.b32.xlu0 %v2941_v60, %s5646_s11  ;;  %5552 = vmatprep.mubr.msk.f32.mxu1 %vm4308_vm9, %v4278_v33  ;;  %v4279_v53 = vsel %vm4259_vm7, %v4246_v47, %v3975_v1  ;;  %v4055_v47 = vsel %vm1680_vm2, %v8507_v9, %v9944_v18  ;;  %v9945_v33 = vld [vmem:[#allocation51_spill] sm:$0xff] }
 0x58b   : > { %3992 = vrot.lane.b32.xlu1 %v3004_v10, %s5653_s27  ;;  %5553 = vmatmul.mubr.msk.f32.gmra.mrb[16].mxu1 %vm4308_vm9, %v4279_v53  ;;  %v4086_v1 = vsel %vm9946_vm1, %v4054_v45, %v9945_v33  ;;  %v9947_v53 = vld [vmem:[#allocation22_spill] sm:$0xff]  ;;  %vm9961_vm1 = vmmov %vm9951_vm4 }
 0x58c   : > { %v3593_v31 = vpop.permute.xlu0 %3592 }
 0x58d   : > { %v3721_v48 = vpop.permute.xlu1 %3720  ;;  %v4181_v19 = vsel %vm4160_vm5, %v4148_v4, %v3593_v31  ;;  %v9954_v4 = vld [vmem:[#allocation46_spill] sm:$0xff] }
 0x58e   : > { %3866 = vrot.lane.b32.xlu0 %v2973_v26, %s5652_s24  ;;  %v4214_v28 = vsel %vm4193_vm12, %v4181_v19, %v3721_v48 }
 0x58f   : > { %3612 = vrot.lane.b32.xlu1 %v3004_v10, %s5650_s16  ;;  %v4087_v10 = vsel %vm9948_vm10, %v4055_v47, %v9947_v53  ;;  %vm9962_vm10 = vmmov %vm9961_vm1 }
 0x590   : > { %v3595_v50 = vpop.permute.xlu0 %3594 }
 0x591   : > { %v3723_v6 = vpop.permute.xlu1 %3722  ;;  %v4182_v27 = vsel %vm4160_vm5, %v4149_v43, %v3595_v50  ;;  %v9955_v43 = vld [vmem:[#allocation19_spill] sm:$0xff] }
 0x592   : > { %3486 = vrot.lane.b32.xlu0 %v2973_v26, %s5648_s13  ;;  %v4215_v23 = vsel %vm4193_vm12, %v4182_v27, %v3723_v6 }
 0x593   : > { %3614 = vrot.lane.b32.xlu1 %v2910_v42, %s5650_s16 }
 0x594   : > { %v3341_v37 = vpop.permute.xlu0 %3340 }
 0x595   : > { %v8754_v8 = vpop.f32.mrb[32].mxu0  ;;  %v3343_v41 = vpop.permute.xlu1 %3342  ;;  %v4118_v31 = vsel %vm9949_vm8, %v4086_v1, %v3341_v37  ;;  %vm9966_vm8 = vmmov %vm9956_vm13 }
 0x596   : > { %v8756_v16 = vpop.f32.mrb[33].mxu0  ;;  %3994 = vrot.lane.b32.xlu0 %v2910_v42, %s5653_s27  ;;  %v4119_v48 = vsel %vm9950_vm3, %v4087_v10, %v3343_v41  ;;  %v2745_v10 = vld [vmem:[#allocation2 + $0x138] sm:$0xff]  ;;  %vm9968_vm3 = vmmov %vm9966_vm8 }
 0x597   : > { %3742 = vrot.lane.b32.xlu1 %v2943_v59, %s5651_s12 }
 0x598   : > { %v3849_v55 = vpop.permute.xlu0 %3848 }
 0x599   : > { %v3851_v22 = vpop.permute.xlu1 %3850  ;;  %v4247_v32 = vsel %vm4226_vm14, %v4214_v28, %v3849_v55  ;;  %v9957_v28 = vld [vmem:[#allocation55_spill] sm:$0xff] }
 0x59a   : > { %3740 = vrot.lane.b32.xlu0 %v2942_v29, %s5651_s12  ;;  %v4248_v54 = vsel %vm4226_vm14, %v4215_v23, %v3851_v22  ;;  %s5370_s12 = sshll.u32 %s10009_s10, 8 }
 0x59b   : > { %3870 = vrot.lane.b32.xlu1 %v2975_v62, %s5652_s24  ;;  %s9377_s15 = scalar_lea.vmem %s9609_s9, %s5370_s12 }
 0x59c   : > { %v3469_v20 = vpop.permute.xlu0 %3468 }
 0x59d   : > { %v3471_v17 = vpop.permute.xlu1 %3470  ;;  %v4150_v50 = vsel %vm9951_vm4, %v4118_v31, %v3469_v20  ;;  %vm9969_vm4 = vmmov %vm9959_vm0 }
 0x59e   : > { %3868 = vrot.lane.b32.xlu0 %v2974_v40, %s5652_s24  ;;  %v8780_v21 = vpop.f32.mrb[0].mxu1  ;;  %v4151_v49 = vsel %vm9952_vm11, %v4119_v48, %v3471_v17  ;;  %v4057_v17 = vsel %vm1680_vm2, %v8554_v11, %v9954_v4  ;;  %v9963_v48 = vld [vmem:[#allocation8_spill] sm:$0xff]  ;;  %vm9970_vm11 = vmmov %vm9959_vm0 }
 0x59f   : > { %3998 = vrot.lane.b32.xlu1 %v3007_v2, %s5653_s27  ;;  %v8785_v39 = vpop.f32.mrb[1].mxu1  ;;  %v9953_v2 = vld [vmem:[#allocation6_spill] sm:$0xff]  ;;  %v4089_v27 = vsel %vm9958_vm15, %v4057_v17, %v9957_v28  ;;  %vm9972_vm15 = vmmov %vm9961_vm1 }
 0x5a0   : > { %v3977_v51 = vpop.permute.xlu0 %3976  ;;  %v4056_v63 = vsel %vm1680_vm2, %v8547_v15, %v9953_v2 }
 0x5a1   : > { %v4280_v14 = vsel %vm4259_vm7, %v4247_v32, %v3977_v51  ;;  %v3979_v56 = vpop.permute.xlu1 %3978  ;;  %v4088_v19 = vsel %vm9956_vm13, %v4056_v63, %v9955_v43  ;;  %vm9971_vm13 = vmmov %vm9961_vm1 }
 0x5a2   : > { %3996 = vrot.lane.b32.xlu0 %v3006_v34, %s5653_s27  ;;  %5555 = vmatprep.mubr.msk.f32.mxu1 %vm4308_vm9, %v4280_v14  ;;  %v4281_v58 = vsel %vm4259_vm7, %v4248_v54, %v3979_v56 }
 0x5a3   : > { %5556 = vmatmul.mubr.msk.f32.gmra.mrb[18].mxu1 %vm4308_vm9, %v4281_v58 }
 0x5a4   : > { %v3597_v0 = vpop.permute.xlu0 %3596 }
 0x5a5   : > { %v3725_v12 = vpop.permute.xlu1 %3724  ;;  %v4183_v42 = vsel %vm4160_vm5, %v4150_v50, %v3597_v0  ;;  %v4058_v50 = vsel %vm1680_vm2, %v2745_v10, %v9963_v48  ;;  %v9977_v10 = vld [vmem:[#allocation11_spill] sm:$0xff] }
 0x5a6   : > { %v4216_v9 = vsel %vm4193_vm12, %v4183_v42, %v3725_v12  ;;  %v9965_v42 = vld [vmem:[#allocation18_spill] sm:$0xff] }
 0x5a8   : > { %v3599_v60 = vpop.permute.xlu0 %3598 }
 0x5a9   : > { %v3727_v52 = vpop.permute.xlu1 %3726  ;;  %v4184_v29 = vsel %vm4160_vm5, %v4151_v49, %v3599_v60 }
 0x5aa   : > { %v4217_v37 = vsel %vm4193_vm12, %v4184_v29, %v3727_v52  ;;  %v9967_v29 = vld [vmem:[#allocation54_spill] sm:$0xff] }
 0x5ac   : > { %v3345_v25 = vpop.permute.xlu0 %3344 }
 0x5ad   : > { %v3347_v35 = vpop.permute.xlu1 %3346  ;;  %v4120_v34 = vsel %vm9959_vm0, %v4088_v19, %v3345_v25  ;;  %vm9975_vm0 = vmmov %vm9968_vm3 }
 0x5ae   : > { %v4121_v32 = vsel %vm9960_vm6, %v4089_v27, %v3347_v35  ;;  %vm9976_vm6 = vmmov %vm9969_vm4 }
 0x5b0   : > { %v3853_v46 = vpop.permute.xlu0 %3852 }
 0x5b1   : > { %v3855_v57 = vpop.permute.xlu1 %3854  ;;  %v4249_v62 = vsel %vm4226_vm14, %v4216_v9, %v3853_v46  ;;  %v4090_v9 = vsel %vm9966_vm8, %v4058_v50, %v9965_v42  ;;  %vm9980_vm8 = vmmov %vm9969_vm4 }
 0x5b2   : > { %v4250_v22 = vsel %vm4226_vm14, %v4217_v37, %v3855_v57 }
 0x5b4   : > { %v3473_v26 = vpop.permute.xlu0 %3472 }
 0x5b5   : > { %v3475_v6 = vpop.permute.xlu1 %3474  ;;  %v4152_v51 = vsel %vm9961_vm1, %v4120_v34, %v3473_v26  ;;  %v2746_v26 = vld [vmem:[#allocation2 + $0x140] sm:$0xff] }
 0x5b6   : > { %v8810_v59 = vpop.f32.mrb[2].mxu1  ;;  %v4153_v15 = vsel %vm9962_vm10, %v4121_v32, %v3475_v6  ;;  %v9964_v6 = vld [vmem:[#allocation9_spill] sm:$0xff]  ;;  %v2747_v32 = vld [vmem:[#allocation2 + $0x150] sm:$0xff]  ;;  %vm9979_vm10 = vmmov %vm9975_vm0 }
 0x5b7   : > { %v8814_v55 = vpop.f32.mrb[3].mxu1  ;;  %v4059_v49 = vsel %vm1680_vm2, %v2746_v26, %v9964_v6  ;;  %v9978_v26 = vld [vmem:[#allocation53_spill] sm:$0xff] }
 0x5b8   : > { %v3981_v41 = vpop.permute.xlu0 %3980  ;;  %v4091_v37 = vsel %vm9968_vm3, %v4059_v49, %v9967_v29  ;;  %vm9981_vm3 = vmmov %vm9961_vm1 }
 0x5b9   : > { %v4282_v7 = vsel %vm4259_vm7, %v4249_v62, %v3981_v41  ;;  %v3983_v3 = vpop.permute.xlu1 %3982 }
 0x5ba   : > { %5558 = vmatprep.mubr.msk.f32.mxu1 %vm4308_vm9, %v4282_v7  ;;  %v4283_v38 = vsel %vm4259_vm7, %v4250_v22, %v3983_v3 }
 0x5bb   : > { %5559 = vmatmul.mubr.msk.f32.gmra.mrb[20].mxu1 %vm4308_vm9, %v4283_v38 }
 0x5bc   : > { %v3601_v24 = vpop.permute.xlu0 %3600 }
 0x5bd   : > { %v3729_v36 = vpop.permute.xlu1 %3728  ;;  %v4185_v14 = vsel %vm4160_vm5, %v4152_v51, %v3601_v24  ;;  %v9973_v51 = vld [vmem:[#allocation10_spill] sm:$0xff] }
 0x5be   : > { %v4218_v11 = vsel %vm4193_vm12, %v4185_v14, %v3729_v36 }
 0x5c0   : > { %v3603_v5 = vpop.permute.xlu0 %3602 }
 0x5c1   : > { %v3731_v40 = vpop.permute.xlu1 %3730  ;;  %v4186_v58 = vsel %vm4160_vm5, %v4153_v15, %v3603_v5  ;;  %v9974_v15 = vld [vmem:[#allocation23_spill] sm:$0xff] }
 0x5c2   : > { %v4219_v12 = vsel %vm4193_vm12, %v4186_v58, %v3731_v40 }
 0x5c4   : > { %v3349_v61 = vpop.permute.xlu0 %3348 }
 0x5c5   : > { %v3351_v30 = vpop.permute.xlu1 %3350  ;;  %v4122_v62 = vsel %vm9969_vm4, %v4090_v9, %v3349_v61  ;;  %vm9984_vm4 = vmmov %vm9975_vm0 }
 0x5c6   : > { %v4123_v22 = vsel %vm9970_vm11, %v4091_v37, %v3351_v30  ;;  %vm9986_vm11 = vmmov %vm9975_vm0 }
 0x5c8   : > { %v3857_v13 = vpop.permute.xlu0 %3856 }
 0x5c9   : > { %v3859_v20 = vpop.permute.xlu1 %3858  ;;  %v4251_v60 = vsel %vm4226_vm14, %v4218_v11, %v3857_v13 }
 0x5ca   : > { %v4252_v25 = vsel %vm4226_vm14, %v4219_v12, %v3859_v20 }
 0x5cc   : > { %v3477_v23 = vpop.permute.xlu0 %3476 }
 0x5cd   : > { %v3479_v54 = vpop.permute.xlu1 %3478  ;;  %v4154_v7 = vsel %vm9971_vm13, %v4122_v62, %v3477_v23  ;;  %vm9987_vm13 = vmmov %vm9976_vm6 }
 0x5ce   : > { %v8838_v56 = vpop.f32.mrb[4].mxu1  ;;  %v4155_v38 = vsel %vm9972_vm15, %v4123_v22, %v3479_v54  ;;  %v4060_v54 = vsel %vm1680_vm2, %v2747_v32, %v9973_v51  ;;  %vm9988_vm15 = vmmov %vm9976_vm6 }
 0x5cf   : > { %v8842_v0 = vpop.f32.mrb[5].mxu1  ;;  %v4092_v14 = vsel %vm9975_vm0, %v4060_v54, %v9974_v15  ;;  %vm9989_vm0 = vmmov %vm9961_vm1 }
 0x5d0   : > { %v3985_v52 = vpop.permute.xlu0 %3984 }
 0x5d1   : > { %v4284_v35 = vsel %vm4259_vm7, %v4251_v60, %v3985_v52  ;;  %v3987_v46 = vpop.permute.xlu1 %3986 }
 0x5d2   : > { %5561 = vmatprep.mubr.msk.f32.mxu1 %vm4308_vm9, %v4284_v35  ;;  %v4285_v57 = vsel %vm4259_vm7, %v4252_v25, %v3987_v46 }
 0x5d3   : > { %5562 = vmatmul.mubr.msk.f32.gmra.mrb[22].mxu1 %vm4308_vm9, %v4285_v57 }
 0x5d4   : > { %v3605_v44 = vpop.permute.xlu0 %3604 }
 0x5d5   : > { %v3733_v45 = vpop.permute.xlu1 %3732  ;;  %v4187_v24 = vsel %vm4160_vm5, %v4154_v7, %v3605_v44  ;;  %v2750_v7 = vld [vmem:[#allocation2 + $0x170] sm:$0xff] }
 0x5d6   : > { %v4220_v5 = vsel %vm4193_vm12, %v4187_v24, %v3733_v45  ;;  %v9982_v24 = vld [vmem:[#allocation13_spill] sm:$0xff] }
 0x5d8   : > { %v3607_v18 = vpop.permute.xlu0 %3606 }
 0x5d9   : > { %v3735_v47 = vpop.permute.xlu1 %3734  ;;  %v4188_v40 = vsel %vm4160_vm5, %v4155_v38, %v3607_v18 }
 0x5da   : > { %v4221_v61 = vsel %vm4193_vm12, %v4188_v40, %v3735_v47  ;;  %v9983_v40 = vld [vmem:[#allocation48_spill] sm:$0xff] }
 0x5dc   : > { %v3353_v33 = vpop.permute.xlu0 %3352 }
 0x5dd   : > { %v3355_v1 = vpop.permute.xlu1 %3354  ;;  %v4124_v58 = vsel %vm9976_vm6, %v4092_v14, %v3353_v33  ;;  %v2748_v33 = vld [vmem:[#allocation2 + $0x158] sm:$0xff]  ;;  %vm9990_vm6 = vmmov %vm9989_vm0 }
 0x5e0   : > { %v3861_v53 = vpop.permute.xlu0 %3860 }
 0x5e1   : > { %v3863_v31 = vpop.permute.xlu1 %3862  ;;  %v4253_v20 = vsel %vm4226_vm14, %v4220_v5, %v3861_v53  ;;  %v2749_v5 = vld [vmem:[#allocation2 + $0x168] sm:$0xff] }
 0x5e2   : > { %v4254_v2 = vsel %vm4226_vm14, %v4221_v61, %v3863_v31  ;;  %v4061_v31 = vsel %vm1680_vm2, %v2748_v33, %v9977_v10  ;;  %v4062_v61 = vsel %vm1680_vm2, %v2749_v5, %v9983_v40 }
 0x5e3   : > { %v4093_v48 = vsel %vm9979_vm10, %v4061_v31, %v9978_v26 }
 0x5e4   : > { %v3481_v41 = vpop.permute.xlu0 %3480  ;;  %v4125_v50 = vsel %vm9980_vm8, %v4093_v48, %v3355_v1  ;;  %v4063_v1 = vsel %vm1680_vm2, %v2750_v7, %v9982_v24 }
 0x5e5   : > { %v3483_v3 = vpop.permute.xlu1 %3482  ;;  %v4156_v60 = vsel %vm9961_vm1, %v4124_v58, %v3481_v41 }
 0x5e6   : > { %v8864_v36 = vpop.f32.mrb[6].mxu1  ;;  %v4157_v49 = vsel %vm9981_vm3, %v4125_v50, %v3483_v3 }
 0x5e7   : > { %v8868_v13 = vpop.f32.mrb[7].mxu1 }
 0x5e8   : > { %v3989_v30 = vpop.permute.xlu0 %3988 }
 0x5e9   : > { %v4286_v63 = vsel %vm4259_vm7, %v4253_v20, %v3989_v30  ;;  %v3991_v4 = vpop.permute.xlu1 %3990  ;;  %v9985_v30 = vld [vmem:[#allocation37_spill] sm:$0xff] }
 0x5ea   : > { %5564 = vmatprep.mubr.msk.f32.mxu1 %vm4308_vm9, %v4286_v63  ;;  %v4287_v17 = vsel %vm4259_vm7, %v4254_v2, %v3991_v4  ;;  %v4094_v2 = vsel %vm9986_vm11, %v4062_v61, %v9985_v30 }
 0x5eb   : > { %5565 = vmatmul.mubr.msk.f32.gmra.mrb[24].mxu1 %vm4308_vm9, %v4287_v17 }
 0x5ec   : > { %v3609_v43 = vpop.permute.xlu0 %3608 }
 0x5ed   : > { %v3737_v19 = vpop.permute.xlu1 %3736  ;;  %v4189_v52 = vsel %vm4160_vm5, %v4156_v60, %v3609_v43 }
 0x5ee   : > { %v4222_v25 = vsel %vm4193_vm12, %v4189_v52, %v3737_v19 }
 0x5f0   : > { %v3611_v28 = vpop.permute.xlu0 %3610 }
 0x5f1   : > { %v3357_v27 = vpop.permute.xlu1 %3356  ;;  %v4190_v9 = vsel %vm4160_vm5, %v4157_v49, %v3611_v28 }
 0x5f2   : > { %v4126_v4 = vsel %vm9988_vm15, %v4094_v2, %v3357_v27 }
 0x5f4   : > { %v3231_v34 = vpop.permute.xlu0 %3230 }
 0x5f5   : > { %v3865_v23 = vpop.permute.xlu1 %3864  ;;  %v4095_v20 = vsel %vm9984_vm4, %v4063_v1, %v3231_v34 }
 0x5f6   : > { %v4255_v46 = vsel %vm4226_vm14, %v4222_v25, %v3865_v23 }
 0x5f8   : > { %v3739_v11 = vpop.permute.xlu0 %3738 }
 0x5f9   : > { %v3485_v12 = vpop.permute.xlu1 %3484  ;;  %v4223_v29 = vsel %vm4193_vm12, %v4190_v9, %v3739_v11 }
 0x5fa   : > { %v4158_v19 = vsel %vm9990_vm6, %v4126_v4, %v3485_v12 }
 0x5fc   : > { %v3359_v35 = vpop.permute.xlu0 %3358 }
 0x5fd   : > { %v3993_v57 = vpop.permute.xlu1 %3992  ;;  %v4127_v63 = vsel %vm9987_vm13, %v4095_v20, %v3359_v35 }
 0x5fe   : > { %v4288_v44 = vsel %vm4259_vm7, %v4255_v46, %v3993_v57  ;;  %v8887_v45 = vpop.f32.mrb[8].mxu1  ;;  %v8939_v46 = vld [vmem:[%s9606_s6] ss:$0 sm:$0xff] }
 0x5ff   : > { %v8889_v18 = vpop.f32.mrb[9].mxu1  ;;  %5567 = vmatprep.mubr.msk.f32.mxu1 %vm4308_vm9, %v4288_v44  ;;  %v8943_v57 = vadd.f32 %v8754_v8, %v8939_v46  ;;  %v8947_v44 = vadd.f32 %v8939_v46, %v8756_v16  ;;  %v8971_v50 = vadd.f32 %v8780_v21, %v8939_v46  ;;  %v8977_v49 = vadd.f32 %v8939_v46, %v8814_v55 }
 0x600   : > { %v3867_v47 = vpop.permute.xlu0 %3866  ;;  %v8988_v7 = vadd.f32 %v8810_v59, %v8939_v46 }
 0x601   : > { %v3613_v53 = vpop.permute.xlu1 %3612  ;;  %v4256_v37 = vsel %vm4226_vm14, %v4223_v29, %v3867_v47  ;;  %v4701_v10 = vmul.f32 %v8943_v57, %v8943_v57  ;;  %v4700_v31 = vmul.f32 %v8947_v44, %v8947_v44  ;;  %v4631_v8 = vsel %vm1680_vm2, %v8943_v57, 0.0 }
 0x602   : > { %v4191_v32 = vsel %vm4160_vm5, %v4158_v19, %v3613_v53  ;;  %v8955_v53 = vadd.f32 %v8939_v46, %v8785_v39  ;;  %v4630_v16 = vsel %vm1680_vm2, %v8947_v44, 0.0  ;;  %v4637_v55 = vsel %vm1680_vm2, %v8977_v49, 0.0 }
 0x603   : > { %v4733_v48 = vsel %vm1680_vm2, %v4701_v10, 0.0  ;;  %v4732_v39 = vsel %vm1680_vm2, %v4700_v31, 0.0  ;;  %v4705_v61 = vmul.f32 %v8988_v7, %v8988_v7  ;;  %v4639_v30 = vsel %vm1680_vm2, %v8988_v7, 0.0 }
 0x604   : > { %v3487_v6 = vpop.permute.xlu0 %3486  ;;  %v4702_v26 = vmul.f32 %v8955_v53, %v8955_v53  ;;  %v4734_v29 = vadd.f32 %v4733_v48, %v4732_v39 }
 0x605   : > { %v3615_v42 = vpop.permute.xlu1 %3614  ;;  %v4159_v17 = vsel %vm9989_vm0, %v4127_v63, %v3487_v6  ;;  %v4633_v6 = vsel %vm1680_vm2, %v8955_v53, 0.0  ;;  %v9012_v63 = vadd.f32 %v8939_v46, %v8868_v13 }
 0x606   : > { %v4192_v28 = vsel %vm4160_vm5, %v4159_v17, %v3615_v42  ;;  %v4632_v42 = vadd.f32 %v4631_v8, %v4630_v16  ;;  %v4735_v9 = vsel %vm1680_vm2, %v4702_v26, 0.0  ;;  %v4741_v17 = vsel %vm1680_vm2, %v4705_v61, 0.0 }
 0x607   : > { %v4736_v21 = vadd.f32 %v4735_v9, %v4734_v29 }
 0x608   : > { %v3995_v62 = vpop.permute.xlu0 %3994 }
 0x609   : > { %v4289_v41 = vsel %vm4259_vm7, %v4256_v37, %v3995_v62  ;;  %v3743_v22 = vpop.permute.xlu1 %3742  ;;  %v4634_v37 = vadd.f32 %v4633_v6, %v4632_v42  ;;  %v4703_v62 = vmul.f32 %v8971_v50, %v8971_v50 }
 0x60a   : > { %5568 = vmatmul.mubr.msk.f32.gmra.mrb[26].mxu1 %vm4308_vm9, %v4289_v41  ;;  %v4225_v51 = vsel %vm4193_vm12, %v4192_v28, %v3743_v22  ;;  %v4704_v41 = vmul.f32 %v8977_v49, %v8977_v49  ;;  %v4635_v22 = vsel %vm1680_vm2, %v8971_v50, 0.0 }
 0x60b   : > { %v4636_v24 = vadd.f32 %v4635_v22, %v4634_v37  ;;  %v4737_v1 = vsel %vm1680_vm2, %v4703_v62, 0.0 }
 0x60c   : > { %v3741_v38 = vpop.permute.xlu0 %3740  ;;  %v4739_v5 = vsel %vm1680_vm2, %v4704_v41, 0.0  ;;  %v4738_v40 = vadd.f32 %v4737_v1, %v4736_v21 }
 0x60d   : > { %v3871_v3 = vpop.permute.xlu1 %3870  ;;  %v4224_v34 = vsel %vm4193_vm12, %v4191_v32, %v3741_v38  ;;  %v8994_v38 = vadd.f32 %v8939_v46, %v8842_v0  ;;  %v9006_v0 = vadd.f32 %v8838_v56, %v8939_v46  ;;  %v4708_v56 = vmul.f32 %v9012_v63, %v9012_v63 }
 0x60e   : > { %v4258_v54 = vsel %vm4226_vm14, %v4225_v51, %v3871_v3  ;;  %v4638_v3 = vadd.f32 %v4637_v55, %v4636_v24  ;;  %v4740_v20 = vadd.f32 %v4739_v5, %v4738_v40 }
 0x60f   : > { %v4706_v59 = vmul.f32 %v8994_v38, %v8994_v38  ;;  %v4641_v2 = vsel %vm1680_vm2, %v8994_v38, 0.0  ;;  %v4643_v13 = vsel %vm1680_vm2, %v9006_v0, 0.0  ;;  %v4747_v10 = vsel %vm1680_vm2, %v4708_v56, 0.0 }
 0x610   : > { %v3869_v43 = vpop.permute.xlu0 %3868  ;;  %v4640_v4 = vadd.f32 %v4639_v30, %v4638_v3  ;;  %v4742_v28 = vadd.f32 %v4741_v17, %v4740_v20 }
 0x611   : > { %v3999_v23 = vpop.permute.xlu1 %3998  ;;  %v4257_v15 = vsel %vm4226_vm14, %v4224_v34, %v3869_v43  ;;  %v4743_v43 = vsel %vm1680_vm2, %v4706_v59, 0.0 }
 0x612   : > { %v4291_v27 = vsel %vm4259_vm7, %v4258_v54, %v3999_v23  ;;  %v4642_v19 = vadd.f32 %v4641_v2, %v4640_v4  ;;  %v4707_v23 = vmul.f32 %v9006_v0, %v9006_v0  ;;  %v4744_v51 = vadd.f32 %v4743_v43, %v4742_v28 }
 0x613   : > { %v9028_v54 = vadd.f32 %v8864_v36, %v8939_v46 }
 0x614   : > { %v3997_v14 = vpop.permute.xlu0 %3996 }
 0x615   : > { %v4290_v11 = vsel %vm4259_vm7, %v4257_v15, %v3997_v14  ;;  %v4645_v15 = vsel %vm1680_vm2, %v9012_v63, 0.0  ;;  %v4644_v14 = vadd.f32 %v4643_v13, %v4642_v19  ;;  %v4709_v16 = vmul.f32 %v9028_v54, %v9028_v54 }
 0x616   : > { %5570 = vmatprep.mubr.msk.f32.mxu1 %vm4308_vm9, %v4290_v11  ;;  %v8923_v58 = vpop.f32.mrb[10].mxu1  ;;  %v4745_v11 = vsel %vm1680_vm2, %v4707_v23, 0.0  ;;  %v4647_v48 = vsel %vm1680_vm2, %v9028_v54, 0.0 }
 0x617   : > { %5571 = vmatmul.mubr.msk.f32.gmra.mrb[28].mxu1 %vm4308_vm9, %v4291_v27  ;;  %v8926_v12 = vpop.f32.mrb[11].mxu1  ;;  %v9034_v27 = vadd.f32 %v8939_v46, %v8889_v18  ;;  %v4646_v31 = vadd.f32 %v4645_v15, %v4644_v14  ;;  %v4746_v8 = vadd.f32 %v4745_v11, %v4744_v51  ;;  %v9046_v18 = vadd.f32 %v8887_v45, %v8939_v46 }
 0x618   : > { %v9052_v6 = vadd.f32 %v8939_v46, %v8926_v12  ;;  %v4749_v9 = vsel %vm1680_vm2, %v4709_v16, 0.0  ;;  %v9064_v12 = vadd.f32 %v8923_v58, %v8939_v46 }
 0x619   : > { %v4710_v36 = vmul.f32 %v9034_v27, %v9034_v27  ;;  %v4748_v26 = vadd.f32 %v4747_v10, %v4746_v8  ;;  %v4649_v39 = vsel %vm1680_vm2, %v9034_v27, 0.0  ;;  %v4648_v42 = vadd.f32 %v4647_v48, %v4646_v31 }
 0x61a   : > { %v4711_v41 = vmul.f32 %v9046_v18, %v9046_v18  ;;  %v4712_v45 = vmul.f32 %v9052_v6, %v9052_v6  ;;  %v4651_v22 = vsel %vm1680_vm2, %v9046_v18, 0.0  ;;  %v4653_v55 = vsel %vm1680_vm2, %v9052_v6, 0.0 }
 0x61b   : > { %v4751_v29 = vsel %vm1680_vm2, %v4710_v36, 0.0  ;;  %v4650_v37 = vadd.f32 %v4649_v39, %v4648_v42  ;;  %v4750_v62 = vadd.f32 %v4749_v9, %v4748_v26  ;;  %v4713_v59 = vmul.f32 %v9064_v12, %v9064_v12 }
 0x61c   : > { %v4753_v5 = vsel %vm1680_vm2, %v4711_v41, 0.0  ;;  %v4755_v3 = vsel %vm1680_vm2, %v4712_v45, 0.0  ;;  %v4655_v30 = vsel %vm1680_vm2, %v9064_v12, 0.0 }
 0x61d   : > { %v4752_v21 = vadd.f32 %v4751_v29, %v4750_v62  ;;  %v4652_v1 = vadd.f32 %v4651_v22, %v4650_v37  ;;  %v4757_v43 = vsel %vm1680_vm2, %v4713_v59, 0.0 }
 0x61f   : > { %v4654_v40 = vadd.f32 %v4653_v55, %v4652_v1  ;;  %v4754_v61 = vadd.f32 %v4753_v5, %v4752_v21 }
 0x621   : > { %v4756_v20 = vadd.f32 %v4755_v3, %v4754_v61  ;;  %v4656_v17 = vadd.f32 %v4655_v30, %v4654_v40 }
 0x623   : > { %v4758_v23 = vadd.f32 %v4757_v43, %v4756_v20 }
 0x62e   : > { %v8928_v60 = vpop.f32.mrb[12].mxu1 }
 0x62f   : > { %v8930_v52 = vpop.f32.mrb[13].mxu1 }
 0x630   : > { %v9070_v24 = vadd.f32 %v8939_v46, %v8930_v52  ;;  %v9082_v52 = vadd.f32 %v8928_v60, %v8939_v46 }
 0x632   : > { %v4714_v58 = vmul.f32 %v9070_v24, %v9070_v24  ;;  %v4657_v2 = vsel %vm1680_vm2, %v9070_v24, 0.0  ;;  %v4715_v56 = vmul.f32 %v9082_v52, %v9082_v52 }
 0x633   : > { %v4658_v28 = vadd.f32 %v4657_v2, %v4656_v17 }
 0x634   : > { %v4759_v19 = vsel %vm1680_vm2, %v4714_v58, 0.0  ;;  %v4761_v8 = vsel %vm1680_vm2, %v4715_v56, 0.0 }
 0x635   : > { %v4760_v13 = vadd.f32 %v4759_v19, %v4758_v23 }
 0x637   : > { %v4762_v26 = vadd.f32 %v4761_v8, %v4760_v13 }
 0x646   : > { %v8932_v25 = vpop.f32.mrb[14].mxu1 }
 0x647   : > { %v8934_v35 = vpop.f32.mrb[15].mxu1  ;;  %v9100_v14 = vadd.f32 %v8932_v25, %v8939_v46 }
 0x648   : > { %v9088_v4 = vadd.f32 %v8939_v46, %v8934_v35  ;;  %v4659_v35 = vsel %vm1680_vm2, %v9082_v52, 0.0 }
 0x649   : > { %v4660_v31 = vadd.f32 %v4659_v35, %v4658_v28  ;;  %v4717_v48 = vmul.f32 %v9100_v14, %v9100_v14  ;;  %v4663_v42 = vsel %vm1680_vm2, %v9100_v14, 0.0 }
 0x64a   : > { %v4716_v60 = vmul.f32 %v9088_v4, %v9088_v4  ;;  %v4661_v11 = vsel %vm1680_vm2, %v9088_v4, 0.0 }
 0x64b   : > { %v4662_v36 = vadd.f32 %v4661_v11, %v4660_v31  ;;  %v4765_v62 = vsel %vm1680_vm2, %v4717_v48, 0.0 }
 0x64c   : > { %v4763_v16 = vsel %vm1680_vm2, %v4716_v60, 0.0 }
 0x64d   : > { %v4764_v39 = vadd.f32 %v4763_v16, %v4762_v26  ;;  %v4664_v37 = vadd.f32 %v4663_v42, %v4662_v36 }
 0x64f   : > { %v4766_v21 = vadd.f32 %v4765_v62, %v4764_v39 }
 0x65e   : > { %v8949_v47 = vpop.f32.mrb[16].mxu1 }
 0x65f   : > { %v8951_v33 = vpop.f32.mrb[17].mxu1 }
 0x660   : > { %v9106_v10 = vadd.f32 %v8939_v46, %v8951_v33  ;;  %v9118_v33 = vadd.f32 %v8949_v47, %v8939_v46 }
 0x662   : > { %v4718_v25 = vmul.f32 %v9106_v10, %v9106_v10  ;;  %v4665_v9 = vsel %vm1680_vm2, %v9106_v10, 0.0  ;;  %v4719_v22 = vmul.f32 %v9118_v33, %v9118_v33  ;;  %v4667_v1 = vsel %vm1680_vm2, %v9118_v33, 0.0 }
 0x663   : > { %v4666_v45 = vadd.f32 %v4665_v9, %v4664_v37 }
 0x664   : > { %v4767_v41 = vsel %vm1680_vm2, %v4718_v25, 0.0  ;;  %v4769_v61 = vsel %vm1680_vm2, %v4719_v22, 0.0 }
 0x665   : > { %v4768_v55 = vadd.f32 %v4767_v41, %v4766_v21  ;;  %v4668_v40 = vadd.f32 %v4667_v1, %v4666_v45 }
 0x667   : > { %v4770_v20 = vadd.f32 %v4769_v61, %v4768_v55 }
 0x676   : > { %v9020_v32 = vpop.f32.mrb[18].mxu1 }
 0x677   : > { %v9022_v34 = vpop.f32.mrb[19].mxu1 }
 0x678   : > { %v9124_v29 = vadd.f32 %v8939_v46, %v9022_v34  ;;  %v9136_v34 = vadd.f32 %v9020_v32, %v8939_v46 }
 0x67a   : > { %v4720_v47 = vmul.f32 %v9124_v29, %v9124_v29  ;;  %v4669_v5 = vsel %vm1680_vm2, %v9124_v29, 0.0  ;;  %v4721_v30 = vmul.f32 %v9136_v34, %v9136_v34  ;;  %v4671_v17 = vsel %vm1680_vm2, %v9136_v34, 0.0 }
 0x67b   : > { %v4670_v58 = vadd.f32 %v4669_v5, %v4668_v40 }
 0x67c   : > { %v4771_v59 = vsel %vm1680_vm2, %v4720_v47, 0.0  ;;  %v4773_v23 = vsel %vm1680_vm2, %v4721_v30, 0.0 }
 0x67d   : > { %v4772_v2 = vadd.f32 %v4771_v59, %v4770_v20  ;;  %v4672_v28 = vadd.f32 %v4671_v17, %v4670_v58 }
 0x67f   : > { %v4774_v13 = vadd.f32 %v4773_v23, %v4772_v2 }
 0x68e   : > { %v5560_v51 = vpop.f32.mrb[20].mxu1 }
 0x68f   : > { %v4581_v15 = vpop.f32.mrb[21].mxu1  ;;  %v9152_v43 = vadd.f32 %v5560_v51, %v8939_v46 }
 0x690   : > { %v9141_v3 = vadd.f32 %v8939_v46, %v4581_v15 }
 0x691   : > { %v4723_v15 = vmul.f32 %v9152_v43, %v9152_v43  ;;  %v4675_v8 = vsel %vm1680_vm2, %v9152_v43, 0.0 }
 0x692   : > { %v4722_v32 = vmul.f32 %v9141_v3, %v9141_v3  ;;  %v4673_v19 = vsel %vm1680_vm2, %v9141_v3, 0.0 }
 0x693   : > { %v4674_v60 = vadd.f32 %v4673_v19, %v4672_v28  ;;  %v4777_v26 = vsel %vm1680_vm2, %v4723_v15, 0.0 }
 0x694   : > { %v4775_v56 = vsel %vm1680_vm2, %v4722_v32, 0.0 }
 0x695   : > { %v4776_v11 = vadd.f32 %v4775_v56, %v4774_v13  ;;  %v4676_v36 = vadd.f32 %v4675_v8, %v4674_v60 }
 0x697   : > { %v4778_v9 = vadd.f32 %v4777_v26, %v4776_v11 }
 0x6a6   : > { %v5563_v35 = vpop.f32.mrb[22].mxu1 }
 0x6a7   : > { %v9161_v31 = vadd.f32 %v5563_v35, %v8939_v46  ;;  %v4591_v51 = vpop.f32.mrb[23].mxu1 }
 0x6a8   : > { %v9166_v16 = vadd.f32 %v8939_v46, %v4591_v51 }
 0x6a9   : > { %v4725_v48 = vmul.f32 %v9161_v31, %v9161_v31  ;;  %v4679_v37 = vsel %vm1680_vm2, %v9161_v31, 0.0 }
 0x6aa   : > { %v4677_v25 = vsel %vm1680_vm2, %v9166_v16, 0.0  ;;  %v4724_v39 = vmul.f32 %v9166_v16, %v9166_v16 }
 0x6ab   : > { %v4678_v42 = vadd.f32 %v4677_v25, %v4676_v36  ;;  %v4781_v21 = vsel %vm1680_vm2, %v4725_v48, 0.0 }
 0x6ac   : > { %v4779_v62 = vsel %vm1680_vm2, %v4724_v39, 0.0 }
 0x6ad   : > { %v4780_v41 = vadd.f32 %v4779_v62, %v4778_v9  ;;  %v4680_v45 = vadd.f32 %v4679_v37, %v4678_v42 }
 0x6af   : > { %v4782_v22 = vadd.f32 %v4781_v21, %v4780_v41 }
 0x6be   : > { %v5566_v47 = vpop.f32.mrb[24].mxu1 }
 0x6bf   : > { %v9180_v55 = vadd.f32 %v5566_v47, %v8939_v46  ;;  %v4601_v1 = vpop.f32.mrb[25].mxu1 }
 0x6c0   : > { %v9183_v5 = vadd.f32 %v8939_v46, %v4601_v1 }
 0x6c1   : > { %v4727_v40 = vmul.f32 %v9180_v55, %v9180_v55  ;;  %v4683_v20 = vsel %vm1680_vm2, %v9180_v55, 0.0 }
 0x6c2   : > { %v4681_v61 = vsel %vm1680_vm2, %v9183_v5, 0.0  ;;  %v4726_v59 = vmul.f32 %v9183_v5, %v9183_v5 }
 0x6c3   : > { %v4682_v58 = vadd.f32 %v4681_v61, %v4680_v45  ;;  %v4785_v17 = vsel %vm1680_vm2, %v4727_v40, 0.0 }
 0x6c4   : > { %v4783_v30 = vsel %vm1680_vm2, %v4726_v59, 0.0 }
 0x6c5   : > { %v4784_v32 = vadd.f32 %v4783_v30, %v4782_v22  ;;  %v4684_v2 = vadd.f32 %v4683_v20, %v4682_v58 }
 0x6c7   : > { %v4786_v19 = vadd.f32 %v4785_v17, %v4784_v32 }
 0x6dd   : > { %v5569_v28 = vpop.f32.mrb[26].mxu1 }
 0x6de   : > { %v9196_v23 = vadd.f32 %v5569_v28, %v8939_v46  ;;  %v4611_v56 = vpop.f32.mrb[27].mxu1 }
 0x6df   : > { %v9199_v60 = vadd.f32 %v8939_v46, %v4611_v56 }
 0x6e0   : > { %v4729_v13 = vmul.f32 %v9196_v23, %v9196_v23  ;;  %v4687_v51 = vsel %vm1680_vm2, %v9196_v23, 0.0 }
 0x6e1   : > { %v4685_v15 = vsel %vm1680_vm2, %v9199_v60, 0.0  ;;  %v4728_v35 = vmul.f32 %v9199_v60, %v9199_v60 }
 0x6e2   : > { %v4686_v11 = vadd.f32 %v4685_v15, %v4684_v2  ;;  %v4789_v48 = vsel %vm1680_vm2, %v4729_v13, 0.0 }
 0x6e3   : > { %v4787_v8 = vsel %vm1680_vm2, %v4728_v35, 0.0 }
 0x6e4   : > { %v4788_v36 = vadd.f32 %v4787_v8, %v4786_v19  ;;  %v4688_v26 = vadd.f32 %v4687_v51, %v4686_v11 }
 0x6e6   : > { %v4790_v25 = vadd.f32 %v4789_v48, %v4788_v36 }
 0x6ea   : > { %v5572_v39 = vpop.f32.mrb[28].mxu1 }
 0x6eb   : > { %v9212_v42 = vadd.f32 %v5572_v39, %v8939_v46  ;;  %v4621_v9 = vpop.f32.mrb[29].mxu1 }
 0x6ec   : > { %v9215_v37 = vadd.f32 %v8939_v46, %v4621_v9 }
 0x6ed   : > { %v4731_v62 = vmul.f32 %v9212_v42, %v9212_v42  ;;  %v4691_v22 = vsel %vm1680_vm2, %v9212_v42, 0.0 }
 0x6ee   : > { %v4689_v41 = vsel %vm1680_vm2, %v9215_v37, 0.0  ;;  %v4730_v45 = vmul.f32 %v9215_v37, %v9215_v37 }
 0x6ef   : > { %v4690_v21 = vadd.f32 %v4689_v41, %v4688_v26  ;;  %v4793_v46 = vsel %vm1680_vm2, %v4731_v62, 0.0 }
 0x6f0   : > { %v4791_v47 = vsel %vm1680_vm2, %v4730_v45, 0.0 }
 0x6f1   : > { %v4692_v1 = vadd.f32 %v4691_v22, %v4690_v21  ;;  %v4792_v40 = vadd.f32 %v4791_v47, %v4790_v25 }
 0x6f3   : > { %v4693_v61 = vrot.slane %v4692_v1, 4  ;;  %v4794_v59 = vadd.f32 %v4793_v46, %v4792_v40 }
 0x6f5   : > { %v4694_v58 = vadd.f32 %v4693_v61, %v4692_v1  ;;  %v4795_v20 = vrot.slane %v4794_v59, 4  ;;  %v9991_v1 = vld [vmem:[#allocation38_spill] sm:$0xff] }
 0x6f7   : > { %v4695_v30 = vrot.slane %v4694_v58, 2  ;;  %v4796_v32 = vadd.f32 %v4795_v20, %v4794_v59 }
 0x6f9   : > { %v4696_v2 = vadd.f32 %v4695_v30, %v4694_v58  ;;  %v4797_v17 = vrot.slane %v4796_v32, 2 }
 0x6fb   : > { %v4697_v19 = vrot.slane %v4696_v2, 1  ;;  %v4798_v28 = vadd.f32 %v4797_v17, %v4796_v32 }
 0x6fd   : > { %v4698_v56 = vadd.f32 %v4697_v19, %v4696_v2  ;;  %v4799_v13 = vrot.slane %v4798_v28, 1 }
 0x6ff   : > { %v9227_v15 = vmul.f32 0.00390625, %v4698_v56  ;;  %v4800_v35 = vadd.f32 %v4799_v13, %v4798_v28 }
 0x701   : > { %v4801_v11 = vmul.f32 0.00390625, %v4800_v35  ;;  %v4802_v51 = vmul.f32 %v9227_v15, %v9227_v15  ;;  %v4829_v26 = vsub.f32 %v9166_v16, %v9227_v15  ;;  %v4830_v48 = vsub.f32 %v9161_v31, %v9227_v15 }
 0x702   : > { %v4831_v25 = vsub.f32 %v9183_v5, %v9227_v15  ;;  %v4832_v39 = vsub.f32 %v9180_v55, %v9227_v15  ;;  %v4833_v9 = vsub.f32 %v9199_v60, %v9227_v15  ;;  %v4834_v62 = vsub.f32 %v9196_v23, %v9227_v15  ;;  %v4839_v5 = vld [vmem:[%s9607_s7] sm:$0x1] }
 0x703   : > { %v4803_v8 = vsub.f32 %v4801_v11, %v4802_v51  ;;  %v4835_v41 = vsub.f32 %v9215_v37, %v9227_v15  ;;  %v4836_v16 = vsub.f32 %v9212_v42, %v9227_v15  ;;  %v4805_v31 = vsub.f32 %v8947_v44, %v9227_v15 }
 0x704   : > { %v4806_v55 = vsub.f32 %v8943_v57, %v9227_v15  ;;  %v4807_v23 = vsub.f32 %v8955_v53, %v9227_v15  ;;  %v4808_v60 = vsub.f32 %v8971_v50, %v9227_v15  ;;  %v4809_v42 = vsub.f32 %v8977_v49, %v9227_v15 }
 0x705   : > { %v4804_v36 = vmax.f32 %v4803_v8, 0.0  ;;  %v4810_v37 = vsub.f32 %v8988_v7, %v9227_v15  ;;  %v4811_v57 = vsub.f32 %v8994_v38, %v9227_v15  ;;  %v4812_v21 = vsub.f32 %v9006_v0, %v9227_v15 }
 0x706   : > { %v4813_v22 = vsub.f32 %v9012_v63, %v9227_v15  ;;  %v4814_v53 = vsub.f32 %v9028_v54, %v9227_v15  ;;  %v4815_v50 = vsub.f32 %v9034_v27, %v9227_v15  ;;  %v4816_v49 = vsub.f32 %v9046_v18, %v9227_v15 }
 0x707   : > { %v4837_v45 = vadd.f32 1e-05, %v4804_v36  ;;  %v4817_v7 = vsub.f32 %v9052_v6, %v9227_v15  ;;  %v4818_v38 = vsub.f32 %v9064_v12, %v9227_v15  ;;  %v4819_v0 = vsub.f32 %v9070_v24, %v9227_v15 }
 0x708   : > { %v4820_v63 = vsub.f32 %v9082_v52, %v9227_v15  ;;  %v4821_v54 = vsub.f32 %v9088_v4, %v9227_v15  ;;  %v4822_v27 = vsub.f32 %v9100_v14, %v9227_v15  ;;  %v4823_v18 = vsub.f32 %v9106_v10, %v9227_v15 }
 0x709   : > { %5631 = vrsqrt.f32 %v4837_v45  ;;  %v4824_v6 = vsub.f32 %v9118_v33, %v9227_v15  ;;  %v9992_v12 = vsub.s32 0, %v9991_v1  ;;  %v4825_v24 = vsub.f32 %v9124_v29, %v9227_v15 }
 0x70a   : > { %v4826_v52 = vsub.f32 %v9136_v34, %v9227_v15  ;;  %v4827_v4 = vsub.f32 %v9141_v3, %v9227_v15  ;;  %v4828_v14 = vsub.f32 %v9152_v43, %v9227_v15 }
 0x713   : > { %v5632_v44 = vpop.eup %5631 }
 0x714   : > { %v4840_v47 = vmul.f32 %v5632_v44, %v4839_v5 }
 0x716   : > { %v4844_v40 = vrot.slane %v4840_v47, %v9992_v12 }
 0x718   : > { %v4845_v46 = vmul.f32 %v4844_v40, %v4805_v31  ;;  %v4846_v10 = vmul.f32 %v4844_v40, %v4806_v55  ;;  %v4847_v61 = vmul.f32 %v4844_v40, %v4807_v23  ;;  %v4848_v59 = vmul.f32 %v4844_v40, %v4808_v60 }
 0x719   : > { %v4849_v33 = vmul.f32 %v4844_v40, %v4809_v42  ;;  %v4850_v58 = vmul.f32 %v4844_v40, %v4810_v37  ;;  %v4851_v20 = vmul.f32 %v4844_v40, %v4811_v57  ;;  %v4852_v30 = vmul.f32 %v4844_v40, %v4812_v21  ;;  %v5367_v37 = vld [vmem:[%s9608_s8] ss:$0 sm:$0xff] }
 0x71a   : > { %v4853_v32 = vmul.f32 %v4844_v40, %v4813_v22  ;;  %v4854_v2 = vmul.f32 %v4844_v40, %v4814_v53  ;;  %v4855_v29 = vmul.f32 %v4844_v40, %v4815_v50  ;;  %v4856_v17 = vmul.f32 %v4844_v40, %v4816_v49 }
 0x71b   : > { %v4857_v19 = vmul.f32 %v4844_v40, %v4817_v7  ;;  %v4858_v34 = vmul.f32 %v4844_v40, %v4818_v38  ;;  %v4859_v28 = vmul.f32 %v4844_v40, %v4819_v0  ;;  %v4860_v56 = vmul.f32 %v4844_v40, %v4820_v63 }
 0x71c   : > { %v4861_v3 = vmul.f32 %v4844_v40, %v4821_v54  ;;  %v4862_v13 = vmul.f32 %v4844_v40, %v4822_v27  ;;  %v4863_v35 = vmul.f32 %v4844_v40, %v4823_v18  ;;  %v4864_v43 = vmul.f32 %v4844_v40, %v4824_v6 }
 0x71d   : > { %v4865_v15 = vmul.f32 %v4844_v40, %v4825_v24  ;;  %v4866_v11 = vmul.f32 %v4844_v40, %v4826_v52  ;;  %v4867_v51 = vmul.f32 %v4844_v40, %v4827_v4  ;;  %v4868_v8 = vmul.f32 %v4844_v40, %v4828_v14 }
 0x71e   : > { %v4869_v36 = vmul.f32 %v4844_v40, %v4829_v26  ;;  %v4870_v45 = vmul.f32 %v4844_v40, %v4830_v48  ;;  %v4871_v31 = vmul.f32 %v4844_v40, %v4831_v25  ;;  %v4872_v55 = vmul.f32 %v4844_v40, %v4832_v39 }
 0x71f   : > { %v4873_v5 = vmul.f32 %v4844_v40, %v4833_v9  ;;  %v4874_v23 = vmul.f32 %v4844_v40, %v4834_v62  ;;  %v4875_v60 = vmul.f32 %v4844_v40, %v4835_v41  ;;  %v4876_v42 = vmul.f32 %v4844_v40, %v4836_v16 }
 0x720   : > { %v9303_v44 = vadd.f32 %v5367_v37, %v4845_v46  ;;  %v9305_v57 = vadd.f32 %v5367_v37, %v4846_v10  ;;  %v9307_v21 = vadd.f32 %v5367_v37, %v4847_v61  ;;  %v9309_v22 = vadd.f32 %v5367_v37, %v4848_v59 }
 0x721   : > { %v9311_v26 = vadd.f32 %v5367_v37, %v4849_v33  ;;  %v9313_v48 = vadd.f32 %v5367_v37, %v4850_v58  ;;  %v9315_v25 = vadd.f32 %v5367_v37, %v4851_v20  ;;  %v9317_v39 = vadd.f32 %v5367_v37, %v4852_v30 }
 0x722   : > { %v9319_v9 = vadd.f32 %v5367_v37, %v4853_v32  ;;  %v9321_v62 = vadd.f32 %v5367_v37, %v4854_v2  ;;  %v9323_v41 = vadd.f32 %v5367_v37, %v4855_v29  ;;  %v9325_v16 = vadd.f32 %v5367_v37, %v4856_v17 }
 0x723   : > { %v9327_v53 = vadd.f32 %v5367_v37, %v4857_v19  ;;  %v9329_v50 = vadd.f32 %v5367_v37, %v4858_v34  ;;  %v9331_v49 = vadd.f32 %v5367_v37, %v4859_v28  ;;  %v9333_v7 = vadd.f32 %v5367_v37, %v4860_v56 }
 0x724   : > { %v9335_v47 = vadd.f32 %v5367_v37, %v4861_v3  ;;  %v9337_v38 = vadd.f32 %v5367_v37, %v4862_v13  ;;  %v9339_v0 = vadd.f32 %v5367_v37, %v4863_v35  ;;  %v9341_v63 = vadd.f32 %v5367_v37, %v4864_v43 }
 0x725   : > { %v9343_v54 = vadd.f32 %v5367_v37, %v4865_v15  ;;  %v9345_v27 = vadd.f32 %v5367_v37, %v4866_v11  ;;  %v9347_v18 = vadd.f32 %v5367_v37, %v4867_v51  ;;  %v9349_v6 = vadd.f32 %v5367_v37, %v4868_v8 }
 0x726   : > { %v9351_v1 = vadd.f32 %v5367_v37, %v4869_v36  ;;  %v9353_v12 = vadd.f32 %v5367_v37, %v4870_v45  ;;  %v9355_v40 = vadd.f32 %v5367_v37, %v4871_v31  ;;  %v9357_v24 = vadd.f32 %v5367_v37, %v4872_v55 }
 0x727   : > { %v9360_v52 = vadd.f32 %v5367_v37, %v4873_v5  ;;  %v9362_v4 = vadd.f32 %v5367_v37, %v4874_v23  ;;  %vm4916_vm5 = vcmp.ge.f32.partialorder %v9303_v44, 0.0  ;;  %vm4917_vm12 = vcmp.ge.f32.partialorder %v9305_v57, 0.0 }
 0x728   : > { %vm4918_vm14 = vcmp.ge.f32.partialorder %v9307_v21, 0.0  ;;  %vm4919_vm7 = vcmp.ge.f32.partialorder %v9309_v22, 0.0  ;;  %vm4920_vm9 = vcmp.ge.f32.partialorder %v9311_v26, 0.0  ;;  %vm4921_vm1 = vcmp.ge.f32.partialorder %v9313_v48, 0.0 }
 0x729   : > { %vm4922_vm10 = vcmp.ge.f32.partialorder %v9315_v25, 0.0  ;;  %vm4923_vm8 = vcmp.ge.f32.partialorder %v9317_v39, 0.0  ;;  %v9379_v14 = vadd.f32 %v5367_v37, %v4875_v60  ;;  %v4948_v46 = vmul.f32 0.01, %v9303_v44 }
 0x72a   : > { %v4949_v10 = vmul.f32 0.01, %v9305_v57  ;;  %v4950_v61 = vmul.f32 0.01, %v9307_v21  ;;  %v9388_v59 = vadd.f32 %v5367_v37, %v4876_v42  ;;  %vm4931_vm4 = vcmp.ge.f32.partialorder %v9333_v7, 0.0 }
 0x72b   : > { %vm4932_vm11 = vcmp.ge.f32.partialorder %v9335_v47, 0.0  ;;  %v4951_v33 = vmul.f32 0.01, %v9309_v22  ;;  %v4952_v58 = vmul.f32 0.01, %v9311_v26  ;;  %vm4937_vm6 = vcmp.ge.f32.partialorder %v9345_v27, 0.0 }
 0x72c   : > { %v4953_v20 = vmul.f32 0.01, %v9313_v48  ;;  %v4954_v30 = vmul.f32 0.01, %v9315_v25  ;;  %v4955_v32 = vmul.f32 0.01, %v9317_v39  ;;  %v4980_v29 = vsel %vm4916_vm5, %v9303_v44, %v4948_v46 }
 0x72d   : > { %v4956_v2 = vmul.f32 0.01, %v9319_v9  ;;  %vm4938_vm13 = vcmp.ge.f32.partialorder %v9347_v18, 0.0  ;;  %v4957_v17 = vmul.f32 0.01, %v9321_v62  ;;  %v4981_v28 = vsel %vm4917_vm12, %v9305_v57, %v4949_v10  ;;  %5012 = vst.msk [vmem:[%s9377_s15] sm:$0xff] %vm1680_vm2, %v4980_v29 }
 0x72e   : > { %v4958_v19 = vmul.f32 0.01, %v9323_v41  ;;  %v4959_v34 = vmul.f32 0.01, %v9325_v16  ;;  %vm4942_vm5 = vcmp.ge.f32.partialorder %v9355_v40, 0.0  ;;  %vm4943_vm0 = vcmp.ge.f32.partialorder %v9357_v24, 0.0 }
 0x72f   : > { %vm4945_vm3 = vcmp.ge.f32.partialorder %v9362_v4, 0.0  ;;  %v4960_v56 = vmul.f32 0.01, %v9327_v53  ;;  %v4961_v3 = vmul.f32 0.01, %v9329_v50  ;;  %v4982_v35 = vsel %vm4918_vm14, %v9307_v21, %v4950_v61  ;;  %5013 = vst.msk [vmem:[%s9377_s15 + $0x8] sm:$0xff] %vm1680_vm2, %v4981_v28 }
 0x730   : > { %v4962_v13 = vmul.f32 0.01, %v9331_v49  ;;  %vm4946_vm12 = vcmp.ge.f32.partialorder %v9379_v14, 0.0  ;;  %vm4947_vm15 = vcmp.ge.f32.partialorder %v9388_v59, 0.0  ;;  %v4963_v43 = vmul.f32 0.01, %v9333_v7 }
 0x731   : > { %v4964_v15 = vmul.f32 0.01, %v9335_v47  ;;  %v4965_v11 = vmul.f32 0.01, %v9337_v38  ;;  %v4983_v51 = vsel %vm4919_vm7, %v9309_v22, %v4951_v33  ;;  %5014 = vst.msk [vmem:[%s9377_s15 + $0x10] sm:$0xff] %vm1680_vm2, %v4982_v35  ;;  %v4984_v31 = vsel %vm4920_vm9, %v9311_v26, %v4952_v58 }
 0x732   : > { %v4966_v8 = vmul.f32 0.01, %v9339_v0  ;;  %v4967_v36 = vmul.f32 0.01, %v9341_v63  ;;  %v4968_v45 = vmul.f32 0.01, %v9343_v54  ;;  %v4985_v60 = vsel %vm4921_vm1, %v9313_v48, %v4953_v20 }
 0x733   : > { %5015 = vst.msk [vmem:[%s9377_s15 + $0x18] sm:$0xff] %vm1680_vm2, %v4983_v51  ;;  %v4969_v55 = vmul.f32 0.01, %v9345_v27  ;;  %v4970_v5 = vmul.f32 0.01, %v9347_v18  ;;  %5016 = vst.msk [vmem:[%s9377_s15 + $0x20] sm:$0xff] %vm1680_vm2, %v4984_v31  ;;  %v4986_v57 = vsel %vm4922_vm10, %v9315_v25, %v4954_v30  ;;  %v4987_v48 = vsel %vm4923_vm8, %v9317_v39, %v4955_v32 }
 0x734   : > { %v4971_v23 = vmul.f32 0.01, %v9349_v6  ;;  %v4972_v42 = vmul.f32 0.01, %v9351_v1  ;;  %v4973_v37 = vmul.f32 0.01, %v9353_v12 }
 0x735   : > { %v4974_v44 = vmul.f32 0.01, %v9355_v40  ;;  %5017 = vst.msk [vmem:[%s9377_s15 + $0x28] sm:$0xff] %vm1680_vm2, %v4985_v60  ;;  %v4975_v21 = vmul.f32 0.01, %v9357_v24  ;;  %5018 = vst.msk [vmem:[%s9377_s15 + $0x30] sm:$0xff] %vm1680_vm2, %v4986_v57 }
 0x736   : > { %v4976_v22 = vmul.f32 0.01, %v9360_v52  ;;  %v4977_v26 = vmul.f32 0.01, %v9362_v4  ;;  %v4978_v46 = vmul.f32 0.01, %v9379_v14 }
 0x737   : > { %v4979_v25 = vmul.f32 0.01, %v9388_v59  ;;  %vm9993_vm14 = vcmp.ge.f32.partialorder %v9319_v9, 0.0  ;;  %vm9994_vm7 = vcmp.ge.f32.partialorder %v9321_v62, 0.0  ;;  %5019 = vst.msk [vmem:[%s9377_s15 + $0x38] sm:$0xff] %vm1680_vm2, %v4987_v48  ;;  %vm9995_vm9 = vcmp.ge.f32.partialorder %v9323_v41, 0.0 }
 0x738   : > { %v4988_v10 = vsel %vm9993_vm14, %v9319_v9, %v4956_v2  ;;  %v4989_v61 = vsel %vm9994_vm7, %v9321_v62, %v4957_v17  ;;  %v4990_v39 = vsel %vm9995_vm9, %v9323_v41, %v4958_v19  ;;  %vm9996_vm1 = vcmp.ge.f32.partialorder %v9325_v16, 0.0 }
 0x739   : > { %v4991_v33 = vsel %vm9996_vm1, %v9325_v16, %v4959_v34  ;;  %vm9997_vm10 = vcmp.ge.f32.partialorder %v9327_v53, 0.0  ;;  %vm9998_vm8 = vcmp.ge.f32.partialorder %v9329_v50, 0.0  ;;  %5020 = vst.msk [vmem:[%s9377_s15 + $0x40] sm:$0xff] %vm1680_vm2, %v4988_v10  ;;  %5021 = vst.msk [vmem:[%s9377_s15 + $0x48] sm:$0xff] %vm1680_vm2, %v4989_v61  ;;  %vm9999_vm14 = vcmp.ge.f32.partialorder %v9331_v49, 0.0 }
 0x73a   : > { %v4992_v58 = vsel %vm9997_vm10, %v9327_v53, %v4960_v56  ;;  %v4993_v9 = vsel %vm9998_vm8, %v9329_v50, %v4961_v3  ;;  %v4994_v62 = vsel %vm9999_vm14, %v9331_v49, %v4962_v13  ;;  %v4995_v41 = vsel %vm4931_vm4, %v9333_v7, %v4963_v43  ;;  %5022 = vst.msk [vmem:[%s9377_s15 + $0x50] sm:$0xff] %vm1680_vm2, %v4990_v39 }
 0x73b   : > { %v4996_v16 = vsel %vm4932_vm11, %v9335_v47, %v4964_v15  ;;  %vm10000_vm7 = vcmp.ge.f32.partialorder %v9337_v38, 0.0  ;;  %5023 = vst.msk [vmem:[%s9377_s15 + $0x58] sm:$0xff] %vm1680_vm2, %v4991_v33  ;;  %5024 = vst.msk [vmem:[%s9377_s15 + $0x60] sm:$0xff] %vm1680_vm2, %v4992_v58  ;;  %vm10001_vm4 = vcmp.ge.f32.partialorder %v9339_v0, 0.0  ;;  %vm10002_vm11 = vcmp.ge.f32.partialorder %v9341_v63, 0.0 }
 0x73c   : > { %v4997_v53 = vsel %vm10000_vm7, %v9337_v38, %v4965_v11  ;;  %5025 = vst.msk [vmem:[%s9377_s15 + $0x68] sm:$0xff] %vm1680_vm2, %v4993_v9  ;;  %v4998_v50 = vsel %vm10001_vm4, %v9339_v0, %v4966_v8  ;;  %v4999_v49 = vsel %vm10002_vm11, %v9341_v63, %v4967_v36  ;;  %vm10003_vm9 = vcmp.ge.f32.partialorder %v9343_v54, 0.0  ;;  %5026 = vst.msk [vmem:[%s9377_s15 + $0x70] sm:$0xff] %vm1680_vm2, %v4994_v62 }
 0x73d   : > { %v5000_v7 = vsel %vm10003_vm9, %v9343_v54, %v4968_v45  ;;  %v5001_v47 = vsel %vm4937_vm6, %v9345_v27, %v4969_v55  ;;  %5027 = vst.msk [vmem:[%s9377_s15 + $0x78] sm:$0xff] %vm1680_vm2, %v4995_v41  ;;  %5028 = vst.msk [vmem:[%s9377_s15 + $0x80] sm:$0xff] %vm1680_vm2, %v4996_v16  ;;  %v5002_v38 = vsel %vm4938_vm13, %v9347_v18, %v4970_v5  ;;  %vm10004_vm1 = vcmp.ge.f32.partialorder %v9349_v6, 0.0 }
 0x73e   : > { %5029 = vst.msk [vmem:[%s9377_s15 + $0x88] sm:$0xff] %vm1680_vm2, %v4997_v53  ;;  %v5003_v0 = vsel %vm10004_vm1, %v9349_v6, %v4971_v23  ;;  %vm10005_vm6 = vcmp.ge.f32.partialorder %v9351_v1, 0.0  ;;  %vm10006_vm10 = vcmp.ge.f32.partialorder %v9353_v12, 0.0  ;;  %5030 = vst.msk [vmem:[%s9377_s15 + $0x90] sm:$0xff] %vm1680_vm2, %v4998_v50  ;;  %v5006_v27 = vsel %vm4942_vm5, %v9355_v40, %v4974_v44 }
 0x73f   : > { %v5004_v63 = vsel %vm10005_vm6, %v9351_v1, %v4972_v42  ;;  %v5005_v54 = vsel %vm10006_vm10, %v9353_v12, %v4973_v37  ;;  %5031 = vst.msk [vmem:[%s9377_s15 + $0x98] sm:$0xff] %vm1680_vm2, %v4999_v49  ;;  %5032 = vst.msk [vmem:[%s9377_s15 + $0xa0] sm:$0xff] %vm1680_vm2, %v5000_v7  ;;  %v5007_v18 = vsel %vm4943_vm0, %v9357_v24, %v4975_v21  ;;  %vm10007_vm13 = vcmp.ge.f32.partialorder %v9360_v52, 0.0 }
 0x740   : > { %5033 = vst.msk [vmem:[%s9377_s15 + $0xa8] sm:$0xff] %vm1680_vm2, %v5001_v47  ;;  %v5008_v6 = vsel %vm10007_vm13, %v9360_v52, %v4976_v22  ;;  %v5009_v1 = vsel %vm4945_vm3, %v9362_v4, %v4977_v26  ;;  %5034 = vst.msk [vmem:[%s9377_s15 + $0xb0] sm:$0xff] %vm1680_vm2, %v5002_v38  ;;  %v5010_v12 = vsel %vm4946_vm12, %v9379_v14, %v4978_v46 }
 0x741   : > { %5035 = vst.msk [vmem:[%s9377_s15 + $0xb8] sm:$0xff] %vm1680_vm2, %v5003_v0  ;;  %5036 = vst.msk [vmem:[%s9377_s15 + $0xc0] sm:$0xff] %vm1680_vm2, %v5004_v63  ;;  %v5011_v40 = vsel %vm4947_vm15, %v9388_v59, %v4979_v25 }
 0x742   : > { %5037 = vst.msk [vmem:[%s9377_s15 + $0xc8] sm:$0xff] %vm1680_vm2, %v5005_v54  ;;  %5038 = vst.msk [vmem:[%s9377_s15 + $0xd0] sm:$0xff] %vm1680_vm2, %v5006_v27 }
 0x743   : > { %5039 = vst.msk [vmem:[%s9377_s15 + $0xd8] sm:$0xff] %vm1680_vm2, %v5007_v18  ;;  %5040 = vst.msk [vmem:[%s9377_s15 + $0xe0] sm:$0xff] %vm1680_vm2, %v5008_v6 }
 0x744   : > { %5041 = vst.msk [vmem:[%s9377_s15 + $0xe8] sm:$0xff] %vm1680_vm2, %v5009_v1  ;;  %5042 = vst.msk [vmem:[%s9377_s15 + $0xf0] sm:$0xff] %vm1680_vm2, %v5010_v12 }
 0x745   : > { %5043 = vst.msk [vmem:[%s9377_s15 + $0xf8] sm:$0xff] %vm1680_vm2, %v5011_v40 }
 0x746 PF: > { %s19_s30 = sadd.s32 1, %s5639_s30  }
 0x747   : > { %p16_p4 = scmp.ge.s32.totalorder %s19_s30, 4  }
 0x749   :  { %18 = sbr.rel (!%p16_p4) target bundleno = 1 (0x1), region = 90 }

</bundles_post_ra>
